<compile_context>
chip_gen: v6e
topology: v6e:2x2x1
jax: 0.10.0
libtpu: 0.0.40
codegen_flags: <defaults>
</compile_context>

<pallas_src>
import functools

import jax
import jax.numpy as jnp
from jax.experimental import pallas as pl
from jax.experimental.pallas import tpu as pltpu

N_HIDDENS = 100
N_LAYERS = 3
HP = ((N_HIDDENS + 127) // 128) * 128      # lane-aligned (padded) hidden size = 128
BP = 8                                      # sublane-aligned batch padding


# ----------------------------------------------------------------------------
# Fused Pallas kernel: 3 bidirectional GRU layers + Linear + residual.
# ----------------------------------------------------------------------------
def _fused_gru_kernel(x_ref, wi0_ref, wi_ref, wh_ref, brz_ref, bhn_ref,
                      wfc_ref, bfc_ref, out_ref,
                      act0, act1, gxf, gxb, *, T, Bp):
    """All refs are full-array VMEM blocks (no grid).

    x_ref  : (T*Bp, n_tags)    f32  time-major, batch padded to Bp; row t*Bp+b
    wi0_ref: (2, n_tags, 3*HP) bf16 layer-0 input weights per direction, gates [r|z|n]
    wi_ref : (2, 2, 2*HP, 3*HP)bf16 layers 1..2 input weights; rows 0:HP act on the fwd
                                     activation lanes, HP:2*HP on the bwd lanes
    wh_ref : (3, HP, 6*HP)     bf16 recurrent weights; fwd gates cols 0:3HP, bwd 3HP:6HP
    brz_ref: (3, 2, 1, 3*HP)   f32  folded biases per gate: [b_ih+b_hh | b_ih+b_hh | b_ih]
    bhn_ref: (3, 2, 1, HP)     f32  b_hh of the n gate (must stay inside the loop)
    wfc_ref: (2*HP, n_tags)    bf16 fc weight [fwd rows ; bwd rows], zero padded
    bfc_ref: (1, n_tags)       f32
    out_ref: (Bp, n_tags)      f32
    scratch: act0/act1 (T*Bp, 2*HP) layer activations [fwd | bwd] (ping-pong),
             gxf/gxb   (T*Bp, 3*HP) hoisted input projections per direction
    """
    H2 = 2 * HP
    H3 = 3 * HP

    def run_layer(layer, src, dst):
        # ---- hoisted input projection: one fat matmul per direction ----
        if layer == 0:
            xin = x_ref[...].astype(jnp.bfloat16)
            wf = wi0_ref[0]
            wb = wi0_ref[1]
        else:
            xin = src[...].astype(jnp.bfloat16)           # (T*Bp, 2*HP): [fwd | bwd], K=256
            wf = wi_ref[layer - 1, 0]
            wb = wi_ref[layer - 1, 1]
        gxf[...] = jnp.dot(xin, wf, preferred_element_type=jnp.float32) + brz_ref[layer, 0]
        gxb[...] = jnp.dot(xin, wb, preferred_element_type=jnp.float32) + brz_ref[layer, 1]

        # ---- serial recurrence: fwd & bwd advance together; ONE fused MXU op per step ----
        wh_l = wh_ref[layer]                              # (HP, 6*HP) bf16, hoisted
        bhn_cat = jnp.concatenate(
            [jnp.broadcast_to(bhn_ref[layer, 0], (Bp, HP)),
             jnp.broadcast_to(bhn_ref[layer, 1], (Bp, HP))], axis=0)   # hoisted broadcasts
        h = jnp.zeros((2 * Bp, HP), jnp.float32)          # rows 0:Bp fwd, Bp:2Bp bwd
        # T is small and static -> fully unrolled at trace time; every slice is static and
        # (8,128)-tile aligned thanks to Bp=8 / HP=128.
        for t in range(T):
            tb = T - 1 - t
            gh = jnp.dot(h.astype(jnp.bfloat16), wh_l,
                         preferred_element_type=jnp.float32)           # (2*Bp, 6*HP)
            gx = jnp.concatenate([gxf[t * Bp:(t + 1) * Bp, :],
                                  gxb[tb * Bp:(tb + 1) * Bp, :]], axis=0)   # (2*Bp, 3*HP)
            ghc = jnp.concatenate([gh[0:Bp, 0:H3], gh[Bp:, H3:]], axis=0)   # (2*Bp, 3*HP)
            # PyTorch gate order r, z, n — each gate occupies a 128-lane block.
            r = jax.nn.sigmoid(gx[:, 0:HP] + ghc[:, 0:HP])
            z = jax.nn.sigmoid(gx[:, HP:2 * HP] + ghc[:, HP:2 * HP])
            n = jnp.tanh(gx[:, 2 * HP:] + r * (ghc[:, 2 * HP:] + bhn_cat))
            h = n + z * (h - n)
            dst[t * Bp:(t + 1) * Bp, 0:HP] = h[0:Bp]      # fwd hidden -> lanes 0:HP
            dst[tb * Bp:(tb + 1) * Bp, HP:H2] = h[Bp:]    # bwd hidden -> lanes HP:2HP

    run_layer(0, None, act0)
    run_layer(1, act0, act1)
    run_layer(2, act1, act0)

    # outs[-1] = [fwd hidden after full pass | bwd hidden after its first step (t = T-1)]
    last = act0[(T - 1) * Bp:T * Bp, :]                   # (Bp, 2*HP)
    out_ref[...] = (x_ref[0:Bp, :]
                    + jnp.dot(last.astype(jnp.bfloat16), wfc_ref[...],
                              preferred_element_type=jnp.float32)
                    + bfc_ref[...])


@jax.jit
def stacked_gru_forward(x, packed):
    """x: (batch, seq, n_tags) -> (batch, n_tags)."""
    B, T, n_tags = x.shape
    Bp = ((B + BP - 1) // BP) * BP
    x_tm = jnp.transpose(x, (1, 0, 2)).astype(jnp.float32)               # (T, B, n_tags)
    x_pad = jnp.zeros((T, Bp, n_tags), jnp.float32).at[:, :B, :].set(x_tm)
    x_flat = x_pad.reshape(T * Bp, n_tags)
    kernel = functools.partial(_fused_gru_kernel, T=T, Bp=Bp)
    vmem = lambda: pl.BlockSpec(memory_space=pltpu.MemorySpace.VMEM)
    out = pl.pallas_call(
        kernel,
        out_shape=jax.ShapeDtypeStruct((Bp, n_tags), jnp.float32),
        in_specs=[vmem() for _ in range(8)],
        out_specs=vmem(),
        scratch_shapes=[
            pltpu.VMEM((T * Bp, 2 * HP), jnp.float32),    # act0 [fwd | bwd]
            pltpu.VMEM((T * Bp, 2 * HP), jnp.float32),    # act1
            pltpu.VMEM((T * Bp, 3 * HP), jnp.float32),    # gxf (hoisted input projection)
            pltpu.VMEM((T * Bp, 3 * HP), jnp.float32),    # gxb
        ],
        compiler_params=pltpu.CompilerParams(vmem_limit_bytes=32 * 1024 * 1024),
    )(x_flat, packed["wi0"], packed["wi"], packed["wh"],
      packed["brz"], packed["bhn"], packed["wfc"], packed["bfc"])
    return out[:B]


# ----------------------------------------------------------------------------
# Parameters: raw PyTorch layout + packing into the padded / stacked kernel layout.
# ----------------------------------------------------------------------------
def init_params(key, n_tags, hidden=N_HIDDENS, n_layers=N_LAYERS):
    """Random weights in PyTorch nn.GRU / nn.Linear layout."""
    params = {"gru": [], "fc": None}
    k_rnn = 1.0 / jnp.sqrt(hidden)
    for layer in range(n_layers):
        in_size = n_tags if layer == 0 else 2 * hidden
        layer_params = []
        for _ in range(2):  # forward, reverse
            key, k1, k2, k3, k4 = jax.random.split(key, 5)
            layer_params.append(dict(
                w_ih=jax.random.uniform(k1, (3 * hidden, in_size), jnp.float32, -k_rnn, k_rnn),
                w_hh=jax.random.uniform(k2, (3 * hidden, hidden), jnp.float32, -k_rnn, k_rnn),
                b_ih=jax.random.uniform(k3, (3 * hidden,), jnp.float32, -k_rnn, k_rnn),
                b_hh=jax.random.uniform(k4, (3 * hidden,), jnp.float32, -k_rnn, k_rnn),
            ))
        params["gru"].append(layer_params)
    key, k1, k2 = jax.random.split(key, 3)
    k_fc = 1.0 / jnp.sqrt(2 * hidden)
    params["fc"] = dict(
        w=jax.random.uniform(k1, (n_tags, 2 * hidden), jnp.float32, -k_fc, k_fc),
        b=jax.random.uniform(k2, (n_tags,), jnp.float32, -k_fc, k_fc),
    )
    return params


def _pad_gate_cols(w_t, hidden, hp):
    """(rows, 3*hidden) gate-blocked [r|z|n] -> (rows, 3*hp), each gate in its own 128-lane block."""
    out = jnp.zeros((w_t.shape[0], 3 * hp), jnp.float32)
    for g in range(3):
        out = out.at[:, g * hp:g * hp + hidden].set(w_t[:, g * hidden:(g + 1) * hidden])
    return out


def _pad_rows(w, rows):
    out = jnp.zeros((rows, w.shape[1]), jnp.float32)
    return out.at[:w.shape[0], :].set(w)


def pack_params(params, n_tags, hidden=N_HIDDENS, hp=HP):
    """Re-pack PyTorch-layout params into the padded / stacked layout the fused kernel expects.
    Padded rows/cols/lanes are zero so the padded hidden lanes stay exactly zero."""
    wi0, wi, wh, brz, bhn = [], [], [], [], []
    for layer, layer_params in enumerate(params["gru"]):
        wh_dirs, wi_dirs = [], []
        for p in layer_params:
            wi_t = _pad_gate_cols(p["w_ih"].T, hidden, hp)               # (in_size, 3*hp)
            if layer == 0:
                wi0.append(wi_t)                                         # (n_tags, 3*hp)
            else:
                # rows 0:hidden act on fwd activation lanes, hp:hp+hidden on bwd lanes
                w_stk = jnp.zeros((2 * hp, 3 * hp), jnp.float32)
                w_stk = w_stk.at[:hidden].set(wi_t[:hidden])
                w_stk = w_stk.at[hp:hp + hidden].set(wi_t[hidden:])
                wi_dirs.append(w_stk)
            wh_dirs.append(_pad_rows(_pad_gate_cols(p["w_hh"].T, hidden, hp), hp))
            b = jnp.zeros((1, 3 * hp), jnp.float32)
            b = b.at[0, 0 * hp:0 * hp + hidden].set(p["b_ih"][:hidden] + p["b_hh"][:hidden])
            b = b.at[0, 1 * hp:1 * hp + hidden].set(
                p["b_ih"][hidden:2 * hidden] + p["b_hh"][hidden:2 * hidden])
            b = b.at[0, 2 * hp:2 * hp + hidden].set(p["b_ih"][2 * hidden:])
            brz.append(b)
            bhn.append(jnp.zeros((1, hp), jnp.float32).at[0, :hidden].set(p["b_hh"][2 * hidden:]))
        wh.append(jnp.concatenate(wh_dirs, axis=1))                      # (hp, 6*hp): [fwd | bwd]
        if layer > 0:
            wi.append(jnp.stack(wi_dirs))                                # (2, 2*hp, 3*hp)
    w_fc_t = params["fc"]["w"].T                                         # (2*hidden, n_tags)
    wfc = jnp.zeros((2 * hp, n_tags), jnp.float32)
    wfc = wfc.at[:hidden].set(w_fc_t[:hidden])
    wfc = wfc.at[hp:hp + hidden].set(w_fc_t[hidden:])
    return dict(
        wi0=jnp.stack(wi0).astype(jnp.bfloat16),                         # (2, n_tags, 3*hp)
        wi=jnp.stack(wi).astype(jnp.bfloat16),                           # (2, 2, 2*hp, 3*hp)
        wh=jnp.stack(wh).astype(jnp.bfloat16),                           # (3, hp, 6*hp)
        brz=jnp.stack(brz).reshape(N_LAYERS, 2, 1, 3 * hp),
        bhn=jnp.stack(bhn).reshape(N_LAYERS, 2, 1, hp),
        wfc=wfc.astype(jnp.bfloat16),                                    # (2*hp, n_tags)
        bfc=params["fc"]["b"].reshape(1, n_tags),
    )


# ----------------------------------------------------------------------------
# Pure-JAX reference (for correctness check only)
# ----------------------------------------------------------------------------
def _ref_gru_dir(x_seq, p):
    H = p["w_hh"].shape[1]
    wi, wh = p["w_ih"].T, p["w_hh"].T
    bi, bh = p["b_ih"], p["b_hh"]

    def step(h, x_t):
        gx = x_t @ wi + bi
        gh = h @ wh + bh
        r = jax.nn.sigmoid(gx[:, :H] + gh[:, :H])
        z = jax.nn.sigmoid(gx[:, H:2 * H] + gh[:, H:2 * H])
        n = jnp.tanh(gx[:, 2 * H:] + r * gh[:, 2 * H:])
        h_new = (1.0 - z) * n + z * h
        return h_new, h_new

    h0 = jnp.zeros((x_seq.shape[1], H), jnp.float32)
    _, outs = jax.lax.scan(step, h0, x_seq)
    return outs


def ref_forward(x, params):
    x_tm = jnp.transpose(x, (1, 0, 2)).astype(jnp.float32)
    seq_in = x_tm
    for layer_params in params["gru"]:
        p_f, p_b = layer_params
        out_f = _ref_gru_dir(seq_in, p_f)
        out_b = _ref_gru_dir(seq_in[::-1], p_b)[::-1]
        seq_in = jnp.concatenate([out_f, out_b], axis=-1)
    return x_tm[0] + seq_in[-1] @ params["fc"]["w"].T + params["fc"]["b"]


if __name__ == "__main__":
    batch, seq, n_tags = 2, 8, 10
    key = jax.random.PRNGKey(0)
    key, kx, kp = jax.random.split(key, 3)
    x = jax.random.normal(kx, (batch, seq, n_tags), jnp.float32)
    params = init_params(kp, n_tags)
    packed = pack_params(params, n_tags)

    out = stacked_gru_forward(x, packed)
    out = jax.block_until_ready(out)
    assert out.shape == (batch, n_tags)

    ref = jax.block_until_ready(ref_forward(x, params))
    # bf16 MXU rounding (default TPU matmul precision) over a 3-layer recurrence.
    assert jnp.allclose(out, ref, atol=5e-3, rtol=5e-3), "mismatch vs reference"

    print("KERNEL_OK")
</pallas_src>

<mosaic_0001>
module attributes {stable_mosaic.version = 11 : i64} {
  func.func @_fused_gru_kernel(%arg0: memref<64x10xf32, #tpu.memory_space<vmem>>, %arg1: memref<2x10x384xbf16, #tpu.memory_space<vmem>>, %arg2: memref<2x2x256x384xbf16, #tpu.memory_space<vmem>>, %arg3: memref<3x128x768xbf16, #tpu.memory_space<vmem>>, %arg4: memref<3x2x1x384xf32, #tpu.memory_space<vmem>>, %arg5: memref<3x2x1x128xf32, #tpu.memory_space<vmem>>, %arg6: memref<256x10xbf16, #tpu.memory_space<vmem>>, %arg7: memref<1x10xf32, #tpu.memory_space<vmem>>, %arg8: memref<8x10xf32, #tpu.memory_space<vmem>>, %arg9: memref<64x256xf32, #tpu.memory_space<vmem>>, %arg10: memref<64x256xf32, #tpu.memory_space<vmem>>, %arg11: memref<64x384xf32, #tpu.memory_space<vmem>>, %arg12: memref<64x384xf32, #tpu.memory_space<vmem>>) attributes {dimension_semantics = [], scalar_prefetch = 0 : i64, scratch_operands = 4 : i64, tpu.core_type = #tpu.core_type<tc>} {
    %c0 = arith.constant 0 : index
    %c0_0 = arith.constant 0 : index
    %0 = vector.load %arg0[%c0, %c0_0] : memref<64x10xf32, #tpu.memory_space<vmem>>, vector<64x10xf32>
    %1 = arith.truncf %0 : vector<64x10xf32> to vector<64x10xbf16>
    %c0_1 = arith.constant 0 : index
    %c0_2 = arith.constant 0 : index
    %c0_3 = arith.constant 0 : index
    %2 = vector.load %arg1[%c0_1, %c0_2, %c0_3] : memref<2x10x384xbf16, #tpu.memory_space<vmem>>, vector<1x10x384xbf16>
    %3 = vector.shape_cast %2 : vector<1x10x384xbf16> to vector<10x384xbf16>
    %c1 = arith.constant 1 : index
    %c0_4 = arith.constant 0 : index
    %c0_5 = arith.constant 0 : index
    %4 = vector.load %arg1[%c1, %c0_4, %c0_5] : memref<2x10x384xbf16, #tpu.memory_space<vmem>>, vector<1x10x384xbf16>
    %5 = vector.shape_cast %4 : vector<1x10x384xbf16> to vector<10x384xbf16>
    %cst = arith.constant dense<0.000000e+00> : vector<64x384xf32>
    %6 = tpu.matmul %1, %3, %cst {dimension_numbers = #tpu.dot_dimension_numbers<[1], [0], [0], [1], [0, 0, 1, 1], [], []>} : vector<64x10xbf16>, vector<10x384xbf16>, vector<64x384xf32> -> vector<64x384xf32>
    %c0_6 = arith.constant 0 : index
    %c0_7 = arith.constant 0 : index
    %c0_8 = arith.constant 0 : index
    %c0_9 = arith.constant 0 : index
    %7 = vector.load %arg4[%c0_6, %c0_7, %c0_8, %c0_9] : memref<3x2x1x384xf32, #tpu.memory_space<vmem>>, vector<1x1x1x384xf32>
    %8 = vector.shape_cast %7 : vector<1x1x1x384xf32> to vector<1x384xf32>
    %9 = vector.broadcast %8 : vector<1x384xf32> to vector<64x384xf32>
    %10 = arith.addf %6, %9 : vector<64x384xf32>
    %c0_10 = arith.constant 0 : index
    %c0_11 = arith.constant 0 : index
    %11 = vector.load %arg11[%c0_10, %c0_11] : memref<64x384xf32, #tpu.memory_space<vmem>>, vector<64x384xf32>
    tpu.vector_store %arg11[%c0_10, %c0_11], %10 {strides = array<i32>} : memref<64x384xf32, #tpu.memory_space<vmem>>, vector<64x384xf32>,
    %cst_12 = arith.constant dense<0.000000e+00> : vector<64x384xf32>
    %12 = tpu.matmul %1, %5, %cst_12 {dimension_numbers = #tpu.dot_dimension_numbers<[1], [0], [0], [1], [0, 0, 1, 1], [], []>} : vector<64x10xbf16>, vector<10x384xbf16>, vector<64x384xf32> -> vector<64x384xf32>
    %c0_13 = arith.constant 0 : index
    %c1_14 = arith.constant 1 : index
    %c0_15 = arith.constant 0 : index
    %c0_16 = arith.constant 0 : index
    %13 = vector.load %arg4[%c0_13, %c1_14, %c0_15, %c0_16] : memref<3x2x1x384xf32, #tpu.memory_space<vmem>>, vector<1x1x1x384xf32>
    %14 = vector.shape_cast %13 : vector<1x1x1x384xf32> to vector<1x384xf32>
    %15 = vector.broadcast %14 : vector<1x384xf32> to vector<64x384xf32>
    %16 = arith.addf %12, %15 : vector<64x384xf32>
    %c0_17 = arith.constant 0 : index
    %c0_18 = arith.constant 0 : index
    %17 = vector.load %arg12[%c0_17, %c0_18] : memref<64x384xf32, #tpu.memory_space<vmem>>, vector<64x384xf32>
    tpu.vector_store %arg12[%c0_17, %c0_18], %16 {strides = array<i32>} : memref<64x384xf32, #tpu.memory_space<vmem>>, vector<64x384xf32>,
    %c0_19 = arith.constant 0 : index
    %c0_20 = arith.constant 0 : index
    %c0_21 = arith.constant 0 : index
    %18 = vector.load %arg3[%c0_19, %c0_20, %c0_21] : memref<3x128x768xbf16, #tpu.memory_space<vmem>>, vector<1x128x768xbf16>
    %19 = vector.shape_cast %18 : vector<1x128x768xbf16> to vector<128x768xbf16>
    %c0_22 = arith.constant 0 : index
    %c0_23 = arith.constant 0 : index
    %c0_24 = arith.constant 0 : index
    %c0_25 = arith.constant 0 : index
    %20 = vector.load %arg5[%c0_22, %c0_23, %c0_24, %c0_25] : memref<3x2x1x128xf32, #tpu.memory_space<vmem>>, vector<1x1x1x128xf32>
    %21 = vector.shape_cast %20 : vector<1x1x1x128xf32> to vector<1x128xf32>
    %22 = vector.shape_cast %21 : vector<1x128xf32> to vector<1x128xf32>
    %23 = vector.broadcast %22 : vector<1x128xf32> to vector<8x128xf32>
    %c0_26 = arith.constant 0 : index
    %c1_27 = arith.constant 1 : index
    %c0_28 = arith.constant 0 : index
    %c0_29 = arith.constant 0 : index
    %24 = vector.load %arg5[%c0_26, %c1_27, %c0_28, %c0_29] : memref<3x2x1x128xf32, #tpu.memory_space<vmem>>, vector<1x1x1x128xf32>
    %25 = vector.shape_cast %24 : vector<1x1x1x128xf32> to vector<1x128xf32>
    %26 = vector.shape_cast %25 : vector<1x128xf32> to vector<1x128xf32>
    %27 = vector.broadcast %26 : vector<1x128xf32> to vector<8x128xf32>
    %28 = tpu.concatenate %23, %27 in 0 : vector<8x128xf32>, vector<8x128xf32> -> vector<16x128xf32>
    %cst_30 = arith.constant 0.000000e+00 : f32
    %29 = vector.broadcast %cst_30 : f32 to vector<16x128xf32>
    %30 = arith.truncf %29 : vector<16x128xf32> to vector<16x128xbf16>
    %cst_31 = arith.constant dense<0.000000e+00> : vector<16x768xf32>
    %31 = tpu.matmul %30, %19, %cst_31 {dimension_numbers = #tpu.dot_dimension_numbers<[1], [0], [0], [1], [0, 0, 1, 1], [], []>} : vector<16x128xbf16>, vector<128x768xbf16>, vector<16x768xf32> -> vector<16x768xf32>
    %c0_32 = arith.constant 0 : index
    %c0_33 = arith.constant 0 : index
    %32 = vector.load %arg11[%c0_32, %c0_33] : memref<64x384xf32, #tpu.memory_space<vmem>>, vector<8x384xf32>
    %c56 = arith.constant 56 : index
    %c0_34 = arith.constant 0 : index
    %33 = vector.load %arg12[%c56, %c0_34] : memref<64x384xf32, #tpu.memory_space<vmem>>, vector<8x384xf32>
    %34 = tpu.concatenate %32, %33 in 0 : vector<8x384xf32>, vector<8x384xf32> -> vector<16x384xf32>
    %35 = vector.extract_strided_slice %31 {offsets = [0, 0], sizes = [8, 384], strides = [1, 1]} : vector<16x768xf32> to vector<8x384xf32>
    %36 = vector.extract_strided_slice %31 {offsets = [8, 384], sizes = [8, 384], strides = [1, 1]} : vector<16x768xf32> to vector<8x384xf32>
    %37 = tpu.concatenate %35, %36 in 0 : vector<8x384xf32>, vector<8x384xf32> -> vector<16x384xf32>
    %38 = vector.extract_strided_slice %34 {offsets = [0, 0], sizes = [16, 128], strides = [1, 1]} : vector<16x384xf32> to vector<16x128xf32>
    %39 = vector.extract_strided_slice %37 {offsets = [0, 0], sizes = [16, 128], strides = [1, 1]} : vector<16x384xf32> to vector<16x128xf32>
    %40 = arith.addf %38, %39 : vector<16x128xf32>
    %41 = arith.negf %40 : vector<16x128xf32>
    %42 = math.exp %41 : vector<16x128xf32>
    %cst_35 = arith.constant 1.000000e+00 : f32
    %43 = vector.broadcast %cst_35 : f32 to vector<16x128xf32>
    %44 = arith.addf %43, %42 : vector<16x128xf32>
    %45 = arith.divf %43, %44 : vector<16x128xf32>
    %46 = vector.extract_strided_slice %34 {offsets = [0, 128], sizes = [16, 128], strides = [1, 1]} : vector<16x384xf32> to vector<16x128xf32>
    %47 = vector.extract_strided_slice %37 {offsets = [0, 128], sizes = [16, 128], strides = [1, 1]} : vector<16x384xf32> to vector<16x128xf32>
    %48 = arith.addf %46, %47 : vector<16x128xf32>
    %49 = arith.negf %48 : vector<16x128xf32>
    %50 = math.exp %49 : vector<16x128xf32>
    %cst_36 = arith.constant 1.000000e+00 : f32
    %51 = vector.broadcast %cst_36 : f32 to vector<16x128xf32>
    %52 = arith.addf %51, %50 : vector<16x128xf32>
    %53 = arith.divf %51, %52 : vector<16x128xf32>
    %54 = vector.extract_strided_slice %34 {offsets = [0, 256], sizes = [16, 128], strides = [1, 1]} : vector<16x384xf32> to vector<16x128xf32>
    %55 = vector.extract_strided_slice %37 {offsets = [0, 256], sizes = [16, 128], strides = [1, 1]} : vector<16x384xf32> to vector<16x128xf32>
    %56 = arith.addf %55, %28 : vector<16x128xf32>
    %57 = arith.mulf %45, %56 : vector<16x128xf32>
    %58 = arith.addf %54, %57 : vector<16x128xf32>
    %59 = math.tanh %58 : vector<16x128xf32>
    %60 = arith.subf %29, %59 : vector<16x128xf32>
    %61 = arith.mulf %53, %60 : vector<16x128xf32>
    %62 = arith.addf %59, %61 : vector<16x128xf32>
    %63 = vector.extract_strided_slice %62 {offsets = [0, 0], sizes = [8, 128], strides = [1, 1]} : vector<16x128xf32> to vector<8x128xf32>
    %c0_37 = arith.constant 0 : index
    %c0_38 = arith.constant 0 : index
    %64 = vector.load %arg9[%c0_37, %c0_38] : memref<64x256xf32, #tpu.memory_space<vmem>>, vector<8x128xf32>
    tpu.vector_store %arg9[%c0_37, %c0_38], %63 {strides = array<i32>} : memref<64x256xf32, #tpu.memory_space<vmem>>, vector<8x128xf32>,
    %65 = vector.extract_strided_slice %62 {offsets = [8, 0], sizes = [8, 128], strides = [1, 1]} : vector<16x128xf32> to vector<8x128xf32>
    %c56_39 = arith.constant 56 : index
    %c128 = arith.constant 128 : index
    %66 = vector.load %arg9[%c56_39, %c128] : memref<64x256xf32, #tpu.memory_space<vmem>>, vector<8x128xf32>
    tpu.vector_store %arg9[%c56_39, %c128], %65 {strides = array<i32>} : memref<64x256xf32, #tpu.memory_space<vmem>>, vector<8x128xf32>,
    %67 = arith.truncf %62 : vector<16x128xf32> to vector<16x128xbf16>
    %cst_40 = arith.constant dense<0.000000e+00> : vector<16x768xf32>
    %68 = tpu.matmul %67, %19, %cst_40 {dimension_numbers = #tpu.dot_dimension_numbers<[1], [0], [0], [1], [0, 0, 1, 1], [], []>} : vector<16x128xbf16>, vector<128x768xbf16>, vector<16x768xf32> -> vector<16x768xf32>
    %c8 = arith.constant 8 : index
    %c0_41 = arith.constant 0 : index
    %69 = vector.load %arg11[%c8, %c0_41] : memref<64x384xf32, #tpu.memory_space<vmem>>, vector<8x384xf32>
    %c48 = arith.constant 48 : index
    %c0_42 = arith.constant 0 : index
    %70 = vector.load %arg12[%c48, %c0_42] : memref<64x384xf32, #tpu.memory_space<vmem>>, vector<8x384xf32>
    %71 = tpu.concatenate %69, %70 in 0 : vector<8x384xf32>, vector<8x384xf32> -> vector<16x384xf32>
    %72 = vector.extract_strided_slice %68 {offsets = [0, 0], sizes = [8, 384], strides = [1, 1]} : vector<16x768xf32> to vector<8x384xf32>
    %73 = vector.extract_strided_slice %68 {offsets = [8, 384], sizes = [8, 384], strides = [1, 1]} : vector<16x768xf32> to vector<8x384xf32>
    %74 = tpu.concatenate %72, %73 in 0 : vector<8x384xf32>, vector<8x384xf32> -> vector<16x384xf32>
    %75 = vector.extract_strided_slice %71 {offsets = [0, 0], sizes = [16, 128], strides = [1, 1]} : vector<16x384xf32> to vector<16x128xf32>
    %76 = vector.extract_strided_slice %74 {offsets = [0, 0], sizes = [16, 128], strides = [1, 1]} : vector<16x384xf32> to vector<16x128xf32>
    %77 = arith.addf %75, %76 : vector<16x128xf32>
    %78 = arith.negf %77 : vector<16x128xf32>
    %79 = math.exp %78 : vector<16x128xf32>
    %cst_43 = arith.constant 1.000000e+00 : f32
    %80 = vector.broadcast %cst_43 : f32 to vector<16x128xf32>
    %81 = arith.addf %80, %79 : vector<16x128xf32>
    %82 = arith.divf %80, %81 : vector<16x128xf32>
    %83 = vector.extract_strided_slice %71 {offsets = [0, 128], sizes = [16, 128], strides = [1, 1]} : vector<16x384xf32> to vector<16x128xf32>
    %84 = vector.extract_strided_slice %74 {offsets = [0, 128], sizes = [16, 128], strides = [1, 1]} : vector<16x384xf32> to vector<16x128xf32>
    %85 = arith.addf %83, %84 : vector<16x128xf32>
    %86 = arith.negf %85 : vector<16x128xf32>
    %87 = math.exp %86 : vector<16x128xf32>
    %cst_44 = arith.constant 1.000000e+00 : f32
    %88 = vector.broadcast %cst_44 : f32 to vector<16x128xf32>
    %89 = arith.addf %88, %87 : vector<16x128xf32>
    %90 = arith.divf %88, %89 : vector<16x128xf32>
    %91 = vector.extract_strided_slice %71 {offsets = [0, 256], sizes = [16, 128], strides = [1, 1]} : vector<16x384xf32> to vector<16x128xf32>
    %92 = vector.extract_strided_slice %74 {offsets = [0, 256], sizes = [16, 128], strides = [1, 1]} : vector<16x384xf32> to vector<16x128xf32>
    %93 = arith.addf %92, %28 : vector<16x128xf32>
    %94 = arith.mulf %82, %93 : vector<16x128xf32>
    %95 = arith.addf %91, %94 : vector<16x128xf32>
    %96 = math.tanh %95 : vector<16x128xf32>
    %97 = arith.subf %62, %96 : vector<16x128xf32>
    %98 = arith.mulf %90, %97 : vector<16x128xf32>
    %99 = arith.addf %96, %98 : vector<16x128xf32>
    %100 = vector.extract_strided_slice %99 {offsets = [0, 0], sizes = [8, 128], strides = [1, 1]} : vector<16x128xf32> to vector<8x128xf32>
    %c8_45 = arith.constant 8 : index
    %c0_46 = arith.constant 0 : index
    %101 = vector.load %arg9[%c8_45, %c0_46] : memref<64x256xf32, #tpu.memory_space<vmem>>, vector<8x128xf32>
    tpu.vector_store %arg9[%c8_45, %c0_46], %100 {strides = array<i32>} : memref<64x256xf32, #tpu.memory_space<vmem>>, vector<8x128xf32>,
    %102 = vector.extract_strided_slice %99 {offsets = [8, 0], sizes = [8, 128], strides = [1, 1]} : vector<16x128xf32> to vector<8x128xf32>
    %c48_47 = arith.constant 48 : index
    %c128_48 = arith.constant 128 : index
    %103 = vector.load %arg9[%c48_47, %c128_48] : memref<64x256xf32, #tpu.memory_space<vmem>>, vector<8x128xf32>
    tpu.vector_store %arg9[%c48_47, %c128_48], %102 {strides = array<i32>} : memref<64x256xf32, #tpu.memory_space<vmem>>, vector<8x128xf32>,
    %104 = arith.truncf %99 : vector<16x128xf32> to vector<16x128xbf16>
    %cst_49 = arith.constant dense<0.000000e+00> : vector<16x768xf32>
    %105 = tpu.matmul %104, %19, %cst_49 {dimension_numbers = #tpu.dot_dimension_numbers<[1], [0], [0], [1], [0, 0, 1, 1], [], []>} : vector<16x128xbf16>, vector<128x768xbf16>, vector<16x768xf32> -> vector<16x768xf32>
    %c16 = arith.constant 16 : index
    %c0_50 = arith.constant 0 : index
    %106 = vector.load %arg11[%c16, %c0_50] : memref<64x384xf32, #tpu.memory_space<vmem>>, vector<8x384xf32>
    %c40 = arith.constant 40 : index
    %c0_51 = arith.constant 0 : index
    %107 = vector.load %arg12[%c40, %c0_51] : memref<64x384xf32, #tpu.memory_space<vmem>>, vector<8x384xf32>
    %108 = tpu.concatenate %106, %107 in 0 : vector<8x384xf32>, vector<8x384xf32> -> vector<16x384xf32>
    %109 = vector.extract_strided_slice %105 {offsets = [0, 0], sizes = [8, 384], strides = [1, 1]} : vector<16x768xf32> to vector<8x384xf32>
    %110 = vector.extract_strided_slice %105 {offsets = [8, 384], sizes = [8, 384], strides = [1, 1]} : vector<16x768xf32> to vector<8x384xf32>
    %111 = tpu.concatenate %109, %110 in 0 : vector<8x384xf32>, vector<8x384xf32> -> vector<16x384xf32>
    %112 = vector.extract_strided_slice %108 {offsets = [0, 0], sizes = [16, 128], strides = [1, 1]} : vector<16x384xf32> to vector<16x128xf32>
    %113 = vector.extract_strided_slice %111 {offsets = [0, 0], sizes = [16, 128], strides = [1, 1]} : vector<16x384xf32> to vector<16x128xf32>
    %114 = arith.addf %112, %113 : vector<16x128xf32>
    %115 = arith.negf %114 : vector<16x128xf32>
    %116 = math.exp %115 : vector<16x128xf32>
    %cst_52 = arith.constant 1.000000e+00 : f32
    %117 = vector.broadcast %cst_52 : f32 to vector<16x128xf32>
    %118 = arith.addf %117, %116 : vector<16x128xf32>
    %119 = arith.divf %117, %118 : vector<16x128xf32>
    %120 = vector.extract_strided_slice %108 {offsets = [0, 128], sizes = [16, 128], strides = [1, 1]} : vector<16x384xf32> to vector<16x128xf32>
    %121 = vector.extract_strided_slice %111 {offsets = [0, 128], sizes = [16, 128], strides = [1, 1]} : vector<16x384xf32> to vector<16x128xf32>
    %122 = arith.addf %120, %121 : vector<16x128xf32>
    %123 = arith.negf %122 : vector<16x128xf32>
    %124 = math.exp %123 : vector<16x128xf32>
    %cst_53 = arith.constant 1.000000e+00 : f32
    %125 = vector.broadcast %cst_53 : f32 to vector<16x128xf32>
    %126 = arith.addf %125, %124 : vector<16x128xf32>
    %127 = arith.divf %125, %126 : vector<16x128xf32>
    %128 = vector.extract_strided_slice %108 {offsets = [0, 256], sizes = [16, 128], strides = [1, 1]} : vector<16x384xf32> to vector<16x128xf32>
    %129 = vector.extract_strided_slice %111 {offsets = [0, 256], sizes = [16, 128], strides = [1, 1]} : vector<16x384xf32> to vector<16x128xf32>
    %130 = arith.addf %129, %28 : vector<16x128xf32>
    %131 = arith.mulf %119, %130 : vector<16x128xf32>
    %132 = arith.addf %128, %131 : vector<16x128xf32>
    %133 = math.tanh %132 : vector<16x128xf32>
    %134 = arith.subf %99, %133 : vector<16x128xf32>
    %135 = arith.mulf %127, %134 : vector<16x128xf32>
    %136 = arith.addf %133, %135 : vector<16x128xf32>
    %137 = vector.extract_strided_slice %136 {offsets = [0, 0], sizes = [8, 128], strides = [1, 1]} : vector<16x128xf32> to vector<8x128xf32>
    %c16_54 = arith.constant 16 : index
    %c0_55 = arith.constant 0 : index
    %138 = vector.load %arg9[%c16_54, %c0_55] : memref<64x256xf32, #tpu.memory_space<vmem>>, vector<8x128xf32>
    tpu.vector_store %arg9[%c16_54, %c0_55], %137 {strides = array<i32>} : memref<64x256xf32, #tpu.memory_space<vmem>>, vector<8x128xf32>,
    %139 = vector.extract_strided_slice %136 {offsets = [8, 0], sizes = [8, 128], strides = [1, 1]} : vector<16x128xf32> to vector<8x128xf32>
    %c40_56 = arith.constant 40 : index
    %c128_57 = arith.constant 128 : index
    %140 = vector.load %arg9[%c40_56, %c128_57] : memref<64x256xf32, #tpu.memory_space<vmem>>, vector<8x128xf32>
    tpu.vector_store %arg9[%c40_56, %c128_57], %139 {strides = array<i32>} : memref<64x256xf32, #tpu.memory_space<vmem>>, vector<8x128xf32>,
    %141 = arith.truncf %136 : vector<16x128xf32> to vector<16x128xbf16>
    %cst_58 = arith.constant dense<0.000000e+00> : vector<16x768xf32>
    %142 = tpu.matmul %141, %19, %cst_58 {dimension_numbers = #tpu.dot_dimension_numbers<[1], [0], [0], [1], [0, 0, 1, 1], [], []>} : vector<16x128xbf16>, vector<128x768xbf16>, vector<16x768xf32> -> vector<16x768xf32>
    %c24 = arith.constant 24 : index
    %c0_59 = arith.constant 0 : index
    %143 = vector.load %arg11[%c24, %c0_59] : memref<64x384xf32, #tpu.memory_space<vmem>>, vector<8x384xf32>
    %c32 = arith.constant 32 : index
    %c0_60 = arith.constant 0 : index
    %144 = vector.load %arg12[%c32, %c0_60] : memref<64x384xf32, #tpu.memory_space<vmem>>, vector<8x384xf32>
    %145 = tpu.concatenate %143, %144 in 0 : vector<8x384xf32>, vector<8x384xf32> -> vector<16x384xf32>
    %146 = vector.extract_strided_slice %142 {offsets = [0, 0], sizes = [8, 384], strides = [1, 1]} : vector<16x768xf32> to vector<8x384xf32>
    %147 = vector.extract_strided_slice %142 {offsets = [8, 384], sizes = [8, 384], strides = [1, 1]} : vector<16x768xf32> to vector<8x384xf32>
    %148 = tpu.concatenate %146, %147 in 0 : vector<8x384xf32>, vector<8x384xf32> -> vector<16x384xf32>
    %149 = vector.extract_strided_slice %145 {offsets = [0, 0], sizes = [16, 128], strides = [1, 1]} : vector<16x384xf32> to vector<16x128xf32>
    %150 = vector.extract_strided_slice %148 {offsets = [0, 0], sizes = [16, 128], strides = [1, 1]} : vector<16x384xf32> to vector<16x128xf32>
    %151 = arith.addf %149, %150 : vector<16x128xf32>
    %152 = arith.negf %151 : vector<16x128xf32>
    %153 = math.exp %152 : vector<16x128xf32>
    %cst_61 = arith.constant 1.000000e+00 : f32
    %154 = vector.broadcast %cst_61 : f32 to vector<16x128xf32>
    %155 = arith.addf %154, %153 : vector<16x128xf32>
    %156 = arith.divf %154, %155 : vector<16x128xf32>
    %157 = vector.extract_strided_slice %145 {offsets = [0, 128], sizes = [16, 128], strides = [1, 1]} : vector<16x384xf32> to vector<16x128xf32>
    %158 = vector.extract_strided_slice %148 {offsets = [0, 128], sizes = [16, 128], strides = [1, 1]} : vector<16x384xf32> to vector<16x128xf32>
    %159 = arith.addf %157, %158 : vector<16x128xf32>
    %160 = arith.negf %159 : vector<16x128xf32>
    %161 = math.exp %160 : vector<16x128xf32>
    %cst_62 = arith.constant 1.000000e+00 : f32
    %162 = vector.broadcast %cst_62 : f32 to vector<16x128xf32>
    %163 = arith.addf %162, %161 : vector<16x128xf32>
    %164 = arith.divf %162, %163 : vector<16x128xf32>
    %165 = vector.extract_strided_slice %145 {offsets = [0, 256], sizes = [16, 128], strides = [1, 1]} : vector<16x384xf32> to vector<16x128xf32>
    %166 = vector.extract_strided_slice %148 {offsets = [0, 256], sizes = [16, 128], strides = [1, 1]} : vector<16x384xf32> to vector<16x128xf32>
    %167 = arith.addf %166, %28 : vector<16x128xf32>
    %168 = arith.mulf %156, %167 : vector<16x128xf32>
    %169 = arith.addf %165, %168 : vector<16x128xf32>
    %170 = math.tanh %169 : vector<16x128xf32>
    %171 = arith.subf %136, %170 : vector<16x128xf32>
    %172 = arith.mulf %164, %171 : vector<16x128xf32>
    %173 = arith.addf %170, %172 : vector<16x128xf32>
    %174 = vector.extract_strided_slice %173 {offsets = [0, 0], sizes = [8, 128], strides = [1, 1]} : vector<16x128xf32> to vector<8x128xf32>
    %c24_63 = arith.constant 24 : index
    %c0_64 = arith.constant 0 : index
    %175 = vector.load %arg9[%c24_63, %c0_64] : memref<64x256xf32, #tpu.memory_space<vmem>>, vector<8x128xf32>
    tpu.vector_store %arg9[%c24_63, %c0_64], %174 {strides = array<i32>} : memref<64x256xf32, #tpu.memory_space<vmem>>, vector<8x128xf32>,
    %176 = vector.extract_strided_slice %173 {offsets = [8, 0], sizes = [8, 128], strides = [1, 1]} : vector<16x128xf32> to vector<8x128xf32>
    %c32_65 = arith.constant 32 : index
    %c128_66 = arith.constant 128 : index
    %177 = vector.load %arg9[%c32_65, %c128_66] : memref<64x256xf32, #tpu.memory_space<vmem>>, vector<8x128xf32>
    tpu.vector_store %arg9[%c32_65, %c128_66], %176 {strides = array<i32>} : memref<64x256xf32, #tpu.memory_space<vmem>>, vector<8x128xf32>,
    %178 = arith.truncf %173 : vector<16x128xf32> to vector<16x128xbf16>
    %cst_67 = arith.constant dense<0.000000e+00> : vector<16x768xf32>
    %179 = tpu.matmul %178, %19, %cst_67 {dimension_numbers = #tpu.dot_dimension_numbers<[1], [0], [0], [1], [0, 0, 1, 1], [], []>} : vector<16x128xbf16>, vector<128x768xbf16>, vector<16x768xf32> -> vector<16x768xf32>
    %c32_68 = arith.constant 32 : index
    %c0_69 = arith.constant 0 : index
    %180 = vector.load %arg11[%c32_68, %c0_69] : memref<64x384xf32, #tpu.memory_space<vmem>>, vector<8x384xf32>
    %c24_70 = arith.constant 24 : index
    %c0_71 = arith.constant 0 : index
    %181 = vector.load %arg12[%c24_70, %c0_71] : memref<64x384xf32, #tpu.memory_space<vmem>>, vector<8x384xf32>
    %182 = tpu.concatenate %180, %181 in 0 : vector<8x384xf32>, vector<8x384xf32> -> vector<16x384xf32>
    %183 = vector.extract_strided_slice %179 {offsets = [0, 0], sizes = [8, 384], strides = [1, 1]} : vector<16x768xf32> to vector<8x384xf32>
    %184 = vector.extract_strided_slice %179 {offsets = [8, 384], sizes = [8, 384], strides = [1, 1]} : vector<16x768xf32> to vector<8x384xf32>
    %185 = tpu.concatenate %183, %184 in 0 : vector<8x384xf32>, vector<8x384xf32> -> vector<16x384xf32>
    %186 = vector.extract_strided_slice %182 {offsets = [0, 0], sizes = [16, 128], strides = [1, 1]} : vector<16x384xf32> to vector<16x128xf32>
    %187 = vector.extract_strided_slice %185 {offsets = [0, 0], sizes = [16, 128], strides = [1, 1]} : vector<16x384xf32> to vector<16x128xf32>
    %188 = arith.addf %186, %187 : vector<16x128xf32>
    %189 = arith.negf %188 : vector<16x128xf32>
    %190 = math.exp %189 : vector<16x128xf32>
    %cst_72 = arith.constant 1.000000e+00 : f32
    %191 = vector.broadcast %cst_72 : f32 to vector<16x128xf32>
    %192 = arith.addf %191, %190 : vector<16x128xf32>
    %193 = arith.divf %191, %192 : vector<16x128xf32>
    %194 = vector.extract_strided_slice %182 {offsets = [0, 128], sizes = [16, 128], strides = [1, 1]} : vector<16x384xf32> to vector<16x128xf32>
    %195 = vector.extract_strided_slice %185 {offsets = [0, 128], sizes = [16, 128], strides = [1, 1]} : vector<16x384xf32> to vector<16x128xf32>
    %196 = arith.addf %194, %195 : vector<16x128xf32>
    %197 = arith.negf %196 : vector<16x128xf32>
    %198 = math.exp %197 : vector<16x128xf32>
    %cst_73 = arith.constant 1.000000e+00 : f32
    %199 = vector.broadcast %cst_73 : f32 to vector<16x128xf32>
    %200 = arith.addf %199, %198 : vector<16x128xf32>
    %201 = arith.divf %199, %200 : vector<16x128xf32>
    %202 = vector.extract_strided_slice %182 {offsets = [0, 256], sizes = [16, 128], strides = [1, 1]} : vector<16x384xf32> to vector<16x128xf32>
    %203 = vector.extract_strided_slice %185 {offsets = [0, 256], sizes = [16, 128], strides = [1, 1]} : vector<16x384xf32> to vector<16x128xf32>
    %204 = arith.addf %203, %28 : vector<16x128xf32>
    %205 = arith.mulf %193, %204 : vector<16x128xf32>
    %206 = arith.addf %202, %205 : vector<16x128xf32>
    %207 = math.tanh %206 : vector<16x128xf32>
    %208 = arith.subf %173, %207 : vector<16x128xf32>
    %209 = arith.mulf %201, %208 : vector<16x128xf32>
    %210 = arith.addf %207, %209 : vector<16x128xf32>
    %211 = vector.extract_strided_slice %210 {offsets = [0, 0], sizes = [8, 128], strides = [1, 1]} : vector<16x128xf32> to vector<8x128xf32>
    %c32_74 = arith.constant 32 : index
    %c0_75 = arith.constant 0 : index
    %212 = vector.load %arg9[%c32_74, %c0_75] : memref<64x256xf32, #tpu.memory_space<vmem>>, vector<8x128xf32>
    tpu.vector_store %arg9[%c32_74, %c0_75], %211 {strides = array<i32>} : memref<64x256xf32, #tpu.memory_space<vmem>>, vector<8x128xf32>,
    %213 = vector.extract_strided_slice %210 {offsets = [8, 0], sizes = [8, 128], strides = [1, 1]} : vector<16x128xf32> to vector<8x128xf32>
    %c24_76 = arith.constant 24 : index
    %c128_77 = arith.constant 128 : index
    %214 = vector.load %arg9[%c24_76, %c128_77] : memref<64x256xf32, #tpu.memory_space<vmem>>, vector<8x128xf32>
    tpu.vector_store %arg9[%c24_76, %c128_77], %213 {strides = array<i32>} : memref<64x256xf32, #tpu.memory_space<vmem>>, vector<8x128xf32>,
    %215 = arith.truncf %210 : vector<16x128xf32> to vector<16x128xbf16>
    %cst_78 = arith.constant dense<0.000000e+00> : vector<16x768xf32>
    %216 = tpu.matmul %215, %19, %cst_78 {dimension_numbers = #tpu.dot_dimension_numbers<[1], [0], [0], [1], [0, 0, 1, 1], [], []>} : vector<16x128xbf16>, vector<128x768xbf16>, vector<16x768xf32> -> vector<16x768xf32>
    %c40_79 = arith.constant 40 : index
    %c0_80 = arith.constant 0 : index
    %217 = vector.load %arg11[%c40_79, %c0_80] : memref<64x384xf32, #tpu.memory_space<vmem>>, vector<8x384xf32>
    %c16_81 = arith.constant 16 : index
    %c0_82 = arith.constant 0 : index
    %218 = vector.load %arg12[%c16_81, %c0_82] : memref<64x384xf32, #tpu.memory_space<vmem>>, vector<8x384xf32>
    %219 = tpu.concatenate %217, %218 in 0 : vector<8x384xf32>, vector<8x384xf32> -> vector<16x384xf32>
    %220 = vector.extract_strided_slice %216 {offsets = [0, 0], sizes = [8, 384], strides = [1, 1]} : vector<16x768xf32> to vector<8x384xf32>
    %221 = vector.extract_strided_slice %216 {offsets = [8, 384], sizes = [8, 384], strides = [1, 1]} : vector<16x768xf32> to vector<8x384xf32>
    %222 = tpu.concatenate %220, %221 in 0 : vector<8x384xf32>, vector<8x384xf32> -> vector<16x384xf32>
    %223 = vector.extract_strided_slice %219 {offsets = [0, 0], sizes = [16, 128], strides = [1, 1]} : vector<16x384xf32> to vector<16x128xf32>
    %224 = vector.extract_strided_slice %222 {offsets = [0, 0], sizes = [16, 128], strides = [1, 1]} : vector<16x384xf32> to vector<16x128xf32>
    %225 = arith.addf %223, %224 : vector<16x128xf32>
    %226 = arith.negf %225 : vector<16x128xf32>
    %227 = math.exp %226 : vector<16x128xf32>
    %cst_83 = arith.constant 1.000000e+00 : f32
    %228 = vector.broadcast %cst_83 : f32 to vector<16x128xf32>
    %229 = arith.addf %228, %227 : vector<16x128xf32>
    %230 = arith.divf %228, %229 : vector<16x128xf32>
    %231 = vector.extract_strided_slice %219 {offsets = [0, 128], sizes = [16, 128], strides = [1, 1]} : vector<16x384xf32> to vector<16x128xf32>
    %232 = vector.extract_strided_slice %222 {offsets = [0, 128], sizes = [16, 128], strides = [1, 1]} : vector<16x384xf32> to vector<16x128xf32>
    %233 = arith.addf %231, %232 : vector<16x128xf32>
    %234 = arith.negf %233 : vector<16x128xf32>
    %235 = math.exp %234 : vector<16x128xf32>
    %cst_84 = arith.constant 1.000000e+00 : f32
    %236 = vector.broadcast %cst_84 : f32 to vector<16x128xf32>
    %237 = arith.addf %236, %235 : vector<16x128xf32>
    %238 = arith.divf %236, %237 : vector<16x128xf32>
    %239 = vector.extract_strided_slice %219 {offsets = [0, 256], sizes = [16, 128], strides = [1, 1]} : vector<16x384xf32> to vector<16x128xf32>
    %240 = vector.extract_strided_slice %222 {offsets = [0, 256], sizes = [16, 128], strides = [1, 1]} : vector<16x384xf32> to vector<16x128xf32>
    %241 = arith.addf %240, %28 : vector<16x128xf32>
    %242 = arith.mulf %230, %241 : vector<16x128xf32>
    %243 = arith.addf %239, %242 : vector<16x128xf32>
    %244 = math.tanh %243 : vector<16x128xf32>
    %245 = arith.subf %210, %244 : vector<16x128xf32>
    %246 = arith.mulf %238, %245 : vector<16x128xf32>
    %247 = arith.addf %244, %246 : vector<16x128xf32>
    %248 = vector.extract_strided_slice %247 {offsets = [0, 0], sizes = [8, 128], strides = [1, 1]} : vector<16x128xf32> to vector<8x128xf32>
    %c40_85 = arith.constant 40 : index
    %c0_86 = arith.constant 0 : index
    %249 = vector.load %arg9[%c40_85, %c0_86] : memref<64x256xf32, #tpu.memory_space<vmem>>, vector<8x128xf32>
    tpu.vector_store %arg9[%c40_85, %c0_86], %248 {strides = array<i32>} : memref<64x256xf32, #tpu.memory_space<vmem>>, vector<8x128xf32>,
    %250 = vector.extract_strided_slice %247 {offsets = [8, 0], sizes = [8, 128], strides = [1, 1]} : vector<16x128xf32> to vector<8x128xf32>
    %c16_87 = arith.constant 16 : index
    %c128_88 = arith.constant 128 : index
    %251 = vector.load %arg9[%c16_87, %c128_88] : memref<64x256xf32, #tpu.memory_space<vmem>>, vector<8x128xf32>
    tpu.vector_store %arg9[%c16_87, %c128_88], %250 {strides = array<i32>} : memref<64x256xf32, #tpu.memory_space<vmem>>, vector<8x128xf32>,
    %252 = arith.truncf %247 : vector<16x128xf32> to vector<16x128xbf16>
    %cst_89 = arith.constant dense<0.000000e+00> : vector<16x768xf32>
    %253 = tpu.matmul %252, %19, %cst_89 {dimension_numbers = #tpu.dot_dimension_numbers<[1], [0], [0], [1], [0, 0, 1, 1], [], []>} : vector<16x128xbf16>, vector<128x768xbf16>, vector<16x768xf32> -> vector<16x768xf32>
    %c48_90 = arith.constant 48 : index
    %c0_91 = arith.constant 0 : index
    %254 = vector.load %arg11[%c48_90, %c0_91] : memref<64x384xf32, #tpu.memory_space<vmem>>, vector<8x384xf32>
    %c8_92 = arith.constant 8 : index
    %c0_93 = arith.constant 0 : index
    %255 = vector.load %arg12[%c8_92, %c0_93] : memref<64x384xf32, #tpu.memory_space<vmem>>, vector<8x384xf32>
    %256 = tpu.concatenate %254, %255 in 0 : vector<8x384xf32>, vector<8x384xf32> -> vector<16x384xf32>
    %257 = vector.extract_strided_slice %253 {offsets = [0, 0], sizes = [8, 384], strides = [1, 1]} : vector<16x768xf32> to vector<8x384xf32>
    %258 = vector.extract_strided_slice %253 {offsets = [8, 384], sizes = [8, 384], strides = [1, 1]} : vector<16x768xf32> to vector<8x384xf32>
    %259 = tpu.concatenate %257, %258 in 0 : vector<8x384xf32>, vector<8x384xf32> -> vector<16x384xf32>
    %260 = vector.extract_strided_slice %256 {offsets = [0, 0], sizes = [16, 128], strides = [1, 1]} : vector<16x384xf32> to vector<16x128xf32>
    %261 = vector.extract_strided_slice %259 {offsets = [0, 0], sizes = [16, 128], strides = [1, 1]} : vector<16x384xf32> to vector<16x128xf32>
    %262 = arith.addf %260, %261 : vector<16x128xf32>
    %263 = arith.negf %262 : vector<16x128xf32>
    %264 = math.exp %263 : vector<16x128xf32>
    %cst_94 = arith.constant 1.000000e+00 : f32
    %265 = vector.broadcast %cst_94 : f32 to vector<16x128xf32>
    %266 = arith.addf %265, %264 : vector<16x128xf32>
    %267 = arith.divf %265, %266 : vector<16x128xf32>
    %268 = vector.extract_strided_slice %256 {offsets = [0, 128], sizes = [16, 128], strides = [1, 1]} : vector<16x384xf32> to vector<16x128xf32>
    %269 = vector.extract_strided_slice %259 {offsets = [0, 128], sizes = [16, 128], strides = [1, 1]} : vector<16x384xf32> to vector<16x128xf32>
    %270 = arith.addf %268, %269 : vector<16x128xf32>
    %271 = arith.negf %270 : vector<16x128xf32>
    %272 = math.exp %271 : vector<16x128xf32>
    %cst_95 = arith.constant 1.000000e+00 : f32
    %273 = vector.broadcast %cst_95 : f32 to vector<16x128xf32>
    %274 = arith.addf %273, %272 : vector<16x128xf32>
    %275 = arith.divf %273, %274 : vector<16x128xf32>
    %276 = vector.extract_strided_slice %256 {offsets = [0, 256], sizes = [16, 128], strides = [1, 1]} : vector<16x384xf32> to vector<16x128xf32>
    %277 = vector.extract_strided_slice %259 {offsets = [0, 256], sizes = [16, 128], strides = [1, 1]} : vector<16x384xf32> to vector<16x128xf32>
    %278 = arith.addf %277, %28 : vector<16x128xf32>
    %279 = arith.mulf %267, %278 : vector<16x128xf32>
    %280 = arith.addf %276, %279 : vector<16x128xf32>
    %281 = math.tanh %280 : vector<16x128xf32>
    %282 = arith.subf %247, %281 : vector<16x128xf32>
    %283 = arith.mulf %275, %282 : vector<16x128xf32>
    %284 = arith.addf %281, %283 : vector<16x128xf32>
    %285 = vector.extract_strided_slice %284 {offsets = [0, 0], sizes = [8, 128], strides = [1, 1]} : vector<16x128xf32> to vector<8x128xf32>
    %c48_96 = arith.constant 48 : index
    %c0_97 = arith.constant 0 : index
    %286 = vector.load %arg9[%c48_96, %c0_97] : memref<64x256xf32, #tpu.memory_space<vmem>>, vector<8x128xf32>
    tpu.vector_store %arg9[%c48_96, %c0_97], %285 {strides = array<i32>} : memref<64x256xf32, #tpu.memory_space<vmem>>, vector<8x128xf32>,
    %287 = vector.extract_strided_slice %284 {offsets = [8, 0], sizes = [8, 128], strides = [1, 1]} : vector<16x128xf32> to vector<8x128xf32>
    %c8_98 = arith.constant 8 : index
    %c128_99 = arith.constant 128 : index
    %288 = vector.load %arg9[%c8_98, %c128_99] : memref<64x256xf32, #tpu.memory_space<vmem>>, vector<8x128xf32>
    tpu.vector_store %arg9[%c8_98, %c128_99], %287 {strides = array<i32>} : memref<64x256xf32, #tpu.memory_space<vmem>>, vector<8x128xf32>,
    %289 = arith.truncf %284 : vector<16x128xf32> to vector<16x128xbf16>
    %cst_100 = arith.constant dense<0.000000e+00> : vector<16x768xf32>
    %290 = tpu.matmul %289, %19, %cst_100 {dimension_numbers = #tpu.dot_dimension_numbers<[1], [0], [0], [1], [0, 0, 1, 1], [], []>} : vector<16x128xbf16>, vector<128x768xbf16>, vector<16x768xf32> -> vector<16x768xf32>
    %c56_101 = arith.constant 56 : index
    %c0_102 = arith.constant 0 : index
    %291 = vector.load %arg11[%c56_101, %c0_102] : memref<64x384xf32, #tpu.memory_space<vmem>>, vector<8x384xf32>
    %c0_103 = arith.constant 0 : index
    %c0_104 = arith.constant 0 : index
    %292 = vector.load %arg12[%c0_103, %c0_104] : memref<64x384xf32, #tpu.memory_space<vmem>>, vector<8x384xf32>
    %293 = tpu.concatenate %291, %292 in 0 : vector<8x384xf32>, vector<8x384xf32> -> vector<16x384xf32>
    %294 = vector.extract_strided_slice %290 {offsets = [0, 0], sizes = [8, 384], strides = [1, 1]} : vector<16x768xf32> to vector<8x384xf32>
    %295 = vector.extract_strided_slice %290 {offsets = [8, 384], sizes = [8, 384], strides = [1, 1]} : vector<16x768xf32> to vector<8x384xf32>
    %296 = tpu.concatenate %294, %295 in 0 : vector<8x384xf32>, vector<8x384xf32> -> vector<16x384xf32>
    %297 = vector.extract_strided_slice %293 {offsets = [0, 0], sizes = [16, 128], strides = [1, 1]} : vector<16x384xf32> to vector<16x128xf32>
    %298 = vector.extract_strided_slice %296 {offsets = [0, 0], sizes = [16, 128], strides = [1, 1]} : vector<16x384xf32> to vector<16x128xf32>
    %299 = arith.addf %297, %298 : vector<16x128xf32>
    %300 = arith.negf %299 : vector<16x128xf32>
    %301 = math.exp %300 : vector<16x128xf32>
    %cst_105 = arith.constant 1.000000e+00 : f32
    %302 = vector.broadcast %cst_105 : f32 to vector<16x128xf32>
    %303 = arith.addf %302, %301 : vector<16x128xf32>
    %304 = arith.divf %302, %303 : vector<16x128xf32>
    %305 = vector.extract_strided_slice %293 {offsets = [0, 128], sizes = [16, 128], strides = [1, 1]} : vector<16x384xf32> to vector<16x128xf32>
    %306 = vector.extract_strided_slice %296 {offsets = [0, 128], sizes = [16, 128], strides = [1, 1]} : vector<16x384xf32> to vector<16x128xf32>
    %307 = arith.addf %305, %306 : vector<16x128xf32>
    %308 = arith.negf %307 : vector<16x128xf32>
    %309 = math.exp %308 : vector<16x128xf32>
    %cst_106 = arith.constant 1.000000e+00 : f32
    %310 = vector.broadcast %cst_106 : f32 to vector<16x128xf32>
    %311 = arith.addf %310, %309 : vector<16x128xf32>
    %312 = arith.divf %310, %311 : vector<16x128xf32>
    %313 = vector.extract_strided_slice %293 {offsets = [0, 256], sizes = [16, 128], strides = [1, 1]} : vector<16x384xf32> to vector<16x128xf32>
    %314 = vector.extract_strided_slice %296 {offsets = [0, 256], sizes = [16, 128], strides = [1, 1]} : vector<16x384xf32> to vector<16x128xf32>
    %315 = arith.addf %314, %28 : vector<16x128xf32>
    %316 = arith.mulf %304, %315 : vector<16x128xf32>
    %317 = arith.addf %313, %316 : vector<16x128xf32>
    %318 = math.tanh %317 : vector<16x128xf32>
    %319 = arith.subf %284, %318 : vector<16x128xf32>
    %320 = arith.mulf %312, %319 : vector<16x128xf32>
    %321 = arith.addf %318, %320 : vector<16x128xf32>
    %322 = vector.extract_strided_slice %321 {offsets = [0, 0], sizes = [8, 128], strides = [1, 1]} : vector<16x128xf32> to vector<8x128xf32>
    %c56_107 = arith.constant 56 : index
    %c0_108 = arith.constant 0 : index
    %323 = vector.load %arg9[%c56_107, %c0_108] : memref<64x256xf32, #tpu.memory_space<vmem>>, vector<8x128xf32>
    tpu.vector_store %arg9[%c56_107, %c0_108], %322 {strides = array<i32>} : memref<64x256xf32, #tpu.memory_space<vmem>>, vector<8x128xf32>,
    %324 = vector.extract_strided_slice %321 {offsets = [8, 0], sizes = [8, 128], strides = [1, 1]} : vector<16x128xf32> to vector<8x128xf32>
    %c0_109 = arith.constant 0 : index
    %c128_110 = arith.constant 128 : index
    %325 = vector.load %arg9[%c0_109, %c128_110] : memref<64x256xf32, #tpu.memory_space<vmem>>, vector<8x128xf32>
    tpu.vector_store %arg9[%c0_109, %c128_110], %324 {strides = array<i32>} : memref<64x256xf32, #tpu.memory_space<vmem>>, vector<8x128xf32>,
    %c0_111 = arith.constant 0 : index
    %c0_112 = arith.constant 0 : index
    %326 = vector.load %arg9[%c0_111, %c0_112] : memref<64x256xf32, #tpu.memory_space<vmem>>, vector<64x256xf32>
    %327 = arith.truncf %326 : vector<64x256xf32> to vector<64x256xbf16>
    %c0_113 = arith.constant 0 : index
    %c0_114 = arith.constant 0 : index
    %c0_115 = arith.constant 0 : index
    %c0_116 = arith.constant 0 : index
    %328 = vector.load %arg2[%c0_113, %c0_114, %c0_115, %c0_116] : memref<2x2x256x384xbf16, #tpu.memory_space<vmem>>, vector<1x1x256x384xbf16>
    %329 = vector.shape_cast %328 : vector<1x1x256x384xbf16> to vector<256x384xbf16>
    %c0_117 = arith.constant 0 : index
    %c1_118 = arith.constant 1 : index
    %c0_119 = arith.constant 0 : index
    %c0_120 = arith.constant 0 : index
    %330 = vector.load %arg2[%c0_117, %c1_118, %c0_119, %c0_120] : memref<2x2x256x384xbf16, #tpu.memory_space<vmem>>, vector<1x1x256x384xbf16>
    %331 = vector.shape_cast %330 : vector<1x1x256x384xbf16> to vector<256x384xbf16>
    %cst_121 = arith.constant dense<0.000000e+00> : vector<64x384xf32>
    %332 = tpu.matmul %327, %329, %cst_121 {dimension_numbers = #tpu.dot_dimension_numbers<[1], [0], [0], [1], [0, 0, 1, 1], [], []>} : vector<64x256xbf16>, vector<256x384xbf16>, vector<64x384xf32> -> vector<64x384xf32>
    %c1_122 = arith.constant 1 : index
    %c0_123 = arith.constant 0 : index
    %c0_124 = arith.constant 0 : index
    %c0_125 = arith.constant 0 : index
    %333 = vector.load %arg4[%c1_122, %c0_123, %c0_124, %c0_125] : memref<3x2x1x384xf32, #tpu.memory_space<vmem>>, vector<1x1x1x384xf32>
    %334 = vector.shape_cast %333 : vector<1x1x1x384xf32> to vector<1x384xf32>
    %335 = vector.broadcast %334 : vector<1x384xf32> to vector<64x384xf32>
    %336 = arith.addf %332, %335 : vector<64x384xf32>
    %c0_126 = arith.constant 0 : index
    %c0_127 = arith.constant 0 : index
    %337 = vector.load %arg11[%c0_126, %c0_127] : memref<64x384xf32, #tpu.memory_space<vmem>>, vector<64x384xf32>
    tpu.vector_store %arg11[%c0_126, %c0_127], %336 {strides = array<i32>} : memref<64x384xf32, #tpu.memory_space<vmem>>, vector<64x384xf32>,
    %cst_128 = arith.constant dense<0.000000e+00> : vector<64x384xf32>
    %338 = tpu.matmul %327, %331, %cst_128 {dimension_numbers = #tpu.dot_dimension_numbers<[1], [0], [0], [1], [0, 0, 1, 1], [], []>} : vector<64x256xbf16>, vector<256x384xbf16>, vector<64x384xf32> -> vector<64x384xf32>
    %c1_129 = arith.constant 1 : index
    %c1_130 = arith.constant 1 : index
    %c0_131 = arith.constant 0 : index
    %c0_132 = arith.constant 0 : index
    %339 = vector.load %arg4[%c1_129, %c1_130, %c0_131, %c0_132] : memref<3x2x1x384xf32, #tpu.memory_space<vmem>>, vector<1x1x1x384xf32>
    %340 = vector.shape_cast %339 : vector<1x1x1x384xf32> to vector<1x384xf32>
    %341 = vector.broadcast %340 : vector<1x384xf32> to vector<64x384xf32>
    %342 = arith.addf %338, %341 : vector<64x384xf32>
    %c0_133 = arith.constant 0 : index
    %c0_134 = arith.constant 0 : index
    %343 = vector.load %arg12[%c0_133, %c0_134] : memref<64x384xf32, #tpu.memory_space<vmem>>, vector<64x384xf32>
    tpu.vector_store %arg12[%c0_133, %c0_134], %342 {strides = array<i32>} : memref<64x384xf32, #tpu.memory_space<vmem>>, vector<64x384xf32>,
    %c1_135 = arith.constant 1 : index
    %c0_136 = arith.constant 0 : index
    %c0_137 = arith.constant 0 : index
    %344 = vector.load %arg3[%c1_135, %c0_136, %c0_137] : memref<3x128x768xbf16, #tpu.memory_space<vmem>>, vector<1x128x768xbf16>
    %345 = vector.shape_cast %344 : vector<1x128x768xbf16> to vector<128x768xbf16>
    %c1_138 = arith.constant 1 : index
    %c0_139 = arith.constant 0 : index
    %c0_140 = arith.constant 0 : index
    %c0_141 = arith.constant 0 : index
    %346 = vector.load %arg5[%c1_138, %c0_139, %c0_140, %c0_141] : memref<3x2x1x128xf32, #tpu.memory_space<vmem>>, vector<1x1x1x128xf32>
    %347 = vector.shape_cast %346 : vector<1x1x1x128xf32> to vector<1x128xf32>
    %348 = vector.shape_cast %347 : vector<1x128xf32> to vector<1x128xf32>
    %349 = vector.broadcast %348 : vector<1x128xf32> to vector<8x128xf32>
    %c1_142 = arith.constant 1 : index
    %c1_143 = arith.constant 1 : index
    %c0_144 = arith.constant 0 : index
    %c0_145 = arith.constant 0 : index
    %350 = vector.load %arg5[%c1_142, %c1_143, %c0_144, %c0_145] : memref<3x2x1x128xf32, #tpu.memory_space<vmem>>, vector<1x1x1x128xf32>
    %351 = vector.shape_cast %350 : vector<1x1x1x128xf32> to vector<1x128xf32>
    %352 = vector.shape_cast %351 : vector<1x128xf32> to vector<1x128xf32>
    %353 = vector.broadcast %352 : vector<1x128xf32> to vector<8x128xf32>
    %354 = tpu.concatenate %349, %353 in 0 : vector<8x128xf32>, vector<8x128xf32> -> vector<16x128xf32>
    %cst_146 = arith.constant 0.000000e+00 : f32
    %355 = vector.broadcast %cst_146 : f32 to vector<16x128xf32>
    %356 = arith.truncf %355 : vector<16x128xf32> to vector<16x128xbf16>
    %cst_147 = arith.constant dense<0.000000e+00> : vector<16x768xf32>
    %357 = tpu.matmul %356, %345, %cst_147 {dimension_numbers = #tpu.dot_dimension_numbers<[1], [0], [0], [1], [0, 0, 1, 1], [], []>} : vector<16x128xbf16>, vector<128x768xbf16>, vector<16x768xf32> -> vector<16x768xf32>
    %c0_148 = arith.constant 0 : index
    %c0_149 = arith.constant 0 : index
    %358 = vector.load %arg11[%c0_148, %c0_149] : memref<64x384xf32, #tpu.memory_space<vmem>>, vector<8x384xf32>
    %c56_150 = arith.constant 56 : index
    %c0_151 = arith.constant 0 : index
    %359 = vector.load %arg12[%c56_150, %c0_151] : memref<64x384xf32, #tpu.memory_space<vmem>>, vector<8x384xf32>
    %360 = tpu.concatenate %358, %359 in 0 : vector<8x384xf32>, vector<8x384xf32> -> vector<16x384xf32>
    %361 = vector.extract_strided_slice %357 {offsets = [0, 0], sizes = [8, 384], strides = [1, 1]} : vector<16x768xf32> to vector<8x384xf32>
    %362 = vector.extract_strided_slice %357 {offsets = [8, 384], sizes = [8, 384], strides = [1, 1]} : vector<16x768xf32> to vector<8x384xf32>
    %363 = tpu.concatenate %361, %362 in 0 : vector<8x384xf32>, vector<8x384xf32> -> vector<16x384xf32>
    %364 = vector.extract_strided_slice %360 {offsets = [0, 0], sizes = [16, 128], strides = [1, 1]} : vector<16x384xf32> to vector<16x128xf32>
    %365 = vector.extract_strided_slice %363 {offsets = [0, 0], sizes = [16, 128], strides = [1, 1]} : vector<16x384xf32> to vector<16x128xf32>
    %366 = arith.addf %364, %365 : vector<16x128xf32>
    %367 = arith.negf %366 : vector<16x128xf32>
    %368 = math.exp %367 : vector<16x128xf32>
    %cst_152 = arith.constant 1.000000e+00 : f32
    %369 = vector.broadcast %cst_152 : f32 to vector<16x128xf32>
    %370 = arith.addf %369, %368 : vector<16x128xf32>
    %371 = arith.divf %369, %370 : vector<16x128xf32>
    %372 = vector.extract_strided_slice %360 {offsets = [0, 128], sizes = [16, 128], strides = [1, 1]} : vector<16x384xf32> to vector<16x128xf32>
    %373 = vector.extract_strided_slice %363 {offsets = [0, 128], sizes = [16, 128], strides = [1, 1]} : vector<16x384xf32> to vector<16x128xf32>
    %374 = arith.addf %372, %373 : vector<16x128xf32>
    %375 = arith.negf %374 : vector<16x128xf32>
    %376 = math.exp %375 : vector<16x128xf32>
    %cst_153 = arith.constant 1.000000e+00 : f32
    %377 = vector.broadcast %cst_153 : f32 to vector<16x128xf32>
    %378 = arith.addf %377, %376 : vector<16x128xf32>
    %379 = arith.divf %377, %378 : vector<16x128xf32>
    %380 = vector.extract_strided_slice %360 {offsets = [0, 256], sizes = [16, 128], strides = [1, 1]} : vector<16x384xf32> to vector<16x128xf32>
    %381 = vector.extract_strided_slice %363 {offsets = [0, 256], sizes = [16, 128], strides = [1, 1]} : vector<16x384xf32> to vector<16x128xf32>
    %382 = arith.addf %381, %354 : vector<16x128xf32>
    %383 = arith.mulf %371, %382 : vector<16x128xf32>
    %384 = arith.addf %380, %383 : vector<16x128xf32>
    %385 = math.tanh %384 : vector<16x128xf32>
    %386 = arith.subf %355, %385 : vector<16x128xf32>
    %387 = arith.mulf %379, %386 : vector<16x128xf32>
    %388 = arith.addf %385, %387 : vector<16x128xf32>
    %389 = vector.extract_strided_slice %388 {offsets = [0, 0], sizes = [8, 128], strides = [1, 1]} : vector<16x128xf32> to vector<8x128xf32>
    %c0_154 = arith.constant 0 : index
    %c0_155 = arith.constant 0 : index
    %390 = vector.load %arg10[%c0_154, %c0_155] : memref<64x256xf32, #tpu.memory_space<vmem>>, vector<8x128xf32>
    tpu.vector_store %arg10[%c0_154, %c0_155], %389 {strides = array<i32>} : memref<64x256xf32, #tpu.memory_space<vmem>>, vector<8x128xf32>,
    %391 = vector.extract_strided_slice %388 {offsets = [8, 0], sizes = [8, 128], strides = [1, 1]} : vector<16x128xf32> to vector<8x128xf32>
    %c56_156 = arith.constant 56 : index
    %c128_157 = arith.constant 128 : index
    %392 = vector.load %arg10[%c56_156, %c128_157] : memref<64x256xf32, #tpu.memory_space<vmem>>, vector<8x128xf32>
    tpu.vector_store %arg10[%c56_156, %c128_157], %391 {strides = array<i32>} : memref<64x256xf32, #tpu.memory_space<vmem>>, vector<8x128xf32>,
    %393 = arith.truncf %388 : vector<16x128xf32> to vector<16x128xbf16>
    %cst_158 = arith.constant dense<0.000000e+00> : vector<16x768xf32>
    %394 = tpu.matmul %393, %345, %cst_158 {dimension_numbers = #tpu.dot_dimension_numbers<[1], [0], [0], [1], [0, 0, 1, 1], [], []>} : vector<16x128xbf16>, vector<128x768xbf16>, vector<16x768xf32> -> vector<16x768xf32>
    %c8_159 = arith.constant 8 : index
    %c0_160 = arith.constant 0 : index
    %395 = vector.load %arg11[%c8_159, %c0_160] : memref<64x384xf32, #tpu.memory_space<vmem>>, vector<8x384xf32>
    %c48_161 = arith.constant 48 : index
    %c0_162 = arith.constant 0 : index
    %396 = vector.load %arg12[%c48_161, %c0_162] : memref<64x384xf32, #tpu.memory_space<vmem>>, vector<8x384xf32>
    %397 = tpu.concatenate %395, %396 in 0 : vector<8x384xf32>, vector<8x384xf32> -> vector<16x384xf32>
    %398 = vector.extract_strided_slice %394 {offsets = [0, 0], sizes = [8, 384], strides = [1, 1]} : vector<16x768xf32> to vector<8x384xf32>
    %399 = vector.extract_strided_slice %394 {offsets = [8, 384], sizes = [8, 384], strides = [1, 1]} : vector<16x768xf32> to vector<8x384xf32>
    %400 = tpu.concatenate %398, %399 in 0 : vector<8x384xf32>, vector<8x384xf32> -> vector<16x384xf32>
    %401 = vector.extract_strided_slice %397 {offsets = [0, 0], sizes = [16, 128], strides = [1, 1]} : vector<16x384xf32> to vector<16x128xf32>
    %402 = vector.extract_strided_slice %400 {offsets = [0, 0], sizes = [16, 128], strides = [1, 1]} : vector<16x384xf32> to vector<16x128xf32>
    %403 = arith.addf %401, %402 : vector<16x128xf32>
    %404 = arith.negf %403 : vector<16x128xf32>
    %405 = math.exp %404 : vector<16x128xf32>
    %cst_163 = arith.constant 1.000000e+00 : f32
    %406 = vector.broadcast %cst_163 : f32 to vector<16x128xf32>
    %407 = arith.addf %406, %405 : vector<16x128xf32>
    %408 = arith.divf %406, %407 : vector<16x128xf32>
    %409 = vector.extract_strided_slice %397 {offsets = [0, 128], sizes = [16, 128], strides = [1, 1]} : vector<16x384xf32> to vector<16x128xf32>
    %410 = vector.extract_strided_slice %400 {offsets = [0, 128], sizes = [16, 128], strides = [1, 1]} : vector<16x384xf32> to vector<16x128xf32>
    %411 = arith.addf %409, %410 : vector<16x128xf32>
    %412 = arith.negf %411 : vector<16x128xf32>
    %413 = math.exp %412 : vector<16x128xf32>
    %cst_164 = arith.constant 1.000000e+00 : f32
    %414 = vector.broadcast %cst_164 : f32 to vector<16x128xf32>
    %415 = arith.addf %414, %413 : vector<16x128xf32>
    %416 = arith.divf %414, %415 : vector<16x128xf32>
    %417 = vector.extract_strided_slice %397 {offsets = [0, 256], sizes = [16, 128], strides = [1, 1]} : vector<16x384xf32> to vector<16x128xf32>
    %418 = vector.extract_strided_slice %400 {offsets = [0, 256], sizes = [16, 128], strides = [1, 1]} : vector<16x384xf32> to vector<16x128xf32>
    %419 = arith.addf %418, %354 : vector<16x128xf32>
    %420 = arith.mulf %408, %419 : vector<16x128xf32>
    %421 = arith.addf %417, %420 : vector<16x128xf32>
    %422 = math.tanh %421 : vector<16x128xf32>
    %423 = arith.subf %388, %422 : vector<16x128xf32>
    %424 = arith.mulf %416, %423 : vector<16x128xf32>
    %425 = arith.addf %422, %424 : vector<16x128xf32>
    %426 = vector.extract_strided_slice %425 {offsets = [0, 0], sizes = [8, 128], strides = [1, 1]} : vector<16x128xf32> to vector<8x128xf32>
    %c8_165 = arith.constant 8 : index
    %c0_166 = arith.constant 0 : index
    %427 = vector.load %arg10[%c8_165, %c0_166] : memref<64x256xf32, #tpu.memory_space<vmem>>, vector<8x128xf32>
    tpu.vector_store %arg10[%c8_165, %c0_166], %426 {strides = array<i32>} : memref<64x256xf32, #tpu.memory_space<vmem>>, vector<8x128xf32>,
    %428 = vector.extract_strided_slice %425 {offsets = [8, 0], sizes = [8, 128], strides = [1, 1]} : vector<16x128xf32> to vector<8x128xf32>
    %c48_167 = arith.constant 48 : index
    %c128_168 = arith.constant 128 : index
    %429 = vector.load %arg10[%c48_167, %c128_168] : memref<64x256xf32, #tpu.memory_space<vmem>>, vector<8x128xf32>
    tpu.vector_store %arg10[%c48_167, %c128_168], %428 {strides = array<i32>} : memref<64x256xf32, #tpu.memory_space<vmem>>, vector<8x128xf32>,
    %430 = arith.truncf %425 : vector<16x128xf32> to vector<16x128xbf16>
    %cst_169 = arith.constant dense<0.000000e+00> : vector<16x768xf32>
    %431 = tpu.matmul %430, %345, %cst_169 {dimension_numbers = #tpu.dot_dimension_numbers<[1], [0], [0], [1], [0, 0, 1, 1], [], []>} : vector<16x128xbf16>, vector<128x768xbf16>, vector<16x768xf32> -> vector<16x768xf32>
    %c16_170 = arith.constant 16 : index
    %c0_171 = arith.constant 0 : index
    %432 = vector.load %arg11[%c16_170, %c0_171] : memref<64x384xf32, #tpu.memory_space<vmem>>, vector<8x384xf32>
    %c40_172 = arith.constant 40 : index
    %c0_173 = arith.constant 0 : index
    %433 = vector.load %arg12[%c40_172, %c0_173] : memref<64x384xf32, #tpu.memory_space<vmem>>, vector<8x384xf32>
    %434 = tpu.concatenate %432, %433 in 0 : vector<8x384xf32>, vector<8x384xf32> -> vector<16x384xf32>
    %435 = vector.extract_strided_slice %431 {offsets = [0, 0], sizes = [8, 384], strides = [1, 1]} : vector<16x768xf32> to vector<8x384xf32>
    %436 = vector.extract_strided_slice %431 {offsets = [8, 384], sizes = [8, 384], strides = [1, 1]} : vector<16x768xf32> to vector<8x384xf32>
    %437 = tpu.concatenate %435, %436 in 0 : vector<8x384xf32>, vector<8x384xf32> -> vector<16x384xf32>
    %438 = vector.extract_strided_slice %434 {offsets = [0, 0], sizes = [16, 128], strides = [1, 1]} : vector<16x384xf32> to vector<16x128xf32>
    %439 = vector.extract_strided_slice %437 {offsets = [0, 0], sizes = [16, 128], strides = [1, 1]} : vector<16x384xf32> to vector<16x128xf32>
    %440 = arith.addf %438, %439 : vector<16x128xf32>
    %441 = arith.negf %440 : vector<16x128xf32>
    %442 = math.exp %441 : vector<16x128xf32>
    %cst_174 = arith.constant 1.000000e+00 : f32
    %443 = vector.broadcast %cst_174 : f32 to vector<16x128xf32>
    %444 = arith.addf %443, %442 : vector<16x128xf32>
    %445 = arith.divf %443, %444 : vector<16x128xf32>
    %446 = vector.extract_strided_slice %434 {offsets = [0, 128], sizes = [16, 128], strides = [1, 1]} : vector<16x384xf32> to vector<16x128xf32>
    %447 = vector.extract_strided_slice %437 {offsets = [0, 128], sizes = [16, 128], strides = [1, 1]} : vector<16x384xf32> to vector<16x128xf32>
    %448 = arith.addf %446, %447 : vector<16x128xf32>
    %449 = arith.negf %448 : vector<16x128xf32>
    %450 = math.exp %449 : vector<16x128xf32>
    %cst_175 = arith.constant 1.000000e+00 : f32
    %451 = vector.broadcast %cst_175 : f32 to vector<16x128xf32>
    %452 = arith.addf %451, %450 : vector<16x128xf32>
    %453 = arith.divf %451, %452 : vector<16x128xf32>
    %454 = vector.extract_strided_slice %434 {offsets = [0, 256], sizes = [16, 128], strides = [1, 1]} : vector<16x384xf32> to vector<16x128xf32>
    %455 = vector.extract_strided_slice %437 {offsets = [0, 256], sizes = [16, 128], strides = [1, 1]} : vector<16x384xf32> to vector<16x128xf32>
    %456 = arith.addf %455, %354 : vector<16x128xf32>
    %457 = arith.mulf %445, %456 : vector<16x128xf32>
    %458 = arith.addf %454, %457 : vector<16x128xf32>
    %459 = math.tanh %458 : vector<16x128xf32>
    %460 = arith.subf %425, %459 : vector<16x128xf32>
    %461 = arith.mulf %453, %460 : vector<16x128xf32>
    %462 = arith.addf %459, %461 : vector<16x128xf32>
    %463 = vector.extract_strided_slice %462 {offsets = [0, 0], sizes = [8, 128], strides = [1, 1]} : vector<16x128xf32> to vector<8x128xf32>
    %c16_176 = arith.constant 16 : index
    %c0_177 = arith.constant 0 : index
    %464 = vector.load %arg10[%c16_176, %c0_177] : memref<64x256xf32, #tpu.memory_space<vmem>>, vector<8x128xf32>
    tpu.vector_store %arg10[%c16_176, %c0_177], %463 {strides = array<i32>} : memref<64x256xf32, #tpu.memory_space<vmem>>, vector<8x128xf32>,
    %465 = vector.extract_strided_slice %462 {offsets = [8, 0], sizes = [8, 128], strides = [1, 1]} : vector<16x128xf32> to vector<8x128xf32>
    %c40_178 = arith.constant 40 : index
    %c128_179 = arith.constant 128 : index
    %466 = vector.load %arg10[%c40_178, %c128_179] : memref<64x256xf32, #tpu.memory_space<vmem>>, vector<8x128xf32>
    tpu.vector_store %arg10[%c40_178, %c128_179], %465 {strides = array<i32>} : memref<64x256xf32, #tpu.memory_space<vmem>>, vector<8x128xf32>,
    %467 = arith.truncf %462 : vector<16x128xf32> to vector<16x128xbf16>
    %cst_180 = arith.constant dense<0.000000e+00> : vector<16x768xf32>
    %468 = tpu.matmul %467, %345, %cst_180 {dimension_numbers = #tpu.dot_dimension_numbers<[1], [0], [0], [1], [0, 0, 1, 1], [], []>} : vector<16x128xbf16>, vector<128x768xbf16>, vector<16x768xf32> -> vector<16x768xf32>
    %c24_181 = arith.constant 24 : index
    %c0_182 = arith.constant 0 : index
    %469 = vector.load %arg11[%c24_181, %c0_182] : memref<64x384xf32, #tpu.memory_space<vmem>>, vector<8x384xf32>
    %c32_183 = arith.constant 32 : index
    %c0_184 = arith.constant 0 : index
    %470 = vector.load %arg12[%c32_183, %c0_184] : memref<64x384xf32, #tpu.memory_space<vmem>>, vector<8x384xf32>
    %471 = tpu.concatenate %469, %470 in 0 : vector<8x384xf32>, vector<8x384xf32> -> vector<16x384xf32>
    %472 = vector.extract_strided_slice %468 {offsets = [0, 0], sizes = [8, 384], strides = [1, 1]} : vector<16x768xf32> to vector<8x384xf32>
    %473 = vector.extract_strided_slice %468 {offsets = [8, 384], sizes = [8, 384], strides = [1, 1]} : vector<16x768xf32> to vector<8x384xf32>
    %474 = tpu.concatenate %472, %473 in 0 : vector<8x384xf32>, vector<8x384xf32> -> vector<16x384xf32>
    %475 = vector.extract_strided_slice %471 {offsets = [0, 0], sizes = [16, 128], strides = [1, 1]} : vector<16x384xf32> to vector<16x128xf32>
    %476 = vector.extract_strided_slice %474 {offsets = [0, 0], sizes = [16, 128], strides = [1, 1]} : vector<16x384xf32> to vector<16x128xf32>
    %477 = arith.addf %475, %476 : vector<16x128xf32>
    %478 = arith.negf %477 : vector<16x128xf32>
    %479 = math.exp %478 : vector<16x128xf32>
    %cst_185 = arith.constant 1.000000e+00 : f32
    %480 = vector.broadcast %cst_185 : f32 to vector<16x128xf32>
    %481 = arith.addf %480, %479 : vector<16x128xf32>
    %482 = arith.divf %480, %481 : vector<16x128xf32>
    %483 = vector.extract_strided_slice %471 {offsets = [0, 128], sizes = [16, 128], strides = [1, 1]} : vector<16x384xf32> to vector<16x128xf32>
    %484 = vector.extract_strided_slice %474 {offsets = [0, 128], sizes = [16, 128], strides = [1, 1]} : vector<16x384xf32> to vector<16x128xf32>
    %485 = arith.addf %483, %484 : vector<16x128xf32>
    %486 = arith.negf %485 : vector<16x128xf32>
    %487 = math.exp %486 : vector<16x128xf32>
    %cst_186 = arith.constant 1.000000e+00 : f32
    %488 = vector.broadcast %cst_186 : f32 to vector<16x128xf32>
    %489 = arith.addf %488, %487 : vector<16x128xf32>
    %490 = arith.divf %488, %489 : vector<16x128xf32>
    %491 = vector.extract_strided_slice %471 {offsets = [0, 256], sizes = [16, 128], strides = [1, 1]} : vector<16x384xf32> to vector<16x128xf32>
    %492 = vector.extract_strided_slice %474 {offsets = [0, 256], sizes = [16, 128], strides = [1, 1]} : vector<16x384xf32> to vector<16x128xf32>
    %493 = arith.addf %492, %354 : vector<16x128xf32>
    %494 = arith.mulf %482, %493 : vector<16x128xf32>
    %495 = arith.addf %491, %494 : vector<16x128xf32>
    %496 = math.tanh %495 : vector<16x128xf32>
    %497 = arith.subf %462, %496 : vector<16x128xf32>
    %498 = arith.mulf %490, %497 : vector<16x128xf32>
    %499 = arith.addf %496, %498 : vector<16x128xf32>
    %500 = vector.extract_strided_slice %499 {offsets = [0, 0], sizes = [8, 128], strides = [1, 1]} : vector<16x128xf32> to vector<8x128xf32>
    %c24_187 = arith.constant 24 : index
    %c0_188 = arith.constant 0 : index
    %501 = vector.load %arg10[%c24_187, %c0_188] : memref<64x256xf32, #tpu.memory_space<vmem>>, vector<8x128xf32>
    tpu.vector_store %arg10[%c24_187, %c0_188], %500 {strides = array<i32>} : memref<64x256xf32, #tpu.memory_space<vmem>>, vector<8x128xf32>,
    %502 = vector.extract_strided_slice %499 {offsets = [8, 0], sizes = [8, 128], strides = [1, 1]} : vector<16x128xf32> to vector<8x128xf32>
    %c32_189 = arith.constant 32 : index
    %c128_190 = arith.constant 128 : index
    %503 = vector.load %arg10[%c32_189, %c128_190] : memref<64x256xf32, #tpu.memory_space<vmem>>, vector<8x128xf32>
    tpu.vector_store %arg10[%c32_189, %c128_190], %502 {strides = array<i32>} : memref<64x256xf32, #tpu.memory_space<vmem>>, vector<8x128xf32>,
    %504 = arith.truncf %499 : vector<16x128xf32> to vector<16x128xbf16>
    %cst_191 = arith.constant dense<0.000000e+00> : vector<16x768xf32>
    %505 = tpu.matmul %504, %345, %cst_191 {dimension_numbers = #tpu.dot_dimension_numbers<[1], [0], [0], [1], [0, 0, 1, 1], [], []>} : vector<16x128xbf16>, vector<128x768xbf16>, vector<16x768xf32> -> vector<16x768xf32>
    %c32_192 = arith.constant 32 : index
    %c0_193 = arith.constant 0 : index
    %506 = vector.load %arg11[%c32_192, %c0_193] : memref<64x384xf32, #tpu.memory_space<vmem>>, vector<8x384xf32>
    %c24_194 = arith.constant 24 : index
    %c0_195 = arith.constant 0 : index
    %507 = vector.load %arg12[%c24_194, %c0_195] : memref<64x384xf32, #tpu.memory_space<vmem>>, vector<8x384xf32>
    %508 = tpu.concatenate %506, %507 in 0 : vector<8x384xf32>, vector<8x384xf32> -> vector<16x384xf32>
    %509 = vector.extract_strided_slice %505 {offsets = [0, 0], sizes = [8, 384], strides = [1, 1]} : vector<16x768xf32> to vector<8x384xf32>
    %510 = vector.extract_strided_slice %505 {offsets = [8, 384], sizes = [8, 384], strides = [1, 1]} : vector<16x768xf32> to vector<8x384xf32>
    %511 = tpu.concatenate %509, %510 in 0 : vector<8x384xf32>, vector<8x384xf32> -> vector<16x384xf32>
    %512 = vector.extract_strided_slice %508 {offsets = [0, 0], sizes = [16, 128], strides = [1, 1]} : vector<16x384xf32> to vector<16x128xf32>
    %513 = vector.extract_strided_slice %511 {offsets = [0, 0], sizes = [16, 128], strides = [1, 1]} : vector<16x384xf32> to vector<16x128xf32>
    %514 = arith.addf %512, %513 : vector<16x128xf32>
    %515 = arith.negf %514 : vector<16x128xf32>
    %516 = math.exp %515 : vector<16x128xf32>
    %cst_196 = arith.constant 1.000000e+00 : f32
    %517 = vector.broadcast %cst_196 : f32 to vector<16x128xf32>
    %518 = arith.addf %517, %516 : vector<16x128xf32>
    %519 = arith.divf %517, %518 : vector<16x128xf32>
    %520 = vector.extract_strided_slice %508 {offsets = [0, 128], sizes = [16, 128], strides = [1, 1]} : vector<16x384xf32> to vector<16x128xf32>
    %521 = vector.extract_strided_slice %511 {offsets = [0, 128], sizes = [16, 128], strides = [1, 1]} : vector<16x384xf32> to vector<16x128xf32>
    %522 = arith.addf %520, %521 : vector<16x128xf32>
    %523 = arith.negf %522 : vector<16x128xf32>
    %524 = math.exp %523 : vector<16x128xf32>
    %cst_197 = arith.constant 1.000000e+00 : f32
    %525 = vector.broadcast %cst_197 : f32 to vector<16x128xf32>
    %526 = arith.addf %525, %524 : vector<16x128xf32>
    %527 = arith.divf %525, %526 : vector<16x128xf32>
    %528 = vector.extract_strided_slice %508 {offsets = [0, 256], sizes = [16, 128], strides = [1, 1]} : vector<16x384xf32> to vector<16x128xf32>
    %529 = vector.extract_strided_slice %511 {offsets = [0, 256], sizes = [16, 128], strides = [1, 1]} : vector<16x384xf32> to vector<16x128xf32>
    %530 = arith.addf %529, %354 : vector<16x128xf32>
    %531 = arith.mulf %519, %530 : vector<16x128xf32>
    %532 = arith.addf %528, %531 : vector<16x128xf32>
    %533 = math.tanh %532 : vector<16x128xf32>
    %534 = arith.subf %499, %533 : vector<16x128xf32>
    %535 = arith.mulf %527, %534 : vector<16x128xf32>
    %536 = arith.addf %533, %535 : vector<16x128xf32>
    %537 = vector.extract_strided_slice %536 {offsets = [0, 0], sizes = [8, 128], strides = [1, 1]} : vector<16x128xf32> to vector<8x128xf32>
    %c32_198 = arith.constant 32 : index
    %c0_199 = arith.constant 0 : index
    %538 = vector.load %arg10[%c32_198, %c0_199] : memref<64x256xf32, #tpu.memory_space<vmem>>, vector<8x128xf32>
    tpu.vector_store %arg10[%c32_198, %c0_199], %537 {strides = array<i32>} : memref<64x256xf32, #tpu.memory_space<vmem>>, vector<8x128xf32>,
    %539 = vector.extract_strided_slice %536 {offsets = [8, 0], sizes = [8, 128], strides = [1, 1]} : vector<16x128xf32> to vector<8x128xf32>
    %c24_200 = arith.constant 24 : index
    %c128_201 = arith.constant 128 : index
    %540 = vector.load %arg10[%c24_200, %c128_201] : memref<64x256xf32, #tpu.memory_space<vmem>>, vector<8x128xf32>
    tpu.vector_store %arg10[%c24_200, %c128_201], %539 {strides = array<i32>} : memref<64x256xf32, #tpu.memory_space<vmem>>, vector<8x128xf32>,
    %541 = arith.truncf %536 : vector<16x128xf32> to vector<16x128xbf16>
    %cst_202 = arith.constant dense<0.000000e+00> : vector<16x768xf32>
    %542 = tpu.matmul %541, %345, %cst_202 {dimension_numbers = #tpu.dot_dimension_numbers<[1], [0], [0], [1], [0, 0, 1, 1], [], []>} : vector<16x128xbf16>, vector<128x768xbf16>, vector<16x768xf32> -> vector<16x768xf32>
    %c40_203 = arith.constant 40 : index
    %c0_204 = arith.constant 0 : index
    %543 = vector.load %arg11[%c40_203, %c0_204] : memref<64x384xf32, #tpu.memory_space<vmem>>, vector<8x384xf32>
    %c16_205 = arith.constant 16 : index
    %c0_206 = arith.constant 0 : index
    %544 = vector.load %arg12[%c16_205, %c0_206] : memref<64x384xf32, #tpu.memory_space<vmem>>, vector<8x384xf32>
    %545 = tpu.concatenate %543, %544 in 0 : vector<8x384xf32>, vector<8x384xf32> -> vector<16x384xf32>
    %546 = vector.extract_strided_slice %542 {offsets = [0, 0], sizes = [8, 384], strides = [1, 1]} : vector<16x768xf32> to vector<8x384xf32>
    %547 = vector.extract_strided_slice %542 {offsets = [8, 384], sizes = [8, 384], strides = [1, 1]} : vector<16x768xf32> to vector<8x384xf32>
    %548 = tpu.concatenate %546, %547 in 0 : vector<8x384xf32>, vector<8x384xf32> -> vector<16x384xf32>
    %549 = vector.extract_strided_slice %545 {offsets = [0, 0], sizes = [16, 128], strides = [1, 1]} : vector<16x384xf32> to vector<16x128xf32>
    %550 = vector.extract_strided_slice %548 {offsets = [0, 0], sizes = [16, 128], strides = [1, 1]} : vector<16x384xf32> to vector<16x128xf32>
    %551 = arith.addf %549, %550 : vector<16x128xf32>
    %552 = arith.negf %551 : vector<16x128xf32>
    %553 = math.exp %552 : vector<16x128xf32>
    %cst_207 = arith.constant 1.000000e+00 : f32
    %554 = vector.broadcast %cst_207 : f32 to vector<16x128xf32>
    %555 = arith.addf %554, %553 : vector<16x128xf32>
    %556 = arith.divf %554, %555 : vector<16x128xf32>
    %557 = vector.extract_strided_slice %545 {offsets = [0, 128], sizes = [16, 128], strides = [1, 1]} : vector<16x384xf32> to vector<16x128xf32>
    %558 = vector.extract_strided_slice %548 {offsets = [0, 128], sizes = [16, 128], strides = [1, 1]} : vector<16x384xf32> to vector<16x128xf32>
    %559 = arith.addf %557, %558 : vector<16x128xf32>
    %560 = arith.negf %559 : vector<16x128xf32>
    %561 = math.exp %560 : vector<16x128xf32>
    %cst_208 = arith.constant 1.000000e+00 : f32
    %562 = vector.broadcast %cst_208 : f32 to vector<16x128xf32>
    %563 = arith.addf %562, %561 : vector<16x128xf32>
    %564 = arith.divf %562, %563 : vector<16x128xf32>
    %565 = vector.extract_strided_slice %545 {offsets = [0, 256], sizes = [16, 128], strides = [1, 1]} : vector<16x384xf32> to vector<16x128xf32>
    %566 = vector.extract_strided_slice %548 {offsets = [0, 256], sizes = [16, 128], strides = [1, 1]} : vector<16x384xf32> to vector<16x128xf32>
    %567 = arith.addf %566, %354 : vector<16x128xf32>
    %568 = arith.mulf %556, %567 : vector<16x128xf32>
    %569 = arith.addf %565, %568 : vector<16x128xf32>
    %570 = math.tanh %569 : vector<16x128xf32>
    %571 = arith.subf %536, %570 : vector<16x128xf32>
    %572 = arith.mulf %564, %571 : vector<16x128xf32>
    %573 = arith.addf %570, %572 : vector<16x128xf32>
    %574 = vector.extract_strided_slice %573 {offsets = [0, 0], sizes = [8, 128], strides = [1, 1]} : vector<16x128xf32> to vector<8x128xf32>
    %c40_209 = arith.constant 40 : index
    %c0_210 = arith.constant 0 : index
    %575 = vector.load %arg10[%c40_209, %c0_210] : memref<64x256xf32, #tpu.memory_space<vmem>>, vector<8x128xf32>
    tpu.vector_store %arg10[%c40_209, %c0_210], %574 {strides = array<i32>} : memref<64x256xf32, #tpu.memory_space<vmem>>, vector<8x128xf32>,
    %576 = vector.extract_strided_slice %573 {offsets = [8, 0], sizes = [8, 128], strides = [1, 1]} : vector<16x128xf32> to vector<8x128xf32>
    %c16_211 = arith.constant 16 : index
    %c128_212 = arith.constant 128 : index
    %577 = vector.load %arg10[%c16_211, %c128_212] : memref<64x256xf32, #tpu.memory_space<vmem>>, vector<8x128xf32>
    tpu.vector_store %arg10[%c16_211, %c128_212], %576 {strides = array<i32>} : memref<64x256xf32, #tpu.memory_space<vmem>>, vector<8x128xf32>,
    %578 = arith.truncf %573 : vector<16x128xf32> to vector<16x128xbf16>
    %cst_213 = arith.constant dense<0.000000e+00> : vector<16x768xf32>
    %579 = tpu.matmul %578, %345, %cst_213 {dimension_numbers = #tpu.dot_dimension_numbers<[1], [0], [0], [1], [0, 0, 1, 1], [], []>} : vector<16x128xbf16>, vector<128x768xbf16>, vector<16x768xf32> -> vector<16x768xf32>
    %c48_214 = arith.constant 48 : index
    %c0_215 = arith.constant 0 : index
    %580 = vector.load %arg11[%c48_214, %c0_215] : memref<64x384xf32, #tpu.memory_space<vmem>>, vector<8x384xf32>
    %c8_216 = arith.constant 8 : index
    %c0_217 = arith.constant 0 : index
    %581 = vector.load %arg12[%c8_216, %c0_217] : memref<64x384xf32, #tpu.memory_space<vmem>>, vector<8x384xf32>
    %582 = tpu.concatenate %580, %581 in 0 : vector<8x384xf32>, vector<8x384xf32> -> vector<16x384xf32>
    %583 = vector.extract_strided_slice %579 {offsets = [0, 0], sizes = [8, 384], strides = [1, 1]} : vector<16x768xf32> to vector<8x384xf32>
    %584 = vector.extract_strided_slice %579 {offsets = [8, 384], sizes = [8, 384], strides = [1, 1]} : vector<16x768xf32> to vector<8x384xf32>
    %585 = tpu.concatenate %583, %584 in 0 : vector<8x384xf32>, vector<8x384xf32> -> vector<16x384xf32>
    %586 = vector.extract_strided_slice %582 {offsets = [0, 0], sizes = [16, 128], strides = [1, 1]} : vector<16x384xf32> to vector<16x128xf32>
    %587 = vector.extract_strided_slice %585 {offsets = [0, 0], sizes = [16, 128], strides = [1, 1]} : vector<16x384xf32> to vector<16x128xf32>
    %588 = arith.addf %586, %587 : vector<16x128xf32>
    %589 = arith.negf %588 : vector<16x128xf32>
    %590 = math.exp %589 : vector<16x128xf32>
    %cst_218 = arith.constant 1.000000e+00 : f32
    %591 = vector.broadcast %cst_218 : f32 to vector<16x128xf32>
    %592 = arith.addf %591, %590 : vector<16x128xf32>
    %593 = arith.divf %591, %592 : vector<16x128xf32>
    %594 = vector.extract_strided_slice %582 {offsets = [0, 128], sizes = [16, 128], strides = [1, 1]} : vector<16x384xf32> to vector<16x128xf32>
    %595 = vector.extract_strided_slice %585 {offsets = [0, 128], sizes = [16, 128], strides = [1, 1]} : vector<16x384xf32> to vector<16x128xf32>
    %596 = arith.addf %594, %595 : vector<16x128xf32>
    %597 = arith.negf %596 : vector<16x128xf32>
    %598 = math.exp %597 : vector<16x128xf32>
    %cst_219 = arith.constant 1.000000e+00 : f32
    %599 = vector.broadcast %cst_219 : f32 to vector<16x128xf32>
    %600 = arith.addf %599, %598 : vector<16x128xf32>
    %601 = arith.divf %599, %600 : vector<16x128xf32>
    %602 = vector.extract_strided_slice %582 {offsets = [0, 256], sizes = [16, 128], strides = [1, 1]} : vector<16x384xf32> to vector<16x128xf32>
    %603 = vector.extract_strided_slice %585 {offsets = [0, 256], sizes = [16, 128], strides = [1, 1]} : vector<16x384xf32> to vector<16x128xf32>
    %604 = arith.addf %603, %354 : vector<16x128xf32>
    %605 = arith.mulf %593, %604 : vector<16x128xf32>
    %606 = arith.addf %602, %605 : vector<16x128xf32>
    %607 = math.tanh %606 : vector<16x128xf32>
    %608 = arith.subf %573, %607 : vector<16x128xf32>
    %609 = arith.mulf %601, %608 : vector<16x128xf32>
    %610 = arith.addf %607, %609 : vector<16x128xf32>
    %611 = vector.extract_strided_slice %610 {offsets = [0, 0], sizes = [8, 128], strides = [1, 1]} : vector<16x128xf32> to vector<8x128xf32>
    %c48_220 = arith.constant 48 : index
    %c0_221 = arith.constant 0 : index
    %612 = vector.load %arg10[%c48_220, %c0_221] : memref<64x256xf32, #tpu.memory_space<vmem>>, vector<8x128xf32>
    tpu.vector_store %arg10[%c48_220, %c0_221], %611 {strides = array<i32>} : memref<64x256xf32, #tpu.memory_space<vmem>>, vector<8x128xf32>,
    %613 = vector.extract_strided_slice %610 {offsets = [8, 0], sizes = [8, 128], strides = [1, 1]} : vector<16x128xf32> to vector<8x128xf32>
    %c8_222 = arith.constant 8 : index
    %c128_223 = arith.constant 128 : index
    %614 = vector.load %arg10[%c8_222, %c128_223] : memref<64x256xf32, #tpu.memory_space<vmem>>, vector<8x128xf32>
    tpu.vector_store %arg10[%c8_222, %c128_223], %613 {strides = array<i32>} : memref<64x256xf32, #tpu.memory_space<vmem>>, vector<8x128xf32>,
    %615 = arith.truncf %610 : vector<16x128xf32> to vector<16x128xbf16>
    %cst_224 = arith.constant dense<0.000000e+00> : vector<16x768xf32>
    %616 = tpu.matmul %615, %345, %cst_224 {dimension_numbers = #tpu.dot_dimension_numbers<[1], [0], [0], [1], [0, 0, 1, 1], [], []>} : vector<16x128xbf16>, vector<128x768xbf16>, vector<16x768xf32> -> vector<16x768xf32>
    %c56_225 = arith.constant 56 : index
    %c0_226 = arith.constant 0 : index
    %617 = vector.load %arg11[%c56_225, %c0_226] : memref<64x384xf32, #tpu.memory_space<vmem>>, vector<8x384xf32>
    %c0_227 = arith.constant 0 : index
    %c0_228 = arith.constant 0 : index
    %618 = vector.load %arg12[%c0_227, %c0_228] : memref<64x384xf32, #tpu.memory_space<vmem>>, vector<8x384xf32>
    %619 = tpu.concatenate %617, %618 in 0 : vector<8x384xf32>, vector<8x384xf32> -> vector<16x384xf32>
    %620 = vector.extract_strided_slice %616 {offsets = [0, 0], sizes = [8, 384], strides = [1, 1]} : vector<16x768xf32> to vector<8x384xf32>
    %621 = vector.extract_strided_slice %616 {offsets = [8, 384], sizes = [8, 384], strides = [1, 1]} : vector<16x768xf32> to vector<8x384xf32>
    %622 = tpu.concatenate %620, %621 in 0 : vector<8x384xf32>, vector<8x384xf32> -> vector<16x384xf32>
    %623 = vector.extract_strided_slice %619 {offsets = [0, 0], sizes = [16, 128], strides = [1, 1]} : vector<16x384xf32> to vector<16x128xf32>
    %624 = vector.extract_strided_slice %622 {offsets = [0, 0], sizes = [16, 128], strides = [1, 1]} : vector<16x384xf32> to vector<16x128xf32>
    %625 = arith.addf %623, %624 : vector<16x128xf32>
    %626 = arith.negf %625 : vector<16x128xf32>
    %627 = math.exp %626 : vector<16x128xf32>
    %cst_229 = arith.constant 1.000000e+00 : f32
    %628 = vector.broadcast %cst_229 : f32 to vector<16x128xf32>
    %629 = arith.addf %628, %627 : vector<16x128xf32>
    %630 = arith.divf %628, %629 : vector<16x128xf32>
    %631 = vector.extract_strided_slice %619 {offsets = [0, 128], sizes = [16, 128], strides = [1, 1]} : vector<16x384xf32> to vector<16x128xf32>
    %632 = vector.extract_strided_slice %622 {offsets = [0, 128], sizes = [16, 128], strides = [1, 1]} : vector<16x384xf32> to vector<16x128xf32>
    %633 = arith.addf %631, %632 : vector<16x128xf32>
    %634 = arith.negf %633 : vector<16x128xf32>
    %635 = math.exp %634 : vector<16x128xf32>
    %cst_230 = arith.constant 1.000000e+00 : f32
    %636 = vector.broadcast %cst_230 : f32 to vector<16x128xf32>
    %637 = arith.addf %636, %635 : vector<16x128xf32>
    %638 = arith.divf %636, %637 : vector<16x128xf32>
    %639 = vector.extract_strided_slice %619 {offsets = [0, 256], sizes = [16, 128], strides = [1, 1]} : vector<16x384xf32> to vector<16x128xf32>
    %640 = vector.extract_strided_slice %622 {offsets = [0, 256], sizes = [16, 128], strides = [1, 1]} : vector<16x384xf32> to vector<16x128xf32>
    %641 = arith.addf %640, %354 : vector<16x128xf32>
    %642 = arith.mulf %630, %641 : vector<16x128xf32>
    %643 = arith.addf %639, %642 : vector<16x128xf32>
    %644 = math.tanh %643 : vector<16x128xf32>
    %645 = arith.subf %610, %644 : vector<16x128xf32>
    %646 = arith.mulf %638, %645 : vector<16x128xf32>
    %647 = arith.addf %644, %646 : vector<16x128xf32>
    %648 = vector.extract_strided_slice %647 {offsets = [0, 0], sizes = [8, 128], strides = [1, 1]} : vector<16x128xf32> to vector<8x128xf32>
    %c56_231 = arith.constant 56 : index
    %c0_232 = arith.constant 0 : index
    %649 = vector.load %arg10[%c56_231, %c0_232] : memref<64x256xf32, #tpu.memory_space<vmem>>, vector<8x128xf32>
    tpu.vector_store %arg10[%c56_231, %c0_232], %648 {strides = array<i32>} : memref<64x256xf32, #tpu.memory_space<vmem>>, vector<8x128xf32>,
    %650 = vector.extract_strided_slice %647 {offsets = [8, 0], sizes = [8, 128], strides = [1, 1]} : vector<16x128xf32> to vector<8x128xf32>
    %c0_233 = arith.constant 0 : index
    %c128_234 = arith.constant 128 : index
    %651 = vector.load %arg10[%c0_233, %c128_234] : memref<64x256xf32, #tpu.memory_space<vmem>>, vector<8x128xf32>
    tpu.vector_store %arg10[%c0_233, %c128_234], %650 {strides = array<i32>} : memref<64x256xf32, #tpu.memory_space<vmem>>, vector<8x128xf32>,
    %c0_235 = arith.constant 0 : index
    %c0_236 = arith.constant 0 : index
    %652 = vector.load %arg10[%c0_235, %c0_236] : memref<64x256xf32, #tpu.memory_space<vmem>>, vector<64x256xf32>
    %653 = arith.truncf %652 : vector<64x256xf32> to vector<64x256xbf16>
    %c1_237 = arith.constant 1 : index
    %c0_238 = arith.constant 0 : index
    %c0_239 = arith.constant 0 : index
    %c0_240 = arith.constant 0 : index
    %654 = vector.load %arg2[%c1_237, %c0_238, %c0_239, %c0_240] : memref<2x2x256x384xbf16, #tpu.memory_space<vmem>>, vector<1x1x256x384xbf16>
    %655 = vector.shape_cast %654 : vector<1x1x256x384xbf16> to vector<256x384xbf16>
    %c1_241 = arith.constant 1 : index
    %c1_242 = arith.constant 1 : index
    %c0_243 = arith.constant 0 : index
    %c0_244 = arith.constant 0 : index
    %656 = vector.load %arg2[%c1_241, %c1_242, %c0_243, %c0_244] : memref<2x2x256x384xbf16, #tpu.memory_space<vmem>>, vector<1x1x256x384xbf16>
    %657 = vector.shape_cast %656 : vector<1x1x256x384xbf16> to vector<256x384xbf16>
    %cst_245 = arith.constant dense<0.000000e+00> : vector<64x384xf32>
    %658 = tpu.matmul %653, %655, %cst_245 {dimension_numbers = #tpu.dot_dimension_numbers<[1], [0], [0], [1], [0, 0, 1, 1], [], []>} : vector<64x256xbf16>, vector<256x384xbf16>, vector<64x384xf32> -> vector<64x384xf32>
    %c2 = arith.constant 2 : index
    %c0_246 = arith.constant 0 : index
    %c0_247 = arith.constant 0 : index
    %c0_248 = arith.constant 0 : index
    %659 = vector.load %arg4[%c2, %c0_246, %c0_247, %c0_248] : memref<3x2x1x384xf32, #tpu.memory_space<vmem>>, vector<1x1x1x384xf32>
    %660 = vector.shape_cast %659 : vector<1x1x1x384xf32> to vector<1x384xf32>
    %661 = vector.broadcast %660 : vector<1x384xf32> to vector<64x384xf32>
    %662 = arith.addf %658, %661 : vector<64x384xf32>
    %c0_249 = arith.constant 0 : index
    %c0_250 = arith.constant 0 : index
    %663 = vector.load %arg11[%c0_249, %c0_250] : memref<64x384xf32, #tpu.memory_space<vmem>>, vector<64x384xf32>
    tpu.vector_store %arg11[%c0_249, %c0_250], %662 {strides = array<i32>} : memref<64x384xf32, #tpu.memory_space<vmem>>, vector<64x384xf32>,
    %cst_251 = arith.constant dense<0.000000e+00> : vector<64x384xf32>
    %664 = tpu.matmul %653, %657, %cst_251 {dimension_numbers = #tpu.dot_dimension_numbers<[1], [0], [0], [1], [0, 0, 1, 1], [], []>} : vector<64x256xbf16>, vector<256x384xbf16>, vector<64x384xf32> -> vector<64x384xf32>
    %c2_252 = arith.constant 2 : index
    %c1_253 = arith.constant 1 : index
    %c0_254 = arith.constant 0 : index
    %c0_255 = arith.constant 0 : index
    %665 = vector.load %arg4[%c2_252, %c1_253, %c0_254, %c0_255] : memref<3x2x1x384xf32, #tpu.memory_space<vmem>>, vector<1x1x1x384xf32>
    %666 = vector.shape_cast %665 : vector<1x1x1x384xf32> to vector<1x384xf32>
    %667 = vector.broadcast %666 : vector<1x384xf32> to vector<64x384xf32>
    %668 = arith.addf %664, %667 : vector<64x384xf32>
    %c0_256 = arith.constant 0 : index
    %c0_257 = arith.constant 0 : index
    %669 = vector.load %arg12[%c0_256, %c0_257] : memref<64x384xf32, #tpu.memory_space<vmem>>, vector<64x384xf32>
    tpu.vector_store %arg12[%c0_256, %c0_257], %668 {strides = array<i32>} : memref<64x384xf32, #tpu.memory_space<vmem>>, vector<64x384xf32>,
    %c2_258 = arith.constant 2 : index
    %c0_259 = arith.constant 0 : index
    %c0_260 = arith.constant 0 : index
    %670 = vector.load %arg3[%c2_258, %c0_259, %c0_260] : memref<3x128x768xbf16, #tpu.memory_space<vmem>>, vector<1x128x768xbf16>
    %671 = vector.shape_cast %670 : vector<1x128x768xbf16> to vector<128x768xbf16>
    %c2_261 = arith.constant 2 : index
    %c0_262 = arith.constant 0 : index
    %c0_263 = arith.constant 0 : index
    %c0_264 = arith.constant 0 : index
    %672 = vector.load %arg5[%c2_261, %c0_262, %c0_263, %c0_264] : memref<3x2x1x128xf32, #tpu.memory_space<vmem>>, vector<1x1x1x128xf32>
    %673 = vector.shape_cast %672 : vector<1x1x1x128xf32> to vector<1x128xf32>
    %674 = vector.shape_cast %673 : vector<1x128xf32> to vector<1x128xf32>
    %675 = vector.broadcast %674 : vector<1x128xf32> to vector<8x128xf32>
    %c2_265 = arith.constant 2 : index
    %c1_266 = arith.constant 1 : index
    %c0_267 = arith.constant 0 : index
    %c0_268 = arith.constant 0 : index
    %676 = vector.load %arg5[%c2_265, %c1_266, %c0_267, %c0_268] : memref<3x2x1x128xf32, #tpu.memory_space<vmem>>, vector<1x1x1x128xf32>
    %677 = vector.shape_cast %676 : vector<1x1x1x128xf32> to vector<1x128xf32>
    %678 = vector.shape_cast %677 : vector<1x128xf32> to vector<1x128xf32>
    %679 = vector.broadcast %678 : vector<1x128xf32> to vector<8x128xf32>
    %680 = tpu.concatenate %675, %679 in 0 : vector<8x128xf32>, vector<8x128xf32> -> vector<16x128xf32>
    %cst_269 = arith.constant 0.000000e+00 : f32
    %681 = vector.broadcast %cst_269 : f32 to vector<16x128xf32>
    %682 = arith.truncf %681 : vector<16x128xf32> to vector<16x128xbf16>
    %cst_270 = arith.constant dense<0.000000e+00> : vector<16x768xf32>
    %683 = tpu.matmul %682, %671, %cst_270 {dimension_numbers = #tpu.dot_dimension_numbers<[1], [0], [0], [1], [0, 0, 1, 1], [], []>} : vector<16x128xbf16>, vector<128x768xbf16>, vector<16x768xf32> -> vector<16x768xf32>
    %c0_271 = arith.constant 0 : index
    %c0_272 = arith.constant 0 : index
    %684 = vector.load %arg11[%c0_271, %c0_272] : memref<64x384xf32, #tpu.memory_space<vmem>>, vector<8x384xf32>
    %c56_273 = arith.constant 56 : index
    %c0_274 = arith.constant 0 : index
    %685 = vector.load %arg12[%c56_273, %c0_274] : memref<64x384xf32, #tpu.memory_space<vmem>>, vector<8x384xf32>
    %686 = tpu.concatenate %684, %685 in 0 : vector<8x384xf32>, vector<8x384xf32> -> vector<16x384xf32>
    %687 = vector.extract_strided_slice %683 {offsets = [0, 0], sizes = [8, 384], strides = [1, 1]} : vector<16x768xf32> to vector<8x384xf32>
    %688 = vector.extract_strided_slice %683 {offsets = [8, 384], sizes = [8, 384], strides = [1, 1]} : vector<16x768xf32> to vector<8x384xf32>
    %689 = tpu.concatenate %687, %688 in 0 : vector<8x384xf32>, vector<8x384xf32> -> vector<16x384xf32>
    %690 = vector.extract_strided_slice %686 {offsets = [0, 0], sizes = [16, 128], strides = [1, 1]} : vector<16x384xf32> to vector<16x128xf32>
    %691 = vector.extract_strided_slice %689 {offsets = [0, 0], sizes = [16, 128], strides = [1, 1]} : vector<16x384xf32> to vector<16x128xf32>
    %692 = arith.addf %690, %691 : vector<16x128xf32>
    %693 = arith.negf %692 : vector<16x128xf32>
    %694 = math.exp %693 : vector<16x128xf32>
    %cst_275 = arith.constant 1.000000e+00 : f32
    %695 = vector.broadcast %cst_275 : f32 to vector<16x128xf32>
    %696 = arith.addf %695, %694 : vector<16x128xf32>
    %697 = arith.divf %695, %696 : vector<16x128xf32>
    %698 = vector.extract_strided_slice %686 {offsets = [0, 128], sizes = [16, 128], strides = [1, 1]} : vector<16x384xf32> to vector<16x128xf32>
    %699 = vector.extract_strided_slice %689 {offsets = [0, 128], sizes = [16, 128], strides = [1, 1]} : vector<16x384xf32> to vector<16x128xf32>
    %700 = arith.addf %698, %699 : vector<16x128xf32>
    %701 = arith.negf %700 : vector<16x128xf32>
    %702 = math.exp %701 : vector<16x128xf32>
    %cst_276 = arith.constant 1.000000e+00 : f32
    %703 = vector.broadcast %cst_276 : f32 to vector<16x128xf32>
    %704 = arith.addf %703, %702 : vector<16x128xf32>
    %705 = arith.divf %703, %704 : vector<16x128xf32>
    %706 = vector.extract_strided_slice %686 {offsets = [0, 256], sizes = [16, 128], strides = [1, 1]} : vector<16x384xf32> to vector<16x128xf32>
    %707 = vector.extract_strided_slice %689 {offsets = [0, 256], sizes = [16, 128], strides = [1, 1]} : vector<16x384xf32> to vector<16x128xf32>
    %708 = arith.addf %707, %680 : vector<16x128xf32>
    %709 = arith.mulf %697, %708 : vector<16x128xf32>
    %710 = arith.addf %706, %709 : vector<16x128xf32>
    %711 = math.tanh %710 : vector<16x128xf32>
    %712 = arith.subf %681, %711 : vector<16x128xf32>
    %713 = arith.mulf %705, %712 : vector<16x128xf32>
    %714 = arith.addf %711, %713 : vector<16x128xf32>
    %715 = vector.extract_strided_slice %714 {offsets = [0, 0], sizes = [8, 128], strides = [1, 1]} : vector<16x128xf32> to vector<8x128xf32>
    %c0_277 = arith.constant 0 : index
    %c0_278 = arith.constant 0 : index
    %716 = vector.load %arg9[%c0_277, %c0_278] : memref<64x256xf32, #tpu.memory_space<vmem>>, vector<8x128xf32>
    tpu.vector_store %arg9[%c0_277, %c0_278], %715 {strides = array<i32>} : memref<64x256xf32, #tpu.memory_space<vmem>>, vector<8x128xf32>,
    %717 = vector.extract_strided_slice %714 {offsets = [8, 0], sizes = [8, 128], strides = [1, 1]} : vector<16x128xf32> to vector<8x128xf32>
    %c56_279 = arith.constant 56 : index
    %c128_280 = arith.constant 128 : index
    %718 = vector.load %arg9[%c56_279, %c128_280] : memref<64x256xf32, #tpu.memory_space<vmem>>, vector<8x128xf32>
    tpu.vector_store %arg9[%c56_279, %c128_280], %717 {strides = array<i32>} : memref<64x256xf32, #tpu.memory_space<vmem>>, vector<8x128xf32>,
    %719 = arith.truncf %714 : vector<16x128xf32> to vector<16x128xbf16>
    %cst_281 = arith.constant dense<0.000000e+00> : vector<16x768xf32>
    %720 = tpu.matmul %719, %671, %cst_281 {dimension_numbers = #tpu.dot_dimension_numbers<[1], [0], [0], [1], [0, 0, 1, 1], [], []>} : vector<16x128xbf16>, vector<128x768xbf16>, vector<16x768xf32> -> vector<16x768xf32>
    %c8_282 = arith.constant 8 : index
    %c0_283 = arith.constant 0 : index
    %721 = vector.load %arg11[%c8_282, %c0_283] : memref<64x384xf32, #tpu.memory_space<vmem>>, vector<8x384xf32>
    %c48_284 = arith.constant 48 : index
    %c0_285 = arith.constant 0 : index
    %722 = vector.load %arg12[%c48_284, %c0_285] : memref<64x384xf32, #tpu.memory_space<vmem>>, vector<8x384xf32>
    %723 = tpu.concatenate %721, %722 in 0 : vector<8x384xf32>, vector<8x384xf32> -> vector<16x384xf32>
    %724 = vector.extract_strided_slice %720 {offsets = [0, 0], sizes = [8, 384], strides = [1, 1]} : vector<16x768xf32> to vector<8x384xf32>
    %725 = vector.extract_strided_slice %720 {offsets = [8, 384], sizes = [8, 384], strides = [1, 1]} : vector<16x768xf32> to vector<8x384xf32>
    %726 = tpu.concatenate %724, %725 in 0 : vector<8x384xf32>, vector<8x384xf32> -> vector<16x384xf32>
    %727 = vector.extract_strided_slice %723 {offsets = [0, 0], sizes = [16, 128], strides = [1, 1]} : vector<16x384xf32> to vector<16x128xf32>
    %728 = vector.extract_strided_slice %726 {offsets = [0, 0], sizes = [16, 128], strides = [1, 1]} : vector<16x384xf32> to vector<16x128xf32>
    %729 = arith.addf %727, %728 : vector<16x128xf32>
    %730 = arith.negf %729 : vector<16x128xf32>
    %731 = math.exp %730 : vector<16x128xf32>
    %cst_286 = arith.constant 1.000000e+00 : f32
    %732 = vector.broadcast %cst_286 : f32 to vector<16x128xf32>
    %733 = arith.addf %732, %731 : vector<16x128xf32>
    %734 = arith.divf %732, %733 : vector<16x128xf32>
    %735 = vector.extract_strided_slice %723 {offsets = [0, 128], sizes = [16, 128], strides = [1, 1]} : vector<16x384xf32> to vector<16x128xf32>
    %736 = vector.extract_strided_slice %726 {offsets = [0, 128], sizes = [16, 128], strides = [1, 1]} : vector<16x384xf32> to vector<16x128xf32>
    %737 = arith.addf %735, %736 : vector<16x128xf32>
    %738 = arith.negf %737 : vector<16x128xf32>
    %739 = math.exp %738 : vector<16x128xf32>
    %cst_287 = arith.constant 1.000000e+00 : f32
    %740 = vector.broadcast %cst_287 : f32 to vector<16x128xf32>
    %741 = arith.addf %740, %739 : vector<16x128xf32>
    %742 = arith.divf %740, %741 : vector<16x128xf32>
    %743 = vector.extract_strided_slice %723 {offsets = [0, 256], sizes = [16, 128], strides = [1, 1]} : vector<16x384xf32> to vector<16x128xf32>
    %744 = vector.extract_strided_slice %726 {offsets = [0, 256], sizes = [16, 128], strides = [1, 1]} : vector<16x384xf32> to vector<16x128xf32>
    %745 = arith.addf %744, %680 : vector<16x128xf32>
    %746 = arith.mulf %734, %745 : vector<16x128xf32>
    %747 = arith.addf %743, %746 : vector<16x128xf32>
    %748 = math.tanh %747 : vector<16x128xf32>
    %749 = arith.subf %714, %748 : vector<16x128xf32>
    %750 = arith.mulf %742, %749 : vector<16x128xf32>
    %751 = arith.addf %748, %750 : vector<16x128xf32>
    %752 = vector.extract_strided_slice %751 {offsets = [0, 0], sizes = [8, 128], strides = [1, 1]} : vector<16x128xf32> to vector<8x128xf32>
    %c8_288 = arith.constant 8 : index
    %c0_289 = arith.constant 0 : index
    %753 = vector.load %arg9[%c8_288, %c0_289] : memref<64x256xf32, #tpu.memory_space<vmem>>, vector<8x128xf32>
    tpu.vector_store %arg9[%c8_288, %c0_289], %752 {strides = array<i32>} : memref<64x256xf32, #tpu.memory_space<vmem>>, vector<8x128xf32>,
    %754 = vector.extract_strided_slice %751 {offsets = [8, 0], sizes = [8, 128], strides = [1, 1]} : vector<16x128xf32> to vector<8x128xf32>
    %c48_290 = arith.constant 48 : index
    %c128_291 = arith.constant 128 : index
    %755 = vector.load %arg9[%c48_290, %c128_291] : memref<64x256xf32, #tpu.memory_space<vmem>>, vector<8x128xf32>
    tpu.vector_store %arg9[%c48_290, %c128_291], %754 {strides = array<i32>} : memref<64x256xf32, #tpu.memory_space<vmem>>, vector<8x128xf32>,
    %756 = arith.truncf %751 : vector<16x128xf32> to vector<16x128xbf16>
    %cst_292 = arith.constant dense<0.000000e+00> : vector<16x768xf32>
    %757 = tpu.matmul %756, %671, %cst_292 {dimension_numbers = #tpu.dot_dimension_numbers<[1], [0], [0], [1], [0, 0, 1, 1], [], []>} : vector<16x128xbf16>, vector<128x768xbf16>, vector<16x768xf32> -> vector<16x768xf32>
    %c16_293 = arith.constant 16 : index
    %c0_294 = arith.constant 0 : index
    %758 = vector.load %arg11[%c16_293, %c0_294] : memref<64x384xf32, #tpu.memory_space<vmem>>, vector<8x384xf32>
    %c40_295 = arith.constant 40 : index
    %c0_296 = arith.constant 0 : index
    %759 = vector.load %arg12[%c40_295, %c0_296] : memref<64x384xf32, #tpu.memory_space<vmem>>, vector<8x384xf32>
    %760 = tpu.concatenate %758, %759 in 0 : vector<8x384xf32>, vector<8x384xf32> -> vector<16x384xf32>
    %761 = vector.extract_strided_slice %757 {offsets = [0, 0], sizes = [8, 384], strides = [1, 1]} : vector<16x768xf32> to vector<8x384xf32>
    %762 = vector.extract_strided_slice %757 {offsets = [8, 384], sizes = [8, 384], strides = [1, 1]} : vector<16x768xf32> to vector<8x384xf32>
    %763 = tpu.concatenate %761, %762 in 0 : vector<8x384xf32>, vector<8x384xf32> -> vector<16x384xf32>
    %764 = vector.extract_strided_slice %760 {offsets = [0, 0], sizes = [16, 128], strides = [1, 1]} : vector<16x384xf32> to vector<16x128xf32>
    %765 = vector.extract_strided_slice %763 {offsets = [0, 0], sizes = [16, 128], strides = [1, 1]} : vector<16x384xf32> to vector<16x128xf32>
    %766 = arith.addf %764, %765 : vector<16x128xf32>
    %767 = arith.negf %766 : vector<16x128xf32>
    %768 = math.exp %767 : vector<16x128xf32>
    %cst_297 = arith.constant 1.000000e+00 : f32
    %769 = vector.broadcast %cst_297 : f32 to vector<16x128xf32>
    %770 = arith.addf %769, %768 : vector<16x128xf32>
    %771 = arith.divf %769, %770 : vector<16x128xf32>
    %772 = vector.extract_strided_slice %760 {offsets = [0, 128], sizes = [16, 128], strides = [1, 1]} : vector<16x384xf32> to vector<16x128xf32>
    %773 = vector.extract_strided_slice %763 {offsets = [0, 128], sizes = [16, 128], strides = [1, 1]} : vector<16x384xf32> to vector<16x128xf32>
    %774 = arith.addf %772, %773 : vector<16x128xf32>
    %775 = arith.negf %774 : vector<16x128xf32>
    %776 = math.exp %775 : vector<16x128xf32>
    %cst_298 = arith.constant 1.000000e+00 : f32
    %777 = vector.broadcast %cst_298 : f32 to vector<16x128xf32>
    %778 = arith.addf %777, %776 : vector<16x128xf32>
    %779 = arith.divf %777, %778 : vector<16x128xf32>
    %780 = vector.extract_strided_slice %760 {offsets = [0, 256], sizes = [16, 128], strides = [1, 1]} : vector<16x384xf32> to vector<16x128xf32>
    %781 = vector.extract_strided_slice %763 {offsets = [0, 256], sizes = [16, 128], strides = [1, 1]} : vector<16x384xf32> to vector<16x128xf32>
    %782 = arith.addf %781, %680 : vector<16x128xf32>
    %783 = arith.mulf %771, %782 : vector<16x128xf32>
    %784 = arith.addf %780, %783 : vector<16x128xf32>
    %785 = math.tanh %784 : vector<16x128xf32>
    %786 = arith.subf %751, %785 : vector<16x128xf32>
    %787 = arith.mulf %779, %786 : vector<16x128xf32>
    %788 = arith.addf %785, %787 : vector<16x128xf32>
    %789 = vector.extract_strided_slice %788 {offsets = [0, 0], sizes = [8, 128], strides = [1, 1]} : vector<16x128xf32> to vector<8x128xf32>
    %c16_299 = arith.constant 16 : index
    %c0_300 = arith.constant 0 : index
    %790 = vector.load %arg9[%c16_299, %c0_300] : memref<64x256xf32, #tpu.memory_space<vmem>>, vector<8x128xf32>
    tpu.vector_store %arg9[%c16_299, %c0_300], %789 {strides = array<i32>} : memref<64x256xf32, #tpu.memory_space<vmem>>, vector<8x128xf32>,
    %791 = vector.extract_strided_slice %788 {offsets = [8, 0], sizes = [8, 128], strides = [1, 1]} : vector<16x128xf32> to vector<8x128xf32>
    %c40_301 = arith.constant 40 : index
    %c128_302 = arith.constant 128 : index
    %792 = vector.load %arg9[%c40_301, %c128_302] : memref<64x256xf32, #tpu.memory_space<vmem>>, vector<8x128xf32>
    tpu.vector_store %arg9[%c40_301, %c128_302], %791 {strides = array<i32>} : memref<64x256xf32, #tpu.memory_space<vmem>>, vector<8x128xf32>,
    %793 = arith.truncf %788 : vector<16x128xf32> to vector<16x128xbf16>
    %cst_303 = arith.constant dense<0.000000e+00> : vector<16x768xf32>
    %794 = tpu.matmul %793, %671, %cst_303 {dimension_numbers = #tpu.dot_dimension_numbers<[1], [0], [0], [1], [0, 0, 1, 1], [], []>} : vector<16x128xbf16>, vector<128x768xbf16>, vector<16x768xf32> -> vector<16x768xf32>
    %c24_304 = arith.constant 24 : index
    %c0_305 = arith.constant 0 : index
    %795 = vector.load %arg11[%c24_304, %c0_305] : memref<64x384xf32, #tpu.memory_space<vmem>>, vector<8x384xf32>
    %c32_306 = arith.constant 32 : index
    %c0_307 = arith.constant 0 : index
    %796 = vector.load %arg12[%c32_306, %c0_307] : memref<64x384xf32, #tpu.memory_space<vmem>>, vector<8x384xf32>
    %797 = tpu.concatenate %795, %796 in 0 : vector<8x384xf32>, vector<8x384xf32> -> vector<16x384xf32>
    %798 = vector.extract_strided_slice %794 {offsets = [0, 0], sizes = [8, 384], strides = [1, 1]} : vector<16x768xf32> to vector<8x384xf32>
    %799 = vector.extract_strided_slice %794 {offsets = [8, 384], sizes = [8, 384], strides = [1, 1]} : vector<16x768xf32> to vector<8x384xf32>
    %800 = tpu.concatenate %798, %799 in 0 : vector<8x384xf32>, vector<8x384xf32> -> vector<16x384xf32>
    %801 = vector.extract_strided_slice %797 {offsets = [0, 0], sizes = [16, 128], strides = [1, 1]} : vector<16x384xf32> to vector<16x128xf32>
    %802 = vector.extract_strided_slice %800 {offsets = [0, 0], sizes = [16, 128], strides = [1, 1]} : vector<16x384xf32> to vector<16x128xf32>
    %803 = arith.addf %801, %802 : vector<16x128xf32>
    %804 = arith.negf %803 : vector<16x128xf32>
    %805 = math.exp %804 : vector<16x128xf32>
    %cst_308 = arith.constant 1.000000e+00 : f32
    %806 = vector.broadcast %cst_308 : f32 to vector<16x128xf32>
    %807 = arith.addf %806, %805 : vector<16x128xf32>
    %808 = arith.divf %806, %807 : vector<16x128xf32>
    %809 = vector.extract_strided_slice %797 {offsets = [0, 128], sizes = [16, 128], strides = [1, 1]} : vector<16x384xf32> to vector<16x128xf32>
    %810 = vector.extract_strided_slice %800 {offsets = [0, 128], sizes = [16, 128], strides = [1, 1]} : vector<16x384xf32> to vector<16x128xf32>
    %811 = arith.addf %809, %810 : vector<16x128xf32>
    %812 = arith.negf %811 : vector<16x128xf32>
    %813 = math.exp %812 : vector<16x128xf32>
    %cst_309 = arith.constant 1.000000e+00 : f32
    %814 = vector.broadcast %cst_309 : f32 to vector<16x128xf32>
    %815 = arith.addf %814, %813 : vector<16x128xf32>
    %816 = arith.divf %814, %815 : vector<16x128xf32>
    %817 = vector.extract_strided_slice %797 {offsets = [0, 256], sizes = [16, 128], strides = [1, 1]} : vector<16x384xf32> to vector<16x128xf32>
    %818 = vector.extract_strided_slice %800 {offsets = [0, 256], sizes = [16, 128], strides = [1, 1]} : vector<16x384xf32> to vector<16x128xf32>
    %819 = arith.addf %818, %680 : vector<16x128xf32>
    %820 = arith.mulf %808, %819 : vector<16x128xf32>
    %821 = arith.addf %817, %820 : vector<16x128xf32>
    %822 = math.tanh %821 : vector<16x128xf32>
    %823 = arith.subf %788, %822 : vector<16x128xf32>
    %824 = arith.mulf %816, %823 : vector<16x128xf32>
    %825 = arith.addf %822, %824 : vector<16x128xf32>
    %826 = vector.extract_strided_slice %825 {offsets = [0, 0], sizes = [8, 128], strides = [1, 1]} : vector<16x128xf32> to vector<8x128xf32>
    %c24_310 = arith.constant 24 : index
    %c0_311 = arith.constant 0 : index
    %827 = vector.load %arg9[%c24_310, %c0_311] : memref<64x256xf32, #tpu.memory_space<vmem>>, vector<8x128xf32>
    tpu.vector_store %arg9[%c24_310, %c0_311], %826 {strides = array<i32>} : memref<64x256xf32, #tpu.memory_space<vmem>>, vector<8x128xf32>,
    %828 = vector.extract_strided_slice %825 {offsets = [8, 0], sizes = [8, 128], strides = [1, 1]} : vector<16x128xf32> to vector<8x128xf32>
    %c32_312 = arith.constant 32 : index
    %c128_313 = arith.constant 128 : index
    %829 = vector.load %arg9[%c32_312, %c128_313] : memref<64x256xf32, #tpu.memory_space<vmem>>, vector<8x128xf32>
    tpu.vector_store %arg9[%c32_312, %c128_313], %828 {strides = array<i32>} : memref<64x256xf32, #tpu.memory_space<vmem>>, vector<8x128xf32>,
    %830 = arith.truncf %825 : vector<16x128xf32> to vector<16x128xbf16>
    %cst_314 = arith.constant dense<0.000000e+00> : vector<16x768xf32>
    %831 = tpu.matmul %830, %671, %cst_314 {dimension_numbers = #tpu.dot_dimension_numbers<[1], [0], [0], [1], [0, 0, 1, 1], [], []>} : vector<16x128xbf16>, vector<128x768xbf16>, vector<16x768xf32> -> vector<16x768xf32>
    %c32_315 = arith.constant 32 : index
    %c0_316 = arith.constant 0 : index
    %832 = vector.load %arg11[%c32_315, %c0_316] : memref<64x384xf32, #tpu.memory_space<vmem>>, vector<8x384xf32>
    %c24_317 = arith.constant 24 : index
    %c0_318 = arith.constant 0 : index
    %833 = vector.load %arg12[%c24_317, %c0_318] : memref<64x384xf32, #tpu.memory_space<vmem>>, vector<8x384xf32>
    %834 = tpu.concatenate %832, %833 in 0 : vector<8x384xf32>, vector<8x384xf32> -> vector<16x384xf32>
    %835 = vector.extract_strided_slice %831 {offsets = [0, 0], sizes = [8, 384], strides = [1, 1]} : vector<16x768xf32> to vector<8x384xf32>
    %836 = vector.extract_strided_slice %831 {offsets = [8, 384], sizes = [8, 384], strides = [1, 1]} : vector<16x768xf32> to vector<8x384xf32>
    %837 = tpu.concatenate %835, %836 in 0 : vector<8x384xf32>, vector<8x384xf32> -> vector<16x384xf32>
    %838 = vector.extract_strided_slice %834 {offsets = [0, 0], sizes = [16, 128], strides = [1, 1]} : vector<16x384xf32> to vector<16x128xf32>
    %839 = vector.extract_strided_slice %837 {offsets = [0, 0], sizes = [16, 128], strides = [1, 1]} : vector<16x384xf32> to vector<16x128xf32>
    %840 = arith.addf %838, %839 : vector<16x128xf32>
    %841 = arith.negf %840 : vector<16x128xf32>
    %842 = math.exp %841 : vector<16x128xf32>
    %cst_319 = arith.constant 1.000000e+00 : f32
    %843 = vector.broadcast %cst_319 : f32 to vector<16x128xf32>
    %844 = arith.addf %843, %842 : vector<16x128xf32>
    %845 = arith.divf %843, %844 : vector<16x128xf32>
    %846 = vector.extract_strided_slice %834 {offsets = [0, 128], sizes = [16, 128], strides = [1, 1]} : vector<16x384xf32> to vector<16x128xf32>
    %847 = vector.extract_strided_slice %837 {offsets = [0, 128], sizes = [16, 128], strides = [1, 1]} : vector<16x384xf32> to vector<16x128xf32>
    %848 = arith.addf %846, %847 : vector<16x128xf32>
    %849 = arith.negf %848 : vector<16x128xf32>
    %850 = math.exp %849 : vector<16x128xf32>
    %cst_320 = arith.constant 1.000000e+00 : f32
    %851 = vector.broadcast %cst_320 : f32 to vector<16x128xf32>
    %852 = arith.addf %851, %850 : vector<16x128xf32>
    %853 = arith.divf %851, %852 : vector<16x128xf32>
    %854 = vector.extract_strided_slice %834 {offsets = [0, 256], sizes = [16, 128], strides = [1, 1]} : vector<16x384xf32> to vector<16x128xf32>
    %855 = vector.extract_strided_slice %837 {offsets = [0, 256], sizes = [16, 128], strides = [1, 1]} : vector<16x384xf32> to vector<16x128xf32>
    %856 = arith.addf %855, %680 : vector<16x128xf32>
    %857 = arith.mulf %845, %856 : vector<16x128xf32>
    %858 = arith.addf %854, %857 : vector<16x128xf32>
    %859 = math.tanh %858 : vector<16x128xf32>
    %860 = arith.subf %825, %859 : vector<16x128xf32>
    %861 = arith.mulf %853, %860 : vector<16x128xf32>
    %862 = arith.addf %859, %861 : vector<16x128xf32>
    %863 = vector.extract_strided_slice %862 {offsets = [0, 0], sizes = [8, 128], strides = [1, 1]} : vector<16x128xf32> to vector<8x128xf32>
    %c32_321 = arith.constant 32 : index
    %c0_322 = arith.constant 0 : index
    %864 = vector.load %arg9[%c32_321, %c0_322] : memref<64x256xf32, #tpu.memory_space<vmem>>, vector<8x128xf32>
    tpu.vector_store %arg9[%c32_321, %c0_322], %863 {strides = array<i32>} : memref<64x256xf32, #tpu.memory_space<vmem>>, vector<8x128xf32>,
    %865 = vector.extract_strided_slice %862 {offsets = [8, 0], sizes = [8, 128], strides = [1, 1]} : vector<16x128xf32> to vector<8x128xf32>
    %c24_323 = arith.constant 24 : index
    %c128_324 = arith.constant 128 : index
    %866 = vector.load %arg9[%c24_323, %c128_324] : memref<64x256xf32, #tpu.memory_space<vmem>>, vector<8x128xf32>
    tpu.vector_store %arg9[%c24_323, %c128_324], %865 {strides = array<i32>} : memref<64x256xf32, #tpu.memory_space<vmem>>, vector<8x128xf32>,
    %867 = arith.truncf %862 : vector<16x128xf32> to vector<16x128xbf16>
    %cst_325 = arith.constant dense<0.000000e+00> : vector<16x768xf32>
    %868 = tpu.matmul %867, %671, %cst_325 {dimension_numbers = #tpu.dot_dimension_numbers<[1], [0], [0], [1], [0, 0, 1, 1], [], []>} : vector<16x128xbf16>, vector<128x768xbf16>, vector<16x768xf32> -> vector<16x768xf32>
    %c40_326 = arith.constant 40 : index
    %c0_327 = arith.constant 0 : index
    %869 = vector.load %arg11[%c40_326, %c0_327] : memref<64x384xf32, #tpu.memory_space<vmem>>, vector<8x384xf32>
    %c16_328 = arith.constant 16 : index
    %c0_329 = arith.constant 0 : index
    %870 = vector.load %arg12[%c16_328, %c0_329] : memref<64x384xf32, #tpu.memory_space<vmem>>, vector<8x384xf32>
    %871 = tpu.concatenate %869, %870 in 0 : vector<8x384xf32>, vector<8x384xf32> -> vector<16x384xf32>
    %872 = vector.extract_strided_slice %868 {offsets = [0, 0], sizes = [8, 384], strides = [1, 1]} : vector<16x768xf32> to vector<8x384xf32>
    %873 = vector.extract_strided_slice %868 {offsets = [8, 384], sizes = [8, 384], strides = [1, 1]} : vector<16x768xf32> to vector<8x384xf32>
    %874 = tpu.concatenate %872, %873 in 0 : vector<8x384xf32>, vector<8x384xf32> -> vector<16x384xf32>
    %875 = vector.extract_strided_slice %871 {offsets = [0, 0], sizes = [16, 128], strides = [1, 1]} : vector<16x384xf32> to vector<16x128xf32>
    %876 = vector.extract_strided_slice %874 {offsets = [0, 0], sizes = [16, 128], strides = [1, 1]} : vector<16x384xf32> to vector<16x128xf32>
    %877 = arith.addf %875, %876 : vector<16x128xf32>
    %878 = arith.negf %877 : vector<16x128xf32>
    %879 = math.exp %878 : vector<16x128xf32>
    %cst_330 = arith.constant 1.000000e+00 : f32
    %880 = vector.broadcast %cst_330 : f32 to vector<16x128xf32>
    %881 = arith.addf %880, %879 : vector<16x128xf32>
    %882 = arith.divf %880, %881 : vector<16x128xf32>
    %883 = vector.extract_strided_slice %871 {offsets = [0, 128], sizes = [16, 128], strides = [1, 1]} : vector<16x384xf32> to vector<16x128xf32>
    %884 = vector.extract_strided_slice %874 {offsets = [0, 128], sizes = [16, 128], strides = [1, 1]} : vector<16x384xf32> to vector<16x128xf32>
    %885 = arith.addf %883, %884 : vector<16x128xf32>
    %886 = arith.negf %885 : vector<16x128xf32>
    %887 = math.exp %886 : vector<16x128xf32>
    %cst_331 = arith.constant 1.000000e+00 : f32
    %888 = vector.broadcast %cst_331 : f32 to vector<16x128xf32>
    %889 = arith.addf %888, %887 : vector<16x128xf32>
    %890 = arith.divf %888, %889 : vector<16x128xf32>
    %891 = vector.extract_strided_slice %871 {offsets = [0, 256], sizes = [16, 128], strides = [1, 1]} : vector<16x384xf32> to vector<16x128xf32>
    %892 = vector.extract_strided_slice %874 {offsets = [0, 256], sizes = [16, 128], strides = [1, 1]} : vector<16x384xf32> to vector<16x128xf32>
    %893 = arith.addf %892, %680 : vector<16x128xf32>
    %894 = arith.mulf %882, %893 : vector<16x128xf32>
    %895 = arith.addf %891, %894 : vector<16x128xf32>
    %896 = math.tanh %895 : vector<16x128xf32>
    %897 = arith.subf %862, %896 : vector<16x128xf32>
    %898 = arith.mulf %890, %897 : vector<16x128xf32>
    %899 = arith.addf %896, %898 : vector<16x128xf32>
    %900 = vector.extract_strided_slice %899 {offsets = [0, 0], sizes = [8, 128], strides = [1, 1]} : vector<16x128xf32> to vector<8x128xf32>
    %c40_332 = arith.constant 40 : index
    %c0_333 = arith.constant 0 : index
    %901 = vector.load %arg9[%c40_332, %c0_333] : memref<64x256xf32, #tpu.memory_space<vmem>>, vector<8x128xf32>
    tpu.vector_store %arg9[%c40_332, %c0_333], %900 {strides = array<i32>} : memref<64x256xf32, #tpu.memory_space<vmem>>, vector<8x128xf32>,
    %902 = vector.extract_strided_slice %899 {offsets = [8, 0], sizes = [8, 128], strides = [1, 1]} : vector<16x128xf32> to vector<8x128xf32>
    %c16_334 = arith.constant 16 : index
    %c128_335 = arith.constant 128 : index
    %903 = vector.load %arg9[%c16_334, %c128_335] : memref<64x256xf32, #tpu.memory_space<vmem>>, vector<8x128xf32>
    tpu.vector_store %arg9[%c16_334, %c128_335], %902 {strides = array<i32>} : memref<64x256xf32, #tpu.memory_space<vmem>>, vector<8x128xf32>,
    %904 = arith.truncf %899 : vector<16x128xf32> to vector<16x128xbf16>
    %cst_336 = arith.constant dense<0.000000e+00> : vector<16x768xf32>
    %905 = tpu.matmul %904, %671, %cst_336 {dimension_numbers = #tpu.dot_dimension_numbers<[1], [0], [0], [1], [0, 0, 1, 1], [], []>} : vector<16x128xbf16>, vector<128x768xbf16>, vector<16x768xf32> -> vector<16x768xf32>
    %c48_337 = arith.constant 48 : index
    %c0_338 = arith.constant 0 : index
    %906 = vector.load %arg11[%c48_337, %c0_338] : memref<64x384xf32, #tpu.memory_space<vmem>>, vector<8x384xf32>
    %c8_339 = arith.constant 8 : index
    %c0_340 = arith.constant 0 : index
    %907 = vector.load %arg12[%c8_339, %c0_340] : memref<64x384xf32, #tpu.memory_space<vmem>>, vector<8x384xf32>
    %908 = tpu.concatenate %906, %907 in 0 : vector<8x384xf32>, vector<8x384xf32> -> vector<16x384xf32>
    %909 = vector.extract_strided_slice %905 {offsets = [0, 0], sizes = [8, 384], strides = [1, 1]} : vector<16x768xf32> to vector<8x384xf32>
    %910 = vector.extract_strided_slice %905 {offsets = [8, 384], sizes = [8, 384], strides = [1, 1]} : vector<16x768xf32> to vector<8x384xf32>
    %911 = tpu.concatenate %909, %910 in 0 : vector<8x384xf32>, vector<8x384xf32> -> vector<16x384xf32>
    %912 = vector.extract_strided_slice %908 {offsets = [0, 0], sizes = [16, 128], strides = [1, 1]} : vector<16x384xf32> to vector<16x128xf32>
    %913 = vector.extract_strided_slice %911 {offsets = [0, 0], sizes = [16, 128], strides = [1, 1]} : vector<16x384xf32> to vector<16x128xf32>
    %914 = arith.addf %912, %913 : vector<16x128xf32>
    %915 = arith.negf %914 : vector<16x128xf32>
    %916 = math.exp %915 : vector<16x128xf32>
    %cst_341 = arith.constant 1.000000e+00 : f32
    %917 = vector.broadcast %cst_341 : f32 to vector<16x128xf32>
    %918 = arith.addf %917, %916 : vector<16x128xf32>
    %919 = arith.divf %917, %918 : vector<16x128xf32>
    %920 = vector.extract_strided_slice %908 {offsets = [0, 128], sizes = [16, 128], strides = [1, 1]} : vector<16x384xf32> to vector<16x128xf32>
    %921 = vector.extract_strided_slice %911 {offsets = [0, 128], sizes = [16, 128], strides = [1, 1]} : vector<16x384xf32> to vector<16x128xf32>
    %922 = arith.addf %920, %921 : vector<16x128xf32>
    %923 = arith.negf %922 : vector<16x128xf32>
    %924 = math.exp %923 : vector<16x128xf32>
    %cst_342 = arith.constant 1.000000e+00 : f32
    %925 = vector.broadcast %cst_342 : f32 to vector<16x128xf32>
    %926 = arith.addf %925, %924 : vector<16x128xf32>
    %927 = arith.divf %925, %926 : vector<16x128xf32>
    %928 = vector.extract_strided_slice %908 {offsets = [0, 256], sizes = [16, 128], strides = [1, 1]} : vector<16x384xf32> to vector<16x128xf32>
    %929 = vector.extract_strided_slice %911 {offsets = [0, 256], sizes = [16, 128], strides = [1, 1]} : vector<16x384xf32> to vector<16x128xf32>
    %930 = arith.addf %929, %680 : vector<16x128xf32>
    %931 = arith.mulf %919, %930 : vector<16x128xf32>
    %932 = arith.addf %928, %931 : vector<16x128xf32>
    %933 = math.tanh %932 : vector<16x128xf32>
    %934 = arith.subf %899, %933 : vector<16x128xf32>
    %935 = arith.mulf %927, %934 : vector<16x128xf32>
    %936 = arith.addf %933, %935 : vector<16x128xf32>
    %937 = vector.extract_strided_slice %936 {offsets = [0, 0], sizes = [8, 128], strides = [1, 1]} : vector<16x128xf32> to vector<8x128xf32>
    %c48_343 = arith.constant 48 : index
    %c0_344 = arith.constant 0 : index
    %938 = vector.load %arg9[%c48_343, %c0_344] : memref<64x256xf32, #tpu.memory_space<vmem>>, vector<8x128xf32>
    tpu.vector_store %arg9[%c48_343, %c0_344], %937 {strides = array<i32>} : memref<64x256xf32, #tpu.memory_space<vmem>>, vector<8x128xf32>,
    %939 = vector.extract_strided_slice %936 {offsets = [8, 0], sizes = [8, 128], strides = [1, 1]} : vector<16x128xf32> to vector<8x128xf32>
    %c8_345 = arith.constant 8 : index
    %c128_346 = arith.constant 128 : index
    %940 = vector.load %arg9[%c8_345, %c128_346] : memref<64x256xf32, #tpu.memory_space<vmem>>, vector<8x128xf32>
    tpu.vector_store %arg9[%c8_345, %c128_346], %939 {strides = array<i32>} : memref<64x256xf32, #tpu.memory_space<vmem>>, vector<8x128xf32>,
    %941 = arith.truncf %936 : vector<16x128xf32> to vector<16x128xbf16>
    %cst_347 = arith.constant dense<0.000000e+00> : vector<16x768xf32>
    %942 = tpu.matmul %941, %671, %cst_347 {dimension_numbers = #tpu.dot_dimension_numbers<[1], [0], [0], [1], [0, 0, 1, 1], [], []>} : vector<16x128xbf16>, vector<128x768xbf16>, vector<16x768xf32> -> vector<16x768xf32>
    %c56_348 = arith.constant 56 : index
    %c0_349 = arith.constant 0 : index
    %943 = vector.load %arg11[%c56_348, %c0_349] : memref<64x384xf32, #tpu.memory_space<vmem>>, vector<8x384xf32>
    %c0_350 = arith.constant 0 : index
    %c0_351 = arith.constant 0 : index
    %944 = vector.load %arg12[%c0_350, %c0_351] : memref<64x384xf32, #tpu.memory_space<vmem>>, vector<8x384xf32>
    %945 = tpu.concatenate %943, %944 in 0 : vector<8x384xf32>, vector<8x384xf32> -> vector<16x384xf32>
    %946 = vector.extract_strided_slice %942 {offsets = [0, 0], sizes = [8, 384], strides = [1, 1]} : vector<16x768xf32> to vector<8x384xf32>
    %947 = vector.extract_strided_slice %942 {offsets = [8, 384], sizes = [8, 384], strides = [1, 1]} : vector<16x768xf32> to vector<8x384xf32>
    %948 = tpu.concatenate %946, %947 in 0 : vector<8x384xf32>, vector<8x384xf32> -> vector<16x384xf32>
    %949 = vector.extract_strided_slice %945 {offsets = [0, 0], sizes = [16, 128], strides = [1, 1]} : vector<16x384xf32> to vector<16x128xf32>
    %950 = vector.extract_strided_slice %948 {offsets = [0, 0], sizes = [16, 128], strides = [1, 1]} : vector<16x384xf32> to vector<16x128xf32>
    %951 = arith.addf %949, %950 : vector<16x128xf32>
    %952 = arith.negf %951 : vector<16x128xf32>
    %953 = math.exp %952 : vector<16x128xf32>
    %cst_352 = arith.constant 1.000000e+00 : f32
    %954 = vector.broadcast %cst_352 : f32 to vector<16x128xf32>
    %955 = arith.addf %954, %953 : vector<16x128xf32>
    %956 = arith.divf %954, %955 : vector<16x128xf32>
    %957 = vector.extract_strided_slice %945 {offsets = [0, 128], sizes = [16, 128], strides = [1, 1]} : vector<16x384xf32> to vector<16x128xf32>
    %958 = vector.extract_strided_slice %948 {offsets = [0, 128], sizes = [16, 128], strides = [1, 1]} : vector<16x384xf32> to vector<16x128xf32>
    %959 = arith.addf %957, %958 : vector<16x128xf32>
    %960 = arith.negf %959 : vector<16x128xf32>
    %961 = math.exp %960 : vector<16x128xf32>
    %cst_353 = arith.constant 1.000000e+00 : f32
    %962 = vector.broadcast %cst_353 : f32 to vector<16x128xf32>
    %963 = arith.addf %962, %961 : vector<16x128xf32>
    %964 = arith.divf %962, %963 : vector<16x128xf32>
    %965 = vector.extract_strided_slice %945 {offsets = [0, 256], sizes = [16, 128], strides = [1, 1]} : vector<16x384xf32> to vector<16x128xf32>
    %966 = vector.extract_strided_slice %948 {offsets = [0, 256], sizes = [16, 128], strides = [1, 1]} : vector<16x384xf32> to vector<16x128xf32>
    %967 = arith.addf %966, %680 : vector<16x128xf32>
    %968 = arith.mulf %956, %967 : vector<16x128xf32>
    %969 = arith.addf %965, %968 : vector<16x128xf32>
    %970 = math.tanh %969 : vector<16x128xf32>
    %971 = arith.subf %936, %970 : vector<16x128xf32>
    %972 = arith.mulf %964, %971 : vector<16x128xf32>
    %973 = arith.addf %970, %972 : vector<16x128xf32>
    %974 = vector.extract_strided_slice %973 {offsets = [0, 0], sizes = [8, 128], strides = [1, 1]} : vector<16x128xf32> to vector<8x128xf32>
    %c56_354 = arith.constant 56 : index
    %c0_355 = arith.constant 0 : index
    %975 = vector.load %arg9[%c56_354, %c0_355] : memref<64x256xf32, #tpu.memory_space<vmem>>, vector<8x128xf32>
    tpu.vector_store %arg9[%c56_354, %c0_355], %974 {strides = array<i32>} : memref<64x256xf32, #tpu.memory_space<vmem>>, vector<8x128xf32>,
    %976 = vector.extract_strided_slice %973 {offsets = [8, 0], sizes = [8, 128], strides = [1, 1]} : vector<16x128xf32> to vector<8x128xf32>
    %c0_356 = arith.constant 0 : index
    %c128_357 = arith.constant 128 : index
    %977 = vector.load %arg9[%c0_356, %c128_357] : memref<64x256xf32, #tpu.memory_space<vmem>>, vector<8x128xf32>
    tpu.vector_store %arg9[%c0_356, %c128_357], %976 {strides = array<i32>} : memref<64x256xf32, #tpu.memory_space<vmem>>, vector<8x128xf32>,
    %c56_358 = arith.constant 56 : index
    %c0_359 = arith.constant 0 : index
    %978 = vector.load %arg9[%c56_358, %c0_359] : memref<64x256xf32, #tpu.memory_space<vmem>>, vector<8x256xf32>
    %c0_360 = arith.constant 0 : index
    %c0_361 = arith.constant 0 : index
    %979 = vector.load %arg0[%c0_360, %c0_361] : memref<64x10xf32, #tpu.memory_space<vmem>>, vector<8x10xf32>
    %980 = arith.truncf %978 : vector<8x256xf32> to vector<8x256xbf16>
    %c0_362 = arith.constant 0 : index
    %c0_363 = arith.constant 0 : index
    %981 = vector.load %arg6[%c0_362, %c0_363] : memref<256x10xbf16, #tpu.memory_space<vmem>>, vector<256x10xbf16>
    %cst_364 = arith.constant dense<0.000000e+00> : vector<8x10xf32>
    %982 = tpu.matmul %980, %981, %cst_364 {dimension_numbers = #tpu.dot_dimension_numbers<[1], [0], [0], [1], [0, 0, 1, 1], [], []>} : vector<8x256xbf16>, vector<256x10xbf16>, vector<8x10xf32> -> vector<8x10xf32>
    %983 = arith.addf %979, %982 : vector<8x10xf32>
    %c0_365 = arith.constant 0 : index
    %c0_366 = arith.constant 0 : index
    %984 = vector.load %arg7[%c0_365, %c0_366] : memref<1x10xf32, #tpu.memory_space<vmem>>, vector<1x10xf32>
    %985 = vector.broadcast %984 : vector<1x10xf32> to vector<8x10xf32>
    %986 = arith.addf %983, %985 : vector<8x10xf32>
    %c0_367 = arith.constant 0 : index
    %c0_368 = arith.constant 0 : index
    %987 = vector.load %arg8[%c0_367, %c0_368] : memref<8x10xf32, #tpu.memory_space<vmem>>, vector<8x10xf32>
    tpu.vector_store %arg8[%c0_367, %c0_368], %986 {strides = array<i32>} : memref<8x10xf32, #tpu.memory_space<vmem>>, vector<8x10xf32>,
    return
  }
}

</mosaic_0001>

<bundles_post_ra>
// kernel: stacked_gru_forward.1
= control target key start
LH: loop header
LB: loop body
LE: loop exit
PB: predicated region body
PF: predicated region fallthrough
CT: control target
= control target key end

     0   :  { %13 = vsyncpa [#allocation7], 0  ;;  %s12692_s0 = inlined_call_operand.vmem [shape: f32[64,10], index: 0, kind: input, shape index: {}]   ;;  %s12693_s1 = inlined_call_operand.vmem [shape: bf16[2,10,384], index: 1, kind: input, shape index: {}]   ;;  %s12694_s2 = inlined_call_operand.hbm [shape: bf16[2,2,256,384], index: 2, kind: input, shape index: {}]   ;;  %s12695_s3 = inlined_call_operand.hbm [shape: bf16[3,128,768], index: 3, kind: input, shape index: {}]   ;;  %s12696_s4 = inlined_call_operand.vmem [shape: f32[3,2,1,384], index: 4, kind: input, shape index: {}]   ;;  %s12697_s5 = inlined_call_operand.vmem [shape: f32[3,2,1,128], index: 5, kind: input, shape index: {}]   ;;  %s12698_s6 = inlined_call_operand.vmem [shape: bf16[256,10], index: 6, kind: input, shape index: {}]   ;;  %s12699_s7 = inlined_call_operand.vmem [shape: f32[1,10], index: 7, kind: input, shape index: {}]   ;;  %s12700_s8 = inlined_call_operand.vmem [shape: f32[8,10], index: 8, kind: output, shape index: {}]  }
   0x1   :  { %14 = vsyncpa [#allocation9], 0  ;;  %s9746_s27 = smov [#allocation6]  }
   0x2   :  { %s24_s28 = sshll.u32 %s9746_s27, 4  ;;  %s25_s28 = int_to_ptr.vmem [resolvable:$true] %s24_s28 }
   0x3   :  { %s9710_s29 = scalar_lea.vmem %s25_s28, 24576  ;;  %p9715_p1 = scmp.lt.s32.totalorder %s25_s28, %s25_s28 }
   0x4   :  { %p9711_p0 = scmp.ne.s32.totalorder %s25_s28, %s9710_s29  ;;  %p9716_p2 = scmp.lt.s32.totalorder %s9710_s29, %s9710_s29 }
   0x6   :  { %p9717_p3 = por %p9716_p2, %p9715_p1 }
   0x8   :  { %p9718_p4 = pnand %p9717_p3, %p9711_p0 }
   0xa   :  { %9721 = shalt.err (!%p9718_p4)
}
   0xb   :  { %s9747_s30 = smov 192   ;;  %s9748_s9 = smov 12  }
   0xc   :  { %30 = dma.hbm_to_vmem [thread:$0]  %s12694_s2, 24576, %s25_s28, [#allocation7], %s9747_s30, %s9747_s30, %s9748_s9  }
   0xd   :  { %s9749_s12 = smov [#allocation8]  }
   0xe   :  { %s36_s13 = sshll.u32 %s9749_s12, 4  ;;  %s37_s13 = int_to_ptr.vmem [resolvable:$true] %s36_s13 }
   0xf   :  { %s9730_s14 = scalar_lea.vmem %s37_s13, 18432  ;;  %p9735_p6 = scmp.lt.s32.totalorder %s37_s13, %s37_s13 }
  0x10   :  { %p9731_p5 = scmp.ne.s32.totalorder %s37_s13, %s9730_s14  ;;  %p9736_p7 = scmp.lt.s32.totalorder %s9730_s14, %s9730_s14 }
  0x12   :  { %p9737_p8 = por %p9736_p7, %p9735_p6 }
  0x14   :  { %p9738_p9 = pnand %p9737_p8, %p9731_p5 }
  0x16   :  { %9741 = shalt.err (!%p9738_p9)
}
  0x17   :  { %s9750_s15 = smov 384   ;;  %s9751_s16 = smov 24  }
  0x18   :  { %42 = dma.hbm_to_vmem [thread:$0]  %s12695_s3, 18432, %s37_s13, [#allocation9], %s9750_s15, %s9750_s15, %s9751_s16  }
  0x19   :  { %9742 = dma.done.wait [#allocation7], 24576  }
  0x1a   :  { %9743 = vsyncadd [#allocation7], 4294942720 }
  0x1b   :  { %9744 = dma.done.wait [#allocation9], 18432  }
  0x1c   :  { %9745 = vsyncadd [#allocation9], 4294948864  ;;  %v12701_v0 = vmov 0   ;;  %vm122_vm0 = vcmask 1044480   ;;  %v62_v2 = vld [vmem:[%s12692_s0 + $0x20] sm:$0xff]  ;;  %v63_v5 = vld [vmem:[%s12692_s0 + $0x28] sm:$0xff] }
  0x1d   :  { %164 = vmatprep.mubr.bf16.mxu0 %v12701_v0  ;;  %v8539_v1 = vld [vmem:[%s12693_s1 + $0x4] ss:$12 sps:$4 sm:$0x1f]   ;;  %v8541_v3 = vld [vmem:[%s12693_s1 + $0x8] ss:$12 sps:$4 sm:$0x1f]   ;;  %v9830_v10 = vpack.c.bf16 %v63_v5, %v62_v2 }
  0x1e   :  { %7829 = vmatprep.subr.msk.bf16.mxu0 %vm122_vm0, %v8539_v1  ;;  %v8542_v4 = vld [vmem:[%s12693_s1] ss:$12 sps:$4 sm:$0x1f]   ;;  %vm109_vm1 = vcmask 80896   ;;  %8530 = vmatprep.subr.msk.bf16.mxu1 %vm122_vm0, %v8541_v3  ;;  %v130_v9 = vsel %vm122_vm0, %v8541_v3, 0  ;;  %v64_v12 = vld [vmem:[%s12692_s0 + $0x30] sm:$0xff] }
  0x1f   :  { %v58_v6 = vld [vmem:[%s12692_s0] sm:$0xff]  ;;  %v59_v7 = vld [vmem:[%s12692_s0 + $0x8] sm:$0xff]  ;;  %v124_v8 = vsel %vm122_vm0, %v8542_v4, 0  ;;  %v65_v13 = vld [vmem:[%s12692_s0 + $0x38] sm:$0xff]  ;;  %8528 = vmatpush3.bf16.msra.mxu1 %v130_v9  ;;  %8513 = vmatprep.mubr.msk.bf16.mxu1 %vm109_vm1, %v9830_v10 }
  0x20   :  { %v9832_v11 = vpack.c.bf16 %v59_v7, %v58_v6  ;;  %147 = vmatpush1.bf16.msra.mxu0 %v124_v8  ;;  %v9840_v14 = vpack.c.bf16 %v65_v13, %v64_v12  ;;  %v8543_v15 = vld [vmem:[%s12693_s1 + $0x1c] ss:$12 sps:$4 sm:$0x1f]   ;;  %v8545_v16 = vld [vmem:[%s12693_s1 + $0x18] ss:$12 sps:$4 sm:$0x1f]   ;;  %v81_v8 = vlaneseq }
  0x21   :  { %8529 = vmatprep.subr.msk.bf16.mxu0 %vm122_vm0, %v8541_v3  ;;  %7842 = vmatprep.subr.msk.bf16.mxu1 %vm122_vm0, %v8543_v15  ;;  %v9852_v17 = vld [vmem:[#allocation8 + $0x154] ss:$24 sps:$4 sm:$0xff]   ;;  %v326_v18 = vsel %vm122_vm0, %v8545_v16, 0  ;;  %v61_v20 = vld [vmem:[%s12692_s0 + $0x18] sm:$0xff]  ;;  %v9868_v22 = vld [vmem:[#allocation8 + $0x150] ss:$24 sps:$4 sm:$0xff]  }
  0x22   :  { %8514 = vmatmul.mubr.msk.bf16.vlgmr.msra.gmra.mxu1 %vm109_vm1, %v9840_v14  ;;  %v60_v19 = vld [vmem:[%s12692_s0 + $0x10] sm:$0xff]  ;;  %v9870_v23 = vld [vmem:[#allocation8 + $0x124] ss:$24 sps:$4 sm:$0xff]   ;;  %v8566_v24 = vld [vmem:[%s12693_s1 + $0x20] ss:$12 sps:$4 sm:$0x1f]  }
  0x23   :  { %7830 = vmatmul.mubr.msk.bf16.vlgmr.msra.gmra.mxu0 %vm109_vm1, %v9832_v11  ;;  %349 = vmatpush1.bf16.msra.mxu1 %v326_v18  ;;  %v67_v21 = vpack.c.bf16 %v61_v20, %v60_v19  ;;  %v9879_v25 = vld [vmem:[#allocation8 + $0x120] ss:$24 sps:$4 sm:$0xff]   ;;  %v9884_v26 = vld [vmem:[#allocation8 + $0xf4] ss:$24 sps:$4 sm:$0xff]   ;;  %v9888_v27 = vld [vmem:[#allocation8 + $0xf0] ss:$24 sps:$4 sm:$0xff]  }
  0x24   :  { %8508 = vmatpush3.bf16.msra.mxu0 %v130_v9  ;;  %174 = vmatprep.mubr.bf16.mxu0 %v12701_v0  ;;  %v9891_v28 = vld [vmem:[#allocation8 + $0xc4] ss:$24 sps:$4 sm:$0xff]   ;;  %v9897_v29 = vld [vmem:[#allocation8 + $0xc0] ss:$24 sps:$4 sm:$0xff]   ;;  %v9902_v30 = vld [vmem:[#allocation8 + $0x94] ss:$24 sps:$4 sm:$0xff]  }
  0x25   :  { %366 = vmatprep.mubr.bf16.mxu1 %v12701_v0  ;;  %799 = vmatprep.subr.bf16.mxu1 %v9852_v17  ;;  %v9905_v31 = vld [vmem:[#allocation8 + $0x90] ss:$24 sps:$4 sm:$0xff]   ;;  %v9908_v32 = vld [vmem:[#allocation8 + $0x64] ss:$24 sps:$4 sm:$0xff]   ;;  %v9915_v33 = vld [vmem:[#allocation8 + $0x60] ss:$24 sps:$4 sm:$0xff]  }
  0x26   :  { %8531 = vmatprep.subr.msk.bf16.mxu0 %vm122_vm0, %v8566_v24  ;;  %v9921_v34 = vld [vmem:[#allocation8 + $0x34] ss:$24 sps:$4 sm:$0xff]   ;;  %v9924_v35 = vld [vmem:[#allocation8 + $0x30] ss:$24 sps:$4 sm:$0xff]   ;;  %v332_v36 = vsel %vm122_vm0, %v8566_v24, 0  ;;  %v82_v9 = vshrl.u32 %v81_v8, 7 }
  0x27   :  { %v9928_v37 = vld [vmem:[#allocation8 + $0x4] ss:$24 sps:$4 sm:$0xff]   ;;  %v9930_v38 = vld [vmem:[#allocation8] ss:$24 sps:$4 sm:$0xff]   ;;  %v8579_v44 = vld [vmem:[#allocation8 + $0x134] ss:$24 sps:$4 sm:$0xff]  }
  0x28   :  { %v9932_v39 = vld [vmem:[#allocation8 + $0x15c] ss:$24 sps:$4 sm:$0xff]   ;;  %v9945_v41 = vld [vmem:[#allocation8 + $0x158] ss:$24 sps:$4 sm:$0xff]   ;;  %v9947_v43 = vld [vmem:[#allocation8 + $0x12c] ss:$24 sps:$4 sm:$0xff]  }
  0x29   :  { %v9937_v40 = vld [vmem:[#allocation8 + $0x164] ss:$24 sps:$4 sm:$0xff]   ;;  %v8576_v42 = vld [vmem:[#allocation8 + $0x160] ss:$24 sps:$4 sm:$0xff]   ;;  %v8582_v46 = vld [vmem:[#allocation8 + $0x130] ss:$24 sps:$4 sm:$0xff]  }
  0x2a   :  { %7843 = vmatmul.mubr.msk.bf16.vlgmr.msra.gmra.mxu1 %vm109_vm1, %v9832_v11  ;;  %v9951_v45 = vld [vmem:[#allocation8 + $0x128] ss:$24 sps:$4 sm:$0xff]   ;;  %v9955_v47 = vld [vmem:[#allocation8 + $0xfc] ss:$24 sps:$4 sm:$0xff]   ;;  %v9959_v49 = vld [vmem:[#allocation8 + $0xf8] ss:$24 sps:$4 sm:$0xff]  }
  0x2b   :  { %7831 = vmatmul.mubr.msk.bf16.gmra.mxu0 %vm109_vm1, %v67_v21  ;;  %800 = vmatpush1.bf16.msra.mxu1 %v9868_v22  ;;  %v8585_v48 = vld [vmem:[#allocation8 + $0x104] ss:$24 sps:$4 sm:$0xff]   ;;  %v8588_v50 = vld [vmem:[#allocation8 + $0x100] ss:$24 sps:$4 sm:$0xff]   ;;  %v8591_v52 = vld [vmem:[#allocation8 + $0xd4] ss:$24 sps:$4 sm:$0xff]  }
  0x2c   :  { %184 = vmatprep.mubr.bf16.mxu0 %v12701_v0  ;;  %801 = vmatprep.subr.bf16.mxu1 %v9870_v23  ;;  %v9964_v51 = vld [vmem:[#allocation8 + $0xcc] ss:$24 sps:$4 sm:$0xff]   ;;  %v8593_v53 = vld [vmem:[#allocation8 + $0xc8] ss:$24 sps:$4 sm:$0xff]   ;;  %v8595_v55 = vld [vmem:[#allocation8 + $0x9c] ss:$24 sps:$4 sm:$0xff]  }
  0x2d   :  { %376 = vmatprep.mubr.bf16.mxu1 %v12701_v0  ;;  %v8594_v54 = vld [vmem:[#allocation8 + $0xd0] ss:$24 sps:$4 sm:$0xff]   ;;  %v8597_v56 = vld [vmem:[#allocation8 + $0xa4] ss:$24 sps:$4 sm:$0xff]   ;;  %v8600_v58 = vld [vmem:[#allocation8 + $0xa0] ss:$24 sps:$4 sm:$0xff]  }
  0x2e   :  { %v8599_v57 = vld [vmem:[#allocation8 + $0x98] ss:$24 sps:$4 sm:$0xff]   ;;  %v8601_v59 = vld [vmem:[#allocation8 + $0x6c] ss:$24 sps:$4 sm:$0xff]   ;;  %v8605_v61 = vld [vmem:[#allocation8 + $0x68] ss:$24 sps:$4 sm:$0xff]  }
  0x2f   :  { %802 = vmatpush1.bf16.msra.mxu1 %v9879_v25  ;;  %v8603_v60 = vld [vmem:[#allocation8 + $0x74] ss:$24 sps:$4 sm:$0xff]   ;;  %v8606_v62 = vld [vmem:[#allocation8 + $0x70] ss:$24 sps:$4 sm:$0xff]   ;;  %v8609_v1 = vld [vmem:[#allocation8 + $0x44] ss:$24 sps:$4 sm:$0xff]  }
  0x30   :  { %803 = vmatprep.subr.bf16.mxu1 %v9884_v26  ;;  %v8607_v63 = vld [vmem:[#allocation8 + $0x3c] ss:$24 sps:$4 sm:$0xff]   ;;  %v8611_v2 = vld [vmem:[#allocation8 + $0x38] ss:$24 sps:$4 sm:$0xff]   ;;  %v8613_v4 = vld [vmem:[#allocation8 + $0xc] ss:$24 sps:$4 sm:$0xff]  }
  0x31   :  { %v8612_v3 = vld [vmem:[#allocation8 + $0x40] ss:$24 sps:$4 sm:$0xff]   ;;  %v8615_v5 = vld [vmem:[#allocation8 + $0x14] ss:$24 sps:$4 sm:$0xff]   ;;  %v8618_v7 = vld [vmem:[#allocation8 + $0x10] ss:$24 sps:$4 sm:$0xff]  }
  0x32   :  { %7844 = vmatmul.mubr.msk.bf16.gmra.mxu1 %vm109_vm1, %v67_v21  ;;  %v8617_v6 = vld [vmem:[#allocation8 + $0x8] ss:$24 sps:$4 sm:$0xff]   ;;  %v10010_v13 = vsub.s32 0, %v82_v9  ;;  %v10030_v24 = vsub.s32 1, %v82_v9 }
  0x33   :  { %7832 = vmatmul.mubr.msk.bf16.gmra.mxu0 %vm109_vm1, %v9830_v10  ;;  %804 = vmatpush1.bf16.msra.mxu1 %v9888_v27  ;;  %v10022_v19 = vld [vmem:[%s12696_s4 + $0x3] sm:$0x7] }
  0x34   :  { %194 = vmatprep.mubr.bf16.mxu0 %v12701_v0  ;;  %805 = vmatprep.subr.bf16.mxu1 %v9891_v28  ;;  %12858 = vst [vmem:[#allocation14_spill] sm:$0xff] %v10010_v13  ;;  %12861 = vst [vmem:[#allocation17_spill] sm:$0xff] %v10030_v24 }
  0x35   :  { %386 = vmatprep.mubr.bf16.mxu1 %v12701_v0 }
  0x37   :  { %806 = vmatpush1.bf16.msra.mxu1 %v9897_v29 }
  0x38   :  { %807 = vmatprep.subr.bf16.mxu1 %v9902_v30 }
  0x3a   :  { %7845 = vmatmul.mubr.msk.bf16.gmra.mxu1 %vm109_vm1, %v9830_v10 }
  0x3b   :  { %7833 = vmatmul.mubr.msk.bf16.gmra.mxu0 %vm109_vm1, %v9840_v14  ;;  %808 = vmatpush1.bf16.msra.mxu1 %v9905_v31 }
  0x3c   :  { %8509 = vmatprep.mubr.msk.bf16.mxu0 %vm109_vm1, %v9832_v11  ;;  %809 = vmatprep.subr.bf16.mxu1 %v9908_v32 }
  0x3d   :  { %396 = vmatprep.mubr.bf16.mxu1 %v12701_v0 }
  0x3f   :  { %810 = vmatpush1.bf16.msra.mxu1 %v9915_v33 }
  0x40   :  { %811 = vmatprep.subr.bf16.mxu1 %v9921_v34 }
  0x42   :  { %7846 = vmatmul.mubr.msk.bf16.gmra.mxu1 %vm109_vm1, %v9840_v14 }
  0x43   :  { %8510 = vmatmul.mubr.msk.bf16.vlgmr.msra.gmra.mxu0 %vm109_vm1, %v67_v21  ;;  %812 = vmatpush1.bf16.msra.mxu1 %v9924_v35 }
  0x44   :  { %8518 = vmatpush3.bf16.msra.mxu0 %v332_v36  ;;  %813 = vmatprep.subr.bf16.mxu1 %v9928_v37 }
  0x45   :  { %8519 = vmatprep.mubr.msk.bf16.mxu0 %vm109_vm1, %v9832_v11  ;;  %831 = vmatprep.mubr.bf16.mxu1 %v12701_v0  ;;  %v79_v11 = vld [vmem:[%s12696_s4] sm:$0x7] }
  0x46   :  { %840 = vmatprep.subr.bf16.mxu0 %v9932_v39  ;;  %v10025_v20 = vrot.slane %v79_v11, %v10010_v13 }
  0x47   :  { %814 = vmatpush1.bf16.msra.mxu1 %v9930_v38 }
  0x48   :  { %881 = vmatprep.subr.bf16.mxu1 %v9937_v40 }
  0x4a   :  { %832 = vmatmul.mubr.bf16.vlgmr.msra.gmra.mxu1 %v12701_v0 }
  0x4b   :  { %8520 = vmatmul.mubr.msk.bf16.vlgmr.msra.gmra.mxu0 %vm109_vm1, %v67_v21  ;;  %882 = vmatpush1.bf16.msra.mxu1 %v8576_v42 }
  0x4c   :  { %841 = vmatpush1.bf16.msra.mxu0 %v9945_v41  ;;  %883 = vmatprep.subr.bf16.mxu1 %v8579_v44 }
  0x4d   :  { %842 = vmatprep.subr.bf16.mxu0 %v9947_v43  ;;  %8523 = vmatprep.mubr.msk.bf16.mxu0 %vm109_vm1, %v9830_v10  ;;  %v10002_v10 = vsub.s32 2, %v82_v9 }
  0x4e   :  { %913 = vmatprep.mubr.bf16.mxu1 %v12701_v0 }
  0x4f   :  { %884 = vmatpush1.bf16.msra.mxu1 %v8582_v46  ;;  %12856 = vst [vmem:[#allocation12_spill] sm:$0xff] %v10002_v10  ;;  %v10008_v12 = vrot.slane %v79_v11, %v10002_v10 }
  0x50   :  { %843 = vmatpush1.bf16.msra.mxu0 %v9951_v45  ;;  %885 = vmatprep.subr.bf16.mxu1 %v8585_v48 }
  0x51   :  { %844 = vmatprep.subr.bf16.mxu0 %v9955_v47  ;;  %12857 = vst [vmem:[#allocation13_spill] sm:$0xff] %v10008_v12 }
  0x53   :  { %8524 = vmatmul.mubr.msk.bf16.gmra.mxu0 %vm109_vm1, %v9840_v14  ;;  %886 = vmatpush1.bf16.msra.mxu1 %v8588_v50 }
  0x54   :  { %845 = vmatpush1.bf16.msra.mxu0 %v9959_v49  ;;  %887 = vmatprep.subr.bf16.mxu1 %v8591_v52 }
  0x55   :  { %846 = vmatprep.subr.bf16.mxu0 %v9964_v51  ;;  %872 = vmatprep.mubr.bf16.mxu0 %v12701_v0 }
  0x57   :  { %888 = vmatpush1.bf16.msra.mxu1 %v8594_v54 }
  0x58   :  { %847 = vmatpush1.bf16.msra.mxu0 %v8593_v53  ;;  %889 = vmatprep.subr.bf16.mxu1 %v8597_v56 }
  0x59   :  { %848 = vmatprep.subr.bf16.mxu0 %v8595_v55 }
  0x5b   :  { %890 = vmatpush1.bf16.msra.mxu1 %v8600_v58 }
  0x5c   :  { %849 = vmatpush1.bf16.msra.mxu0 %v8599_v57  ;;  %891 = vmatprep.subr.bf16.mxu1 %v8603_v60 }
  0x5d   :  { %850 = vmatprep.subr.bf16.mxu0 %v8601_v59 }
  0x5f   :  { %892 = vmatpush1.bf16.msra.mxu1 %v8606_v62 }
  0x60   :  { %851 = vmatpush1.bf16.msra.mxu0 %v8605_v61  ;;  %893 = vmatprep.subr.bf16.mxu1 %v8609_v1 }
  0x61   :  { %852 = vmatprep.subr.bf16.mxu0 %v8607_v63 }
  0x63   :  { %894 = vmatpush1.bf16.msra.mxu1 %v8612_v3 }
  0x64   :  { %853 = vmatpush1.bf16.msra.mxu0 %v8611_v2  ;;  %895 = vmatprep.subr.bf16.mxu1 %v8615_v5 }
  0x65   :  { %854 = vmatprep.subr.bf16.mxu0 %v8613_v4 }
  0x67   :  { %896 = vmatpush1.bf16.msra.mxu1 %v8618_v7 }
  0x68   :  { %855 = vmatpush1.bf16.msra.mxu0 %v8617_v6  ;;  %1014 = vmatprep.subr.bf16.mxu1 %v9932_v39 }
  0x69   :  { %973 = vmatprep.subr.bf16.mxu0 %v9852_v17 }
  0x6a   :  { %914 = vmatmul.mubr.bf16.vlgmr.msra.gmra.mxu1 %v12701_v0 }
  0x6b   :  { %873 = vmatmul.mubr.bf16.vlgmr.msra.gmra.mxu0 %v12701_v0  ;;  %1015 = vmatpush1.bf16.msra.mxu1 %v9945_v41 }
  0x6c   :  { %974 = vmatpush1.bf16.msra.mxu0 %v9868_v22  ;;  %1016 = vmatprep.subr.bf16.mxu1 %v9947_v43 }
  0x6d   :  { %975 = vmatprep.subr.bf16.mxu0 %v9870_v23  ;;  %1005 = vmatprep.mubr.bf16.mxu0 %v12701_v0 }
  0x6e   :  { %1046 = vmatprep.mubr.bf16.mxu1 %v12701_v0 }
  0x6f   :  { %1017 = vmatpush1.bf16.msra.mxu1 %v9951_v45 }
  0x70   :  { %976 = vmatpush1.bf16.msra.mxu0 %v9879_v25  ;;  %1018 = vmatprep.subr.bf16.mxu1 %v9955_v47 }
  0x71   :  { %977 = vmatprep.subr.bf16.mxu0 %v9884_v26 }
  0x73   :  { %1019 = vmatpush1.bf16.msra.mxu1 %v9959_v49 }
  0x74   :  { %978 = vmatpush1.bf16.msra.mxu0 %v9888_v27  ;;  %1020 = vmatprep.subr.bf16.mxu1 %v9964_v51  ;;  %v10040_v27 = vrot.slane %v10022_v19, %v10010_v13 }
  0x75   :  { %979 = vmatprep.subr.bf16.mxu0 %v9891_v28 }
  0x77   :  { %1021 = vmatpush1.bf16.msra.mxu1 %v8593_v53 }
  0x78   :  { %980 = vmatpush1.bf16.msra.mxu0 %v9897_v29  ;;  %1022 = vmatprep.subr.bf16.mxu1 %v8595_v55 }
  0x79   :  { %981 = vmatprep.subr.bf16.mxu0 %v9902_v30  ;;  %v10048_v30 = vrot.slane %v10022_v19, %v10030_v24 }
  0x7b   :  { %1023 = vmatpush1.bf16.msra.mxu1 %v8599_v57  ;;  %12864 = vst [vmem:[#allocation20_spill] sm:$0xff] %v10048_v30 }
  0x7c   :  { %982 = vmatpush1.bf16.msra.mxu0 %v9905_v31  ;;  %1024 = vmatprep.subr.bf16.mxu1 %v8601_v59 }
  0x7d   :  { %983 = vmatprep.subr.bf16.mxu0 %v9908_v32 }
  0x7f   :  { %1025 = vmatpush1.bf16.msra.mxu1 %v8605_v61 }
  0x80   :  { %984 = vmatpush1.bf16.msra.mxu0 %v9915_v33  ;;  %1026 = vmatprep.subr.bf16.mxu1 %v8607_v63  ;;  %v10051_v33 = vrot.slane %v79_v11, %v10030_v24 }
  0x81   :  { %985 = vmatprep.subr.bf16.mxu0 %v9921_v34 }
  0x82   :  { %12865 = vst [vmem:[#allocation21_spill] sm:$0xff] %v10051_v33 }
  0x83   :  { %1027 = vmatpush1.bf16.msra.mxu1 %v8611_v2 }
  0x84   :  { %986 = vmatpush1.bf16.msra.mxu0 %v9924_v35  ;;  %1028 = vmatprep.subr.bf16.mxu1 %v8613_v4 }
  0x85   :  { %987 = vmatprep.subr.bf16.mxu0 %v9928_v37 }
  0x87   :  { %1029 = vmatpush1.bf16.msra.mxu1 %v8617_v6 }
  0x88   :  { %988 = vmatpush1.bf16.msra.mxu0 %v9930_v38  ;;  %1147 = vmatprep.subr.bf16.mxu1 %v9852_v17 }
  0x89   :  { %1055 = vmatprep.subr.bf16.mxu0 %v9937_v40 }
  0xe2   :  { %v8515_v15 = vpop.f32.mrf.mxu1 }
  0xe3   :  { %v10012_v14 = vpop.f32.mrf.mxu0  ;;  %v10015_v16 = vadd.f32 %v8515_v15, %v10008_v12 }
  0xe4   :  { %v255_v18 = vpop.f32.mrf.mxu1 }
  0xe5   :  { %12859 = vst [vmem:[#allocation15_spill] sm:$0xff] %v10015_v16  ;;  %v10017_v17 = vpop.f32.mrf.mxu0  ;;  %v10028_v21 = vadd.f32 %v255_v18, %v10008_v12  ;;  %v10245_v16 = vld [vmem:[#allocation8 + $0x64] ss:$24 sps:$4 sm:$0xff]  }
  0xe6   :  { %v8516_v23 = vpop.f32.mrf.mxu1 }
  0xe7   :  { %12860 = vst [vmem:[#allocation16_spill] sm:$0xff] %v10028_v21  ;;  %v170_v22 = vpop.f32.mrf.mxu0  ;;  %v10036_v26 = vadd.f32 %v8516_v23, %v10008_v12  ;;  %v10281_v21 = vld [vmem:[#allocation8 + $0x164] ss:$24 sps:$4 sm:$0xff]  }
  0xe8   :  { %v10033_v25 = vadd.f32 %v170_v22, %v10025_v20  ;;  %v10044_v29 = vpop.f32.mrf.mxu1 }
  0xe9   :  { %12862 = vst [vmem:[#allocation18_spill] sm:$0xff] %v10036_v26  ;;  %v10042_v28 = vpop.f32.mrf.mxu0  ;;  %12863 = vst [vmem:[#allocation19_spill] sm:$0xff] %v10044_v29  ;;  %v10266_v29 = vld [vmem:[#allocation8 + $0x30] ss:$24 sps:$4 sm:$0xff]  }
  0xea   :  { %v368_v32 = vpop.f32.mrf.mxu1 }
  0xeb   :  { %v176_v31 = vpop.f32.mrf.mxu0  ;;  %v10057_v35 = vadd.f32 %v368_v32, %v10040_v27 }
  0xec   :  { %v10054_v34 = vadd.f32 %v176_v31, %v10025_v20  ;;  %v370_v37 = vpop.f32.mrf.mxu1 }
  0xed   :  { %12867 = vst [vmem:[#allocation23_spill] sm:$0xff] %v10057_v35  ;;  %v178_v36 = vpop.f32.mrf.mxu0  ;;  %v10063_v39 = vadd.f32 %v370_v37, %v10048_v30 }
  0xee   :  { %12866 = vst [vmem:[#allocation22_spill] sm:$0xff] %v10054_v34  ;;  %v10060_v38 = vadd.f32 %v178_v36, %v10051_v33  ;;  %v372_v41 = vpop.f32.mrf.mxu1 }
  0xef   :  { %12869 = vst [vmem:[#allocation25_spill] sm:$0xff] %v10063_v39  ;;  %v180_v40 = vpop.f32.mrf.mxu0  ;;  %v10069_v43 = vadd.f32 %v372_v41, %v10040_v27 }
  0xf0   :  { %12868 = vst [vmem:[#allocation24_spill] sm:$0xff] %v10060_v38  ;;  %v10066_v42 = vadd.f32 %v180_v40, %v10025_v20  ;;  %v10073_v45 = vpop.f32.mrf.mxu1 }
  0xf1   :  { %12871 = vst [vmem:[#allocation27_spill] sm:$0xff] %v10069_v43  ;;  %v10071_v44 = vpop.f32.mrf.mxu0  ;;  %12873 = vst [vmem:[#allocation29_spill] sm:$0xff] %v10073_v45  ;;  %v10248_v45 = vld [vmem:[#allocation8 + $0x70] ss:$24 sps:$4 sm:$0xff]   ;;  %v10254_v43 = vld [vmem:[#allocation8 + $0x60] ss:$24 sps:$4 sm:$0xff]  }
  0xf2   :  { %12870 = vst [vmem:[#allocation26_spill] sm:$0xff] %v10066_v42  ;;  %12872 = vst [vmem:[#allocation28_spill] sm:$0xff] %v10071_v44  ;;  %v378_v47 = vpop.f32.mrf.mxu1  ;;  %v10310_v44 = vld [vmem:[#allocation8 + $0x98] ss:$24 sps:$4 sm:$0xff]   ;;  %v10316_v42 = vld [vmem:[#allocation8 + $0x68] ss:$24 sps:$4 sm:$0xff]  }
  0xf3   :  { %v186_v46 = vpop.f32.mrf.mxu0  ;;  %v10079_v49 = vadd.f32 %v378_v47, %v10040_v27  ;;  %12909 = vst [vmem:[#allocation64_spill] sm:$0xff] %v10310_v44  ;;  %12911 = vst [vmem:[#allocation66_spill] sm:$0xff] %v10316_v42 }
  0xf4   :  { %v10076_v48 = vadd.f32 %v186_v46, %v10025_v20  ;;  %v380_v51 = vpop.f32.mrf.mxu1  ;;  %v10133_v46 = vrot.slane %v10022_v19, %v10002_v10 }
  0xf5   :  { %12875 = vst [vmem:[#allocation31_spill] sm:$0xff] %v10079_v49  ;;  %v188_v50 = vpop.f32.mrf.mxu0  ;;  %v10085_v53 = vadd.f32 %v380_v51, %v10048_v30  ;;  %v10272_v49 = vld [vmem:[#allocation8 + $0x10] ss:$24 sps:$4 sm:$0xff]  }
  0xf6   :  { %12874 = vst [vmem:[#allocation30_spill] sm:$0xff] %v10076_v48  ;;  %v10082_v52 = vadd.f32 %v188_v50, %v10051_v33  ;;  %v382_v55 = vpop.f32.mrf.mxu1  ;;  %12892 = vst [vmem:[#allocation48_spill] sm:$0xff] %v10133_v46  ;;  %v10295_v48 = vld [vmem:[#allocation8 + $0xfc] ss:$24 sps:$4 sm:$0xff]  }
  0xf7   :  { %12877 = vst [vmem:[#allocation33_spill] sm:$0xff] %v10085_v53  ;;  %v190_v54 = vpop.f32.mrf.mxu0  ;;  %v10091_v57 = vadd.f32 %v382_v55, %v10040_v27  ;;  %v10263_v53 = vld [vmem:[#allocation8 + $0x14] ss:$24 sps:$4 sm:$0xff]   ;;  %12904 = vst [vmem:[#allocation59_spill] sm:$0xff] %v10295_v48 }
  0xf8   :  { %12876 = vst [vmem:[#allocation32_spill] sm:$0xff] %v10082_v52  ;;  %v10088_v56 = vadd.f32 %v190_v54, %v10025_v20  ;;  %v10095_v59 = vpop.f32.mrf.mxu1  ;;  %v10289_v52 = vld [vmem:[#allocation8 + $0x12c] ss:$24 sps:$4 sm:$0xff]  }
  0xf9   :  { %12879 = vst [vmem:[#allocation35_spill] sm:$0xff] %v10091_v57  ;;  %v10093_v58 = vpop.f32.mrf.mxu0  ;;  %12881 = vst [vmem:[#allocation37_spill] sm:$0xff] %v10095_v59  ;;  %v10285_v59 = vld [vmem:[#allocation8 + $0x158] ss:$24 sps:$4 sm:$0xff]   ;;  %v10292_v57 = vld [vmem:[#allocation8 + $0x128] ss:$24 sps:$4 sm:$0xff]  }
  0xfa   :  { %12878 = vst [vmem:[#allocation34_spill] sm:$0xff] %v10088_v56  ;;  %12880 = vst [vmem:[#allocation36_spill] sm:$0xff] %v10093_v58  ;;  %v388_v61 = vpop.f32.mrf.mxu1  ;;  %v10269_v58 = vld [vmem:[#allocation8 + $0x4] ss:$24 sps:$4 sm:$0xff]  }
  0xfb   :  { %v196_v60 = vpop.f32.mrf.mxu0  ;;  %v10101_v63 = vadd.f32 %v388_v61, %v10040_v27  ;;  %v10275_v56 = vld [vmem:[#allocation8 + $0x15c] ss:$24 sps:$4 sm:$0xff]   ;;  %12903 = vst [vmem:[#allocation58_spill] sm:$0xff] %v10292_v57 }
  0xfc   :  { %v10098_v62 = vadd.f32 %v196_v60, %v10025_v20  ;;  %v390_v2 = vpop.f32.mrf.mxu1 }
  0xfd   :  { %12883 = vst [vmem:[#allocation39_spill] sm:$0xff] %v10101_v63  ;;  %v198_v1 = vpop.f32.mrf.mxu0  ;;  %v10107_v4 = vadd.f32 %v390_v2, %v10048_v30  ;;  %v10313_v63 = vld [vmem:[#allocation8 + $0x6c] ss:$24 sps:$4 sm:$0xff]  }
  0xfe   :  { %12882 = vst [vmem:[#allocation38_spill] sm:$0xff] %v10098_v62  ;;  %v10104_v3 = vadd.f32 %v198_v1, %v10051_v33  ;;  %v392_v6 = vpop.f32.mrf.mxu1  ;;  %v10257_v62 = vld [vmem:[#allocation8 + $0x34] ss:$24 sps:$4 sm:$0xff]   ;;  %12910 = vst [vmem:[#allocation65_spill] sm:$0xff] %v10313_v63 }
  0xff   :  { %12885 = vst [vmem:[#allocation41_spill] sm:$0xff] %v10107_v4  ;;  %v200_v5 = vpop.f32.mrf.mxu0  ;;  %v10113_v8 = vadd.f32 %v392_v6, %v10040_v27  ;;  %v10304_v4 = vld [vmem:[#allocation8 + $0xc8] ss:$24 sps:$4 sm:$0xff]  }
 0x100   :  { %12884 = vst [vmem:[#allocation40_spill] sm:$0xff] %v10104_v3  ;;  %v10110_v7 = vadd.f32 %v200_v5, %v10025_v20  ;;  %v10117_v11 = vpop.f32.mrf.mxu1  ;;  %v10251_v3 = vld [vmem:[#allocation8 + $0x44] ss:$24 sps:$4 sm:$0xff]   ;;  %12907 = vst [vmem:[#allocation62_spill] sm:$0xff] %v10304_v4 }
 0x101   :  { %12887 = vst [vmem:[#allocation43_spill] sm:$0xff] %v10113_v8  ;;  %v10115_v9 = vpop.f32.mrf.mxu0  ;;  %12889 = vst [vmem:[#allocation45_spill] sm:$0xff] %v10117_v11  ;;  %v10328_v11 = vld [vmem:[#allocation8 + $0x8] ss:$24 sps:$4 sm:$0xff]  }
 0x102   :  { %12886 = vst [vmem:[#allocation42_spill] sm:$0xff] %v10110_v7  ;;  %12888 = vst [vmem:[#allocation44_spill] sm:$0xff] %v10115_v9  ;;  %v398_v18 = vpop.f32.mrf.mxu1 }
 0x103   :  { %v8511_v15 = vpop.f32.mrf.mxu0  ;;  %v10123_v23 = vadd.f32 %v398_v18, %v10040_v27  ;;  %12915 = vst [vmem:[#allocation70_spill] sm:$0xff] %v10328_v11 }
 0x104   :  { %v10120_v22 = vadd.f32 %v8511_v15, %v10008_v12  ;;  %v400_v32 = vpop.f32.mrf.mxu1 }
 0x105   :  { %v239_v31 = vpop.f32.mrf.mxu0  ;;  %v10126_v36 = vadd.f32 %v400_v32, %v10048_v30 }
 0x106   :  { %12890 = vst [vmem:[#allocation46_spill] sm:$0xff] %v10120_v22  ;;  %v402_v40 = vpop.f32.mrf.mxu1  ;;  %v10325_v22 = vld [vmem:[#allocation8 + $0xc] ss:$24 sps:$4 sm:$0xff]  }
 0x107   :  { %v8512_v37 = vpop.f32.mrf.mxu0  ;;  %12914 = vst [vmem:[#allocation69_spill] sm:$0xff] %v10325_v22 }
 0x108   :  { %v10129_v41 = vadd.f32 %v8512_v37, %v10008_v12  ;;  %v404_v50 = vpop.f32.mrf.mxu1 }
 0x109   :  { %v10135_v47 = vpop.f32.mrf.mxu0 }
 0x10a   :  { %12891 = vst [vmem:[#allocation47_spill] sm:$0xff] %v10129_v41  ;;  %v833_v54 = vpop.f32.mrf.mxu1  ;;  %v10307_v41 = vld [vmem:[#allocation8 + $0x9c] ss:$24 sps:$4 sm:$0xff]  }
 0x10b   :  { %v8521_v51 = vpop.f32.mrf.mxu0  ;;  %12908 = vst [vmem:[#allocation63_spill] sm:$0xff] %v10307_v41 }
 0x10c   :  { %v10138_v55 = vadd.f32 %v8521_v51, %v10133_v46  ;;  %v835_v61 = vpop.f32.mrf.mxu1 }
 0x10d   :  { %v441_v60 = vpop.f32.mrf.mxu0 }
 0x10e   :  { %12893 = vst [vmem:[#allocation49_spill] sm:$0xff] %v10138_v55  ;;  %v10141_v1 = vadd.f32 %v441_v60, %v10133_v46  ;;  %v837_v5 = vpop.f32.mrf.mxu1  ;;  %v167_v60 = vadd.f32 %v10012_v14, %v10025_v20  ;;  %v405_v20 = vadd.f32 %v404_v50, %v10048_v30  ;;  %v10172_v50 = vld [vmem:[%s12697_s5 + $0x1] ss:$0 sm:$0xff]  ;;  %v10331_v30 = vld [vmem:[#allocation8 + $0x154] ss:$24 sps:$4 sm:$0xff]  }
 0x10f   :  { %v8522_v2 = vpop.f32.mrf.mxu0  ;;  %v10260_v55 = vld [vmem:[#allocation8 + $0x40] ss:$24 sps:$4 sm:$0xff]   ;;  %12916 = vst [vmem:[#allocation71_spill] sm:$0xff] %v10331_v30 }
 0x110   :  { %12894 = vst [vmem:[#allocation50_spill] sm:$0xff] %v10141_v1  ;;  %v10144_v6 = vadd.f32 %v8522_v2, %v10133_v46  ;;  %v838_v15 = vpop.f32.mrf.mxu1  ;;  %v928_v0 = vadd.f32 %v833_v54, %v167_v60 }
 0x111   :  { %v10146_v19 = vpop.f32.mrf.mxu0 }
 0x112   :  { %12895 = vst [vmem:[#allocation51_spill] sm:$0xff] %v10144_v6  ;;  %12896 = vst [vmem:[#allocation52_spill] sm:$0xff] %v10146_v19  ;;  %v7902_v24 = vmul.f32 -1.442695, %v928_v0  ;;  %v169_v0 = vadd.f32 %v10017_v17, %v10051_v33  ;;  %v10242_v19 = vld [vmem:[#allocation8 + $0x90] ss:$24 sps:$4 sm:$0xff]  }
 0x113   :  { %v8525_v18 = vpop.f32.mrf.mxu0  ;;  %v10278_v6 = vld [vmem:[#allocation8] ss:$24 sps:$4 sm:$0xff]  }
 0x114   :  { %v10149_v32 = vadd.f32 %v8525_v18, %v10133_v46  ;;  %9035 = vpow2.f32 %v7902_v24  ;;  %v403_v18 = vadd.f32 %v402_v40, %v10040_v27  ;;  %v942_v24 = vadd.f32 %v835_v61, %v169_v0 }
 0x115   :  { %v457_v37 = vpop.f32.mrf.mxu0 }
 0x116   :  { %v10152_v51 = vadd.f32 %v457_v37, %v10133_v46  ;;  %v7904_v54 = vmul.f32 -1.442695, %v942_v24 }
 0x117   :  { %v8526_v5 = vpop.f32.mrf.mxu0 }
 0x118   :  { %12897 = vst [vmem:[#allocation53_spill] sm:$0xff] %v10152_v51  ;;  %v10298_v51 = vld [vmem:[#allocation8 + $0xf8] ss:$24 sps:$4 sm:$0xff]  }
 0x119   :  { %v10156_v2 = vpop.f32.mrf.mxu0  ;;  %12905 = vst [vmem:[#allocation60_spill] sm:$0xff] %v10298_v51 }
 0x11a   :  { %12898 = vst [vmem:[#allocation54_spill] sm:$0xff] %v10156_v2  ;;  %v10319_v2 = vld [vmem:[#allocation8 + $0x3c] ss:$24 sps:$4 sm:$0xff]  }
 0x11b   :  { %12912 = vst [vmem:[#allocation67_spill] sm:$0xff] %v10319_v2 }
 0x121   :  { %v9036_v37 = vpop.eup %9035 }
 0x122   :  { %v936_v7 = vadd.f32 1.0, %v9036_v37 }
 0x12a   :  { %v915_v13 = vpop.f32.mrf.mxu1 }
 0x12b   :  { %v874_v10 = vpop.f32.mrf.mxu0 }
 0x12c   :  { %v916_v1 = vpop.f32.mrf.mxu1 }
 0x12d   :  { %v876_v15 = vpop.f32.mrf.mxu0 }
 0x12e   :  { %v917_v14 = vpop.f32.mrf.mxu1 }
 0x12f   :  { %v877_v39 = vpop.f32.mrf.mxu0  ;;  %v943_v13 = vadd.f32 %v917_v14, %v405_v20 }
 0x130   :  { %v919_v61 = vpop.f32.mrf.mxu1 }
 0x131   :  { %v878_v26 = vpop.f32.mrf.mxu0  ;;  %v7905_v1 = vmul.f32 -1.442695, %v943_v13 }
 0x132   :  { %v929_v9 = vadd.f32 %v878_v26, %v403_v18  ;;  %v10165_v26 = vld [vmem:[%s12697_s5] ss:$0 sm:$0xff]  ;;  %v957_v18 = vadd.f32 %v10172_v50, %v919_v61  ;;  %v12902_v61 = vmov 0  }
 0x133   :  { %12899 = vst [vmem:[#allocation55_spill] sm:$0xff] %v10165_v26 }
 0x134   :  { %v7903_v35 = vmul.f32 -1.442695, %v929_v9  ;;  %v240_v9 = vadd.f32 %v239_v31, %v10008_v12 }
 0x136   :  { %9037 = vpow2.f32 %v7903_v35  ;;  %v956_v35 = vadd.f32 %v10165_v26, %v874_v10  ;;  %v469_v10 = vadd.f32 %v8526_v5, %v10133_v46  ;;  %v10322_v46 = vld [vmem:[#allocation8 + $0x38] ss:$24 sps:$4 sm:$0xff]  }
 0x137   :  { %9039 = vrcp.f32 %v936_v7  ;;  %12913 = vst [vmem:[#allocation68_spill] sm:$0xff] %v10322_v46 }
 0x138   :  { %9041 = vpow2.f32 %v7904_v54 }
 0x139   :  { %9043 = vpow2.f32 %v7905_v1 }
 0x143   :  { %v9038_v39 = vpop.eup %9037 }
 0x144   :  { %v937_v27 = vadd.f32 1.0, %v9038_v39  ;;  %v9040_v17 = vpop.eup %9039 }
 0x145   :  { %v958_v7 = vmul.f32 %v9040_v17, %v956_v35  ;;  %v9042_v60 = vpop.eup %9041 }
 0x146   :  { %9045 = vrcp.f32 %v937_v27  ;;  %v9044_v15 = vpop.eup %9043  ;;  %v950_v0 = vadd.f32 1.0, %v9042_v60  ;;  %v10190_v60 = vld [vmem:[#allocation8 + $0x134] ss:$24 sps:$4 sm:$0xff]  }
 0x147   :  { %v960_v40 = vadd.f32 %v958_v7, %v240_v9  ;;  %v951_v20 = vadd.f32 1.0, %v9044_v15  ;;  %v10193_v15 = vld [vmem:[#allocation8 + $0x150] ss:$24 sps:$4 sm:$0xff]  }
 0x149   :  { %9047 = vtanh.f32 %v960_v40  ;;  %v10186_v40 = vld [vmem:[#allocation8 + $0x160] ss:$24 sps:$4 sm:$0xff]  }
 0x14a   :  { %9049 = vrcp.f32 %v950_v0  ;;  %v10203_v0 = vld [vmem:[#allocation8 + $0x104] ss:$24 sps:$4 sm:$0xff]  }
 0x153   :  { %v9046_v37 = vpop.eup %9045 }
 0x154   :  { %v959_v14 = vmul.f32 %v9046_v37, %v957_v18  ;;  %v10196_v18 = vld [vmem:[#allocation8 + $0x124] ss:$24 sps:$4 sm:$0xff]   ;;  %v10200_v37 = vld [vmem:[#allocation8 + $0x130] ss:$24 sps:$4 sm:$0xff]  }
 0x156   :  { %v961_v24 = vadd.f32 %v959_v14, %v469_v10  ;;  %v9048_v31 = vpop.eup %9047  ;;  %v10206_v10 = vld [vmem:[#allocation8 + $0x120] ss:$24 sps:$4 sm:$0xff]   ;;  %v10209_v14 = vld [vmem:[#allocation8 + $0xf4] ss:$24 sps:$4 sm:$0xff]  }
 0x157   :  { %v964_v13 = vsub.f32 0.0, %v9048_v31  ;;  %v9050_v54 = vpop.eup %9049 }
 0x158   :  { %9051 = vtanh.f32 %v961_v24  ;;  %v10215_v24 = vld [vmem:[#allocation8 + $0xd4] ss:$24 sps:$4 sm:$0xff]  }
 0x159   :  { %9053 = vrcp.f32 %v951_v20  ;;  %v966_v27 = vmul.f32 %v9050_v54, %v964_v13  ;;  %v10212_v20 = vld [vmem:[#allocation8 + $0x100] ss:$24 sps:$4 sm:$0xff]   ;;  %v10221_v13 = vld [vmem:[#allocation8 + $0xc4] ss:$24 sps:$4 sm:$0xff]   ;;  %v10224_v54 = vld [vmem:[#allocation8 + $0xd0] ss:$24 sps:$4 sm:$0xff]  }
 0x15b   :  { %v10176_v7 = vadd.f32 %v9048_v31, %v966_v27  ;;  %v10218_v31 = vld [vmem:[#allocation8 + $0xf0] ss:$24 sps:$4 sm:$0xff]   ;;  %v10233_v27 = vld [vmem:[#allocation8 + $0x94] ss:$24 sps:$4 sm:$0xff]  }
 0x15d   :  { %12900 = vst [vmem:[#allocation56_spill] sm:$0xff] %v10176_v7 }
 0x165   :  { %v9052_v1 = vpop.eup %9051 }
 0x166   :  { %v965_v39 = vsub.f32 0.0, %v9052_v1  ;;  %v9054_v35 = vpop.eup %9053 }
 0x168   :  { %v967_v17 = vmul.f32 %v9054_v35, %v965_v39  ;;  %v10230_v39 = vld [vmem:[#allocation8 + $0xc0] ss:$24 sps:$4 sm:$0xff]  }
 0x169   :  { %v10236_v35 = vld [vmem:[#allocation8 + $0xa0] ss:$24 sps:$4 sm:$0xff]  }
 0x16a   :  { %v10178_v9 = vadd.f32 %v9052_v1, %v967_v17  ;;  %v10227_v1 = vld [vmem:[#allocation8 + $0xa4] ss:$24 sps:$4 sm:$0xff]   ;;  %v10239_v17 = vld [vmem:[#allocation8 + $0x74] ss:$24 sps:$4 sm:$0xff]  }
 0x16c   :  { %12901 = vst [vmem:[#allocation57_spill] sm:$0xff] %v10178_v9  ;;  %v10182_v5 = vpack.c.bf16 %v10178_v9, %v10176_v7 }
 0x16e   :  { %1006 = vmatmul.mubr.bf16.vlgmr.msra.gmra.mxu0 %v10182_v5  ;;  %1047 = vmatmul.mubr.bf16.vlgmr.msra.gmra.mxu1 %v10182_v5 }
 0x16f   :  { %1056 = vmatpush1.bf16.msra.mxu0 %v10186_v40  ;;  %1087 = vmatprep.mubr.bf16.mxu0 %v12902_v61 }
 0x170   :  { %1057 = vmatprep.subr.bf16.mxu0 %v10190_v60  ;;  %1148 = vmatpush1.bf16.msra.mxu1 %v10193_v15 }
 0x171   :  { %1149 = vmatprep.subr.bf16.mxu1 %v10196_v18  ;;  %1179 = vmatprep.mubr.bf16.mxu1 %v12902_v61 }
 0x173   :  { %1058 = vmatpush1.bf16.msra.mxu0 %v10200_v37 }
 0x174   :  { %1059 = vmatprep.subr.bf16.mxu0 %v10203_v0  ;;  %1150 = vmatpush1.bf16.msra.mxu1 %v10206_v10 }
 0x175   :  { %1151 = vmatprep.subr.bf16.mxu1 %v10209_v14 }
 0x177   :  { %1060 = vmatpush1.bf16.msra.mxu0 %v10212_v20 }
 0x178   :  { %1061 = vmatprep.subr.bf16.mxu0 %v10215_v24  ;;  %1152 = vmatpush1.bf16.msra.mxu1 %v10218_v31 }
 0x179   :  { %1153 = vmatprep.subr.bf16.mxu1 %v10221_v13 }
 0x17b   :  { %1062 = vmatpush1.bf16.msra.mxu0 %v10224_v54 }
 0x17c   :  { %1063 = vmatprep.subr.bf16.mxu0 %v10227_v1  ;;  %1154 = vmatpush1.bf16.msra.mxu1 %v10230_v39 }
 0x17d   :  { %1155 = vmatprep.subr.bf16.mxu1 %v10233_v27 }
 0x17f   :  { %1064 = vmatpush1.bf16.msra.mxu0 %v10236_v35 }
 0x180   :  { %1065 = vmatprep.subr.bf16.mxu0 %v10239_v17  ;;  %1156 = vmatpush1.bf16.msra.mxu1 %v10242_v19 }
 0x181   :  { %1157 = vmatprep.subr.bf16.mxu1 %v10245_v16 }
 0x183   :  { %1066 = vmatpush1.bf16.msra.mxu0 %v10248_v45 }
 0x184   :  { %1067 = vmatprep.subr.bf16.mxu0 %v10251_v3  ;;  %1158 = vmatpush1.bf16.msra.mxu1 %v10254_v43 }
 0x185   :  { %1159 = vmatprep.subr.bf16.mxu1 %v10257_v62 }
 0x187   :  { %1068 = vmatpush1.bf16.msra.mxu0 %v10260_v55 }
 0x188   :  { %1069 = vmatprep.subr.bf16.mxu0 %v10263_v53  ;;  %1160 = vmatpush1.bf16.msra.mxu1 %v10266_v29 }
 0x189   :  { %1161 = vmatprep.subr.bf16.mxu1 %v10269_v58 }
 0x18b   :  { %1070 = vmatpush1.bf16.msra.mxu0 %v10272_v49 }
 0x18c   :  { %1188 = vmatprep.subr.bf16.mxu0 %v10275_v56  ;;  %1162 = vmatpush1.bf16.msra.mxu1 %v10278_v6 }
 0x18d   :  { %1229 = vmatprep.subr.bf16.mxu1 %v10281_v21 }
 0x18e   :  { %1088 = vmatmul.mubr.bf16.vlgmr.msra.gmra.mxu0 %v10182_v5  ;;  %v10301_v5 = vld [vmem:[#allocation8 + $0xcc] ss:$24 sps:$4 sm:$0xff]  }
 0x18f   :  { %1189 = vmatpush1.bf16.msra.mxu0 %v10285_v59  ;;  %1220 = vmatprep.mubr.bf16.mxu0 %v12902_v61  ;;  %12906 = vst [vmem:[#allocation61_spill] sm:$0xff] %v10301_v5 }
 0x190   :  { %1190 = vmatprep.subr.bf16.mxu0 %v10289_v52 }
 0x193   :  { %1191 = vmatpush1.bf16.msra.mxu0 %v10292_v57 }
 0x194   :  { %1192 = vmatprep.subr.bf16.mxu0 %v10295_v48 }
 0x197   :  { %1193 = vmatpush1.bf16.msra.mxu0 %v10298_v51 }
 0x198   :  { %1194 = vmatprep.subr.bf16.mxu0 %v10301_v5 }
 0x19b   :  { %1195 = vmatpush1.bf16.msra.mxu0 %v10304_v4 }
 0x19c   :  { %1196 = vmatprep.subr.bf16.mxu0 %v10307_v41 }
 0x19f   :  { %1197 = vmatpush1.bf16.msra.mxu0 %v10310_v44 }
 0x1a0   :  { %1198 = vmatprep.subr.bf16.mxu0 %v10313_v63 }
 0x1a3   :  { %1199 = vmatpush1.bf16.msra.mxu0 %v10316_v42 }
 0x1a4   :  { %1200 = vmatprep.subr.bf16.mxu0 %v10319_v2 }
 0x1a7   :  { %1201 = vmatpush1.bf16.msra.mxu0 %v10322_v46 }
 0x1a8   :  { %1202 = vmatprep.subr.bf16.mxu0 %v10325_v22 }
 0x1ab   :  { %1203 = vmatpush1.bf16.msra.mxu0 %v10328_v11  ;;  %v173_v11 = vadd.f32 %v10042_v28, %v10051_v33 }
 0x1ac   :  { %1321 = vmatprep.subr.bf16.mxu0 %v10331_v30 }
 0x22e   :  { %v1007_v38 = vpop.f32.mrf.mxu0  ;;  %v1048_v8 = vpop.f32.mrf.mxu1 }
 0x22f   :  { %v1102_v34 = vadd.f32 %v1007_v38, %v10033_v25 }
 0x230   :  { %v1009_v2 = vpop.f32.mrf.mxu0  ;;  %v1050_v42 = vpop.f32.mrf.mxu1 }
 0x231   :  { %v7906_v63 = vmul.f32 -1.442695, %v1102_v34  ;;  %v1116_v30 = vadd.f32 %v1009_v2, %v173_v11 }
 0x232   :  { %v1011_v46 = vpop.f32.mrf.mxu0  ;;  %v1051_v44 = vpop.f32.mrf.mxu1 }
 0x233   :  { %9055 = vpow2.f32 %v7906_v63  ;;  %v7908_v51 = vmul.f32 -1.442695, %v1116_v30  ;;  %v1130_v44 = vadd.f32 %v10165_v26, %v1048_v8 }
 0x234   :  { %v1012_v41 = vpop.f32.mrf.mxu0  ;;  %v1052_v22 = vpop.f32.mrf.mxu1 }
 0x235   :  { %v1103_v4 = vadd.f32 %v1052_v22, %v10123_v23 }
 0x237   :  { %v7907_v5 = vmul.f32 -1.442695, %v1103_v4  ;;  %v243_v4 = vadd.f32 %v10135_v47, %v10008_v12 }
 0x239   :  { %9057 = vpow2.f32 %v7907_v5 }
 0x23a   :  { %9059 = vpow2.f32 %v7908_v51 }
 0x240   :  { %v9056_v48 = vpop.eup %9055 }
 0x241   :  { %v1110_v57 = vadd.f32 1.0, %v9056_v48 }
 0x243   :  { %9061 = vrcp.f32 %v1110_v57 }
 0x246   :  { %v9058_v25 = vpop.eup %9057 }
 0x247   :  { %v1111_v34 = vadd.f32 1.0, %v9058_v25  ;;  %v9060_v42 = vpop.eup %9059 }
 0x248   :  { %v1124_v23 = vadd.f32 1.0, %v9060_v42 }
 0x249   :  { %9063 = vrcp.f32 %v1111_v34 }
 0x24e   :  { %v1089_v38 = vpop.f32.mrf.mxu0 }
 0x250   :  { %v9062_v63 = vpop.eup %9061  ;;  %v1090_v22 = vpop.f32.mrf.mxu0 }
 0x251   :  { %v1132_v28 = vmul.f32 %v9062_v63, %v1130_v44 }
 0x252   :  { %v1091_v11 = vpop.f32.mrf.mxu0 }
 0x253   :  { %v1134_v30 = vadd.f32 %v1132_v28, %v243_v4  ;;  %v1117_v48 = vadd.f32 %v1091_v11, %v10126_v36  ;;  %v12920_v11 = vld [vmem:[#allocation59_spill] sm:$0xff] }
 0x254   :  { %v1093_v41 = vpop.f32.mrf.mxu0 }
 0x255   :  { %9065 = vtanh.f32 %v1134_v30  ;;  %v7909_v57 = vmul.f32 -1.442695, %v1117_v48  ;;  %v1131_v46 = vadd.f32 %v10172_v50, %v1093_v41  ;;  %v12921_v30 = vld [vmem:[#allocation60_spill] sm:$0xff]  ;;  %v12922_v48 = vld [vmem:[#allocation61_spill] sm:$0xff]  ;;  %v12923_v41 = vld [vmem:[#allocation62_spill] sm:$0xff] }
 0x256   :  { %v9064_v51 = vpop.eup %9063  ;;  %9067 = vrcp.f32 %v1124_v23  ;;  %v12919_v23 = vld [vmem:[#allocation58_spill] sm:$0xff] }
 0x257   :  { %9069 = vpow2.f32 %v7909_v57  ;;  %v1133_v8 = vmul.f32 %v9064_v51, %v1131_v46  ;;  %v12924_v57 = vld [vmem:[#allocation63_spill] sm:$0xff]  ;;  %v12925_v46 = vld [vmem:[#allocation64_spill] sm:$0xff]  ;;  %v12926_v51 = vld [vmem:[#allocation65_spill] sm:$0xff] }
 0x259   :  { %v1135_v2 = vadd.f32 %v1133_v8, %v10149_v32  ;;  %v12927_v8 = vld [vmem:[#allocation66_spill] sm:$0xff] }
 0x25b   :  { %9071 = vtanh.f32 %v1135_v2  ;;  %v12928_v2 = vld [vmem:[#allocation67_spill] sm:$0xff] }
 0x262   :  { %v9066_v5 = vpop.eup %9065 }
 0x263   :  { %v9068_v25 = vpop.eup %9067  ;;  %v1138_v47 = vsub.f32 %v10176_v7, %v9066_v5 }
 0x264   :  { %v9070_v34 = vpop.eup %9069 }
 0x265   :  { %v1125_v38 = vadd.f32 1.0, %v9070_v34  ;;  %v1140_v42 = vmul.f32 %v9068_v25, %v1138_v47  ;;  %v12930_v25 = vld [vmem:[#allocation69_spill] sm:$0xff]  ;;  %v12931_v47 = vld [vmem:[#allocation70_spill] sm:$0xff]  ;;  %v12932_v34 = vld [vmem:[#allocation71_spill] sm:$0xff] }
 0x267   :  { %9073 = vrcp.f32 %v1125_v38  ;;  %v10345_v36 = vadd.f32 %v9066_v5, %v1140_v42  ;;  %v12929_v5 = vld [vmem:[#allocation68_spill] sm:$0xff] }
 0x268   :  { %v9072_v44 = vpop.eup %9071 }
 0x269   :  { %12917 = vst [vmem:[#allocation72_spill] sm:$0xff] %v10345_v36  ;;  %v1139_v63 = vsub.f32 %v10178_v9, %v9072_v44 }
 0x274   :  { %v9074_v22 = vpop.eup %9073 }
 0x275   :  { %v1141_v4 = vmul.f32 %v9074_v22, %v1139_v63 }
 0x277   :  { %v10348_v28 = vadd.f32 %v9072_v44, %v1141_v4  ;;  %v12933_v44 = vld [vmem:[#allocation22_spill] sm:$0xff] }
 0x279   :  { %12918 = vst [vmem:[#allocation73_spill] sm:$0xff] %v10348_v28  ;;  %v1146_v32 = vpack.c.bf16 %v10348_v28, %v10345_v36 }
 0x27b   :  { %1180 = vmatmul.mubr.bf16.vlgmr.msra.gmra.mxu1 %v1146_v32  ;;  %1221 = vmatmul.mubr.bf16.vlgmr.msra.gmra.mxu0 %v1146_v32 }
 0x27c   :  { %1230 = vmatpush1.bf16.msra.mxu1 %v10186_v40  ;;  %1261 = vmatprep.mubr.bf16.mxu1 %v12902_v61 }
 0x27d   :  { %1231 = vmatprep.subr.bf16.mxu1 %v10190_v60  ;;  %1322 = vmatpush1.bf16.msra.mxu0 %v10193_v15 }
 0x27e   :  { %1323 = vmatprep.subr.bf16.mxu0 %v10196_v18  ;;  %1353 = vmatprep.mubr.bf16.mxu0 %v12902_v61 }
 0x280   :  { %1232 = vmatpush1.bf16.msra.mxu1 %v10200_v37 }
 0x281   :  { %1233 = vmatprep.subr.bf16.mxu1 %v10203_v0  ;;  %1324 = vmatpush1.bf16.msra.mxu0 %v10206_v10 }
 0x282   :  { %1325 = vmatprep.subr.bf16.mxu0 %v10209_v14 }
 0x284   :  { %1234 = vmatpush1.bf16.msra.mxu1 %v10212_v20 }
 0x285   :  { %1235 = vmatprep.subr.bf16.mxu1 %v10215_v24  ;;  %1326 = vmatpush1.bf16.msra.mxu0 %v10218_v31 }
 0x286   :  { %1327 = vmatprep.subr.bf16.mxu0 %v10221_v13 }
 0x288   :  { %1236 = vmatpush1.bf16.msra.mxu1 %v10224_v54 }
 0x289   :  { %1237 = vmatprep.subr.bf16.mxu1 %v10227_v1  ;;  %1328 = vmatpush1.bf16.msra.mxu0 %v10230_v39 }
 0x28a   :  { %1329 = vmatprep.subr.bf16.mxu0 %v10233_v27 }
 0x28c   :  { %1238 = vmatpush1.bf16.msra.mxu1 %v10236_v35 }
 0x28d   :  { %1239 = vmatprep.subr.bf16.mxu1 %v10239_v17  ;;  %1330 = vmatpush1.bf16.msra.mxu0 %v10242_v19 }
 0x28e   :  { %1331 = vmatprep.subr.bf16.mxu0 %v10245_v16 }
 0x290   :  { %1240 = vmatpush1.bf16.msra.mxu1 %v10248_v45 }
 0x291   :  { %1241 = vmatprep.subr.bf16.mxu1 %v10251_v3  ;;  %1332 = vmatpush1.bf16.msra.mxu0 %v10254_v43 }
 0x292   :  { %1333 = vmatprep.subr.bf16.mxu0 %v10257_v62 }
 0x294   :  { %1242 = vmatpush1.bf16.msra.mxu1 %v10260_v55 }
 0x295   :  { %1243 = vmatprep.subr.bf16.mxu1 %v10263_v53  ;;  %1334 = vmatpush1.bf16.msra.mxu0 %v10266_v29 }
 0x296   :  { %1335 = vmatprep.subr.bf16.mxu0 %v10269_v58 }
 0x298   :  { %1244 = vmatpush1.bf16.msra.mxu1 %v10272_v49 }
 0x299   :  { %1362 = vmatprep.subr.bf16.mxu1 %v10275_v56  ;;  %1336 = vmatpush1.bf16.msra.mxu0 %v10278_v6 }
 0x29a   :  { %1403 = vmatprep.subr.bf16.mxu0 %v10281_v21 }
 0x29b   :  { %1262 = vmatmul.mubr.bf16.vlgmr.msra.gmra.mxu1 %v1146_v32 }
 0x29c   :  { %1363 = vmatpush1.bf16.msra.mxu1 %v10285_v59  ;;  %1394 = vmatprep.mubr.bf16.mxu1 %v12902_v61 }
 0x29d   :  { %1364 = vmatprep.subr.bf16.mxu1 %v10289_v52 }
 0x2a0   :  { %1365 = vmatpush1.bf16.msra.mxu1 %v12919_v23 }
 0x2a1   :  { %1366 = vmatprep.subr.bf16.mxu1 %v12920_v11 }
 0x2a4   :  { %1367 = vmatpush1.bf16.msra.mxu1 %v12921_v30 }
 0x2a5   :  { %1368 = vmatprep.subr.bf16.mxu1 %v12922_v48 }
 0x2a8   :  { %1369 = vmatpush1.bf16.msra.mxu1 %v12923_v41 }
 0x2a9   :  { %1370 = vmatprep.subr.bf16.mxu1 %v12924_v57 }
 0x2ac   :  { %1371 = vmatpush1.bf16.msra.mxu1 %v12925_v46 }
 0x2ad   :  { %1372 = vmatprep.subr.bf16.mxu1 %v12926_v51 }
 0x2b0   :  { %1373 = vmatpush1.bf16.msra.mxu1 %v12927_v8 }
 0x2b1   :  { %1374 = vmatprep.subr.bf16.mxu1 %v12928_v2  ;;  %v12934_v2 = vld [vmem:[#allocation43_spill] sm:$0xff] }
 0x2b4   :  { %1375 = vmatpush1.bf16.msra.mxu1 %v12929_v5 }
 0x2b5   :  { %1376 = vmatprep.subr.bf16.mxu1 %v12930_v25  ;;  %v12935_v25 = vld [vmem:[#allocation24_spill] sm:$0xff] }
 0x2b8   :  { %1377 = vmatpush1.bf16.msra.mxu1 %v12931_v47 }
 0x2b9   :  { %1495 = vmatprep.subr.bf16.mxu1 %v12932_v34 }
 0x33b   :  { %v1181_v38 = vpop.f32.mrf.mxu1  ;;  %v1222_v42 = vpop.f32.mrf.mxu0 }
 0x33c   :  { %v1276_v63 = vadd.f32 %v1181_v38, %v12933_v44 }
 0x33d   :  { %v1183_v22 = vpop.f32.mrf.mxu1  ;;  %v1224_v4 = vpop.f32.mrf.mxu0 }
 0x33e   :  { %v7910_v32 = vmul.f32 -1.442695, %v1276_v63  ;;  %v1290_v47 = vadd.f32 %v1183_v22, %v12935_v25 }
 0x33f   :  { %v1185_v9 = vpop.f32.mrf.mxu1  ;;  %v1225_v7 = vpop.f32.mrf.mxu0 }
 0x340   :  { %9075 = vpow2.f32 %v7910_v32  ;;  %v7912_v51 = vmul.f32 -1.442695, %v1290_v47  ;;  %v1304_v7 = vadd.f32 %v10165_v26, %v1222_v42  ;;  %v12936_v32 = vld [vmem:[#allocation20_spill] sm:$0xff]  ;;  %v12938_v47 = vld [vmem:[#allocation46_spill] sm:$0xff] }
 0x341   :  { %v1186_v12 = vpop.f32.mrf.mxu1  ;;  %v1226_v33 = vpop.f32.mrf.mxu0  ;;  %v12940_v42 = vld [vmem:[#allocation54_spill] sm:$0xff] }
 0x342   :  { %v1277_v5 = vadd.f32 %v1226_v33, %v12934_v2  ;;  %v12937_v33 = vld [vmem:[#allocation45_spill] sm:$0xff] }
 0x343   :  { %v395_v2 = vadd.f32 %v12937_v33, %v12936_v32  ;;  %v12953_v32 = vld [vmem:[#allocation39_spill] sm:$0xff] }
 0x344   :  { %v7911_v8 = vmul.f32 -1.442695, %v1277_v5 }
 0x346   :  { %9077 = vpow2.f32 %v7911_v8 }
 0x347   :  { %9079 = vpow2.f32 %v7912_v51 }
 0x34d   :  { %v9076_v34 = vpop.eup %9075 }
 0x34e   :  { %v1284_v46 = vadd.f32 1.0, %v9076_v34 }
 0x350   :  { %9081 = vrcp.f32 %v1284_v46 }
 0x353   :  { %v9078_v38 = vpop.eup %9077 }
 0x354   :  { %v1285_v44 = vadd.f32 1.0, %v9078_v38  ;;  %v9080_v9 = vpop.eup %9079 }
 0x355   :  { %v1298_v5 = vadd.f32 1.0, %v9080_v9 }
 0x356   :  { %9083 = vrcp.f32 %v1285_v44 }
 0x35b   :  { %v1263_v63 = vpop.f32.mrf.mxu1 }
 0x35c   :  { %v12939_v63 = vld [vmem:[#allocation48_spill] sm:$0xff] }
 0x35d   :  { %v9082_v12 = vpop.eup %9081  ;;  %v1264_v4 = vpop.f32.mrf.mxu1  ;;  %v461_v26 = vadd.f32 %v12940_v42, %v12939_v63  ;;  %v12947_v42 = vld [vmem:[#allocation67_spill] sm:$0xff] }
 0x35e   :  { %v1306_v8 = vmul.f32 %v9082_v12, %v1304_v7 }
 0x35f   :  { %v1265_v25 = vpop.f32.mrf.mxu1 }
 0x360   :  { %v1308_v22 = vadd.f32 %v1306_v8, %v12938_v47  ;;  %v1291_v34 = vadd.f32 %v1265_v25, %v395_v2 }
 0x361   :  { %v1267_v51 = vpop.f32.mrf.mxu1 }
 0x362   :  { %9085 = vtanh.f32 %v1308_v22  ;;  %v7913_v46 = vmul.f32 -1.442695, %v1291_v34  ;;  %v1305_v38 = vadd.f32 %v10172_v50, %v1267_v51 }
 0x363   :  { %v9084_v44 = vpop.eup %9083  ;;  %9087 = vrcp.f32 %v1298_v5 }
 0x364   :  { %9089 = vpow2.f32 %v7913_v46  ;;  %v1307_v4 = vmul.f32 %v9084_v44, %v1305_v38  ;;  %v12944_v46 = vld [vmem:[#allocation64_spill] sm:$0xff]  ;;  %v12945_v38 = vld [vmem:[#allocation65_spill] sm:$0xff]  ;;  %v12946_v44 = vld [vmem:[#allocation66_spill] sm:$0xff] }
 0x366   :  { %v1309_v57 = vadd.f32 %v1307_v4, %v461_v26  ;;  %v12948_v4 = vld [vmem:[#allocation68_spill] sm:$0xff] }
 0x368   :  { %9091 = vtanh.f32 %v1309_v57  ;;  %v12943_v57 = vld [vmem:[#allocation63_spill] sm:$0xff] }
 0x36f   :  { %v9086_v33 = vpop.eup %9085 }
 0x370   :  { %v9088_v7 = vpop.eup %9087  ;;  %v1312_v9 = vsub.f32 %v10345_v36, %v9086_v33 }
 0x371   :  { %v9090_v12 = vpop.eup %9089 }
 0x372   :  { %v1299_v2 = vadd.f32 1.0, %v9090_v12  ;;  %v1314_v8 = vmul.f32 %v9088_v7, %v1312_v9  ;;  %v12950_v7 = vld [vmem:[#allocation70_spill] sm:$0xff]  ;;  %v12951_v9 = vld [vmem:[#allocation71_spill] sm:$0xff] }
 0x374   :  { %9093 = vrcp.f32 %v1299_v2  ;;  %v10414_v25 = vadd.f32 %v9086_v33, %v1314_v8  ;;  %v12949_v33 = vld [vmem:[#allocation69_spill] sm:$0xff]  ;;  %v12952_v8 = vld [vmem:[#allocation26_spill] sm:$0xff] }
 0x375   :  { %v9092_v47 = vpop.eup %9091 }
 0x376   :  { %12941 = vst [vmem:[#allocation58_spill] sm:$0xff] %v10414_v25  ;;  %v1313_v5 = vsub.f32 %v10348_v28, %v9092_v47 }
 0x381   :  { %v9094_v22 = vpop.eup %9093 }
 0x382   :  { %v1315_v34 = vmul.f32 %v9094_v22, %v1313_v5 }
 0x384   :  { %v10417_v51 = vadd.f32 %v9092_v47, %v1315_v34 }
 0x386   :  { %12942 = vst [vmem:[#allocation59_spill] sm:$0xff] %v10417_v51  ;;  %v1320_v26 = vpack.c.bf16 %v10417_v51, %v10414_v25 }
 0x388   :  { %1354 = vmatmul.mubr.bf16.vlgmr.msra.gmra.mxu0 %v1320_v26  ;;  %1395 = vmatmul.mubr.bf16.vlgmr.msra.gmra.mxu1 %v1320_v26 }
 0x389   :  { %1404 = vmatpush1.bf16.msra.mxu0 %v10186_v40  ;;  %1435 = vmatprep.mubr.bf16.mxu0 %v12902_v61 }
 0x38a   :  { %1405 = vmatprep.subr.bf16.mxu0 %v10190_v60  ;;  %1496 = vmatpush1.bf16.msra.mxu1 %v10193_v15 }
 0x38b   :  { %1497 = vmatprep.subr.bf16.mxu1 %v10196_v18  ;;  %1527 = vmatprep.mubr.bf16.mxu1 %v12902_v61 }
 0x38d   :  { %1406 = vmatpush1.bf16.msra.mxu0 %v10200_v37 }
 0x38e   :  { %1407 = vmatprep.subr.bf16.mxu0 %v10203_v0  ;;  %1498 = vmatpush1.bf16.msra.mxu1 %v10206_v10 }
 0x38f   :  { %1499 = vmatprep.subr.bf16.mxu1 %v10209_v14 }
 0x391   :  { %1408 = vmatpush1.bf16.msra.mxu0 %v10212_v20 }
 0x392   :  { %1409 = vmatprep.subr.bf16.mxu0 %v10215_v24  ;;  %1500 = vmatpush1.bf16.msra.mxu1 %v10218_v31 }
 0x393   :  { %1501 = vmatprep.subr.bf16.mxu1 %v10221_v13 }
 0x395   :  { %1410 = vmatpush1.bf16.msra.mxu0 %v10224_v54 }
 0x396   :  { %1411 = vmatprep.subr.bf16.mxu0 %v10227_v1  ;;  %1502 = vmatpush1.bf16.msra.mxu1 %v10230_v39 }
 0x397   :  { %1503 = vmatprep.subr.bf16.mxu1 %v10233_v27 }
 0x399   :  { %1412 = vmatpush1.bf16.msra.mxu0 %v10236_v35 }
 0x39a   :  { %1413 = vmatprep.subr.bf16.mxu0 %v10239_v17  ;;  %1504 = vmatpush1.bf16.msra.mxu1 %v10242_v19 }
 0x39b   :  { %1505 = vmatprep.subr.bf16.mxu1 %v10245_v16 }
 0x39d   :  { %1414 = vmatpush1.bf16.msra.mxu0 %v10248_v45 }
 0x39e   :  { %1415 = vmatprep.subr.bf16.mxu0 %v10251_v3  ;;  %1506 = vmatpush1.bf16.msra.mxu1 %v10254_v43 }
 0x39f   :  { %1507 = vmatprep.subr.bf16.mxu1 %v10257_v62 }
 0x3a1   :  { %1416 = vmatpush1.bf16.msra.mxu0 %v10260_v55 }
 0x3a2   :  { %1417 = vmatprep.subr.bf16.mxu0 %v10263_v53  ;;  %1508 = vmatpush1.bf16.msra.mxu1 %v10266_v29 }
 0x3a3   :  { %1509 = vmatprep.subr.bf16.mxu1 %v10269_v58 }
 0x3a5   :  { %1418 = vmatpush1.bf16.msra.mxu0 %v10272_v49 }
 0x3a6   :  { %1536 = vmatprep.subr.bf16.mxu0 %v10275_v56  ;;  %1510 = vmatpush1.bf16.msra.mxu1 %v10278_v6 }
 0x3a7   :  { %1577 = vmatprep.subr.bf16.mxu1 %v10281_v21 }
 0x3a8   :  { %1436 = vmatmul.mubr.bf16.vlgmr.msra.gmra.mxu0 %v1320_v26 }
 0x3a9   :  { %1537 = vmatpush1.bf16.msra.mxu0 %v10285_v59  ;;  %1568 = vmatprep.mubr.bf16.mxu0 %v12902_v61 }
 0x3aa   :  { %1538 = vmatprep.subr.bf16.mxu0 %v10289_v52 }
 0x3ad   :  { %1539 = vmatpush1.bf16.msra.mxu0 %v12919_v23 }
 0x3ae   :  { %1540 = vmatprep.subr.bf16.mxu0 %v12920_v11 }
 0x3b1   :  { %1541 = vmatpush1.bf16.msra.mxu0 %v12921_v30 }
 0x3b2   :  { %1542 = vmatprep.subr.bf16.mxu0 %v12922_v48 }
 0x3b5   :  { %1543 = vmatpush1.bf16.msra.mxu0 %v12923_v41 }
 0x3b6   :  { %1544 = vmatprep.subr.bf16.mxu0 %v12943_v57 }
 0x3b9   :  { %1545 = vmatpush1.bf16.msra.mxu0 %v12944_v46 }
 0x3ba   :  { %1546 = vmatprep.subr.bf16.mxu0 %v12945_v38 }
 0x3bd   :  { %1547 = vmatpush1.bf16.msra.mxu0 %v12946_v44  ;;  %v12955_v44 = vld [vmem:[#allocation28_spill] sm:$0xff] }
 0x3be   :  { %1548 = vmatprep.subr.bf16.mxu0 %v12947_v42 }
 0x3c1   :  { %1549 = vmatpush1.bf16.msra.mxu0 %v12948_v4 }
 0x3c2   :  { %1550 = vmatprep.subr.bf16.mxu0 %v12949_v33  ;;  %v12954_v33 = vld [vmem:[#allocation21_spill] sm:$0xff] }
 0x3c5   :  { %1551 = vmatpush1.bf16.msra.mxu0 %v12950_v7  ;;  %v183_v7 = vadd.f32 %v12955_v44, %v12954_v33  ;;  %v12957_v44 = vld [vmem:[#allocation47_spill] sm:$0xff] }
 0x3c6   :  { %1669 = vmatprep.subr.bf16.mxu0 %v12951_v9 }
 0x448   :  { %v1355_v12 = vpop.f32.mrf.mxu0  ;;  %v1396_v2 = vpop.f32.mrf.mxu1 }
 0x449   :  { %v1450_v47 = vadd.f32 %v1355_v12, %v12952_v8 }
 0x44a   :  { %v1357_v5 = vpop.f32.mrf.mxu0  ;;  %v1398_v22 = vpop.f32.mrf.mxu1 }
 0x44b   :  { %v7914_v34 = vmul.f32 -1.442695, %v1450_v47  ;;  %v1464_v9 = vadd.f32 %v1357_v5, %v183_v7  ;;  %v12958_v7 = vld [vmem:[#allocation41_spill] sm:$0xff] }
 0x44c   :  { %v1359_v26 = vpop.f32.mrf.mxu0  ;;  %v1399_v28 = vpop.f32.mrf.mxu1 }
 0x44d   :  { %9095 = vpow2.f32 %v7914_v34  ;;  %v7916_v38 = vmul.f32 -1.442695, %v1464_v9 }
 0x44e   :  { %v1360_v36 = vpop.f32.mrf.mxu0  ;;  %v1400_v63 = vpop.f32.mrf.mxu1 }
 0x44f   :  { %v1451_v4 = vadd.f32 %v1400_v63, %v12953_v32  ;;  %v12956_v36 = vld [vmem:[#allocation55_spill] sm:$0xff] }
 0x450   :  { %v1478_v22 = vadd.f32 %v12956_v36, %v1396_v2 }
 0x451   :  { %v7915_v42 = vmul.f32 -1.442695, %v1451_v4 }
 0x453   :  { %9097 = vpow2.f32 %v7915_v42 }
 0x454   :  { %9099 = vpow2.f32 %v7916_v38 }
 0x45a   :  { %v9096_v46 = vpop.eup %9095 }
 0x45b   :  { %v1458_v57 = vadd.f32 1.0, %v9096_v46 }
 0x45d   :  { %9101 = vrcp.f32 %v1458_v57 }
 0x460   :  { %v9098_v12 = vpop.eup %9097 }
 0x461   :  { %v1459_v8 = vadd.f32 1.0, %v9098_v12  ;;  %v9100_v47 = vpop.eup %9099 }
 0x462   :  { %v1472_v4 = vadd.f32 1.0, %v9100_v47 }
 0x463   :  { %9103 = vrcp.f32 %v1459_v8  ;;  %v12959_v8 = vld [vmem:[#allocation53_spill] sm:$0xff] }
 0x468   :  { %v1437_v28 = vpop.f32.mrf.mxu0 }
 0x46a   :  { %v9102_v34 = vpop.eup %9101  ;;  %v1438_v32 = vpop.f32.mrf.mxu0 }
 0x46b   :  { %v1480_v63 = vmul.f32 %v9102_v34, %v1478_v22 }
 0x46c   :  { %v1439_v26 = vpop.f32.mrf.mxu0 }
 0x46d   :  { %v1482_v42 = vadd.f32 %v1480_v63, %v12957_v44  ;;  %v1465_v9 = vadd.f32 %v1439_v26, %v12958_v7 }
 0x46e   :  { %v1441_v5 = vpop.f32.mrf.mxu0 }
 0x46f   :  { %9105 = vtanh.f32 %v1482_v42  ;;  %v7917_v46 = vmul.f32 -1.442695, %v1465_v9  ;;  %v1479_v57 = vadd.f32 %v10172_v50, %v1441_v5 }
 0x470   :  { %v9104_v38 = vpop.eup %9103  ;;  %9107 = vrcp.f32 %v1472_v4 }
 0x471   :  { %9109 = vpow2.f32 %v7917_v46  ;;  %v1481_v12 = vmul.f32 %v9104_v38, %v1479_v57  ;;  %v12960_v46 = vld [vmem:[#allocation63_spill] sm:$0xff]  ;;  %v12961_v57 = vld [vmem:[#allocation64_spill] sm:$0xff]  ;;  %v12962_v38 = vld [vmem:[#allocation65_spill] sm:$0xff] }
 0x473   :  { %v1483_v2 = vadd.f32 %v1481_v12, %v12959_v8  ;;  %v12963_v12 = vld [vmem:[#allocation66_spill] sm:$0xff]  ;;  %v12964_v8 = vld [vmem:[#allocation67_spill] sm:$0xff] }
 0x475   :  { %9111 = vtanh.f32 %v1483_v2  ;;  %v12965_v2 = vld [vmem:[#allocation68_spill] sm:$0xff] }
 0x47c   :  { %v9106_v28 = vpop.eup %9105 }
 0x47d   :  { %v9108_v32 = vpop.eup %9107  ;;  %v1486_v47 = vsub.f32 %v10414_v25, %v9106_v28 }
 0x47e   :  { %v9110_v22 = vpop.eup %9109 }
 0x47f   :  { %v1473_v34 = vadd.f32 1.0, %v9110_v22  ;;  %v1488_v63 = vmul.f32 %v9108_v32, %v1486_v47  ;;  %v12967_v32 = vld [vmem:[#allocation70_spill] sm:$0xff]  ;;  %v12968_v47 = vld [vmem:[#allocation71_spill] sm:$0xff] }
 0x481   :  { %9113 = vrcp.f32 %v1473_v34  ;;  %v10482_v26 = vadd.f32 %v9106_v28, %v1488_v63  ;;  %v12966_v28 = vld [vmem:[#allocation69_spill] sm:$0xff]  ;;  %v12969_v63 = vld [vmem:[#allocation30_spill] sm:$0xff] }
 0x482   :  { %v9112_v44 = vpop.eup %9111 }
 0x483   :  { %v1487_v42 = vsub.f32 %v10417_v51, %v9112_v44 }
 0x48e   :  { %v9114_v7 = vpop.eup %9113 }
 0x48f   :  { %v1489_v4 = vmul.f32 %v9114_v7, %v1487_v42 }
 0x491   :  { %v10485_v9 = vadd.f32 %v9112_v44, %v1489_v4 }
 0x493   :  { %v1494_v5 = vpack.c.bf16 %v10485_v9, %v10482_v26 }
 0x495   :  { %1528 = vmatmul.mubr.bf16.vlgmr.msra.gmra.mxu1 %v1494_v5  ;;  %1569 = vmatmul.mubr.bf16.vlgmr.msra.gmra.mxu0 %v1494_v5 }
 0x496   :  { %1578 = vmatpush1.bf16.msra.mxu1 %v10186_v40  ;;  %1609 = vmatprep.mubr.bf16.mxu1 %v12902_v61 }
 0x497   :  { %1579 = vmatprep.subr.bf16.mxu1 %v10190_v60  ;;  %1670 = vmatpush1.bf16.msra.mxu0 %v10193_v15 }
 0x498   :  { %1671 = vmatprep.subr.bf16.mxu0 %v10196_v18  ;;  %1701 = vmatprep.mubr.bf16.mxu0 %v12902_v61 }
 0x49a   :  { %1580 = vmatpush1.bf16.msra.mxu1 %v10200_v37 }
 0x49b   :  { %1581 = vmatprep.subr.bf16.mxu1 %v10203_v0  ;;  %1672 = vmatpush1.bf16.msra.mxu0 %v10206_v10 }
 0x49c   :  { %1673 = vmatprep.subr.bf16.mxu0 %v10209_v14 }
 0x49e   :  { %1582 = vmatpush1.bf16.msra.mxu1 %v10212_v20 }
 0x49f   :  { %1583 = vmatprep.subr.bf16.mxu1 %v10215_v24  ;;  %1674 = vmatpush1.bf16.msra.mxu0 %v10218_v31 }
 0x4a0   :  { %1675 = vmatprep.subr.bf16.mxu0 %v10221_v13 }
 0x4a2   :  { %1584 = vmatpush1.bf16.msra.mxu1 %v10224_v54 }
 0x4a3   :  { %1585 = vmatprep.subr.bf16.mxu1 %v10227_v1  ;;  %1676 = vmatpush1.bf16.msra.mxu0 %v10230_v39 }
 0x4a4   :  { %1677 = vmatprep.subr.bf16.mxu0 %v10233_v27 }
 0x4a6   :  { %1586 = vmatpush1.bf16.msra.mxu1 %v10236_v35 }
 0x4a7   :  { %1587 = vmatprep.subr.bf16.mxu1 %v10239_v17  ;;  %1678 = vmatpush1.bf16.msra.mxu0 %v10242_v19 }
 0x4a8   :  { %1679 = vmatprep.subr.bf16.mxu0 %v10245_v16 }
 0x4aa   :  { %1588 = vmatpush1.bf16.msra.mxu1 %v10248_v45 }
 0x4ab   :  { %1589 = vmatprep.subr.bf16.mxu1 %v10251_v3  ;;  %1680 = vmatpush1.bf16.msra.mxu0 %v10254_v43 }
 0x4ac   :  { %1681 = vmatprep.subr.bf16.mxu0 %v10257_v62 }
 0x4ae   :  { %1590 = vmatpush1.bf16.msra.mxu1 %v10260_v55 }
 0x4af   :  { %1591 = vmatprep.subr.bf16.mxu1 %v10263_v53  ;;  %1682 = vmatpush1.bf16.msra.mxu0 %v10266_v29 }
 0x4b0   :  { %1683 = vmatprep.subr.bf16.mxu0 %v10269_v58 }
 0x4b2   :  { %1592 = vmatpush1.bf16.msra.mxu1 %v10272_v49 }
 0x4b3   :  { %1710 = vmatprep.subr.bf16.mxu1 %v10275_v56  ;;  %1684 = vmatpush1.bf16.msra.mxu0 %v10278_v6 }
 0x4b4   :  { %1751 = vmatprep.subr.bf16.mxu0 %v10281_v21 }
 0x4b5   :  { %1610 = vmatmul.mubr.bf16.vlgmr.msra.gmra.mxu1 %v1494_v5 }
 0x4b6   :  { %1711 = vmatpush1.bf16.msra.mxu1 %v10285_v59  ;;  %1742 = vmatprep.mubr.bf16.mxu1 %v12902_v61 }
 0x4b7   :  { %1712 = vmatprep.subr.bf16.mxu1 %v10289_v52 }
 0x4ba   :  { %1713 = vmatpush1.bf16.msra.mxu1 %v12919_v23 }
 0x4bb   :  { %1714 = vmatprep.subr.bf16.mxu1 %v12920_v11 }
 0x4be   :  { %1715 = vmatpush1.bf16.msra.mxu1 %v12921_v30 }
 0x4bf   :  { %1716 = vmatprep.subr.bf16.mxu1 %v12922_v48 }
 0x4c2   :  { %1717 = vmatpush1.bf16.msra.mxu1 %v12923_v41 }
 0x4c3   :  { %1718 = vmatprep.subr.bf16.mxu1 %v12960_v46 }
 0x4c6   :  { %1719 = vmatpush1.bf16.msra.mxu1 %v12961_v57 }
 0x4c7   :  { %1720 = vmatprep.subr.bf16.mxu1 %v12962_v38 }
 0x4ca   :  { %1721 = vmatpush1.bf16.msra.mxu1 %v12963_v12 }
 0x4cb   :  { %1722 = vmatprep.subr.bf16.mxu1 %v12964_v8  ;;  %v12970_v8 = vld [vmem:[#allocation35_spill] sm:$0xff] }
 0x4ce   :  { %1723 = vmatpush1.bf16.msra.mxu1 %v12965_v2 }
 0x4cf   :  { %1724 = vmatprep.subr.bf16.mxu1 %v12966_v28  ;;  %v12971_v28 = vld [vmem:[#allocation32_spill] sm:$0xff] }
 0x4d2   :  { %1725 = vmatpush1.bf16.msra.mxu1 %v12967_v32 }
 0x4d3   :  { %1843 = vmatprep.subr.bf16.mxu1 %v12968_v47 }
 0x555   :  { %v1529_v22 = vpop.f32.mrf.mxu1  ;;  %v1570_v34 = vpop.f32.mrf.mxu0 }
 0x556   :  { %v1624_v44 = vadd.f32 %v1529_v22, %v12969_v63 }
 0x557   :  { %v1531_v42 = vpop.f32.mrf.mxu1  ;;  %v1572_v7 = vpop.f32.mrf.mxu0 }
 0x558   :  { %v7918_v4 = vmul.f32 -1.442695, %v1624_v44  ;;  %v1638_v32 = vadd.f32 %v1531_v42, %v12971_v28 }
 0x559   :  { %v1533_v5 = vpop.f32.mrf.mxu1  ;;  %v1573_v51 = vpop.f32.mrf.mxu0 }
 0x55a   :  { %9115 = vpow2.f32 %v7918_v4  ;;  %v7920_v38 = vmul.f32 -1.442695, %v1638_v32  ;;  %v1652_v51 = vadd.f32 %v12956_v36, %v1570_v34  ;;  %v12972_v5 = vld [vmem:[#allocation20_spill] sm:$0xff]  ;;  %v12975_v34 = vld [vmem:[#allocation51_spill] sm:$0xff] }
 0x55b   :  { %v1534_v25 = vpop.f32.mrf.mxu1  ;;  %v1574_v33 = vpop.f32.mrf.mxu0  ;;  %v12974_v32 = vld [vmem:[#allocation16_spill] sm:$0xff] }
 0x55c   :  { %v1625_v2 = vadd.f32 %v1574_v33, %v12970_v8  ;;  %v12973_v33 = vld [vmem:[#allocation37_spill] sm:$0xff] }
 0x55d   :  { %v385_v8 = vadd.f32 %v12973_v33, %v12972_v5 }
 0x55e   :  { %v7919_v12 = vmul.f32 -1.442695, %v1625_v2 }
 0x560   :  { %9117 = vpow2.f32 %v7919_v12 }
 0x561   :  { %9119 = vpow2.f32 %v7920_v38 }
 0x567   :  { %v9116_v47 = vpop.eup %9115 }
 0x568   :  { %v1632_v57 = vadd.f32 1.0, %v9116_v47 }
 0x56a   :  { %9121 = vrcp.f32 %v1632_v57 }
 0x56d   :  { %v9118_v22 = vpop.eup %9117 }
 0x56e   :  { %v1633_v63 = vadd.f32 1.0, %v9118_v22  ;;  %v9120_v7 = vpop.eup %9119 }
 0x56f   :  { %v1646_v2 = vadd.f32 1.0, %v9120_v7 }
 0x570   :  { %9123 = vrcp.f32 %v1633_v63 }
 0x575   :  { %v1611_v44 = vpop.f32.mrf.mxu1 }
 0x577   :  { %v9122_v25 = vpop.eup %9121  ;;  %v1612_v4 = vpop.f32.mrf.mxu1 }
 0x578   :  { %v1654_v12 = vmul.f32 %v9122_v25, %v1652_v51 }
 0x579   :  { %v1613_v28 = vpop.f32.mrf.mxu1 }
 0x57a   :  { %v1656_v42 = vadd.f32 %v1654_v12, %v12974_v32  ;;  %v1639_v47 = vadd.f32 %v1613_v28, %v385_v8 }
 0x57b   :  { %v1615_v38 = vpop.f32.mrf.mxu1 }
 0x57c   :  { %9125 = vtanh.f32 %v1656_v42  ;;  %v7921_v57 = vmul.f32 -1.442695, %v1639_v47  ;;  %v1653_v22 = vadd.f32 %v10172_v50, %v1615_v38 }
 0x57d   :  { %v9124_v63 = vpop.eup %9123  ;;  %9127 = vrcp.f32 %v1646_v2 }
 0x57e   :  { %9129 = vpow2.f32 %v7921_v57  ;;  %v1655_v36 = vmul.f32 %v9124_v63, %v1653_v22 }
 0x580   :  { %v1657_v44 = vadd.f32 %v1655_v36, %v12975_v34  ;;  %v12991_v36 = vld [vmem:[#allocation33_spill] sm:$0xff] }
 0x582   :  { %9131 = vtanh.f32 %v1657_v44 }
 0x589   :  { %v9126_v4 = vpop.eup %9125 }
 0x58a   :  { %v9128_v46 = vpop.eup %9127  ;;  %v1660_v7 = vsub.f32 %v10482_v26, %v9126_v4 }
 0x58b   :  { %v9130_v51 = vpop.eup %9129 }
 0x58c   :  { %v1647_v25 = vadd.f32 1.0, %v9130_v51  ;;  %v1662_v33 = vmul.f32 %v9128_v46, %v1660_v7  ;;  %v12990_v46 = vld [vmem:[#allocation19_spill] sm:$0xff]  ;;  %v10624_v7 = vld [vmem:[%s12697_s5 + $0x1] ss:$0 sm:$0xff] }
 0x58e   :  { %9133 = vrcp.f32 %v1647_v25  ;;  %v10550_v8 = vadd.f32 %v9126_v4, %v1662_v33 }
 0x58f   :  { %v9132_v12 = vpop.eup %9131 }
 0x590   :  { %v1661_v50 = vsub.f32 %v10485_v9, %v9132_v12 }
 0x59b   :  { %v9134_v28 = vpop.eup %9133 }
 0x59c   :  { %v1663_v2 = vmul.f32 %v9134_v28, %v1661_v50 }
 0x59e   :  { %v10553_v32 = vadd.f32 %v9132_v12, %v1663_v2  ;;  %v12992_v12 = vld [vmem:[#allocation49_spill] sm:$0xff] }
 0x5a0   :  { %v1668_v42 = vpack.c.bf16 %v10553_v32, %v10550_v8 }
 0x5a2   :  { %1702 = vmatmul.mubr.bf16.vlgmr.msra.gmra.mxu0 %v1668_v42  ;;  %1743 = vmatmul.mubr.bf16.vlgmr.msra.gmra.mxu1 %v1668_v42 }
 0x5a3   :  { %1752 = vmatpush1.bf16.msra.mxu0 %v10186_v40  ;;  %1783 = vmatprep.mubr.bf16.mxu0 %v12902_v61 }
 0x5a4   :  { %1753 = vmatprep.subr.bf16.mxu0 %v10190_v60  ;;  %1844 = vmatpush1.bf16.msra.mxu1 %v10193_v15 }
 0x5a5   :  { %1845 = vmatprep.subr.bf16.mxu1 %v10196_v18  ;;  %1875 = vmatprep.mubr.bf16.mxu1 %v12902_v61 }
 0x5a7   :  { %1754 = vmatpush1.bf16.msra.mxu0 %v10200_v37  ;;  %v12986_v37 = vld [vmem:[#allocation31_spill] sm:$0xff] }
 0x5a8   :  { %1755 = vmatprep.subr.bf16.mxu0 %v10203_v0  ;;  %1846 = vmatpush1.bf16.msra.mxu1 %v10206_v10 }
 0x5a9   :  { %1847 = vmatprep.subr.bf16.mxu1 %v10209_v14  ;;  %v12987_v14 = vld [vmem:[#allocation21_spill] sm:$0xff] }
 0x5ab   :  { %1756 = vmatpush1.bf16.msra.mxu0 %v10212_v20  ;;  %v12988_v20 = vld [vmem:[#allocation36_spill] sm:$0xff] }
 0x5ac   :  { %1757 = vmatprep.subr.bf16.mxu0 %v10215_v24  ;;  %1848 = vmatpush1.bf16.msra.mxu1 %v10218_v31  ;;  %v193_v24 = vadd.f32 %v12988_v20, %v12987_v14  ;;  %v10663_v20 = vld [vmem:[#allocation8 + $0xa4] ss:$24 sps:$4 sm:$0xff]  }
 0x5ad   :  { %1849 = vmatprep.subr.bf16.mxu1 %v10221_v13 }
 0x5af   :  { %1758 = vmatpush1.bf16.msra.mxu0 %v10224_v54 }
 0x5b0   :  { %1759 = vmatprep.subr.bf16.mxu0 %v10227_v1  ;;  %1850 = vmatpush1.bf16.msra.mxu1 %v10230_v39 }
 0x5b1   :  { %1851 = vmatprep.subr.bf16.mxu1 %v10233_v27 }
 0x5b3   :  { %1760 = vmatpush1.bf16.msra.mxu0 %v10236_v35 }
 0x5b4   :  { %1761 = vmatprep.subr.bf16.mxu0 %v10239_v17  ;;  %1852 = vmatpush1.bf16.msra.mxu1 %v10242_v19 }
 0x5b5   :  { %1853 = vmatprep.subr.bf16.mxu1 %v10245_v16  ;;  %v12976_v16 = vld [vmem:[#allocation63_spill] sm:$0xff] }
 0x5b7   :  { %1762 = vmatpush1.bf16.msra.mxu0 %v10248_v45  ;;  %v12980_v45 = vld [vmem:[#allocation67_spill] sm:$0xff] }
 0x5b8   :  { %1763 = vmatprep.subr.bf16.mxu0 %v10251_v3  ;;  %1854 = vmatpush1.bf16.msra.mxu1 %v10254_v43  ;;  %v12979_v43 = vld [vmem:[#allocation66_spill] sm:$0xff] }
 0x5b9   :  { %1855 = vmatprep.subr.bf16.mxu1 %v10257_v62  ;;  %v12985_v62 = vld [vmem:[#allocation34_spill] sm:$0xff] }
 0x5bb   :  { %1764 = vmatpush1.bf16.msra.mxu0 %v10260_v55 }
 0x5bc   :  { %1765 = vmatprep.subr.bf16.mxu0 %v10263_v53  ;;  %1856 = vmatpush1.bf16.msra.mxu1 %v10266_v29  ;;  %v12978_v29 = vld [vmem:[#allocation65_spill] sm:$0xff]  ;;  %v12983_v53 = vld [vmem:[#allocation70_spill] sm:$0xff] }
 0x5bd   :  { %1857 = vmatprep.subr.bf16.mxu1 %v10269_v58 }
 0x5bf   :  { %1766 = vmatpush1.bf16.msra.mxu0 %v10272_v49  ;;  %v12981_v49 = vld [vmem:[#allocation68_spill] sm:$0xff] }
 0x5c0   :  { %1884 = vmatprep.subr.bf16.mxu0 %v10275_v56  ;;  %1858 = vmatpush1.bf16.msra.mxu1 %v10278_v6  ;;  %v12984_v56 = vld [vmem:[#allocation71_spill] sm:$0xff] }
 0x5c1   :  { %1925 = vmatprep.subr.bf16.mxu1 %v10281_v21  ;;  %v12977_v21 = vld [vmem:[#allocation64_spill] sm:$0xff] }
 0x5c2   :  { %1784 = vmatmul.mubr.bf16.vlgmr.msra.gmra.mxu0 %v1668_v42 }
 0x5c3   :  { %1885 = vmatpush1.bf16.msra.mxu0 %v10285_v59  ;;  %1916 = vmatprep.mubr.bf16.mxu0 %v12902_v61 }
 0x5c4   :  { %1886 = vmatprep.subr.bf16.mxu0 %v10289_v52  ;;  %v12982_v52 = vld [vmem:[#allocation69_spill] sm:$0xff] }
 0x5c7   :  { %1887 = vmatpush1.bf16.msra.mxu0 %v12919_v23  ;;  %v10615_v23 = vld [vmem:[%s12697_s5] ss:$0 sm:$0xff] }
 0x5c8   :  { %1888 = vmatprep.subr.bf16.mxu0 %v12920_v11 }
 0x5cb   :  { %1889 = vmatpush1.bf16.msra.mxu0 %v12921_v30 }
 0x5cc   :  { %1890 = vmatprep.subr.bf16.mxu0 %v12922_v48 }
 0x5cf   :  { %1891 = vmatpush1.bf16.msra.mxu0 %v12923_v41  ;;  %v12989_v41 = vld [vmem:[#allocation13_spill] sm:$0xff] }
 0x5d0   :  { %1892 = vmatprep.subr.bf16.mxu0 %v12976_v16  ;;  %v259_v47 = vadd.f32 %v12990_v46, %v12989_v41  ;;  %v9581_v41 = vld [vmem:[#allocation8 + $0x30] ss:$24 sps:$4 sm:$0xff]   ;;  %v9582_v46 = vld [vmem:[#allocation8 + $0x4] ss:$24 sps:$4 sm:$0xff]  }
 0x5d3   :  { %1893 = vmatpush1.bf16.msra.mxu0 %v12977_v21 }
 0x5d4   :  { %1894 = vmatprep.subr.bf16.mxu0 %v12978_v29 }
 0x5d7   :  { %1895 = vmatpush1.bf16.msra.mxu0 %v12979_v43 }
 0x5d8   :  { %1896 = vmatprep.subr.bf16.mxu0 %v12980_v45 }
 0x5db   :  { %1897 = vmatpush1.bf16.msra.mxu0 %v12981_v49 }
 0x5dc   :  { %1898 = vmatprep.subr.bf16.mxu0 %v12982_v52 }
 0x5df   :  { %1899 = vmatpush1.bf16.msra.mxu0 %v12983_v53 }
 0x5e0   :  { %2017 = vmatprep.subr.bf16.mxu0 %v12984_v56 }
 0x662   :  { %v1703_v58 = vpop.f32.mrf.mxu0  ;;  %v1744_v59 = vpop.f32.mrf.mxu1 }
 0x663   :  { %v1798_v3 = vadd.f32 %v1703_v58, %v12985_v62  ;;  %v1826_v11 = vadd.f32 %v10615_v23, %v1744_v59  ;;  %v10640_v59 = vld [vmem:[#allocation8 + $0x160] ss:$24 sps:$4 sm:$0xff]   ;;  %v10644_v62 = vld [vmem:[#allocation8 + $0x134] ss:$24 sps:$4 sm:$0xff]  }
 0x664   :  { %v1705_v55 = vpop.f32.mrf.mxu0  ;;  %v1746_v6 = vpop.f32.mrf.mxu1 }
 0x665   :  { %v7922_v19 = vmul.f32 -1.442695, %v1798_v3  ;;  %v1812_v31 = vadd.f32 %v1705_v55, %v193_v24  ;;  %v9557_v3 = vld [vmem:[#allocation8 + $0x150] ss:$24 sps:$4 sm:$0xff]   ;;  %v9558_v55 = vld [vmem:[#allocation8 + $0x124] ss:$24 sps:$4 sm:$0xff]  }
 0x666   :  { %v1707_v40 = vpop.f32.mrf.mxu0  ;;  %v1747_v60 = vpop.f32.mrf.mxu1  ;;  %v10648_v6 = vld [vmem:[#allocation8 + $0x130] ss:$24 sps:$4 sm:$0xff]   ;;  %v9569_v24 = vld [vmem:[#allocation8 + $0xc0] ss:$24 sps:$4 sm:$0xff]  }
 0x667   :  { %9135 = vpow2.f32 %v7922_v19  ;;  %v7924_v13 = vmul.f32 -1.442695, %v1812_v31  ;;  %v10651_v19 = vld [vmem:[#allocation8 + $0x104] ss:$24 sps:$4 sm:$0xff]   ;;  %v9561_v40 = vld [vmem:[#allocation8 + $0x120] ss:$24 sps:$4 sm:$0xff]  }
 0x668   :  { %v1708_v15 = vpop.f32.mrf.mxu0  ;;  %v1748_v18 = vpop.f32.mrf.mxu1  ;;  %v9562_v60 = vld [vmem:[#allocation8 + $0xf4] ss:$24 sps:$4 sm:$0xff]  }
 0x669   :  { %v1799_v0 = vadd.f32 %v1748_v18, %v12986_v37  ;;  %v10654_v15 = vld [vmem:[#allocation8 + $0x100] ss:$24 sps:$4 sm:$0xff]   ;;  %v10657_v18 = vld [vmem:[#allocation8 + $0xd4] ss:$24 sps:$4 sm:$0xff]   ;;  %v9565_v37 = vld [vmem:[#allocation8 + $0xf0] ss:$24 sps:$4 sm:$0xff]  }
 0x66a   :  { %v9570_v31 = vld [vmem:[#allocation8 + $0x94] ss:$24 sps:$4 sm:$0xff]  }
 0x66b   :  { %v7923_v10 = vmul.f32 -1.442695, %v1799_v0  ;;  %v9566_v0 = vld [vmem:[#allocation8 + $0xc4] ss:$24 sps:$4 sm:$0xff]  }
 0x66d   :  { %9137 = vpow2.f32 %v7923_v10  ;;  %v10660_v10 = vld [vmem:[#allocation8 + $0xd0] ss:$24 sps:$4 sm:$0xff]  }
 0x66e   :  { %9139 = vpow2.f32 %v7924_v13  ;;  %v10666_v13 = vld [vmem:[#allocation8 + $0xa0] ss:$24 sps:$4 sm:$0xff]  }
 0x674   :  { %v9136_v54 = vpop.eup %9135 }
 0x675   :  { %v1806_v1 = vadd.f32 1.0, %v9136_v54  ;;  %v10669_v54 = vld [vmem:[#allocation8 + $0x74] ss:$24 sps:$4 sm:$0xff]  }
 0x677   :  { %9141 = vrcp.f32 %v1806_v1  ;;  %v9573_v1 = vld [vmem:[#allocation8 + $0x90] ss:$24 sps:$4 sm:$0xff]  }
 0x67a   :  { %v9138_v39 = vpop.eup %9137 }
 0x67b   :  { %v1807_v27 = vadd.f32 1.0, %v9138_v39  ;;  %v9140_v17 = vpop.eup %9139  ;;  %v9574_v39 = vld [vmem:[#allocation8 + $0x64] ss:$24 sps:$4 sm:$0xff]  }
 0x67c   :  { %v1820_v57 = vadd.f32 1.0, %v9140_v17  ;;  %v9577_v17 = vld [vmem:[#allocation8 + $0x60] ss:$24 sps:$4 sm:$0xff]  }
 0x67d   :  { %9143 = vrcp.f32 %v1807_v27  ;;  %v10672_v27 = vld [vmem:[#allocation8 + $0x70] ss:$24 sps:$4 sm:$0xff]  }
 0x682   :  { %v1785_v35 = vpop.f32.mrf.mxu0 }
 0x683   :  { %v10675_v35 = vld [vmem:[#allocation8 + $0x44] ss:$24 sps:$4 sm:$0xff]  }
 0x684   :  { %v9142_v30 = vpop.eup %9141  ;;  %v1786_v48 = vpop.f32.mrf.mxu0 }
 0x685   :  { %v1828_v38 = vmul.f32 %v9142_v30, %v1826_v11  ;;  %v9578_v11 = vld [vmem:[#allocation8 + $0x34] ss:$24 sps:$4 sm:$0xff]   ;;  %v10678_v30 = vld [vmem:[#allocation8 + $0x40] ss:$24 sps:$4 sm:$0xff]  }
 0x686   :  { %v1787_v22 = vpop.f32.mrf.mxu0  ;;  %v10681_v48 = vld [vmem:[#allocation8 + $0x14] ss:$24 sps:$4 sm:$0xff]  }
 0x687   :  { %v1830_v63 = vadd.f32 %v1828_v38, %v259_v47  ;;  %v1813_v34 = vadd.f32 %v1787_v22, %v12991_v36  ;;  %v10684_v47 = vld [vmem:[#allocation8 + $0x10] ss:$24 sps:$4 sm:$0xff]   ;;  %v9584_v38 = vld [vmem:[#allocation8 + $0x15c] ss:$24 sps:$4 sm:$0xff]   ;;  %v9588_v36 = vld [vmem:[#allocation8 + $0x12c] ss:$24 sps:$4 sm:$0xff]  }
 0x688   :  { %v1789_v44 = vpop.f32.mrf.mxu0  ;;  %v9586_v22 = vld [vmem:[#allocation8 + $0x164] ss:$24 sps:$4 sm:$0xff]  }
 0x689   :  { %9145 = vtanh.f32 %v1830_v63  ;;  %v7925_v4 = vmul.f32 -1.442695, %v1813_v34  ;;  %v1827_v51 = vadd.f32 %v10624_v7, %v1789_v44  ;;  %v9587_v63 = vld [vmem:[#allocation8 + $0x158] ss:$24 sps:$4 sm:$0xff]   ;;  %v9589_v34 = vld [vmem:[#allocation8 + $0x128] ss:$24 sps:$4 sm:$0xff]  }
 0x68a   :  { %v9144_v25 = vpop.eup %9143  ;;  %9147 = vrcp.f32 %v1820_v57  ;;  %v9585_v57 = vld [vmem:[#allocation8] ss:$24 sps:$4 sm:$0xff]   ;;  %v9590_v44 = vld [vmem:[#allocation8 + $0xfc] ss:$24 sps:$4 sm:$0xff]  }
 0x68b   :  { %9149 = vpow2.f32 %v7925_v4  ;;  %v1829_v33 = vmul.f32 %v9144_v25, %v1827_v51  ;;  %v9591_v4 = vld [vmem:[#allocation8 + $0xf8] ss:$24 sps:$4 sm:$0xff]   ;;  %v9592_v51 = vld [vmem:[#allocation8 + $0xcc] ss:$24 sps:$4 sm:$0xff]   ;;  %v9593_v25 = vld [vmem:[#allocation8 + $0xc8] ss:$24 sps:$4 sm:$0xff]  }
 0x68d   :  { %v1831_v50 = vadd.f32 %v1829_v33, %v12992_v12  ;;  %v9594_v33 = vld [vmem:[#allocation8 + $0x9c] ss:$24 sps:$4 sm:$0xff]   ;;  %v9595_v12 = vld [vmem:[#allocation8 + $0x98] ss:$24 sps:$4 sm:$0xff]  }
 0x68f   :  { %9151 = vtanh.f32 %v1831_v50  ;;  %v9596_v50 = vld [vmem:[#allocation8 + $0x6c] ss:$24 sps:$4 sm:$0xff]  }
 0x696   :  { %v9146_v28 = vpop.eup %9145 }
 0x697   :  { %v9148_v2 = vpop.eup %9147  ;;  %v1834_v42 = vsub.f32 %v10550_v8, %v9146_v28 }
 0x698   :  { %v9150_v16 = vpop.eup %9149 }
 0x699   :  { %v1821_v21 = vadd.f32 1.0, %v9150_v16  ;;  %v1836_v29 = vmul.f32 %v9148_v2, %v1834_v42  ;;  %v9598_v2 = vld [vmem:[#allocation8 + $0x3c] ss:$24 sps:$4 sm:$0xff]   ;;  %v9599_v42 = vld [vmem:[#allocation8 + $0x38] ss:$24 sps:$4 sm:$0xff]  }
 0x69a   :  { %v9600_v16 = vld [vmem:[#allocation8 + $0xc] ss:$24 sps:$4 sm:$0xff]  }
 0x69b   :  { %9153 = vrcp.f32 %v1821_v21  ;;  %v10629_v43 = vadd.f32 %v9146_v28, %v1836_v29  ;;  %v9597_v28 = vld [vmem:[#allocation8 + $0x68] ss:$24 sps:$4 sm:$0xff]  }
 0x69c   :  { %v9152_v45 = vpop.eup %9151  ;;  %v9601_v21 = vld [vmem:[#allocation8 + $0x8] ss:$24 sps:$4 sm:$0xff]  }
 0x69d   :  { %v1835_v49 = vsub.f32 %v10553_v32, %v9152_v45 }
 0x6a8   :  { %v9154_v52 = vpop.eup %9153 }
 0x6a9   :  { %v1837_v53 = vmul.f32 %v9154_v52, %v1835_v49  ;;  %v12993_v49 = vld [vmem:[#allocation38_spill] sm:$0xff] }
 0x6ab   :  { %v10632_v56 = vadd.f32 %v9152_v45, %v1837_v53 }
 0x6ad   :  { %v10636_v58 = vpack.c.bf16 %v10632_v56, %v10629_v43 }
 0x6af   :  { %1876 = vmatmul.mubr.bf16.vlgmr.msra.gmra.mxu1 %v10636_v58  ;;  %1917 = vmatmul.mubr.bf16.vlgmr.msra.gmra.mxu0 %v10636_v58 }
 0x6b0   :  { %1926 = vmatpush1.bf16.msra.mxu1 %v10640_v59  ;;  %1957 = vmatprep.mubr.bf16.mxu1 %v12902_v61 }
 0x6b1   :  { %1927 = vmatprep.subr.bf16.mxu1 %v10644_v62  ;;  %2018 = vmatpush1.bf16.msra.mxu0 %v9557_v3 }
 0x6b2   :  { %2019 = vmatprep.subr.bf16.mxu0 %v9558_v55  ;;  %2049 = vmatprep.mubr.bf16.mxu0 %v12902_v61 }
 0x6b4   :  { %1928 = vmatpush1.bf16.msra.mxu1 %v10648_v6 }
 0x6b5   :  { %1929 = vmatprep.subr.bf16.mxu1 %v10651_v19  ;;  %2020 = vmatpush1.bf16.msra.mxu0 %v9561_v40 }
 0x6b6   :  { %2021 = vmatprep.subr.bf16.mxu0 %v9562_v60 }
 0x6b8   :  { %1930 = vmatpush1.bf16.msra.mxu1 %v10654_v15 }
 0x6b9   :  { %1931 = vmatprep.subr.bf16.mxu1 %v10657_v18  ;;  %2022 = vmatpush1.bf16.msra.mxu0 %v9565_v37 }
 0x6ba   :  { %2023 = vmatprep.subr.bf16.mxu0 %v9566_v0  ;;  %v12994_v0 = vld [vmem:[#allocation27_spill] sm:$0xff] }
 0x6bc   :  { %1932 = vmatpush1.bf16.msra.mxu1 %v10660_v10 }
 0x6bd   :  { %1933 = vmatprep.subr.bf16.mxu1 %v10663_v20  ;;  %2024 = vmatpush1.bf16.msra.mxu0 %v9569_v24 }
 0x6be   :  { %2025 = vmatprep.subr.bf16.mxu0 %v9570_v31 }
 0x6c0   :  { %1934 = vmatpush1.bf16.msra.mxu1 %v10666_v13 }
 0x6c1   :  { %1935 = vmatprep.subr.bf16.mxu1 %v10669_v54  ;;  %2026 = vmatpush1.bf16.msra.mxu0 %v9573_v1  ;;  %v12995_v1 = vld [vmem:[#allocation40_spill] sm:$0xff] }
 0x6c2   :  { %2027 = vmatprep.subr.bf16.mxu0 %v9574_v39 }
 0x6c4   :  { %1936 = vmatpush1.bf16.msra.mxu1 %v10672_v27 }
 0x6c5   :  { %1937 = vmatprep.subr.bf16.mxu1 %v10675_v35  ;;  %2028 = vmatpush1.bf16.msra.mxu0 %v9577_v17 }
 0x6c6   :  { %2029 = vmatprep.subr.bf16.mxu0 %v9578_v11 }
 0x6c8   :  { %1938 = vmatpush1.bf16.msra.mxu1 %v10678_v30 }
 0x6c9   :  { %1939 = vmatprep.subr.bf16.mxu1 %v10681_v48  ;;  %2030 = vmatpush1.bf16.msra.mxu0 %v9581_v41 }
 0x6ca   :  { %2031 = vmatprep.subr.bf16.mxu0 %v9582_v46 }
 0x6cc   :  { %1940 = vmatpush1.bf16.msra.mxu1 %v10684_v47 }
 0x6cd   :  { %2058 = vmatprep.subr.bf16.mxu1 %v9584_v38  ;;  %2032 = vmatpush1.bf16.msra.mxu0 %v9585_v57 }
 0x6ce   :  { %2099 = vmatprep.subr.bf16.mxu0 %v9586_v22 }
 0x6cf   :  { %1958 = vmatmul.mubr.bf16.vlgmr.msra.gmra.mxu1 %v10636_v58 }
 0x6d0   :  { %2059 = vmatpush1.bf16.msra.mxu1 %v9587_v63  ;;  %2090 = vmatprep.mubr.bf16.mxu1 %v12902_v61 }
 0x6d1   :  { %2060 = vmatprep.subr.bf16.mxu1 %v9588_v36 }
 0x6d4   :  { %2061 = vmatpush1.bf16.msra.mxu1 %v9589_v34 }
 0x6d5   :  { %2062 = vmatprep.subr.bf16.mxu1 %v9590_v44  ;;  %v12996_v44 = vld [vmem:[#allocation29_spill] sm:$0xff] }
 0x6d8   :  { %2063 = vmatpush1.bf16.msra.mxu1 %v9591_v4  ;;  %v375_v4 = vadd.f32 %v12996_v44, %v12972_v5  ;;  %v8655_v44 = vld [vmem:[#allocation6 + $0x13c] ss:$12 sps:$4 sm:$0xff]  }
 0x6d9   :  { %2064 = vmatprep.subr.bf16.mxu1 %v9592_v51 }
 0x6dc   :  { %2065 = vmatpush1.bf16.msra.mxu1 %v9593_v25 }
 0x6dd   :  { %2066 = vmatprep.subr.bf16.mxu1 %v9594_v33 }
 0x6e0   :  { %2067 = vmatpush1.bf16.msra.mxu1 %v9595_v12  ;;  %v12997_v12 = vld [vmem:[#allocation15_spill] sm:$0xff] }
 0x6e1   :  { %2068 = vmatprep.subr.bf16.mxu1 %v9596_v50 }
 0x6e4   :  { %2069 = vmatpush1.bf16.msra.mxu1 %v9597_v28 }
 0x6e5   :  { %2070 = vmatprep.subr.bf16.mxu1 %v9598_v2 }
 0x6e8   :  { %2071 = vmatpush1.bf16.msra.mxu1 %v9599_v42 }
 0x6e9   :  { %2072 = vmatprep.subr.bf16.mxu1 %v9600_v16 }
 0x6ec   :  { %2073 = vmatpush1.bf16.msra.mxu1 %v9601_v21 }
 0x76f   :  { %v1877_v29 = vpop.f32.mrf.mxu1  ;;  %v1918_v45 = vpop.f32.mrf.mxu0 }
 0x770   :  { %v1972_v52 = vadd.f32 %v1877_v29, %v12993_v49  ;;  %v2000_v63 = vadd.f32 %v10615_v23, %v1918_v45  ;;  %v12998_v29 = vld [vmem:[#allocation48_spill] sm:$0xff] }
 0x771   :  { %v1879_v53 = vpop.f32.mrf.mxu1  ;;  %v1920_v58 = vpop.f32.mrf.mxu0  ;;  %v12999_v45 = vld [vmem:[#allocation52_spill] sm:$0xff] }
 0x772   :  { %v7926_v3 = vmul.f32 -1.442695, %v1972_v52  ;;  %v1986_v39 = vadd.f32 %v1879_v53, %v12995_v1  ;;  %v445_v49 = vadd.f32 %v12999_v45, %v12998_v29  ;;  %v8670_v29 = vld [vmem:[#allocation6 + $0xf4] ss:$12 sps:$4 sm:$0xff]   ;;  %v8671_v45 = vld [vmem:[#allocation6 + $0xf8] ss:$12 sps:$4 sm:$0xff]  }
 0x773   :  { %v1881_v55 = vpop.f32.mrf.mxu1  ;;  %v1921_v40 = vpop.f32.mrf.mxu0 }
 0x774   :  { %9155 = vpow2.f32 %v7926_v3  ;;  %v7928_v17 = vmul.f32 -1.442695, %v1986_v39 }
 0x775   :  { %v1882_v60 = vpop.f32.mrf.mxu1  ;;  %v1922_v37 = vpop.f32.mrf.mxu0 }
 0x776   :  { %v1973_v24 = vadd.f32 %v1922_v37, %v12994_v0 }
 0x778   :  { %v7927_v31 = vmul.f32 -1.442695, %v1973_v24 }
 0x77a   :  { %9157 = vpow2.f32 %v7927_v31 }
 0x77b   :  { %9159 = vpow2.f32 %v7928_v17 }
 0x781   :  { %v9156_v11 = vpop.eup %9155 }
 0x782   :  { %v1980_v41 = vadd.f32 1.0, %v9156_v11  ;;  %v8640_v11 = vld [vmem:[#allocation6] ss:$12 sps:$4 sm:$0xff]  }
 0x784   :  { %9161 = vrcp.f32 %v1980_v41  ;;  %v8645_v41 = vld [vmem:[#allocation6 + $0x16c] ss:$12 sps:$4 sm:$0xff]  }
 0x787   :  { %v9158_v46 = vpop.eup %9157 }
 0x788   :  { %v1981_v38 = vadd.f32 1.0, %v9158_v46  ;;  %v9160_v22 = vpop.eup %9159  ;;  %v8646_v46 = vld [vmem:[#allocation6 + $0x170] ss:$12 sps:$4 sm:$0xff]  }
 0x789   :  { %v1994_v25 = vadd.f32 1.0, %v9160_v22  ;;  %v8650_v22 = vld [vmem:[#allocation6 + $0x154] ss:$12 sps:$4 sm:$0xff]  }
 0x78a   :  { %9163 = vrcp.f32 %v1981_v38  ;;  %v8643_v38 = vld [vmem:[#allocation6 + $0x168] ss:$12 sps:$4 sm:$0xff]  }
 0x78f   :  { %v1959_v57 = vpop.f32.mrf.mxu1 }
 0x790   :  { %v8647_v57 = vld [vmem:[#allocation6 + $0xb0] ss:$12 sps:$4 sm:$0xff]  }
 0x791   :  { %v9162_v36 = vpop.eup %9161  ;;  %v1960_v34 = vpop.f32.mrf.mxu1 }
 0x792   :  { %v2002_v51 = vmul.f32 %v9162_v36, %v2000_v63  ;;  %v8651_v63 = vld [vmem:[#allocation6 + $0x158] ss:$12 sps:$4 sm:$0xff]   ;;  %v8648_v36 = vld [vmem:[#allocation6 + $0x150] ss:$12 sps:$4 sm:$0xff]  }
 0x793   :  { %v1961_v33 = vpop.f32.mrf.mxu1  ;;  %v8652_v34 = vld [vmem:[#allocation6 + $0x98] ss:$12 sps:$4 sm:$0xff]  }
 0x794   :  { %v2004_v50 = vadd.f32 %v2002_v51, %v12997_v12  ;;  %v1987_v28 = vadd.f32 %v1961_v33, %v375_v4  ;;  %v8656_v4 = vld [vmem:[#allocation6 + $0x140] ss:$12 sps:$4 sm:$0xff]   ;;  %v8653_v51 = vld [vmem:[#allocation6 + $0x138] ss:$12 sps:$4 sm:$0xff]   ;;  %v8661_v12 = vld [vmem:[#allocation6 + $0x128] ss:$12 sps:$4 sm:$0xff]  }
 0x795   :  { %v1963_v2 = vpop.f32.mrf.mxu1  ;;  %v8660_v33 = vld [vmem:[#allocation6 + $0x124] ss:$12 sps:$4 sm:$0xff]  }
 0x796   :  { %9165 = vtanh.f32 %v2004_v50  ;;  %v7929_v42 = vmul.f32 -1.442695, %v1987_v28  ;;  %v2001_v16 = vadd.f32 %v10624_v7, %v1963_v2  ;;  %v8658_v50 = vld [vmem:[#allocation6 + $0x120] ss:$12 sps:$4 sm:$0xff]   ;;  %v8662_v28 = vld [vmem:[#allocation6 + $0x68] ss:$12 sps:$4 sm:$0xff]  }
 0x797   :  { %v9164_v21 = vpop.eup %9163  ;;  %9167 = vrcp.f32 %v1994_v25  ;;  %v8657_v25 = vld [vmem:[#allocation6 + $0x80] ss:$12 sps:$4 sm:$0xff]  }
 0x798   :  { %9169 = vpow2.f32 %v7929_v42  ;;  %v2003_v52 = vmul.f32 %v9164_v21, %v2001_v16  ;;  %v8665_v2 = vld [vmem:[#allocation6 + $0x10c] ss:$12 sps:$4 sm:$0xff]   ;;  %v8666_v42 = vld [vmem:[#allocation6 + $0x110] ss:$12 sps:$4 sm:$0xff]   ;;  %v8663_v16 = vld [vmem:[#allocation6 + $0x108] ss:$12 sps:$4 sm:$0xff]  }
 0x799   :  { %v8667_v21 = vld [vmem:[#allocation6 + $0x50] ss:$12 sps:$4 sm:$0xff]  }
 0x79a   :  { %v2005_v53 = vadd.f32 %v2003_v52, %v445_v49  ;;  %v8668_v49 = vld [vmem:[#allocation6 + $0xf0] ss:$12 sps:$4 sm:$0xff]   ;;  %v8672_v52 = vld [vmem:[#allocation6 + $0x38] ss:$12 sps:$4 sm:$0xff]  }
 0x79c   :  { %9171 = vtanh.f32 %v2005_v53  ;;  %v8675_v53 = vld [vmem:[#allocation6 + $0xdc] ss:$12 sps:$4 sm:$0xff]  }
 0x7a3   :  { %v9166_v5 = vpop.eup %9165 }
 0x7a4   :  { %v9168_v58 = vpop.eup %9167  ;;  %v2008_v3 = vsub.f32 %v10629_v43, %v9166_v5 }
 0x7a5   :  { %v9170_v55 = vpop.eup %9169 }
 0x7a6   :  { %v1995_v40 = vadd.f32 1.0, %v9170_v55  ;;  %v2010_v60 = vmul.f32 %v9168_v58, %v2008_v3  ;;  %v8673_v58 = vld [vmem:[#allocation6 + $0xd8] ss:$12 sps:$4 sm:$0xff]   ;;  %v8677_v3 = vld [vmem:[#allocation6 + $0x20] ss:$12 sps:$4 sm:$0xff]  }
 0x7a7   :  { %v8680_v55 = vld [vmem:[#allocation6 + $0xc4] ss:$12 sps:$4 sm:$0xff]  }
 0x7a8   :  { %9173 = vrcp.f32 %v1995_v40  ;;  %v10700_v37 = vadd.f32 %v9166_v5, %v2010_v60  ;;  %v8676_v5 = vld [vmem:[#allocation6 + $0xe0] ss:$12 sps:$4 sm:$0xff]   ;;  %v8681_v40 = vld [vmem:[#allocation6 + $0xc8] ss:$12 sps:$4 sm:$0xff]  }
 0x7a9   :  { %v9172_v0 = vpop.eup %9171  ;;  %v8678_v60 = vld [vmem:[#allocation6 + $0xc0] ss:$12 sps:$4 sm:$0xff]  }
 0x7aa   :  { %v2009_v24 = vsub.f32 %v10632_v56, %v9172_v0 }
 0x7b5   :  { %v9174_v31 = vpop.eup %9173 }
 0x7b6   :  { %v2011_v1 = vmul.f32 %v9174_v31, %v2009_v24  ;;  %v8685_v24 = vld [vmem:[#allocation6 + $0x22c] ss:$12 sps:$4 sm:$0xff]   ;;  %v8686_v31 = vld [vmem:[#allocation6 + $0x2f0] ss:$12 sps:$4 sm:$0xff]  }
 0x7b8   :  { %v10703_v39 = vadd.f32 %v9172_v0, %v2011_v1  ;;  %v8682_v0 = vld [vmem:[#allocation6 + $0x8] ss:$12 sps:$4 sm:$0xff]  }
 0x7ba   :  { %v2016_v17 = vpack.c.bf16 %v10703_v39, %v10700_v37 }
 0x7bc   :  { %2050 = vmatmul.mubr.bf16.vlgmr.msra.gmra.mxu0 %v2016_v17  ;;  %2091 = vmatmul.mubr.bf16.vlgmr.msra.gmra.mxu1 %v2016_v17 }
 0x7bd   :  { %2100 = vmatpush1.bf16.msra.mxu0 %v10640_v59  ;;  %2131 = vmatprep.mubr.bf16.mxu0 %v12902_v61  ;;  %v8621_v59 = vld [vmem:[#allocation6 + $0xac] ss:$12 sps:$4 sm:$0xff]  }
 0x7be   :  { %2101 = vmatprep.subr.bf16.mxu0 %v10644_v62  ;;  %v8619_v62 = vld [vmem:[#allocation6 + $0xa8] ss:$12 sps:$4 sm:$0xff]   ;;  %2617 = vmatprep.subr.bf16.mxu1 %v8621_v59 }
 0x7bf   :  { %2618 = vmatpush1.bf16.msra.mxu1 %v8619_v62  ;;  %v13000_v59 = vld [vmem:[#allocation42_spill] sm:$0xff] }
 0x7c1   :  { %2102 = vmatpush1.bf16.msra.mxu0 %v10648_v6  ;;  %v8624_v6 = vld [vmem:[#allocation6 + $0x94] ss:$12 sps:$4 sm:$0xff]  }
 0x7c2   :  { %2103 = vmatprep.subr.bf16.mxu0 %v10651_v19  ;;  %v8622_v19 = vld [vmem:[#allocation6 + $0x90] ss:$12 sps:$4 sm:$0xff]   ;;  %2619 = vmatprep.subr.bf16.mxu1 %v8624_v6 }
 0x7c3   :  { %2620 = vmatpush1.bf16.msra.mxu1 %v8622_v19 }
 0x7c5   :  { %2104 = vmatpush1.bf16.msra.mxu0 %v10654_v15  ;;  %v8627_v15 = vld [vmem:[#allocation6 + $0x7c] ss:$12 sps:$4 sm:$0xff]  }
 0x7c6   :  { %2105 = vmatprep.subr.bf16.mxu0 %v10657_v18  ;;  %v8625_v18 = vld [vmem:[#allocation6 + $0x78] ss:$12 sps:$4 sm:$0xff]   ;;  %2621 = vmatprep.subr.bf16.mxu1 %v8627_v15 }
 0x7c7   :  { %2622 = vmatpush1.bf16.msra.mxu1 %v8625_v18 }
 0x7c9   :  { %2106 = vmatpush1.bf16.msra.mxu0 %v10660_v10  ;;  %v8630_v10 = vld [vmem:[#allocation6 + $0x64] ss:$12 sps:$4 sm:$0xff]  }
 0x7ca   :  { %2107 = vmatprep.subr.bf16.mxu0 %v10663_v20  ;;  %v8628_v20 = vld [vmem:[#allocation6 + $0x60] ss:$12 sps:$4 sm:$0xff]   ;;  %2623 = vmatprep.subr.bf16.mxu1 %v8630_v10 }
 0x7cb   :  { %2624 = vmatpush1.bf16.msra.mxu1 %v8628_v20 }
 0x7cd   :  { %2108 = vmatpush1.bf16.msra.mxu0 %v10666_v13  ;;  %v8633_v13 = vld [vmem:[#allocation6 + $0x4c] ss:$12 sps:$4 sm:$0xff]  }
 0x7ce   :  { %2109 = vmatprep.subr.bf16.mxu0 %v10669_v54  ;;  %v8631_v54 = vld [vmem:[#allocation6 + $0x48] ss:$12 sps:$4 sm:$0xff]   ;;  %2625 = vmatprep.subr.bf16.mxu1 %v8633_v13 }
 0x7cf   :  { %2626 = vmatpush1.bf16.msra.mxu1 %v8631_v54  ;;  %v13001_v54 = vld [vmem:[#allocation23_spill] sm:$0xff] }
 0x7d1   :  { %2110 = vmatpush1.bf16.msra.mxu0 %v10672_v27  ;;  %v8636_v27 = vld [vmem:[#allocation6 + $0x34] ss:$12 sps:$4 sm:$0xff]  }
 0x7d2   :  { %2111 = vmatprep.subr.bf16.mxu0 %v10675_v35  ;;  %v8634_v35 = vld [vmem:[#allocation6 + $0x30] ss:$12 sps:$4 sm:$0xff]   ;;  %2627 = vmatprep.subr.bf16.mxu1 %v8636_v27 }
 0x7d3   :  { %2628 = vmatpush1.bf16.msra.mxu1 %v8634_v35 }
 0x7d5   :  { %2112 = vmatpush1.bf16.msra.mxu0 %v10678_v30  ;;  %v8639_v30 = vld [vmem:[#allocation6 + $0x1c] ss:$12 sps:$4 sm:$0xff]  }
 0x7d6   :  { %2113 = vmatprep.subr.bf16.mxu0 %v10681_v48  ;;  %v8637_v48 = vld [vmem:[#allocation6 + $0x18] ss:$12 sps:$4 sm:$0xff]   ;;  %2629 = vmatprep.subr.bf16.mxu1 %v8639_v30 }
 0x7d7   :  { %2630 = vmatpush1.bf16.msra.mxu1 %v8637_v48  ;;  %v13002_v30 = vld [vmem:[#allocation44_spill] sm:$0xff] }
 0x7d8   :  { %v203_v48 = vadd.f32 %v13002_v30, %v12987_v14  ;;  %v13003_v14 = vld [vmem:[#allocation18_spill] sm:$0xff]  ;;  %v13009_v30 = vld [vmem:[#allocation59_spill] sm:$0xff] }
 0x7d9   :  { %2114 = vmatpush1.bf16.msra.mxu0 %v10684_v47  ;;  %v8642_v47 = vld [vmem:[#allocation6 + $0x4] ss:$12 sps:$4 sm:$0xff]  }
 0x7da   :  { %2631 = vmatprep.subr.bf16.mxu1 %v8642_v47  ;;  %8325 = vmatprep.subr.bf16.mxu0 %v8646_v46 }
 0x7db   :  { %2632 = vmatpush1.bf16.msra.mxu1 %v8640_v11 }
 0x7dc   :  { %2132 = vmatmul.mubr.bf16.vlgmr.msra.gmra.mxu0 %v2016_v17  ;;  %2633 = vmatprep.subr.bf16.mxu1 %v8645_v41 }
 0x7dd   :  { %8326 = vmatpush3.bf16.msra.mxu0 %v8647_v57 }
 0x7de   :  { %8327 = vmatprep.subr.bf16.mxu0 %v8651_v63 }
 0x7df   :  { %2634 = vmatpush2.bf16.msra.mxu1 %v8643_v38 }
 0x7e0   :  { %2635 = vmatprep.subr.bf16.mxu1 %v8650_v22 }
 0x7e1   :  { %8328 = vmatpush3.bf16.msra.mxu0 %v8652_v34 }
 0x7e2   :  { %8329 = vmatprep.subr.bf16.mxu0 %v8656_v4 }
 0x7e3   :  { %2636 = vmatpush2.bf16.msra.mxu1 %v8648_v36 }
 0x7e4   :  { %2637 = vmatprep.subr.bf16.mxu1 %v8655_v44 }
 0x7e5   :  { %8330 = vmatpush3.bf16.msra.mxu0 %v8657_v25 }
 0x7e6   :  { %8331 = vmatprep.subr.bf16.mxu0 %v8661_v12  ;;  %v13004_v12 = vld [vmem:[#allocation25_spill] sm:$0xff] }
 0x7e7   :  { %2638 = vmatpush2.bf16.msra.mxu1 %v8653_v51 }
 0x7e8   :  { %2639 = vmatprep.subr.bf16.mxu1 %v8660_v33 }
 0x7e9   :  { %8332 = vmatpush3.bf16.msra.mxu0 %v8662_v28 }
 0x7ea   :  { %8333 = vmatprep.subr.bf16.mxu0 %v8666_v42 }
 0x7eb   :  { %2640 = vmatpush2.bf16.msra.mxu1 %v8658_v50 }
 0x7ec   :  { %2641 = vmatprep.subr.bf16.mxu1 %v8665_v2 }
 0x7ed   :  { %8334 = vmatpush3.bf16.msra.mxu0 %v8667_v21 }
 0x7ee   :  { %8335 = vmatprep.subr.bf16.mxu0 %v8671_v45 }
 0x7ef   :  { %2642 = vmatpush2.bf16.msra.mxu1 %v8663_v16 }
 0x7f0   :  { %2643 = vmatprep.subr.bf16.mxu1 %v8670_v29  ;;  %v13005_v29 = vld [vmem:[#allocation50_spill] sm:$0xff] }
 0x7f1   :  { %8336 = vmatpush3.bf16.msra.mxu0 %v8672_v52 }
 0x7f2   :  { %8337 = vmatprep.subr.bf16.mxu0 %v8676_v5 }
 0x7f3   :  { %2644 = vmatpush2.bf16.msra.mxu1 %v8668_v49 }
 0x7f4   :  { %2645 = vmatprep.subr.bf16.mxu1 %v8675_v53 }
 0x7f5   :  { %8338 = vmatpush3.bf16.msra.mxu0 %v8677_v3 }
 0x7f6   :  { %8339 = vmatprep.subr.bf16.mxu0 %v8681_v40 }
 0x7f7   :  { %2646 = vmatpush2.bf16.msra.mxu1 %v8673_v58 }
 0x7f8   :  { %2647 = vmatprep.subr.bf16.mxu1 %v8680_v55 }
 0x7f9   :  { %8340 = vmatpush3.bf16.msra.mxu0 %v8682_v0 }
 0x7fa   :  { %3053 = vmatprep.subr.bf16.mxu0 %v8685_v24 }
 0x7fb   :  { %2648 = vmatpush2.bf16.msra.mxu1 %v8678_v60 }
 0x7fc   :  { %8365 = vmatprep.subr.bf16.mxu1 %v8686_v31  ;;  %v8683_v31 = vld [vmem:[#allocation6 + $0x228] ss:$12 sps:$4 sm:$0xff]  }
 0x87c   :  { %v2051_v1 = vpop.f32.mrf.mxu0  ;;  %v2092_v17 = vpop.f32.mrf.mxu1 }
 0x87d   :  { %v2146_v62 = vadd.f32 %v2051_v1, %v13000_v59  ;;  %v2174_v36 = vadd.f32 %v10615_v23, %v2092_v17  ;;  %v8687_v1 = vld [vmem:[#allocation6 + $0x230] ss:$12 sps:$4 sm:$0xff]   ;;  %v13006_v17 = vld [vmem:[#allocation56_spill] sm:$0xff] }
 0x87e   :  { %v2053_v6 = vpop.f32.mrf.mxu0  ;;  %v2094_v19 = vpop.f32.mrf.mxu1  ;;  %v13007_v59 = vld [vmem:[#allocation72_spill] sm:$0xff] }
 0x87f   :  { %v7930_v15 = vmul.f32 -1.442695, %v2146_v62  ;;  %v2160_v47 = vadd.f32 %v2053_v6, %v203_v48  ;;  %v10741_v62 = vpack.c.bf16 %v13007_v59, %v13006_v17  ;;  %v8690_v6 = vld [vmem:[#allocation6 + $0x214] ss:$12 sps:$4 sm:$0xff]   ;;  %v8691_v19 = vld [vmem:[#allocation6 + $0x2d8] ss:$12 sps:$4 sm:$0xff]   ;;  %v10761_v48 = vpack.c.bf16 %v13009_v30, %v10485_v9 }
 0x880   :  { %v2055_v18 = vpop.f32.mrf.mxu0  ;;  %v2095_v10 = vpop.f32.mrf.mxu1  ;;  %v10767_v9 = vpack.c.bf16 %v10629_v43, %v10550_v8  ;;  %v8715_v8 = vld [vmem:[#allocation6 + $0x19c] ss:$12 sps:$4 sm:$0xff]   ;;  %v8716_v43 = vld [vmem:[#allocation6 + $0x260] ss:$12 sps:$4 sm:$0xff]  }
 0x881   :  { %9175 = vpow2.f32 %v7930_v15  ;;  %v7932_v11 = vmul.f32 -1.442695, %v2160_v47  ;;  %v8688_v15 = vld [vmem:[#allocation6 + $0x210] ss:$12 sps:$4 sm:$0xff]   ;;  %v8692_v18 = vld [vmem:[#allocation6 + $0x218] ss:$12 sps:$4 sm:$0xff]  }
 0x882   :  { %v2056_v20 = vpop.f32.mrf.mxu0  ;;  %v2096_v13 = vpop.f32.mrf.mxu1  ;;  %v8695_v10 = vld [vmem:[#allocation6 + $0x1fc] ss:$12 sps:$4 sm:$0xff]   ;;  %v8698_v47 = vld [vmem:[#allocation6 + $0x1e0] ss:$12 sps:$4 sm:$0xff]  }
 0x883   :  { %v2147_v27 = vadd.f32 %v2096_v13, %v13001_v54  ;;  %v8696_v20 = vld [vmem:[#allocation6 + $0x2c0] ss:$12 sps:$4 sm:$0xff]   ;;  %v8693_v13 = vld [vmem:[#allocation6 + $0x1f8] ss:$12 sps:$4 sm:$0xff]   ;;  %v8753_v17 = vld [vmem:[#allocation6 + $0x270] ss:$12 sps:$4 sm:$0xff]  }
 0x884   :  { %v8697_v54 = vld [vmem:[#allocation6 + $0x200] ss:$12 sps:$4 sm:$0xff]  }
 0x885   :  { %v7931_v35 = vmul.f32 -1.442695, %v2147_v27  ;;  %v8700_v27 = vld [vmem:[#allocation6 + $0x1e4] ss:$12 sps:$4 sm:$0xff]   ;;  %v10822_v59 = vld [vmem:[#allocation8 + $0x1e0] ss:$24 sps:$4 sm:$0xff]  }
 0x886   :  { %v10849_v30 = vld [vmem:[#allocation8 + $0x2e0] ss:$24 sps:$4 sm:$0xff]  }
 0x887   :  { %9177 = vpow2.f32 %v7931_v35  ;;  %v8701_v35 = vld [vmem:[#allocation6 + $0x2a8] ss:$12 sps:$4 sm:$0xff]  }
 0x888   :  { %9179 = vpow2.f32 %v7932_v11  ;;  %v8702_v11 = vld [vmem:[#allocation6 + $0x1e8] ss:$12 sps:$4 sm:$0xff]  }
 0x88e   :  { %v9176_v41 = vpop.eup %9175 }
 0x88f   :  { %v2154_v46 = vadd.f32 1.0, %v9176_v41  ;;  %v8706_v41 = vld [vmem:[#allocation6 + $0x290] ss:$12 sps:$4 sm:$0xff]  }
 0x891   :  { %9181 = vrcp.f32 %v2154_v46  ;;  %v8703_v46 = vld [vmem:[#allocation6 + $0x1c8] ss:$12 sps:$4 sm:$0xff]  }
 0x894   :  { %v9178_v38 = vpop.eup %9177 }
 0x895   :  { %v2155_v57 = vadd.f32 1.0, %v9178_v38  ;;  %v9180_v63 = vpop.eup %9179  ;;  %v8707_v38 = vld [vmem:[#allocation6 + $0x1d0] ss:$12 sps:$4 sm:$0xff]  }
 0x896   :  { %v2168_v51 = vadd.f32 1.0, %v9180_v63  ;;  %v13010_v63 = vld [vmem:[#allocation73_spill] sm:$0xff] }
 0x897   :  { %9183 = vrcp.f32 %v2155_v57  ;;  %v8710_v57 = vld [vmem:[#allocation6 + $0x1b4] ss:$12 sps:$4 sm:$0xff]  }
 0x89c   :  { %v2133_v22 = vpop.f32.mrf.mxu0 }
 0x89d   :  { %v8711_v22 = vld [vmem:[#allocation6 + $0x278] ss:$12 sps:$4 sm:$0xff]  }
 0x89e   :  { %v9182_v34 = vpop.eup %9181  ;;  %v2134_v44 = vpop.f32.mrf.mxu0 }
 0x89f   :  { %v2176_v4 = vmul.f32 %v9182_v34, %v2174_v36  ;;  %v13011_v36 = vld [vmem:[#allocation57_spill] sm:$0xff]  ;;  %v8708_v44 = vld [vmem:[#allocation6 + $0x1b0] ss:$12 sps:$4 sm:$0xff]  }
 0x8a0   :  { %v2135_v25 = vpop.f32.mrf.mxu0  ;;  %v10773_v34 = vpack.c.bf16 %v13011_v36, %v13010_v63  ;;  %v10886_v63 = vld [vmem:[#allocation8 + $0x248] ss:$24 sps:$4 sm:$0xff]  }
 0x8a1   :  { %v2178_v33 = vadd.f32 %v2176_v4, %v13003_v14  ;;  %v2161_v50 = vadd.f32 %v2135_v25, %v13004_v12  ;;  %v8712_v4 = vld [vmem:[#allocation6 + $0x1b8] ss:$12 sps:$4 sm:$0xff]   ;;  %v8717_v25 = vld [vmem:[#allocation6 + $0x1a0] ss:$12 sps:$4 sm:$0xff]   ;;  %v8721_v12 = vld [vmem:[#allocation6 + $0x248] ss:$12 sps:$4 sm:$0xff]  }
 0x8a2   :  { %v2137_v28 = vpop.f32.mrf.mxu0  ;;  %13016 = vst [vmem:[#allocation43_spill] sm:$0xff] %v10886_v63  ;;  %v10890_v36 = vld [vmem:[#allocation8 + $0x250] ss:$24 sps:$4 sm:$0xff]  }
 0x8a3   :  { %9185 = vtanh.f32 %v2178_v33  ;;  %v7933_v2 = vmul.f32 -1.442695, %v2161_v50  ;;  %v2175_v42 = vadd.f32 %v10624_v7, %v2137_v28  ;;  %v8720_v33 = vld [vmem:[#allocation6 + $0x184] ss:$12 sps:$4 sm:$0xff]   ;;  %v8718_v50 = vld [vmem:[#allocation6 + $0x180] ss:$12 sps:$4 sm:$0xff]  }
 0x8a4   :  { %v9184_v16 = vpop.eup %9183  ;;  %9187 = vrcp.f32 %v2168_v51  ;;  %v8713_v51 = vld [vmem:[#allocation6 + $0x198] ss:$12 sps:$4 sm:$0xff]   ;;  %v8722_v28 = vld [vmem:[#allocation6 + $0x188] ss:$12 sps:$4 sm:$0xff]  }
 0x8a5   :  { %9189 = vpow2.f32 %v7933_v2  ;;  %v2177_v21 = vmul.f32 %v9184_v16, %v2175_v42  ;;  %v8725_v2 = vld [vmem:[#allocation6 + $0x2ec] ss:$12 sps:$4 sm:$0xff]   ;;  %v10787_v16 = vld [vmem:[#allocation8 + $0x2d0] ss:$24 sps:$4 sm:$0xff]  }
 0x8a6   :  { %v10785_v42 = vld [vmem:[#allocation8 + $0x2d4] ss:$24 sps:$4 sm:$0xff]  }
 0x8a7   :  { %v2179_v23 = vadd.f32 %v2177_v21, %v13005_v29  ;;  %13012 = vst [vmem:[#allocation60_spill] sm:$0xff] %v10785_v42  ;;  %v8731_v21 = vld [vmem:[#allocation6 + $0x2d4] ss:$12 sps:$4 sm:$0xff]   ;;  %v10790_v29 = vld [vmem:[#allocation8 + $0x2a4] ss:$24 sps:$4 sm:$0xff]  }
 0x8a9   :  { %9191 = vtanh.f32 %v2179_v23  ;;  %v8729_v23 = vld [vmem:[#allocation6 + $0x2d0] ss:$12 sps:$4 sm:$0xff]  }
 0x8b0   :  { %v9186_v45 = vpop.eup %9185 }
 0x8b1   :  { %v9188_v49 = vpop.eup %9187  ;;  %v2182_v52 = vsub.f32 %v10700_v37, %v9186_v45 }
 0x8b2   :  { %v9190_v53 = vpop.eup %9189 }
 0x8b3   :  { %v2169_v5 = vadd.f32 1.0, %v9190_v53  ;;  %v2184_v58 = vmul.f32 %v9188_v49, %v2182_v52  ;;  %v8737_v49 = vld [vmem:[#allocation6 + $0x2bc] ss:$12 sps:$4 sm:$0xff]   ;;  %v10797_v52 = vld [vmem:[#allocation8 + $0x274] ss:$24 sps:$4 sm:$0xff]  }
 0x8b4   :  { %v8735_v53 = vld [vmem:[#allocation6 + $0x2b8] ss:$12 sps:$4 sm:$0xff]  }
 0x8b5   :  { %9193 = vrcp.f32 %v2169_v5  ;;  %v10733_v3 = vadd.f32 %v9186_v45, %v2184_v58  ;;  %v10794_v45 = vld [vmem:[#allocation8 + $0x2a0] ss:$24 sps:$4 sm:$0xff]   ;;  %v10801_v5 = vld [vmem:[#allocation8 + $0x270] ss:$24 sps:$4 sm:$0xff]  }
 0x8b6   :  { %v9192_v55 = vpop.eup %9191  ;;  %v8743_v58 = vld [vmem:[#allocation6 + $0x2a4] ss:$12 sps:$4 sm:$0xff]  }
 0x8b7   :  { %v2183_v7 = vsub.f32 %v10703_v39, %v9192_v55  ;;  %v10779_v14 = vpack.c.bf16 %v10733_v3, %v10700_v37  ;;  %v8723_v37 = vld [vmem:[#allocation6 + $0x2e8] ss:$12 sps:$4 sm:$0xff]   ;;  %v10804_v3 = vld [vmem:[#allocation8 + $0x244] ss:$24 sps:$4 sm:$0xff]  }
 0x8c2   :  { %v9194_v40 = vpop.eup %9193 }
 0x8c3   :  { %v2185_v60 = vmul.f32 %v9194_v40, %v2183_v7  ;;  %v10808_v7 = vld [vmem:[#allocation8 + $0x240] ss:$24 sps:$4 sm:$0xff]  }
 0x8c4   :  { %v8749_v40 = vld [vmem:[#allocation6 + $0x28c] ss:$12 sps:$4 sm:$0xff]  }
 0x8c5   :  { %v2187_v0 = vadd.f32 %v9192_v55, %v2185_v60  ;;  %v8741_v55 = vld [vmem:[#allocation6 + $0x2a0] ss:$12 sps:$4 sm:$0xff]  }
 0x8c6   :  { %v10811_v60 = vld [vmem:[#allocation8 + $0x214] ss:$24 sps:$4 sm:$0xff]  }
 0x8c7   :  { %v10737_v24 = vpack.c.bf16 %v10703_v39, %v2187_v0  ;;  %v10749_v39 = vpack.c.bf16 %v10553_v32, %v10632_v56  ;;  %v13008_v32 = vld [vmem:[#allocation58_spill] sm:$0xff] }
 0x8c8   :  { %v10755_v56 = vpack.c.bf16 %v10482_v26, %v13008_v32  ;;  %v8705_v26 = vld [vmem:[#allocation6 + $0x1cc] ss:$12 sps:$4 sm:$0xff]   ;;  %v8747_v0 = vld [vmem:[#allocation6 + $0x288] ss:$12 sps:$4 sm:$0xff]  }
 0x8c9   :  { %2649 = vmatprep.mubr.bf16.mxu1 %v10737_v24  ;;  %2722 = vmatprep.mubr.bf16.mxu0 %v10737_v24  ;;  %v10839_v32 = vld [vmem:[#allocation8 + $0x2dc] ss:$24 sps:$4 sm:$0xff]  }
 0x8ca   :  { %2650 = vmatmul.mubr.bf16.vlgmr.msra.gmra.mxu1 %v10741_v62  ;;  %2723 = vmatmul.mubr.bf16.vlgmr.msra.gmra.mxu0 %v10741_v62 }
 0x8cb   :  { %3054 = vmatpush1.bf16.msra.mxu0 %v8683_v31  ;;  %8366 = vmatpush3.bf16.msra.mxu1 %v8687_v1  ;;  %v8755_v31 = vld [vmem:[#allocation6 + $0x274] ss:$12 sps:$4 sm:$0xff]   ;;  %v10818_v1 = vld [vmem:[#allocation8 + $0x1e4] ss:$24 sps:$4 sm:$0xff]  }
 0x8cc   :  { %2659 = vmatprep.mubr.bf16.mxu1 %v10749_v39  ;;  %2730 = vmatprep.mubr.bf16.mxu0 %v10749_v39 }
 0x8cd   :  { %3055 = vmatprep.subr.bf16.mxu0 %v8690_v6  ;;  %8367 = vmatprep.subr.bf16.mxu1 %v8691_v19  ;;  %v8761_v6 = vld [vmem:[#allocation6 + $0x25c] ss:$12 sps:$4 sm:$0xff]   ;;  %v10825_v19 = vld [vmem:[#allocation8 + $0x1b4] ss:$24 sps:$4 sm:$0xff]  }
 0x8cf   :  { %3056 = vmatpush1.bf16.msra.mxu0 %v8688_v15  ;;  %8368 = vmatpush3.bf16.msra.mxu1 %v8692_v18  ;;  %v8759_v15 = vld [vmem:[#allocation6 + $0x258] ss:$12 sps:$4 sm:$0xff]   ;;  %v10829_v18 = vld [vmem:[#allocation8 + $0x1b0] ss:$24 sps:$4 sm:$0xff]  }
 0x8d0   :  { %3057 = vmatprep.subr.bf16.mxu0 %v8695_v10  ;;  %8369 = vmatprep.subr.bf16.mxu1 %v8696_v20  ;;  %v8767_v10 = vld [vmem:[#allocation6 + $0x244] ss:$12 sps:$4 sm:$0xff]  }
 0x8d1   :  { %v10832_v20 = vld [vmem:[#allocation8 + $0x184] ss:$24 sps:$4 sm:$0xff]  }
 0x8d2   :  { %2660 = vmatmul.mubr.bf16.gmra.mxu1 %v10755_v56  ;;  %2731 = vmatmul.mubr.bf16.gmra.mxu0 %v10755_v56 }
 0x8d3   :  { %3058 = vmatpush1.bf16.msra.mxu0 %v8693_v13  ;;  %8370 = vmatpush3.bf16.msra.mxu1 %v8697_v54  ;;  %v8765_v13 = vld [vmem:[#allocation6 + $0x240] ss:$12 sps:$4 sm:$0xff]  }
 0x8d4   :  { %2669 = vmatprep.mubr.bf16.mxu1 %v10761_v48  ;;  %2738 = vmatprep.mubr.bf16.mxu0 %v10761_v48  ;;  %v10836_v54 = vld [vmem:[#allocation8 + $0x180] ss:$24 sps:$4 sm:$0xff]  }
 0x8d5   :  { %3059 = vmatprep.subr.bf16.mxu0 %v8700_v27  ;;  %8371 = vmatprep.subr.bf16.mxu1 %v8701_v35  ;;  %v10841_v27 = vld [vmem:[#allocation8 + $0x2e4] ss:$24 sps:$4 sm:$0xff]   ;;  %v10845_v35 = vld [vmem:[#allocation8 + $0x2d8] ss:$24 sps:$4 sm:$0xff]  }
 0x8d7   :  { %3060 = vmatpush1.bf16.msra.mxu0 %v8698_v47  ;;  %8372 = vmatpush3.bf16.msra.mxu1 %v8702_v11  ;;  %v10851_v47 = vld [vmem:[#allocation8 + $0x2ac] ss:$24 sps:$4 sm:$0xff]  }
 0x8d8   :  { %3061 = vmatprep.subr.bf16.mxu0 %v8705_v26  ;;  %8373 = vmatprep.subr.bf16.mxu1 %v8706_v41  ;;  %v10853_v11 = vld [vmem:[#allocation8 + $0x2b4] ss:$24 sps:$4 sm:$0xff]   ;;  %v10859_v26 = vld [vmem:[#allocation8 + $0x2a8] ss:$24 sps:$4 sm:$0xff]  }
 0x8d9   :  { %v10863_v41 = vld [vmem:[#allocation8 + $0x2b0] ss:$24 sps:$4 sm:$0xff]  }
 0x8da   :  { %2670 = vmatmul.mubr.bf16.gmra.mxu1 %v10767_v9  ;;  %2739 = vmatmul.mubr.bf16.gmra.mxu0 %v10767_v9 }
 0x8db   :  { %3062 = vmatpush1.bf16.msra.mxu0 %v8703_v46  ;;  %8374 = vmatpush3.bf16.msra.mxu1 %v8707_v38  ;;  %v10865_v46 = vld [vmem:[#allocation8 + $0x27c] ss:$24 sps:$4 sm:$0xff]  }
 0x8dc   :  { %2679 = vmatprep.mubr.bf16.mxu1 %v10773_v34  ;;  %2746 = vmatprep.mubr.bf16.mxu0 %v10773_v34  ;;  %13013 = vst [vmem:[#allocation61_spill] sm:$0xff] %v10865_v46  ;;  %v10868_v38 = vld [vmem:[#allocation8 + $0x284] ss:$24 sps:$4 sm:$0xff]  }
 0x8dd   :  { %3063 = vmatprep.subr.bf16.mxu0 %v8710_v57  ;;  %8375 = vmatprep.subr.bf16.mxu1 %v8711_v22  ;;  %v10878_v57 = vld [vmem:[#allocation8 + $0x24c] ss:$24 sps:$4 sm:$0xff]  }
 0x8de   :  { %13015 = vst [vmem:[#allocation22_spill] sm:$0xff] %v10878_v57  ;;  %v10881_v22 = vld [vmem:[#allocation8 + $0x254] ss:$24 sps:$4 sm:$0xff]  }
 0x8df   :  { %3064 = vmatpush1.bf16.msra.mxu0 %v8708_v44  ;;  %8376 = vmatpush3.bf16.msra.mxu1 %v8712_v4  ;;  %v10892_v44 = vld [vmem:[#allocation8 + $0x21c] ss:$24 sps:$4 sm:$0xff]  }
 0x8e0   :  { %3065 = vmatprep.subr.bf16.mxu0 %v8715_v8  ;;  %8377 = vmatprep.subr.bf16.mxu1 %v8716_v43  ;;  %13017 = vst [vmem:[#allocation24_spill] sm:$0xff] %v10892_v44  ;;  %v10895_v4 = vld [vmem:[#allocation8 + $0x224] ss:$24 sps:$4 sm:$0xff]   ;;  %v10907_v43 = vld [vmem:[#allocation8 + $0x1f4] ss:$24 sps:$4 sm:$0xff]  }
 0x8e1   :  { %v10904_v8 = vld [vmem:[#allocation8 + $0x1ec] ss:$24 sps:$4 sm:$0xff]  }
 0x8e2   :  { %2680 = vmatmul.mubr.bf16.gmra.mxu1 %v10779_v14  ;;  %2747 = vmatmul.mubr.bf16.gmra.mxu0 %v10779_v14  ;;  %13019 = vst [vmem:[#allocation46_spill] sm:$0xff] %v10904_v8 }
 0x8e3   :  { %3066 = vmatpush1.bf16.msra.mxu0 %v8713_v51  ;;  %8378 = vmatpush3.bf16.msra.mxu1 %v8717_v25  ;;  %v10912_v51 = vld [vmem:[#allocation8 + $0x1e8] ss:$24 sps:$4 sm:$0xff]  }
 0x8e4   :  { %3085 = vmatprep.mubr.bf16.mxu0 %v10737_v24  ;;  %3158 = vmatprep.mubr.bf16.mxu1 %v10737_v24  ;;  %v10815_v24 = vld [vmem:[#allocation8 + $0x210] ss:$24 sps:$4 sm:$0xff]   ;;  %13020 = vst [vmem:[#allocation54_spill] sm:$0xff] %v10912_v51 }
 0x8e5   :  { %3067 = vmatprep.subr.bf16.mxu0 %v8720_v33  ;;  %8379 = vmatprep.subr.bf16.mxu1 %v8721_v12  ;;  %v10916_v25 = vld [vmem:[#allocation8 + $0x1f0] ss:$24 sps:$4 sm:$0xff]   ;;  %v10918_v33 = vld [vmem:[#allocation8 + $0x1bc] ss:$24 sps:$4 sm:$0xff]  }
 0x8e6   :  { %13021 = vst [vmem:[#allocation26_spill] sm:$0xff] %v10918_v33  ;;  %v10921_v12 = vld [vmem:[#allocation8 + $0x1c4] ss:$24 sps:$4 sm:$0xff]  }
 0x8e7   :  { %3068 = vmatpush1.bf16.msra.mxu0 %v8718_v50  ;;  %8380 = vmatpush3.bf16.msra.mxu1 %v8722_v28  ;;  %v10930_v50 = vld [vmem:[#allocation8 + $0x18c] ss:$24 sps:$4 sm:$0xff]  }
 0x8e8   :  { %3069 = vmatprep.subr.bf16.mxu0 %v8725_v2  ;;  %3520 = vmatprep.subr.bf16.mxu1 %v10785_v42  ;;  %13023 = vst [vmem:[#allocation28_spill] sm:$0xff] %v10930_v50  ;;  %v10933_v28 = vld [vmem:[#allocation8 + $0x194] ss:$24 sps:$4 sm:$0xff]   ;;  %v10937_v2 = vld [vmem:[#allocation8 + $0x188] ss:$24 sps:$4 sm:$0xff]  }
 0x8e9   :  { %13024 = vst [vmem:[#allocation55_spill] sm:$0xff] %v10937_v2 }
 0x8ea   :  { %3159 = vmatmul.mubr.bf16.vlgmr.msra.gmra.mxu1 %v10741_v62 }
 0x8eb   :  { %3070 = vmatpush2.bf16.msra.mxu0 %v8723_v37  ;;  %3521 = vmatpush1.bf16.msra.mxu1 %v10787_v16  ;;  %v10942_v37 = vld [vmem:[#allocation8 + $0x190] ss:$24 sps:$4 sm:$0xff]  }
 0x8ec   :  { %3166 = vmatprep.mubr.bf16.mxu1 %v10749_v39  ;;  %3071 = vmatprep.subr.bf16.mxu0 %v8731_v21 }
 0x8ed   :  { %3522 = vmatprep.subr.bf16.mxu1 %v10790_v29 }
 0x8ef   :  { %3072 = vmatpush2.bf16.msra.mxu0 %v8729_v23  ;;  %3523 = vmatpush1.bf16.msra.mxu1 %v10794_v45 }
 0x8f0   :  { %3073 = vmatprep.subr.bf16.mxu0 %v8737_v49  ;;  %3524 = vmatprep.subr.bf16.mxu1 %v10797_v52 }
 0x8f2   :  { %3167 = vmatmul.mubr.bf16.gmra.mxu1 %v10755_v56 }
 0x8f3   :  { %3074 = vmatpush2.bf16.msra.mxu0 %v8735_v53  ;;  %3525 = vmatpush1.bf16.msra.mxu1 %v10801_v5 }
 0x8f4   :  { %3174 = vmatprep.mubr.bf16.mxu1 %v10761_v48  ;;  %3075 = vmatprep.subr.bf16.mxu0 %v8743_v58  ;;  %v13025_v58 = vld [vmem:[#allocation14_spill] sm:$0xff] }
 0x8f5   :  { %3526 = vmatprep.subr.bf16.mxu1 %v10804_v3 }
 0x8f7   :  { %3076 = vmatpush2.bf16.msra.mxu0 %v8741_v55  ;;  %3527 = vmatpush1.bf16.msra.mxu1 %v10808_v7 }
 0x8f8   :  { %3077 = vmatprep.subr.bf16.mxu0 %v8749_v40  ;;  %3528 = vmatprep.subr.bf16.mxu1 %v10811_v60 }
 0x8fa   :  { %3175 = vmatmul.mubr.bf16.gmra.mxu1 %v10767_v9 }
 0x8fb   :  { %3078 = vmatpush2.bf16.msra.mxu0 %v8747_v0  ;;  %3529 = vmatpush1.bf16.msra.mxu1 %v10815_v24 }
 0x8fc   :  { %3182 = vmatprep.mubr.bf16.mxu1 %v10773_v34  ;;  %3079 = vmatprep.subr.bf16.mxu0 %v8755_v31 }
 0x8fd   :  { %3530 = vmatprep.subr.bf16.mxu1 %v10818_v1 }
 0x8ff   :  { %3080 = vmatpush2.bf16.msra.mxu0 %v8753_v17  ;;  %3531 = vmatpush1.bf16.msra.mxu1 %v10822_v59 }
 0x900   :  { %3081 = vmatprep.subr.bf16.mxu0 %v8761_v6  ;;  %3532 = vmatprep.subr.bf16.mxu1 %v10825_v19 }
 0x902   :  { %3183 = vmatmul.mubr.bf16.gmra.mxu1 %v10779_v14 }
 0x903   :  { %3082 = vmatpush2.bf16.msra.mxu0 %v8759_v15  ;;  %3533 = vmatpush1.bf16.msra.mxu1 %v10829_v18 }
 0x904   :  { %3083 = vmatprep.subr.bf16.mxu0 %v8767_v10  ;;  %3534 = vmatprep.subr.bf16.mxu1 %v10832_v20  ;;  %v13028_v10 = vld [vmem:[#allocation12_spill] sm:$0xff] }
 0x905   :  { %3552 = vmatprep.mubr.bf16.mxu1 %v12902_v61 }
 0x907   :  { %3084 = vmatpush2.bf16.msra.mxu0 %v8765_v13  ;;  %3535 = vmatpush1.bf16.msra.mxu1 %v10836_v54 }
 0x908   :  { %3561 = vmatprep.subr.bf16.mxu0 %v10839_v32  ;;  %3602 = vmatprep.subr.bf16.mxu1 %v10841_v27 }
 0x90a   :  { %3086 = vmatmul.mubr.bf16.vlgmr.msra.gmra.mxu0 %v10741_v62  ;;  %3553 = vmatmul.mubr.bf16.vlgmr.msra.gmra.mxu1 %v12902_v61  ;;  %v10872_v62 = vld [vmem:[#allocation8 + $0x278] ss:$24 sps:$4 sm:$0xff]  }
 0x90b   :  { %3095 = vmatprep.mubr.bf16.mxu0 %v10749_v39  ;;  %3562 = vmatpush1.bf16.msra.mxu0 %v10845_v35  ;;  %13014 = vst [vmem:[#allocation62_spill] sm:$0xff] %v10872_v62  ;;  %v10876_v39 = vld [vmem:[#allocation8 + $0x280] ss:$24 sps:$4 sm:$0xff]  }
 0x90c   :  { %3603 = vmatpush1.bf16.msra.mxu1 %v10849_v30  ;;  %3563 = vmatprep.subr.bf16.mxu0 %v10851_v47 }
 0x90d   :  { %3604 = vmatprep.subr.bf16.mxu1 %v10853_v11  ;;  %3634 = vmatprep.mubr.bf16.mxu1 %v12902_v61 }
 0x90f   :  { %3564 = vmatpush1.bf16.msra.mxu0 %v10859_v26 }
 0x910   :  { %3605 = vmatpush1.bf16.msra.mxu1 %v10863_v41  ;;  %3565 = vmatprep.subr.bf16.mxu0 %v10865_v46 }
 0x911   :  { %3606 = vmatprep.subr.bf16.mxu1 %v10868_v38 }
 0x912   :  { %3096 = vmatmul.mubr.bf16.gmra.mxu0 %v10755_v56  ;;  %v10898_v56 = vld [vmem:[#allocation8 + $0x218] ss:$24 sps:$4 sm:$0xff]  }
 0x913   :  { %3105 = vmatprep.mubr.bf16.mxu0 %v10761_v48  ;;  %3566 = vmatpush1.bf16.msra.mxu0 %v10872_v62  ;;  %13018 = vst [vmem:[#allocation45_spill] sm:$0xff] %v10898_v56  ;;  %v10902_v48 = vld [vmem:[#allocation8 + $0x220] ss:$24 sps:$4 sm:$0xff]  }
 0x914   :  { %3607 = vmatpush1.bf16.msra.mxu1 %v10876_v39  ;;  %3567 = vmatprep.subr.bf16.mxu0 %v10878_v57 }
 0x915   :  { %3608 = vmatprep.subr.bf16.mxu1 %v10881_v22 }
 0x917   :  { %3568 = vmatpush1.bf16.msra.mxu0 %v10886_v63 }
 0x918   :  { %3609 = vmatpush1.bf16.msra.mxu1 %v10890_v36  ;;  %3569 = vmatprep.subr.bf16.mxu0 %v10892_v44 }
 0x919   :  { %3610 = vmatprep.subr.bf16.mxu1 %v10895_v4 }
 0x91a   :  { %3106 = vmatmul.mubr.bf16.gmra.mxu0 %v10767_v9  ;;  %v10924_v9 = vld [vmem:[#allocation8 + $0x1b8] ss:$24 sps:$4 sm:$0xff]  }
 0x91b   :  { %3115 = vmatprep.mubr.bf16.mxu0 %v10773_v34  ;;  %3570 = vmatpush1.bf16.msra.mxu0 %v10898_v56  ;;  %13022 = vst [vmem:[#allocation39_spill] sm:$0xff] %v10924_v9  ;;  %v10928_v34 = vld [vmem:[#allocation8 + $0x1c0] ss:$24 sps:$4 sm:$0xff]  }
 0x91c   :  { %3611 = vmatpush1.bf16.msra.mxu1 %v10902_v48  ;;  %3571 = vmatprep.subr.bf16.mxu0 %v10904_v8 }
 0x91d   :  { %3612 = vmatprep.subr.bf16.mxu1 %v10907_v43 }
 0x91f   :  { %3572 = vmatpush1.bf16.msra.mxu0 %v10912_v51 }
 0x920   :  { %3613 = vmatpush1.bf16.msra.mxu1 %v10916_v25  ;;  %3573 = vmatprep.subr.bf16.mxu0 %v10918_v33 }
 0x921   :  { %3614 = vmatprep.subr.bf16.mxu1 %v10921_v12 }
 0x922   :  { %3116 = vmatmul.mubr.bf16.gmra.mxu0 %v10779_v14  ;;  %v7934_v14 = vld [vmem:[%s12696_s4 + $0x6] sm:$0x7] }
 0x923   :  { %3574 = vmatpush1.bf16.msra.mxu0 %v10924_v9  ;;  %3593 = vmatprep.mubr.bf16.mxu0 %v12902_v61  ;;  %v10993_v55 = vrot.slane %v7934_v14, %v13025_v58  ;;  %v11003_v13 = vrot.slane %v7934_v14, %v13028_v10 }
 0x924   :  { %3615 = vmatpush1.bf16.msra.mxu1 %v10928_v34  ;;  %3575 = vmatprep.subr.bf16.mxu0 %v10930_v50 }
 0x925   :  { %3616 = vmatprep.subr.bf16.mxu1 %v10933_v28 }
 0x927   :  { %3576 = vmatpush1.bf16.msra.mxu0 %v10937_v2 }
 0x928   :  { %3617 = vmatpush1.bf16.msra.mxu1 %v10942_v37  ;;  %3694 = vmatprep.subr.bf16.mxu0 %v10785_v42 }
 0x929   :  { %3735 = vmatprep.subr.bf16.mxu1 %v10839_v32 }
 0x92a   :  { %3594 = vmatmul.mubr.bf16.vlgmr.msra.gmra.mxu0 %v12902_v61 }
 0x92b   :  { %3635 = vmatmul.mubr.bf16.vlgmr.msra.gmra.mxu1 %v12902_v61  ;;  %3695 = vmatpush1.bf16.msra.mxu0 %v10787_v16 }
 0x92c   :  { %3736 = vmatpush1.bf16.msra.mxu1 %v10845_v35  ;;  %3696 = vmatprep.subr.bf16.mxu0 %v10790_v29 }
 0x92d   :  { %3737 = vmatprep.subr.bf16.mxu1 %v10851_v47  ;;  %3726 = vmatprep.mubr.bf16.mxu0 %v12902_v61 }
 0x92e   :  { %3767 = vmatprep.mubr.bf16.mxu1 %v12902_v61 }
 0x92f   :  { %3697 = vmatpush1.bf16.msra.mxu0 %v10794_v45 }
 0x930   :  { %3738 = vmatpush1.bf16.msra.mxu1 %v10859_v26  ;;  %3698 = vmatprep.subr.bf16.mxu0 %v10797_v52 }
 0x931   :  { %3739 = vmatprep.subr.bf16.mxu1 %v10865_v46 }
 0x933   :  { %3699 = vmatpush1.bf16.msra.mxu0 %v10801_v5 }
 0x934   :  { %3740 = vmatpush1.bf16.msra.mxu1 %v10872_v62  ;;  %3700 = vmatprep.subr.bf16.mxu0 %v10804_v3 }
 0x935   :  { %3741 = vmatprep.subr.bf16.mxu1 %v10878_v57 }
 0x937   :  { %3701 = vmatpush1.bf16.msra.mxu0 %v10808_v7 }
 0x938   :  { %3742 = vmatpush1.bf16.msra.mxu1 %v10886_v63  ;;  %3702 = vmatprep.subr.bf16.mxu0 %v10811_v60 }
 0x939   :  { %3743 = vmatprep.subr.bf16.mxu1 %v10892_v44 }
 0x93b   :  { %3703 = vmatpush1.bf16.msra.mxu0 %v10815_v24 }
 0x93c   :  { %3744 = vmatpush1.bf16.msra.mxu1 %v10898_v56  ;;  %3704 = vmatprep.subr.bf16.mxu0 %v10818_v1 }
 0x93d   :  { %3745 = vmatprep.subr.bf16.mxu1 %v10904_v8 }
 0x93f   :  { %3705 = vmatpush1.bf16.msra.mxu0 %v10822_v59 }
 0x940   :  { %3746 = vmatpush1.bf16.msra.mxu1 %v10912_v51  ;;  %3706 = vmatprep.subr.bf16.mxu0 %v10825_v19 }
 0x941   :  { %3747 = vmatprep.subr.bf16.mxu1 %v10918_v33 }
 0x943   :  { %3707 = vmatpush1.bf16.msra.mxu0 %v10829_v18 }
 0x944   :  { %3748 = vmatpush1.bf16.msra.mxu1 %v10924_v9  ;;  %3708 = vmatprep.subr.bf16.mxu0 %v10832_v20  ;;  %v13029_v9 = vld [vmem:[#allocation17_spill] sm:$0xff] }
 0x945   :  { %3749 = vmatprep.subr.bf16.mxu1 %v10930_v50  ;;  %v11006_v33 = vrot.slane %v7934_v14, %v13029_v9 }
 0x947   :  { %3709 = vmatpush1.bf16.msra.mxu0 %v10836_v54  ;;  %13030 = vst [vmem:[#allocation53_spill] sm:$0xff] %v11006_v33 }
 0x948   :  { %3750 = vmatpush1.bf16.msra.mxu1 %v10937_v2  ;;  %3776 = vmatprep.subr.bf16.mxu0 %v10841_v27 }
 0x949   :  { %3868 = vmatprep.subr.bf16.mxu1 %v10785_v42 }
 0x98a   :  { %v10988_v21 = vpop.f32.mrf.mxu1  ;;  %v8341_v23 = vpop.f32.mrf.mxu0 }
 0x98c   :  { %v10990_v49 = vpop.f32.mrf.mxu1  ;;  %v8342_v53 = vpop.f32.mrf.mxu0 }
 0x98d   :  { %v10995_v40 = vadd.f32 %v8342_v53, %v8341_v23 }
 0x98e   :  { %v2655_v0 = vpop.f32.mrf.mxu1  ;;  %v8344_v31 = vpop.f32.mrf.mxu0 }
 0x98f   :  { %v10998_v17 = vadd.f32 %v2655_v0, %v10993_v55 }
 0x990   :  { %v11000_v6 = vpop.f32.mrf.mxu1  ;;  %v8345_v15 = vpop.f32.mrf.mxu0 }
 0x991   :  { %13026 = vst [vmem:[#allocation47_spill] sm:$0xff] %v10998_v17  ;;  %13027 = vst [vmem:[#allocation41_spill] sm:$0xff] %v11000_v6  ;;  %v8346_v42 = vadd.f32 %v8345_v15, %v8344_v31 }
 0x992   :  { %v2661_v2 = vpop.f32.mrf.mxu1  ;;  %v8347_v50 = vpop.f32.mrf.mxu0 }
 0x993   :  { %v11009_v23 = vadd.f32 %v8346_v42, %v11003_v13  ;;  %v11012_v53 = vadd.f32 %v2661_v2, %v10993_v55 }
 0x994   :  { %v2663_v0 = vpop.f32.mrf.mxu1  ;;  %v8348_v17 = vpop.f32.mrf.mxu0 }
 0x995   :  { %13031 = vst [vmem:[#allocation30_spill] sm:$0xff] %v11009_v23  ;;  %13032 = vst [vmem:[#allocation35_spill] sm:$0xff] %v11012_v53  ;;  %v11015_v6 = vadd.f32 %v2663_v0, %v11006_v33  ;;  %v8349_v51 = vadd.f32 %v8348_v17, %v8347_v50 }
 0x996   :  { %v2665_v8 = vpop.f32.mrf.mxu1  ;;  %v8350_v56 = vpop.f32.mrf.mxu0 }
 0x997   :  { %13033 = vst [vmem:[#allocation32_spill] sm:$0xff] %v11015_v6  ;;  %v11018_v31 = vadd.f32 %v8349_v51, %v11003_v13  ;;  %v11021_v14 = vadd.f32 %v2665_v8, %v10993_v55 }
 0x998   :  { %v11023_v15 = vpop.f32.mrf.mxu1  ;;  %v8351_v42 = vpop.f32.mrf.mxu0 }
 0x999   :  { %13034 = vst [vmem:[#allocation20_spill] sm:$0xff] %v11018_v31  ;;  %13035 = vst [vmem:[#allocation37_spill] sm:$0xff] %v11021_v14  ;;  %v8352_v23 = vadd.f32 %v8351_v42, %v8350_v56 }
 0x99a   :  { %13036 = vst [vmem:[#allocation16_spill] sm:$0xff] %v11023_v15  ;;  %v2671_v2 = vpop.f32.mrf.mxu1  ;;  %v8353_v53 = vpop.f32.mrf.mxu0 }
 0x99b   :  { %v11026_v44 = vadd.f32 %v8352_v23, %v11003_v13  ;;  %v11029_v0 = vadd.f32 %v2671_v2, %v10993_v55 }
 0x99c   :  { %v2673_v50 = vpop.f32.mrf.mxu1  ;;  %v8354_v17 = vpop.f32.mrf.mxu0 }
 0x99d   :  { %13037 = vst [vmem:[#allocation51_spill] sm:$0xff] %v11026_v44  ;;  %13038 = vst [vmem:[#allocation63_spill] sm:$0xff] %v11029_v0  ;;  %v11032_v51 = vadd.f32 %v2673_v50, %v11006_v33  ;;  %v8355_v31 = vadd.f32 %v8354_v17, %v8353_v53 }
 0x99e   :  { %v2675_v8 = vpop.f32.mrf.mxu1  ;;  %v8356_v14 = vpop.f32.mrf.mxu0 }
 0x99f   :  { %13039 = vst [vmem:[#allocation64_spill] sm:$0xff] %v11032_v51  ;;  %v11035_v15 = vadd.f32 %v8355_v31, %v11003_v13  ;;  %v11038_v56 = vadd.f32 %v2675_v8, %v10993_v55 }
 0x9a0   :  { %v11040_v42 = vpop.f32.mrf.mxu1  ;;  %v8357_v23 = vpop.f32.mrf.mxu0 }
 0x9a1   :  { %13040 = vst [vmem:[#allocation65_spill] sm:$0xff] %v11035_v15  ;;  %13041 = vst [vmem:[#allocation66_spill] sm:$0xff] %v11038_v56  ;;  %v8358_v44 = vadd.f32 %v8357_v23, %v8356_v14 }
 0x9a2   :  { %13042 = vst [vmem:[#allocation67_spill] sm:$0xff] %v11040_v42  ;;  %v2681_v2 = vpop.f32.mrf.mxu1  ;;  %v8359_v0 = vpop.f32.mrf.mxu0 }
 0x9a3   :  { %v11043_v6 = vadd.f32 %v8358_v44, %v11003_v13  ;;  %v11046_v50 = vadd.f32 %v2681_v2, %v10993_v55  ;;  %v7983_v2 = vld [vmem:[%s12696_s4 + $0x9] sm:$0x7] }
 0x9a4   :  { %v2683_v53 = vpop.f32.mrf.mxu1  ;;  %v8360_v17 = vpop.f32.mrf.mxu0 }
 0x9a5   :  { %13043 = vst [vmem:[#allocation68_spill] sm:$0xff] %v11043_v6  ;;  %13044 = vst [vmem:[#allocation69_spill] sm:$0xff] %v11046_v50  ;;  %v11049_v31 = vadd.f32 %v2683_v53, %v11006_v33  ;;  %v8361_v15 = vadd.f32 %v8360_v17, %v8359_v0  ;;  %v11066_v0 = vrot.slane %v7983_v2, %v13028_v10 }
 0x9a6   :  { %v2685_v8 = vpop.f32.mrf.mxu1  ;;  %v8362_v56 = vpop.f32.mrf.mxu0 }
 0x9a7   :  { %13045 = vst [vmem:[#allocation70_spill] sm:$0xff] %v11049_v31  ;;  %v11052_v42 = vadd.f32 %v8361_v15, %v11003_v13  ;;  %v11055_v14 = vadd.f32 %v2685_v8, %v10993_v55 }
 0x9a8   :  { %v11057_v23 = vpop.f32.mrf.mxu1  ;;  %v8363_v44 = vpop.f32.mrf.mxu0 }
 0x9a9   :  { %13046 = vst [vmem:[#allocation71_spill] sm:$0xff] %v11052_v42  ;;  %13047 = vst [vmem:[#allocation34_spill] sm:$0xff] %v11055_v14  ;;  %v8364_v50 = vadd.f32 %v8363_v44, %v8362_v56 }
 0x9aa   :  { %13048 = vst [vmem:[#allocation31_spill] sm:$0xff] %v11057_v23  ;;  %v8381_v6 = vpop.f32.mrf.mxu1 }
 0x9ab   :  { %v11063_v53 = vadd.f32 %v8364_v50, %v11003_v13 }
 0x9ac   :  { %v8382_v15 = vpop.f32.mrf.mxu1 }
 0x9ad   :  { %13049 = vst [vmem:[#allocation21_spill] sm:$0xff] %v11063_v53  ;;  %v8383_v17 = vadd.f32 %v8382_v15, %v8381_v6 }
 0x9ae   :  { %v8384_v42 = vpop.f32.mrf.mxu1 }
 0x9af   :  { %v11069_v8 = vadd.f32 %v8383_v17, %v11066_v0 }
 0x9b0   :  { %v8385_v23 = vpop.f32.mrf.mxu1 }
 0x9b1   :  { %13050 = vst [vmem:[#allocation36_spill] sm:$0xff] %v11069_v8  ;;  %v8386_v14 = vadd.f32 %v8385_v23, %v8384_v42 }
 0x9b2   :  { %v8387_v31 = vpop.f32.mrf.mxu1 }
 0x9b3   :  { %v11072_v51 = vadd.f32 %v8386_v14, %v11066_v0 }
 0x9b4   :  { %v8388_v56 = vpop.f32.mrf.mxu1 }
 0x9b5   :  { %13051 = vst [vmem:[#allocation13_spill] sm:$0xff] %v11072_v51  ;;  %v8389_v44 = vadd.f32 %v8388_v56, %v8387_v31 }
 0x9b6   :  { %v8390_v63 = vpop.f32.mrf.mxu1 }
 0x9b7   :  { %v11075_v50 = vadd.f32 %v8389_v44, %v11066_v0 }
 0x9b8   :  { %v8391_v10 = vpop.f32.mrf.mxu1 }
 0x9b9   :  { %13052 = vst [vmem:[#allocation19_spill] sm:$0xff] %v11075_v50  ;;  %v8392_v53 = vadd.f32 %v8391_v10, %v8390_v63  ;;  %v2785_v10 = vrot.slane %v7983_v2, %v13025_v58 }
 0x9ba   :  { %v8393_v57 = vpop.f32.mrf.mxu1 }
 0x9bb   :  { %v11078_v6 = vadd.f32 %v8392_v53, %v11066_v0  ;;  %v2652_v53 = vadd.f32 %v10988_v21, %v10993_v55 }
 0x9bc   :  { %v8394_v15 = vpop.f32.mrf.mxu1 }
 0x9bd   :  { %13053 = vst [vmem:[#allocation33_spill] sm:$0xff] %v11078_v6  ;;  %v8395_v17 = vadd.f32 %v8394_v15, %v8393_v57 }
 0x9be   :  { %v8396_v8 = vpop.f32.mrf.mxu1 }
 0x9bf   :  { %v11081_v42 = vadd.f32 %v8395_v17, %v11066_v0 }
 0x9c0   :  { %v8397_v14 = vpop.f32.mrf.mxu1 }
 0x9c1   :  { %13054 = vst [vmem:[#allocation49_spill] sm:$0xff] %v11081_v42  ;;  %v8398_v23 = vadd.f32 %v8397_v14, %v8396_v8  ;;  %v11097_v8 = vrot.slane %v7983_v2, %v13029_v9 }
 0x9c2   :  { %v8399_v51 = vpop.f32.mrf.mxu1 }
 0x9c3   :  { %v11084_v31 = vadd.f32 %v8398_v23, %v11066_v0  ;;  %13057 = vst [vmem:[#allocation40_spill] sm:$0xff] %v11097_v8 }
 0x9c4   :  { %v8400_v56 = vpop.f32.mrf.mxu1 }
 0x9c5   :  { %13055 = vst [vmem:[#allocation38_spill] sm:$0xff] %v11084_v31  ;;  %v8401_v44 = vadd.f32 %v8400_v56, %v8399_v51 }
 0x9c6   :  { %v11086_v50 = vpop.f32.mrf.mxu1 }
 0x9c7   :  { %v11089_v63 = vadd.f32 %v8401_v44, %v11066_v0 }
 0x9c8   :  { %v11092_v57 = vpop.f32.mrf.mxu1 }
 0x9c9   :  { %13056 = vst [vmem:[#allocation27_spill] sm:$0xff] %v11089_v63 }
 0x9ca   :  { %v3087_v15 = vpop.f32.mrf.mxu0  ;;  %v3554_v17 = vpop.f32.mrf.mxu1 }
 0x9cb   :  { %v11099_v14 = vadd.f32 %v3087_v15, %v2785_v10  ;;  %v3649_v51 = vadd.f32 %v3554_v17, %v2652_v53  ;;  %v2654_v53 = vadd.f32 %v10990_v49, %v11006_v33 }
 0x9cc   :  { %v3089_v23 = vpop.f32.mrf.mxu0  ;;  %v3556_v56 = vpop.f32.mrf.mxu1 }
 0x9cd   :  { %13058 = vst [vmem:[#allocation29_spill] sm:$0xff] %v11099_v14  ;;  %v8084_v6 = vmul.f32 -1.442695, %v3649_v51  ;;  %v11102_v44 = vadd.f32 %v3089_v23, %v11097_v8  ;;  %v3663_v51 = vadd.f32 %v3556_v56, %v2654_v53 }
 0x9ce   :  { %v3091_v58 = vpop.f32.mrf.mxu0  ;;  %v3558_v42 = vpop.f32.mrf.mxu1 }
 0x9cf   :  { %13059 = vst [vmem:[#allocation15_spill] sm:$0xff] %v11102_v44  ;;  %9195 = vpow2.f32 %v8084_v6  ;;  %v11104_v31 = vadd.f32 %v3091_v58, %v2785_v10  ;;  %v8086_v58 = vmul.f32 -1.442695, %v3663_v51 }
 0x9d0   :  { %v11106_v21 = vpop.f32.mrf.mxu0  ;;  %v3559_v55 = vpop.f32.mrf.mxu1 }
 0x9d1   :  { %13060 = vst [vmem:[#allocation48_spill] sm:$0xff] %v11104_v31  ;;  %13061 = vst [vmem:[#allocation52_spill] sm:$0xff] %v11106_v21  ;;  %9197 = vpow2.f32 %v8086_v58 }
 0x9d2   :  { %v3097_v2 = vpop.f32.mrf.mxu0 }
 0x9d3   :  { %v11108_v9 = vadd.f32 %v3097_v2, %v2785_v10 }
 0x9d4   :  { %v3099_v15 = vpop.f32.mrf.mxu0 }
 0x9d5   :  { %13062 = vst [vmem:[#allocation42_spill] sm:$0xff] %v11108_v9  ;;  %v11113_v17 = vadd.f32 %v3099_v15, %v11097_v8 }
 0x9d6   :  { %v3101_v23 = vpop.f32.mrf.mxu0 }
 0x9d7   :  { %13063 = vst [vmem:[#allocation23_spill] sm:$0xff] %v11113_v17  ;;  %v11115_v44 = vadd.f32 %v3101_v23, %v2785_v10 }
 0x9d8   :  { %v11117_v6 = vpop.f32.mrf.mxu0 }
 0x9d9   :  { %13064 = vst [vmem:[#allocation44_spill] sm:$0xff] %v11115_v44  ;;  %13065 = vst [vmem:[#allocation18_spill] sm:$0xff] %v11117_v6 }
 0x9da   :  { %v3107_v42 = vpop.f32.mrf.mxu0 }
 0x9db   :  { %v11119_v14 = vadd.f32 %v3107_v42, %v2785_v10 }
 0x9dc   :  { %v9196_v55 = vpop.eup %9195  ;;  %v3109_v2 = vpop.f32.mrf.mxu0 }
 0x9dd   :  { %13066 = vst [vmem:[#allocation25_spill] sm:$0xff] %v11119_v14  ;;  %v3657_v21 = vadd.f32 1.0, %v9196_v55  ;;  %v11122_v31 = vadd.f32 %v3109_v2, %v11097_v8  ;;  %v11136_v55 = vld [vmem:[%s12697_s5 + $0x2] ss:$0 sm:$0xff] }
 0x9de   :  { %v3111_v49 = vpop.f32.mrf.mxu0  ;;  %13072 = vst [vmem:[#allocation73_spill] sm:$0xff] %v11136_v55 }
 0x9df   :  { %13067 = vst [vmem:[#allocation50_spill] sm:$0xff] %v11122_v31  ;;  %9199 = vrcp.f32 %v3657_v21  ;;  %v11124_v15 = vadd.f32 %v3111_v49, %v2785_v10  ;;  %v9198_v21 = vpop.eup %9197 }
 0x9e0   :  { %v11126_v56 = vpop.f32.mrf.mxu0 }
 0x9e1   :  { %13068 = vst [vmem:[#allocation56_spill] sm:$0xff] %v11124_v15  ;;  %13069 = vst [vmem:[#allocation72_spill] sm:$0xff] %v11126_v56  ;;  %v3671_v56 = vadd.f32 1.0, %v9198_v21 }
 0x9e2   :  { %v3117_v53 = vpop.f32.mrf.mxu0 }
 0x9e3   :  { %v11128_v23 = vadd.f32 %v3117_v53, %v2785_v10  ;;  %v2725_v53 = vadd.f32 %v10995_v40, %v11003_v13 }
 0x9e4   :  { %v3119_v51 = vpop.f32.mrf.mxu0 }
 0x9e5   :  { %13070 = vst [vmem:[#allocation58_spill] sm:$0xff] %v11128_v23  ;;  %v11131_v42 = vadd.f32 %v3119_v51, %v11097_v8 }
 0x9e6   :  { %v3121_v17 = vpop.f32.mrf.mxu0 }
 0x9e7   :  { %13071 = vst [vmem:[#allocation59_spill] sm:$0xff] %v11131_v42  ;;  %v3122_v15 = vadd.f32 %v3121_v17, %v2785_v10 }
 0x9e8   :  { %v3123_v9 = vpop.f32.mrf.mxu0 }
 0x9ea   :  { %v3595_v58 = vpop.f32.mrf.mxu0 }
 0x9eb   :  { %v3677_v2 = vadd.f32 %v11136_v55, %v3595_v58  ;;  %v3636_v49 = vpop.f32.mrf.mxu1  ;;  %v3124_v58 = vadd.f32 %v3123_v9, %v11097_v8 }
 0x9ec   :  { %v9200_v6 = vpop.eup %9199  ;;  %v3597_v44 = vpop.f32.mrf.mxu0  ;;  %v13089_v8 = vld [vmem:[#allocation58_spill] sm:$0xff] }
 0x9ed   :  { %v3679_v31 = vmul.f32 %v9200_v6, %v3677_v2  ;;  %v3637_v51 = vpop.f32.mrf.mxu1 }
 0x9ee   :  { %v3598_v14 = vpop.f32.mrf.mxu0  ;;  %v13077_v51 = vld [vmem:[#allocation22_spill] sm:$0xff] }
 0x9ef   :  { %v3681_v63 = vadd.f32 %v3679_v31, %v2725_v53  ;;  %v3638_v62 = vpop.f32.mrf.mxu1 }
 0x9f0   :  { %v3599_v42 = vpop.f32.mrf.mxu0  ;;  %v3664_v49 = vadd.f32 %v3638_v62, %v3124_v58  ;;  %v8404_v62 = vadd.f32 %v11092_v57, %v11086_v50  ;;  %v13076_v57 = vld [vmem:[#allocation62_spill] sm:$0xff]  ;;  %v13078_v58 = vld [vmem:[#allocation43_spill] sm:$0xff] }
 0x9f1   :  { %9201 = vtanh.f32 %v3681_v63  ;;  %v3650_v33 = vadd.f32 %v3599_v42, %v3122_v15  ;;  %v3640_v31 = vpop.f32.mrf.mxu1 }
 0x9f2   :  { %9203 = vrcp.f32 %v3671_v56  ;;  %v8087_v40 = vmul.f32 -1.442695, %v3664_v49  ;;  %v13079_v49 = vld [vmem:[#allocation24_spill] sm:$0xff] }
 0x9f3   :  { %v8085_v23 = vmul.f32 -1.442695, %v3650_v33  ;;  %v11147_v33 = vld [vmem:[%s12697_s5 + $0x3] ss:$0 sm:$0xff] }
 0x9f4   :  { %v3678_v63 = vadd.f32 %v11147_v33, %v3640_v31  ;;  %v13085_v31 = vld [vmem:[#allocation28_spill] sm:$0xff] }
 0x9f5   :  { %9205 = vpow2.f32 %v8085_v23 }
 0x9f6   :  { %9207 = vpow2.f32 %v8087_v40  ;;  %v13081_v40 = vld [vmem:[#allocation46_spill] sm:$0xff] }
 0x9fe   :  { %v9202_v44 = vpop.eup %9201 }
 0x9ff   :  { %v3685_v55 = vsub.f32 0.0, %v9202_v44  ;;  %v9204_v46 = vpop.eup %9203 }
 0xa01   :  { %v3687_v13 = vmul.f32 %v9204_v46, %v3685_v55  ;;  %v3188_v46 = vadd.f32 %v8404_v62, %v11066_v0  ;;  %v13075_v0 = vld [vmem:[#allocation61_spill] sm:$0xff]  ;;  %v13086_v62 = vld [vmem:[#allocation55_spill] sm:$0xff] }
 0xa02   :  { %v9206_v6 = vpop.eup %9205 }
 0xa03   :  { %v3658_v14 = vadd.f32 1.0, %v9206_v6  ;;  %v11142_v21 = vadd.f32 %v9202_v44, %v3687_v13  ;;  %v9208_v9 = vpop.eup %9207  ;;  %v13080_v44 = vld [vmem:[#allocation45_spill] sm:$0xff]  ;;  %v13082_v13 = vld [vmem:[#allocation54_spill] sm:$0xff] }
 0xa04   :  { %v3672_v15 = vadd.f32 1.0, %v9208_v9  ;;  %v13083_v6 = vld [vmem:[#allocation26_spill] sm:$0xff]  ;;  %v13087_v9 = vld [vmem:[#allocation60_spill] sm:$0xff] }
 0xa05   :  { %13073 = vst [vmem:[#allocation57_spill] sm:$0xff] %v11142_v21  ;;  %9209 = vrcp.f32 %v3658_v14  ;;  %v13084_v14 = vld [vmem:[#allocation39_spill] sm:$0xff] }
 0xa12   :  { %v9210_v10 = vpop.eup %9209 }
 0xa13   :  { %v3680_v17 = vmul.f32 %v9210_v10, %v3678_v63 }
 0xa15   :  { %v3682_v56 = vadd.f32 %v3680_v17, %v3188_v46  ;;  %v13088_v46 = vld [vmem:[#allocation47_spill] sm:$0xff] }
 0xa17   :  { %9211 = vtanh.f32 %v3682_v56 }
 0xa18   :  { %9213 = vrcp.f32 %v3672_v15 }
 0xa24   :  { %v9212_v23 = vpop.eup %9211 }
 0xa25   :  { %v3686_v42 = vsub.f32 0.0, %v9212_v23  ;;  %v9214_v55 = vpop.eup %9213 }
 0xa27   :  { %v3688_v2 = vmul.f32 %v9214_v55, %v3686_v42 }
 0xa29   :  { %v11153_v53 = vadd.f32 %v9212_v23, %v3688_v2 }
 0xa2b   :  { %13074 = vst [vmem:[#allocation74_spill] sm:$0xff] %v11153_v53  ;;  %v3693_v50 = vpack.c.bf16 %v11153_v53, %v11142_v21 }
 0xa2d   :  { %3727 = vmatmul.mubr.bf16.vlgmr.msra.gmra.mxu0 %v3693_v50  ;;  %3768 = vmatmul.mubr.bf16.vlgmr.msra.gmra.mxu1 %v3693_v50 }
 0xa2e   :  { %3777 = vmatpush1.bf16.msra.mxu0 %v10849_v30  ;;  %3808 = vmatprep.mubr.bf16.mxu0 %v12902_v61 }
 0xa2f   :  { %3778 = vmatprep.subr.bf16.mxu0 %v10853_v11  ;;  %3869 = vmatpush1.bf16.msra.mxu1 %v10787_v16 }
 0xa30   :  { %3870 = vmatprep.subr.bf16.mxu1 %v10790_v29  ;;  %3900 = vmatprep.mubr.bf16.mxu1 %v12902_v61 }
 0xa32   :  { %3779 = vmatpush1.bf16.msra.mxu0 %v10863_v41 }
 0xa33   :  { %3780 = vmatprep.subr.bf16.mxu0 %v10868_v38  ;;  %3871 = vmatpush1.bf16.msra.mxu1 %v10794_v45 }
 0xa34   :  { %3872 = vmatprep.subr.bf16.mxu1 %v10797_v52 }
 0xa36   :  { %3781 = vmatpush1.bf16.msra.mxu0 %v10876_v39 }
 0xa37   :  { %3782 = vmatprep.subr.bf16.mxu0 %v10881_v22  ;;  %3873 = vmatpush1.bf16.msra.mxu1 %v10801_v5 }
 0xa38   :  { %3874 = vmatprep.subr.bf16.mxu1 %v10804_v3 }
 0xa3a   :  { %3783 = vmatpush1.bf16.msra.mxu0 %v10890_v36 }
 0xa3b   :  { %3784 = vmatprep.subr.bf16.mxu0 %v10895_v4  ;;  %3875 = vmatpush1.bf16.msra.mxu1 %v10808_v7 }
 0xa3c   :  { %3876 = vmatprep.subr.bf16.mxu1 %v10811_v60 }
 0xa3e   :  { %3785 = vmatpush1.bf16.msra.mxu0 %v10902_v48 }
 0xa3f   :  { %3786 = vmatprep.subr.bf16.mxu0 %v10907_v43  ;;  %3877 = vmatpush1.bf16.msra.mxu1 %v10815_v24 }
 0xa40   :  { %3878 = vmatprep.subr.bf16.mxu1 %v10818_v1 }
 0xa42   :  { %3787 = vmatpush1.bf16.msra.mxu0 %v10916_v25 }
 0xa43   :  { %3788 = vmatprep.subr.bf16.mxu0 %v10921_v12  ;;  %3879 = vmatpush1.bf16.msra.mxu1 %v10822_v59 }
 0xa44   :  { %3880 = vmatprep.subr.bf16.mxu1 %v10825_v19 }
 0xa46   :  { %3789 = vmatpush1.bf16.msra.mxu0 %v10928_v34 }
 0xa47   :  { %3790 = vmatprep.subr.bf16.mxu0 %v10933_v28  ;;  %3881 = vmatpush1.bf16.msra.mxu1 %v10829_v18 }
 0xa48   :  { %3882 = vmatprep.subr.bf16.mxu1 %v10832_v20 }
 0xa4a   :  { %3791 = vmatpush1.bf16.msra.mxu0 %v10942_v37 }
 0xa4b   :  { %3909 = vmatprep.subr.bf16.mxu0 %v10839_v32  ;;  %3883 = vmatpush1.bf16.msra.mxu1 %v10836_v54 }
 0xa4c   :  { %3950 = vmatprep.subr.bf16.mxu1 %v10841_v27 }
 0xa4d   :  { %3809 = vmatmul.mubr.bf16.vlgmr.msra.gmra.mxu0 %v3693_v50 }
 0xa4e   :  { %3910 = vmatpush1.bf16.msra.mxu0 %v10845_v35  ;;  %3941 = vmatprep.mubr.bf16.mxu0 %v12902_v61 }
 0xa4f   :  { %3911 = vmatprep.subr.bf16.mxu0 %v10851_v47 }
 0xa52   :  { %3912 = vmatpush1.bf16.msra.mxu0 %v10859_v26 }
 0xa53   :  { %3913 = vmatprep.subr.bf16.mxu0 %v13075_v0 }
 0xa56   :  { %3914 = vmatpush1.bf16.msra.mxu0 %v13076_v57 }
 0xa57   :  { %3915 = vmatprep.subr.bf16.mxu0 %v13077_v51 }
 0xa5a   :  { %3916 = vmatpush1.bf16.msra.mxu0 %v13078_v58 }
 0xa5b   :  { %3917 = vmatprep.subr.bf16.mxu0 %v13079_v49 }
 0xa5e   :  { %3918 = vmatpush1.bf16.msra.mxu0 %v13080_v44 }
 0xa5f   :  { %3919 = vmatprep.subr.bf16.mxu0 %v13081_v40 }
 0xa62   :  { %3920 = vmatpush1.bf16.msra.mxu0 %v13082_v13  ;;  %v13091_v13 = vld [vmem:[#allocation41_spill] sm:$0xff] }
 0xa63   :  { %3921 = vmatprep.subr.bf16.mxu0 %v13083_v6 }
 0xa66   :  { %3922 = vmatpush1.bf16.msra.mxu0 %v13084_v14 }
 0xa67   :  { %3923 = vmatprep.subr.bf16.mxu0 %v13085_v31  ;;  %v13090_v31 = vld [vmem:[#allocation53_spill] sm:$0xff] }
 0xa6a   :  { %3924 = vmatpush1.bf16.msra.mxu0 %v13086_v62  ;;  %v2658_v62 = vadd.f32 %v13091_v13, %v13090_v31  ;;  %v13093_v13 = vld [vmem:[#allocation30_spill] sm:$0xff] }
 0xa6b   :  { %4042 = vmatprep.subr.bf16.mxu0 %v13087_v9 }
 0xaed   :  { %v3728_v63 = vpop.f32.mrf.mxu0  ;;  %v3769_v10 = vpop.f32.mrf.mxu1 }
 0xaee   :  { %v3823_v17 = vadd.f32 %v3728_v63, %v13088_v46 }
 0xaef   :  { %v3730_v15 = vpop.f32.mrf.mxu0  ;;  %v3771_v56 = vpop.f32.mrf.mxu1 }
 0xaf0   :  { %v8088_v23 = vmul.f32 -1.442695, %v3823_v17  ;;  %v3837_v9 = vadd.f32 %v3730_v15, %v2658_v62  ;;  %v13094_v62 = vld [vmem:[#allocation59_spill] sm:$0xff] }
 0xaf1   :  { %v3732_v42 = vpop.f32.mrf.mxu0  ;;  %v3772_v55 = vpop.f32.mrf.mxu1 }
 0xaf2   :  { %9215 = vpow2.f32 %v8088_v23  ;;  %v8090_v40 = vmul.f32 -1.442695, %v3837_v9  ;;  %v13092_v23 = vld [vmem:[#allocation73_spill] sm:$0xff] }
 0xaf3   :  { %v3733_v2 = vpop.f32.mrf.mxu0  ;;  %v3773_v50 = vpop.f32.mrf.mxu1  ;;  %v3851_v42 = vadd.f32 %v13092_v23, %v3769_v10 }
 0xaf4   :  { %v3824_v14 = vadd.f32 %v3773_v50, %v13089_v8 }
 0xaf6   :  { %v8089_v6 = vmul.f32 -1.442695, %v3824_v14 }
 0xaf8   :  { %9217 = vpow2.f32 %v8089_v6 }
 0xaf9   :  { %9219 = vpow2.f32 %v8090_v40 }
 0xaff   :  { %v9216_v44 = vpop.eup %9215 }
 0xb00   :  { %v3831_v49 = vadd.f32 1.0, %v9216_v44 }
 0xb02   :  { %9221 = vrcp.f32 %v3831_v49 }
 0xb05   :  { %v9218_v63 = vpop.eup %9217 }
 0xb06   :  { %v3832_v46 = vadd.f32 1.0, %v9218_v63  ;;  %v9220_v56 = vpop.eup %9219 }
 0xb07   :  { %v3845_v2 = vadd.f32 1.0, %v9220_v56 }
 0xb08   :  { %9223 = vrcp.f32 %v3832_v46  ;;  %v13095_v46 = vld [vmem:[#allocation27_spill] sm:$0xff] }
 0xb0d   :  { %v3810_v17 = vpop.f32.mrf.mxu0 }
 0xb0f   :  { %v9222_v55 = vpop.eup %9221  ;;  %v3811_v8 = vpop.f32.mrf.mxu0 }
 0xb10   :  { %v3853_v14 = vmul.f32 %v9222_v55, %v3851_v42 }
 0xb11   :  { %v3812_v50 = vpop.f32.mrf.mxu0 }
 0xb12   :  { %v3855_v6 = vadd.f32 %v3853_v14, %v13093_v13  ;;  %v3838_v15 = vadd.f32 %v3812_v50, %v13094_v62 }
 0xb13   :  { %v3814_v9 = vpop.f32.mrf.mxu0 }
 0xb14   :  { %9225 = vtanh.f32 %v3855_v6  ;;  %v8091_v44 = vmul.f32 -1.442695, %v3838_v15  ;;  %v3852_v49 = vadd.f32 %v11147_v33, %v3814_v9 }
 0xb15   :  { %v9224_v40 = vpop.eup %9223  ;;  %9227 = vrcp.f32 %v3845_v2 }
 0xb16   :  { %9229 = vpow2.f32 %v8091_v44  ;;  %v3854_v63 = vmul.f32 %v9224_v40, %v3852_v49 }
 0xb18   :  { %v3856_v10 = vadd.f32 %v3854_v63, %v13095_v46 }
 0xb1a   :  { %9231 = vtanh.f32 %v3856_v10 }
 0xb21   :  { %v9226_v17 = vpop.eup %9225 }
 0xb22   :  { %v9228_v8 = vpop.eup %9227  ;;  %v3859_v56 = vsub.f32 %v11142_v21, %v9226_v17 }
 0xb23   :  { %v9230_v42 = vpop.eup %9229 }
 0xb24   :  { %v3846_v55 = vadd.f32 1.0, %v9230_v42  ;;  %v3861_v14 = vmul.f32 %v9228_v8, %v3859_v56  ;;  %v13111_v8 = vld [vmem:[#allocation72_spill] sm:$0xff] }
 0xb26   :  { %9233 = vrcp.f32 %v3846_v55  ;;  %v11218_v50 = vadd.f32 %v9226_v17, %v3861_v14  ;;  %v13110_v17 = vld [vmem:[#allocation40_spill] sm:$0xff] }
 0xb27   :  { %v9232_v13 = vpop.eup %9231  ;;  %v3114_v56 = vadd.f32 %v13111_v8, %v13110_v17  ;;  %v11383_v8 = vld [vmem:[#allocation8 + $0x27c] ss:$24 sps:$4 sm:$0xff]  }
 0xb28   :  { %13096 = vst [vmem:[#allocation61_spill] sm:$0xff] %v11218_v50  ;;  %v3860_v6 = vsub.f32 %v11153_v53, %v9232_v13 }
 0xb33   :  { %v9234_v62 = vpop.eup %9233 }
 0xb34   :  { %v3862_v2 = vmul.f32 %v9234_v62, %v3860_v6 }
 0xb36   :  { %v11221_v15 = vadd.f32 %v9232_v13, %v3862_v2  ;;  %v13112_v13 = vld [vmem:[#allocation20_spill] sm:$0xff] }
 0xb38   :  { %13097 = vst [vmem:[#allocation62_spill] sm:$0xff] %v11221_v15  ;;  %v3867_v9 = vpack.c.bf16 %v11221_v15, %v11218_v50 }
 0xb3a   :  { %3901 = vmatmul.mubr.bf16.vlgmr.msra.gmra.mxu1 %v3867_v9  ;;  %3942 = vmatmul.mubr.bf16.vlgmr.msra.gmra.mxu0 %v3867_v9 }
 0xb3b   :  { %3951 = vmatpush1.bf16.msra.mxu1 %v10849_v30  ;;  %3982 = vmatprep.mubr.bf16.mxu1 %v12902_v61 }
 0xb3c   :  { %3952 = vmatprep.subr.bf16.mxu1 %v10853_v11  ;;  %4043 = vmatpush1.bf16.msra.mxu0 %v10787_v16  ;;  %v13098_v16 = vld [vmem:[#allocation24_spill] sm:$0xff] }
 0xb3d   :  { %4044 = vmatprep.subr.bf16.mxu0 %v10790_v29  ;;  %4074 = vmatprep.mubr.bf16.mxu0 %v12902_v61  ;;  %v13099_v29 = vld [vmem:[#allocation45_spill] sm:$0xff]  ;;  %v13108_v11 = vld [vmem:[#allocation56_spill] sm:$0xff] }
 0xb3f   :  { %3953 = vmatpush1.bf16.msra.mxu1 %v10863_v41 }
 0xb40   :  { %3954 = vmatprep.subr.bf16.mxu1 %v10868_v38  ;;  %4045 = vmatpush1.bf16.msra.mxu0 %v10794_v45  ;;  %v13100_v45 = vld [vmem:[#allocation46_spill] sm:$0xff]  ;;  %v13109_v38 = vld [vmem:[#allocation32_spill] sm:$0xff] }
 0xb41   :  { %4046 = vmatprep.subr.bf16.mxu0 %v10797_v52  ;;  %v13101_v52 = vld [vmem:[#allocation54_spill] sm:$0xff] }
 0xb43   :  { %3955 = vmatpush1.bf16.msra.mxu1 %v10876_v39 }
 0xb44   :  { %3956 = vmatprep.subr.bf16.mxu1 %v10881_v22  ;;  %4047 = vmatpush1.bf16.msra.mxu0 %v10801_v5  ;;  %v13102_v5 = vld [vmem:[#allocation26_spill] sm:$0xff] }
 0xb45   :  { %4048 = vmatprep.subr.bf16.mxu0 %v10804_v3  ;;  %v13103_v3 = vld [vmem:[#allocation39_spill] sm:$0xff] }
 0xb47   :  { %3957 = vmatpush1.bf16.msra.mxu1 %v10890_v36 }
 0xb48   :  { %3958 = vmatprep.subr.bf16.mxu1 %v10895_v4  ;;  %4049 = vmatpush1.bf16.msra.mxu0 %v10808_v7  ;;  %v13104_v7 = vld [vmem:[#allocation28_spill] sm:$0xff] }
 0xb49   :  { %4050 = vmatprep.subr.bf16.mxu0 %v10811_v60  ;;  %v13105_v60 = vld [vmem:[#allocation55_spill] sm:$0xff] }
 0xb4b   :  { %3959 = vmatpush1.bf16.msra.mxu1 %v10902_v48 }
 0xb4c   :  { %3960 = vmatprep.subr.bf16.mxu1 %v10907_v43  ;;  %4051 = vmatpush1.bf16.msra.mxu0 %v10815_v24  ;;  %v11275_v24 = vld [vmem:[#allocation8 + $0x2d4] ss:$24 sps:$4 sm:$0xff]  }
 0xb4d   :  { %4052 = vmatprep.subr.bf16.mxu0 %v10818_v1  ;;  %13106 = vst [vmem:[#allocation22_spill] sm:$0xff] %v11275_v24 }
 0xb4f   :  { %3961 = vmatpush1.bf16.msra.mxu1 %v10916_v25 }
 0xb50   :  { %3962 = vmatprep.subr.bf16.mxu1 %v10921_v12  ;;  %4053 = vmatpush1.bf16.msra.mxu0 %v10822_v59 }
 0xb51   :  { %4054 = vmatprep.subr.bf16.mxu0 %v10825_v19  ;;  %v13107_v19 = vld [vmem:[#allocation35_spill] sm:$0xff] }
 0xb53   :  { %3963 = vmatpush1.bf16.msra.mxu1 %v10928_v34 }
 0xb54   :  { %3964 = vmatprep.subr.bf16.mxu1 %v10933_v28  ;;  %4055 = vmatpush1.bf16.msra.mxu0 %v10829_v18 }
 0xb55   :  { %4056 = vmatprep.subr.bf16.mxu0 %v10832_v20 }
 0xb57   :  { %3965 = vmatpush1.bf16.msra.mxu1 %v10942_v37 }
 0xb58   :  { %4083 = vmatprep.subr.bf16.mxu1 %v10839_v32  ;;  %4057 = vmatpush1.bf16.msra.mxu0 %v10836_v54 }
 0xb59   :  { %4124 = vmatprep.subr.bf16.mxu0 %v10841_v27 }
 0xb5a   :  { %3983 = vmatmul.mubr.bf16.vlgmr.msra.gmra.mxu1 %v3867_v9 }
 0xb5b   :  { %4084 = vmatpush1.bf16.msra.mxu1 %v10845_v35  ;;  %4115 = vmatprep.mubr.bf16.mxu1 %v12902_v61 }
 0xb5c   :  { %4085 = vmatprep.subr.bf16.mxu1 %v10851_v47 }
 0xb5f   :  { %4086 = vmatpush1.bf16.msra.mxu1 %v10859_v26 }
 0xb60   :  { %4087 = vmatprep.subr.bf16.mxu1 %v13075_v0 }
 0xb63   :  { %4088 = vmatpush1.bf16.msra.mxu1 %v13076_v57 }
 0xb64   :  { %4089 = vmatprep.subr.bf16.mxu1 %v13077_v51 }
 0xb67   :  { %4090 = vmatpush1.bf16.msra.mxu1 %v13078_v58 }
 0xb68   :  { %4091 = vmatprep.subr.bf16.mxu1 %v13098_v16 }
 0xb6b   :  { %4092 = vmatpush1.bf16.msra.mxu1 %v13099_v29 }
 0xb6c   :  { %4093 = vmatprep.subr.bf16.mxu1 %v13100_v45 }
 0xb6f   :  { %4094 = vmatpush1.bf16.msra.mxu1 %v13101_v52  ;;  %v13113_v52 = vld [vmem:[#allocation38_spill] sm:$0xff] }
 0xb70   :  { %4095 = vmatprep.subr.bf16.mxu1 %v13102_v5 }
 0xb73   :  { %4096 = vmatpush1.bf16.msra.mxu1 %v13103_v3 }
 0xb74   :  { %4097 = vmatprep.subr.bf16.mxu1 %v13104_v7 }
 0xb77   :  { %4098 = vmatpush1.bf16.msra.mxu1 %v13105_v60 }
 0xb78   :  { %4216 = vmatprep.subr.bf16.mxu1 %v11275_v24 }
 0xbfa   :  { %v3902_v1 = vpop.f32.mrf.mxu1  ;;  %v3943_v59 = vpop.f32.mrf.mxu0 }
 0xbfb   :  { %v3997_v18 = vadd.f32 %v3902_v1, %v13107_v19  ;;  %v4025_v63 = vadd.f32 %v13092_v23, %v3943_v59 }
 0xbfc   :  { %v3904_v20 = vpop.f32.mrf.mxu1  ;;  %v3945_v54 = vpop.f32.mrf.mxu0 }
 0xbfd   :  { %v8092_v32 = vmul.f32 -1.442695, %v3997_v18  ;;  %v4011_v39 = vadd.f32 %v3904_v20, %v13109_v38  ;;  %v11305_v38 = vld [vmem:[#allocation8 + $0x2a4] ss:$24 sps:$4 sm:$0xff]  }
 0xbfe   :  { %v3906_v27 = vpop.f32.mrf.mxu1  ;;  %v3946_v35 = vpop.f32.mrf.mxu0 }
 0xbff   :  { %9235 = vpow2.f32 %v8092_v32  ;;  %v8094_v0 = vmul.f32 -1.442695, %v4011_v39  ;;  %v11309_v39 = vld [vmem:[#allocation8 + $0x2b0] ss:$24 sps:$4 sm:$0xff]  }
 0xc00   :  { %v3907_v30 = vpop.f32.mrf.mxu1  ;;  %v3947_v47 = vpop.f32.mrf.mxu0 }
 0xc01   :  { %v3998_v26 = vadd.f32 %v3947_v47, %v13108_v11  ;;  %v11295_v11 = vld [vmem:[#allocation8 + $0x2e0] ss:$24 sps:$4 sm:$0xff]  }
 0xc03   :  { %v8093_v41 = vmul.f32 -1.442695, %v3998_v26  ;;  %v11299_v26 = vld [vmem:[#allocation8 + $0x2b4] ss:$24 sps:$4 sm:$0xff]  }
 0xc05   :  { %9237 = vpow2.f32 %v8093_v41  ;;  %v11302_v41 = vld [vmem:[#allocation8 + $0x2d0] ss:$24 sps:$4 sm:$0xff]  }
 0xc06   :  { %9239 = vpow2.f32 %v8094_v0  ;;  %v11312_v0 = vld [vmem:[#allocation8 + $0x284] ss:$24 sps:$4 sm:$0xff]  }
 0xc0c   :  { %v9236_v57 = vpop.eup %9235 }
 0xc0d   :  { %v4005_v51 = vadd.f32 1.0, %v9236_v57  ;;  %v11315_v57 = vld [vmem:[#allocation8 + $0x2a0] ss:$24 sps:$4 sm:$0xff]  }
 0xc0f   :  { %9241 = vrcp.f32 %v4005_v51  ;;  %v11318_v51 = vld [vmem:[#allocation8 + $0x274] ss:$24 sps:$4 sm:$0xff]  }
 0xc12   :  { %v9238_v58 = vpop.eup %9237 }
 0xc13   :  { %v4006_v44 = vadd.f32 1.0, %v9238_v58  ;;  %v9240_v40 = vpop.eup %9239  ;;  %v11321_v58 = vld [vmem:[#allocation8 + $0x280] ss:$24 sps:$4 sm:$0xff]  }
 0xc14   :  { %v4019_v55 = vadd.f32 1.0, %v9240_v40  ;;  %v11333_v40 = vld [vmem:[#allocation8 + $0x240] ss:$24 sps:$4 sm:$0xff]  }
 0xc15   :  { %9243 = vrcp.f32 %v4006_v44  ;;  %v11325_v44 = vld [vmem:[#allocation8 + $0x270] ss:$24 sps:$4 sm:$0xff]  }
 0xc1a   :  { %v3984_v49 = vpop.f32.mrf.mxu1 }
 0xc1b   :  { %v11328_v49 = vld [vmem:[#allocation8 + $0x244] ss:$24 sps:$4 sm:$0xff]  }
 0xc1c   :  { %v9242_v46 = vpop.eup %9241  ;;  %v3985_v10 = vpop.f32.mrf.mxu1 }
 0xc1d   :  { %v4027_v42 = vmul.f32 %v9242_v46, %v4025_v63  ;;  %v11336_v63 = vld [vmem:[#allocation8 + $0x214] ss:$24 sps:$4 sm:$0xff]   ;;  %v11344_v46 = vld [vmem:[#allocation8 + $0x1e4] ss:$24 sps:$4 sm:$0xff]   ;;  %v11380_v10 = vld [vmem:[#allocation8 + $0x2a8] ss:$24 sps:$4 sm:$0xff]  }
 0xc1e   :  { %v3986_v14 = vpop.f32.mrf.mxu1 }
 0xc1f   :  { %v4029_v6 = vadd.f32 %v4027_v42, %v13112_v13  ;;  %v4012_v62 = vadd.f32 %v3986_v14, %v3114_v56  ;;  %v11386_v56 = vld [vmem:[#allocation8 + $0x278] ss:$24 sps:$4 sm:$0xff]   ;;  %v11389_v42 = vld [vmem:[#allocation8 + $0x24c] ss:$24 sps:$4 sm:$0xff]   ;;  %v11395_v14 = vld [vmem:[#allocation8 + $0x21c] ss:$24 sps:$4 sm:$0xff]  }
 0xc20   :  { %v3988_v2 = vpop.f32.mrf.mxu1  ;;  %13116 = vst [vmem:[#allocation47_spill] sm:$0xff] %v11395_v14  ;;  %v11398_v13 = vld [vmem:[#allocation8 + $0x218] ss:$24 sps:$4 sm:$0xff]  }
 0xc21   :  { %9245 = vtanh.f32 %v4029_v6  ;;  %v8095_v9 = vmul.f32 -1.442695, %v4012_v62  ;;  %v4026_v16 = vadd.f32 %v11147_v33, %v3988_v2  ;;  %13117 = vst [vmem:[#allocation58_spill] sm:$0xff] %v11398_v13  ;;  %v11401_v6 = vld [vmem:[#allocation8 + $0x1ec] ss:$24 sps:$4 sm:$0xff]  }
 0xc22   :  { %v9244_v29 = vpop.eup %9243  ;;  %9247 = vrcp.f32 %v4019_v55  ;;  %v11392_v55 = vld [vmem:[#allocation8 + $0x248] ss:$24 sps:$4 sm:$0xff]   ;;  %13118 = vst [vmem:[#allocation41_spill] sm:$0xff] %v11401_v6  ;;  %v11407_v2 = vld [vmem:[#allocation8 + $0x1bc] ss:$24 sps:$4 sm:$0xff]  }
 0xc23   :  { %9249 = vpow2.f32 %v8095_v9  ;;  %v4028_v45 = vmul.f32 %v9244_v29, %v4026_v16  ;;  %v11404_v62 = vld [vmem:[#allocation8 + $0x1e8] ss:$24 sps:$4 sm:$0xff]   ;;  %13120 = vst [vmem:[#allocation30_spill] sm:$0xff] %v11407_v2  ;;  %v11410_v9 = vld [vmem:[#allocation8 + $0x1b8] ss:$24 sps:$4 sm:$0xff]  }
 0xc24   :  { %13119 = vst [vmem:[#allocation73_spill] sm:$0xff] %v11404_v62  ;;  %13121 = vst [vmem:[#allocation59_spill] sm:$0xff] %v11410_v9  ;;  %v11413_v16 = vld [vmem:[#allocation8 + $0x18c] ss:$24 sps:$4 sm:$0xff]  }
 0xc25   :  { %v4030_v5 = vadd.f32 %v4028_v45, %v13113_v52  ;;  %13122 = vst [vmem:[#allocation27_spill] sm:$0xff] %v11413_v16  ;;  %v13123_v52 = vld [vmem:[#allocation37_spill] sm:$0xff] }
 0xc27   :  { %9251 = vtanh.f32 %v4030_v5 }
 0xc2e   :  { %v9246_v3 = vpop.eup %9245 }
 0xc2f   :  { %v9248_v7 = vpop.eup %9247  ;;  %v4033_v1 = vsub.f32 %v11218_v50, %v9246_v3 }
 0xc30   :  { %v9250_v59 = vpop.eup %9249 }
 0xc31   :  { %v4020_v19 = vadd.f32 1.0, %v9250_v59  ;;  %v4035_v18 = vmul.f32 %v9248_v7, %v4033_v1 }
 0xc33   :  { %9253 = vrcp.f32 %v4020_v19  ;;  %v11288_v20 = vadd.f32 %v9246_v3, %v4035_v18 }
 0xc34   :  { %v9252_v54 = vpop.eup %9251 }
 0xc35   :  { %13114 = vst [vmem:[#allocation43_spill] sm:$0xff] %v11288_v20  ;;  %v4034_v32 = vsub.f32 %v11221_v15, %v9252_v54 }
 0xc40   :  { %v9254_v27 = vpop.eup %9253 }
 0xc41   :  { %v4036_v35 = vmul.f32 %v9254_v27, %v4034_v32  ;;  %v13124_v32 = vld [vmem:[#allocation25_spill] sm:$0xff] }
 0xc43   :  { %v11291_v30 = vadd.f32 %v9252_v54, %v4036_v35 }
 0xc45   :  { %13115 = vst [vmem:[#allocation60_spill] sm:$0xff] %v11291_v30  ;;  %v4041_v47 = vpack.c.bf16 %v11291_v30, %v11288_v20 }
 0xc47   :  { %4075 = vmatmul.mubr.bf16.vlgmr.msra.gmra.mxu0 %v4041_v47  ;;  %4116 = vmatmul.mubr.bf16.vlgmr.msra.gmra.mxu1 %v4041_v47 }
 0xc48   :  { %4125 = vmatpush1.bf16.msra.mxu0 %v11295_v11  ;;  %4156 = vmatprep.mubr.bf16.mxu0 %v12902_v61 }
 0xc49   :  { %4126 = vmatprep.subr.bf16.mxu0 %v11299_v26  ;;  %4217 = vmatpush1.bf16.msra.mxu1 %v11302_v41 }
 0xc4a   :  { %4218 = vmatprep.subr.bf16.mxu1 %v11305_v38  ;;  %4248 = vmatprep.mubr.bf16.mxu1 %v12902_v61 }
 0xc4c   :  { %4127 = vmatpush1.bf16.msra.mxu0 %v11309_v39 }
 0xc4d   :  { %4128 = vmatprep.subr.bf16.mxu0 %v11312_v0  ;;  %4219 = vmatpush1.bf16.msra.mxu1 %v11315_v57 }
 0xc4e   :  { %4220 = vmatprep.subr.bf16.mxu1 %v11318_v51 }
 0xc50   :  { %4129 = vmatpush1.bf16.msra.mxu0 %v11321_v58 }
 0xc51   :  { %4130 = vmatprep.subr.bf16.mxu0 %v10881_v22  ;;  %4221 = vmatpush1.bf16.msra.mxu1 %v11325_v44  ;;  %v11341_v22 = vld [vmem:[#allocation8 + $0x210] ss:$24 sps:$4 sm:$0xff]  }
 0xc52   :  { %4222 = vmatprep.subr.bf16.mxu1 %v11328_v49 }
 0xc54   :  { %4131 = vmatpush1.bf16.msra.mxu0 %v10890_v36  ;;  %v11349_v36 = vld [vmem:[#allocation8 + $0x1e0] ss:$24 sps:$4 sm:$0xff]  }
 0xc55   :  { %4132 = vmatprep.subr.bf16.mxu0 %v10895_v4  ;;  %4223 = vmatpush1.bf16.msra.mxu1 %v11333_v40  ;;  %v11352_v4 = vld [vmem:[#allocation8 + $0x1b4] ss:$24 sps:$4 sm:$0xff]  }
 0xc56   :  { %4224 = vmatprep.subr.bf16.mxu1 %v11336_v63 }
 0xc58   :  { %4133 = vmatpush1.bf16.msra.mxu0 %v10902_v48  ;;  %v11357_v48 = vld [vmem:[#allocation8 + $0x1b0] ss:$24 sps:$4 sm:$0xff]  }
 0xc59   :  { %4134 = vmatprep.subr.bf16.mxu0 %v10907_v43  ;;  %4225 = vmatpush1.bf16.msra.mxu1 %v11341_v22  ;;  %v11360_v43 = vld [vmem:[#allocation8 + $0x184] ss:$24 sps:$4 sm:$0xff]  }
 0xc5a   :  { %4226 = vmatprep.subr.bf16.mxu1 %v11344_v46 }
 0xc5c   :  { %4135 = vmatpush1.bf16.msra.mxu0 %v10916_v25  ;;  %v11364_v25 = vld [vmem:[#allocation8 + $0x2dc] ss:$24 sps:$4 sm:$0xff]  }
 0xc5d   :  { %4136 = vmatprep.subr.bf16.mxu0 %v10921_v12  ;;  %4227 = vmatpush1.bf16.msra.mxu1 %v11349_v36  ;;  %v11367_v12 = vld [vmem:[#allocation8 + $0x180] ss:$24 sps:$4 sm:$0xff]  }
 0xc5e   :  { %4228 = vmatprep.subr.bf16.mxu1 %v11352_v4 }
 0xc60   :  { %4137 = vmatpush1.bf16.msra.mxu0 %v10928_v34  ;;  %v11370_v34 = vld [vmem:[#allocation8 + $0x2e4] ss:$24 sps:$4 sm:$0xff]  }
 0xc61   :  { %4138 = vmatprep.subr.bf16.mxu0 %v10933_v28  ;;  %4229 = vmatpush1.bf16.msra.mxu1 %v11357_v48  ;;  %v11373_v28 = vld [vmem:[#allocation8 + $0x2d8] ss:$24 sps:$4 sm:$0xff]  }
 0xc62   :  { %4230 = vmatprep.subr.bf16.mxu1 %v11360_v43 }
 0xc64   :  { %4139 = vmatpush1.bf16.msra.mxu0 %v10942_v37  ;;  %v11377_v37 = vld [vmem:[#allocation8 + $0x2ac] ss:$24 sps:$4 sm:$0xff]  }
 0xc65   :  { %4257 = vmatprep.subr.bf16.mxu0 %v11364_v25  ;;  %4231 = vmatpush1.bf16.msra.mxu1 %v11367_v12 }
 0xc66   :  { %4298 = vmatprep.subr.bf16.mxu1 %v11370_v34 }
 0xc67   :  { %4157 = vmatmul.mubr.bf16.vlgmr.msra.gmra.mxu0 %v4041_v47  ;;  %v13125_v47 = vld [vmem:[#allocation16_spill] sm:$0xff] }
 0xc68   :  { %4258 = vmatpush1.bf16.msra.mxu0 %v11373_v28  ;;  %4289 = vmatprep.mubr.bf16.mxu0 %v12902_v61 }
 0xc69   :  { %4259 = vmatprep.subr.bf16.mxu0 %v11377_v37 }
 0xc6c   :  { %4260 = vmatpush1.bf16.msra.mxu0 %v11380_v10 }
 0xc6d   :  { %4261 = vmatprep.subr.bf16.mxu0 %v11383_v8 }
 0xc70   :  { %4262 = vmatpush1.bf16.msra.mxu0 %v11386_v56 }
 0xc71   :  { %4263 = vmatprep.subr.bf16.mxu0 %v11389_v42 }
 0xc74   :  { %4264 = vmatpush1.bf16.msra.mxu0 %v11392_v55 }
 0xc75   :  { %4265 = vmatprep.subr.bf16.mxu0 %v11395_v14 }
 0xc78   :  { %4266 = vmatpush1.bf16.msra.mxu0 %v11398_v13 }
 0xc79   :  { %4267 = vmatprep.subr.bf16.mxu0 %v11401_v6 }
 0xc7c   :  { %4268 = vmatpush1.bf16.msra.mxu0 %v11404_v62 }
 0xc7d   :  { %4269 = vmatprep.subr.bf16.mxu0 %v11407_v2 }
 0xc80   :  { %4270 = vmatpush1.bf16.msra.mxu0 %v11410_v9 }
 0xc81   :  { %4271 = vmatprep.subr.bf16.mxu0 %v11413_v16 }
 0xc84   :  { %4272 = vmatpush1.bf16.msra.mxu0 %v13105_v60  ;;  %v2668_v60 = vadd.f32 %v13125_v47, %v13090_v31 }
 0xc85   :  { %4390 = vmatprep.subr.bf16.mxu0 %v11275_v24 }
 0xd07   :  { %v4076_v29 = vpop.f32.mrf.mxu0  ;;  %v4117_v45 = vpop.f32.mrf.mxu1 }
 0xd08   :  { %v4171_v5 = vadd.f32 %v4076_v29, %v13123_v52 }
 0xd09   :  { %v4078_v3 = vpop.f32.mrf.mxu0  ;;  %v4119_v7 = vpop.f32.mrf.mxu1 }
 0xd0a   :  { %v8096_v1 = vmul.f32 -1.442695, %v4171_v5  ;;  %v4185_v53 = vadd.f32 %v4078_v3, %v2668_v60  ;;  %v13127_v3 = vld [vmem:[#allocation50_spill] sm:$0xff] }
 0xd0b   :  { %v4080_v59 = vpop.f32.mrf.mxu0  ;;  %v4120_v19 = vpop.f32.mrf.mxu1 }
 0xd0c   :  { %9255 = vpow2.f32 %v8096_v1  ;;  %v8098_v15 = vmul.f32 -1.442695, %v4185_v53  ;;  %v4199_v1 = vadd.f32 %v13092_v23, %v4117_v45 }
 0xd0d   :  { %v4081_v18 = vpop.f32.mrf.mxu0  ;;  %v4121_v54 = vpop.f32.mrf.mxu1 }
 0xd0e   :  { %v4172_v27 = vadd.f32 %v4121_v54, %v13124_v32 }
 0xd10   :  { %v8097_v35 = vmul.f32 -1.442695, %v4172_v27  ;;  %v13126_v27 = vld [vmem:[#allocation51_spill] sm:$0xff] }
 0xd12   :  { %9257 = vpow2.f32 %v8097_v35 }
 0xd13   :  { %9259 = vpow2.f32 %v8098_v15 }
 0xd19   :  { %v9256_v50 = vpop.eup %9255 }
 0xd1a   :  { %v4179_v21 = vadd.f32 1.0, %v9256_v50 }
 0xd1c   :  { %9261 = vrcp.f32 %v4179_v21 }
 0xd1f   :  { %v9258_v29 = vpop.eup %9257 }
 0xd20   :  { %v4180_v52 = vadd.f32 1.0, %v9258_v29  ;;  %v9260_v7 = vpop.eup %9259  ;;  %v13128_v29 = vld [vmem:[#allocation49_spill] sm:$0xff] }
 0xd21   :  { %v4193_v54 = vadd.f32 1.0, %v9260_v7 }
 0xd22   :  { %9263 = vrcp.f32 %v4180_v52 }
 0xd27   :  { %v4158_v5 = vpop.f32.mrf.mxu0 }
 0xd29   :  { %v9262_v59 = vpop.eup %9261  ;;  %v4159_v19 = vpop.f32.mrf.mxu0 }
 0xd2a   :  { %v4201_v18 = vmul.f32 %v9262_v59, %v4199_v1 }
 0xd2b   :  { %v4160_v32 = vpop.f32.mrf.mxu0 }
 0xd2c   :  { %v4203_v35 = vadd.f32 %v4201_v18, %v13126_v27  ;;  %v4186_v53 = vadd.f32 %v4160_v32, %v13127_v3 }
 0xd2d   :  { %v4162_v47 = vpop.f32.mrf.mxu0 }
 0xd2e   :  { %9265 = vtanh.f32 %v4203_v35  ;;  %v8099_v50 = vmul.f32 -1.442695, %v4186_v53  ;;  %v4200_v21 = vadd.f32 %v11147_v33, %v4162_v47  ;;  %v11446_v47 = vld [vmem:[#allocation8 + $0x254] ss:$24 sps:$4 sm:$0xff]  }
 0xd2f   :  { %v9264_v15 = vpop.eup %9263  ;;  %9267 = vrcp.f32 %v4193_v54 }
 0xd30   :  { %9269 = vpow2.f32 %v8099_v50  ;;  %v4202_v60 = vmul.f32 %v9264_v15, %v4200_v21  ;;  %v11451_v50 = vld [vmem:[#allocation8 + $0x250] ss:$24 sps:$4 sm:$0xff]   ;;  %v11454_v21 = vld [vmem:[#allocation8 + $0x224] ss:$24 sps:$4 sm:$0xff]   ;;  %v11459_v15 = vld [vmem:[#allocation8 + $0x220] ss:$24 sps:$4 sm:$0xff]  }
 0xd32   :  { %v4204_v45 = vadd.f32 %v4202_v60, %v13128_v29  ;;  %v11462_v60 = vld [vmem:[#allocation8 + $0x1f4] ss:$24 sps:$4 sm:$0xff]   ;;  %v11467_v29 = vld [vmem:[#allocation8 + $0x1f0] ss:$24 sps:$4 sm:$0xff]  }
 0xd34   :  { %9271 = vtanh.f32 %v4204_v45  ;;  %v11470_v45 = vld [vmem:[#allocation8 + $0x1c4] ss:$24 sps:$4 sm:$0xff]  }
 0xd3b   :  { %v9266_v52 = vpop.eup %9265 }
 0xd3c   :  { %v9268_v5 = vpop.eup %9267  ;;  %v4207_v7 = vsub.f32 %v11288_v20, %v9266_v52 }
 0xd3d   :  { %v9270_v1 = vpop.eup %9269 }
 0xd3e   :  { %v4194_v59 = vadd.f32 1.0, %v9270_v1  ;;  %v4209_v19 = vmul.f32 %v9268_v5, %v4207_v7  ;;  %v11478_v5 = vld [vmem:[#allocation8 + $0x194] ss:$24 sps:$4 sm:$0xff]   ;;  %v11483_v7 = vld [vmem:[#allocation8 + $0x190] ss:$24 sps:$4 sm:$0xff]  }
 0xd3f   :  { %v11504_v1 = vld [vmem:[#allocation8 + $0x188] ss:$24 sps:$4 sm:$0xff]  }
 0xd40   :  { %9273 = vrcp.f32 %v4194_v59  ;;  %v11428_v18 = vadd.f32 %v9266_v52, %v4209_v19  ;;  %v11475_v52 = vld [vmem:[#allocation8 + $0x1c0] ss:$24 sps:$4 sm:$0xff]   ;;  %13131 = vst [vmem:[#allocation46_spill] sm:$0xff] %v11504_v1 }
 0xd41   :  { %v9272_v32 = vpop.eup %9271 }
 0xd42   :  { %13129 = vst [vmem:[#allocation24_spill] sm:$0xff] %v11428_v18  ;;  %v4208_v27 = vsub.f32 %v11291_v30, %v9272_v32 }
 0xd4d   :  { %v9274_v35 = vpop.eup %9273 }
 0xd4e   :  { %v4210_v54 = vmul.f32 %v9274_v35, %v4208_v27 }
 0xd50   :  { %v11431_v3 = vadd.f32 %v9272_v32, %v4210_v54  ;;  %v13132_v32 = vld [vmem:[#allocation63_spill] sm:$0xff] }
 0xd52   :  { %13130 = vst [vmem:[#allocation45_spill] sm:$0xff] %v11431_v3  ;;  %v4215_v53 = vpack.c.bf16 %v11431_v3, %v11428_v18 }
 0xd54   :  { %4249 = vmatmul.mubr.bf16.vlgmr.msra.gmra.mxu1 %v4215_v53  ;;  %4290 = vmatmul.mubr.bf16.vlgmr.msra.gmra.mxu0 %v4215_v53 }
 0xd55   :  { %4299 = vmatpush1.bf16.msra.mxu1 %v11295_v11  ;;  %4330 = vmatprep.mubr.bf16.mxu1 %v12902_v61 }
 0xd56   :  { %4300 = vmatprep.subr.bf16.mxu1 %v11299_v26  ;;  %4391 = vmatpush1.bf16.msra.mxu0 %v11302_v41 }
 0xd57   :  { %4392 = vmatprep.subr.bf16.mxu0 %v11305_v38  ;;  %4422 = vmatprep.mubr.bf16.mxu0 %v12902_v61 }
 0xd59   :  { %4301 = vmatpush1.bf16.msra.mxu1 %v11309_v39 }
 0xd5a   :  { %4302 = vmatprep.subr.bf16.mxu1 %v11312_v0  ;;  %4393 = vmatpush1.bf16.msra.mxu0 %v11315_v57 }
 0xd5b   :  { %4394 = vmatprep.subr.bf16.mxu0 %v11318_v51 }
 0xd5d   :  { %4303 = vmatpush1.bf16.msra.mxu1 %v11321_v58 }
 0xd5e   :  { %4304 = vmatprep.subr.bf16.mxu1 %v11446_v47  ;;  %4395 = vmatpush1.bf16.msra.mxu0 %v11325_v44 }
 0xd5f   :  { %4396 = vmatprep.subr.bf16.mxu0 %v11328_v49 }
 0xd61   :  { %4305 = vmatpush1.bf16.msra.mxu1 %v11451_v50 }
 0xd62   :  { %4306 = vmatprep.subr.bf16.mxu1 %v11454_v21  ;;  %4397 = vmatpush1.bf16.msra.mxu0 %v11333_v40 }
 0xd63   :  { %4398 = vmatprep.subr.bf16.mxu0 %v11336_v63 }
 0xd65   :  { %4307 = vmatpush1.bf16.msra.mxu1 %v11459_v15 }
 0xd66   :  { %4308 = vmatprep.subr.bf16.mxu1 %v11462_v60  ;;  %4399 = vmatpush1.bf16.msra.mxu0 %v11341_v22 }
 0xd67   :  { %4400 = vmatprep.subr.bf16.mxu0 %v11344_v46 }
 0xd69   :  { %4309 = vmatpush1.bf16.msra.mxu1 %v11467_v29 }
 0xd6a   :  { %4310 = vmatprep.subr.bf16.mxu1 %v11470_v45  ;;  %4401 = vmatpush1.bf16.msra.mxu0 %v11349_v36 }
 0xd6b   :  { %4402 = vmatprep.subr.bf16.mxu0 %v11352_v4 }
 0xd6d   :  { %4311 = vmatpush1.bf16.msra.mxu1 %v11475_v52 }
 0xd6e   :  { %4312 = vmatprep.subr.bf16.mxu1 %v11478_v5  ;;  %4403 = vmatpush1.bf16.msra.mxu0 %v11357_v48 }
 0xd6f   :  { %4404 = vmatprep.subr.bf16.mxu0 %v11360_v43 }
 0xd71   :  { %4313 = vmatpush1.bf16.msra.mxu1 %v11483_v7 }
 0xd72   :  { %4431 = vmatprep.subr.bf16.mxu1 %v11364_v25  ;;  %4405 = vmatpush1.bf16.msra.mxu0 %v11367_v12 }
 0xd73   :  { %4472 = vmatprep.subr.bf16.mxu0 %v11370_v34 }
 0xd74   :  { %4331 = vmatmul.mubr.bf16.vlgmr.msra.gmra.mxu1 %v4215_v53 }
 0xd75   :  { %4432 = vmatpush1.bf16.msra.mxu1 %v11373_v28  ;;  %4463 = vmatprep.mubr.bf16.mxu1 %v12902_v61 }
 0xd76   :  { %4433 = vmatprep.subr.bf16.mxu1 %v11377_v37 }
 0xd79   :  { %4434 = vmatpush1.bf16.msra.mxu1 %v11380_v10 }
 0xd7a   :  { %4435 = vmatprep.subr.bf16.mxu1 %v11383_v8 }
 0xd7d   :  { %4436 = vmatpush1.bf16.msra.mxu1 %v11386_v56 }
 0xd7e   :  { %4437 = vmatprep.subr.bf16.mxu1 %v11389_v42 }
 0xd81   :  { %4438 = vmatpush1.bf16.msra.mxu1 %v11392_v55 }
 0xd82   :  { %4439 = vmatprep.subr.bf16.mxu1 %v11395_v14 }
 0xd85   :  { %4440 = vmatpush1.bf16.msra.mxu1 %v11398_v13 }
 0xd86   :  { %4441 = vmatprep.subr.bf16.mxu1 %v11401_v6  ;;  %v13134_v6 = vld [vmem:[#allocation64_spill] sm:$0xff] }
 0xd89   :  { %4442 = vmatpush1.bf16.msra.mxu1 %v11404_v62 }
 0xd8a   :  { %4443 = vmatprep.subr.bf16.mxu1 %v11407_v2  ;;  %v13133_v2 = vld [vmem:[#allocation44_spill] sm:$0xff] }
 0xd8d   :  { %4444 = vmatpush1.bf16.msra.mxu1 %v11410_v9 }
 0xd8e   :  { %4445 = vmatprep.subr.bf16.mxu1 %v11413_v16 }
 0xd91   :  { %4446 = vmatpush1.bf16.msra.mxu1 %v11504_v1 }
 0xd92   :  { %4564 = vmatprep.subr.bf16.mxu1 %v11275_v24 }
 0xe14   :  { %v4250_v59 = vpop.f32.mrf.mxu1  ;;  %v4291_v19 = vpop.f32.mrf.mxu0 }
 0xe15   :  { %v4345_v27 = vadd.f32 %v4250_v59, %v13132_v32 }
 0xe16   :  { %v4252_v35 = vpop.f32.mrf.mxu1  ;;  %v4293_v54 = vpop.f32.mrf.mxu0 }
 0xe17   :  { %v8100_v53 = vmul.f32 -1.442695, %v4345_v27  ;;  %v4359_v1 = vadd.f32 %v4252_v35, %v13134_v6 }
 0xe18   :  { %v4254_v30 = vpop.f32.mrf.mxu1  ;;  %v4294_v20 = vpop.f32.mrf.mxu0 }
 0xe19   :  { %9275 = vpow2.f32 %v8100_v53  ;;  %v8102_v13 = vmul.f32 -1.442695, %v4359_v1  ;;  %v4373_v20 = vadd.f32 %v13092_v23, %v4291_v19  ;;  %v13136_v1 = vld [vmem:[#allocation65_spill] sm:$0xff] }
 0xe1a   :  { %v4255_v31 = vpop.f32.mrf.mxu1  ;;  %v4295_v9 = vpop.f32.mrf.mxu0  ;;  %v13137_v19 = vld [vmem:[#allocation33_spill] sm:$0xff] }
 0xe1b   :  { %v4346_v16 = vadd.f32 %v4295_v9, %v13133_v2  ;;  %v13135_v2 = vld [vmem:[#allocation18_spill] sm:$0xff] }
 0xe1c   :  { %v3104_v9 = vadd.f32 %v13135_v2, %v13110_v17 }
 0xe1d   :  { %v8101_v62 = vmul.f32 -1.442695, %v4346_v16 }
 0xe1f   :  { %9277 = vpow2.f32 %v8101_v62 }
 0xe20   :  { %9279 = vpow2.f32 %v8102_v13 }
 0xe26   :  { %v9276_v24 = vpop.eup %9275 }
 0xe27   :  { %v4353_v14 = vadd.f32 1.0, %v9276_v24 }
 0xe29   :  { %9281 = vrcp.f32 %v4353_v14 }
 0xe2c   :  { %v9278_v59 = vpop.eup %9277 }
 0xe2d   :  { %v4354_v32 = vadd.f32 1.0, %v9278_v59  ;;  %v9280_v30 = vpop.eup %9279 }
 0xe2e   :  { %v4367_v16 = vadd.f32 1.0, %v9280_v30 }
 0xe2f   :  { %9283 = vrcp.f32 %v4354_v32 }
 0xe34   :  { %v4332_v27 = vpop.f32.mrf.mxu1 }
 0xe36   :  { %v9282_v31 = vpop.eup %9281  ;;  %v4333_v54 = vpop.f32.mrf.mxu1 }
 0xe37   :  { %v4375_v62 = vmul.f32 %v9282_v31, %v4373_v20 }
 0xe38   :  { %v4334_v6 = vpop.f32.mrf.mxu1 }
 0xe39   :  { %v4377_v35 = vadd.f32 %v4375_v62, %v13136_v1  ;;  %v4360_v24 = vadd.f32 %v4334_v6, %v3104_v9 }
 0xe3a   :  { %v4336_v13 = vpop.f32.mrf.mxu1 }
 0xe3b   :  { %9285 = vtanh.f32 %v4377_v35  ;;  %v8103_v14 = vmul.f32 -1.442695, %v4360_v24  ;;  %v4374_v53 = vadd.f32 %v11147_v33, %v4336_v13  ;;  %v13138_v24 = vld [vmem:[#allocation47_spill] sm:$0xff]  ;;  %v13139_v13 = vld [vmem:[#allocation58_spill] sm:$0xff] }
 0xe3c   :  { %v9284_v59 = vpop.eup %9283  ;;  %9287 = vrcp.f32 %v4367_v16 }
 0xe3d   :  { %9289 = vpow2.f32 %v8103_v14  ;;  %v4376_v23 = vmul.f32 %v9284_v59, %v4374_v53  ;;  %v13140_v14 = vld [vmem:[#allocation41_spill] sm:$0xff]  ;;  %v13142_v59 = vld [vmem:[#allocation30_spill] sm:$0xff] }
 0xe3e   :  { %v13141_v53 = vld [vmem:[#allocation73_spill] sm:$0xff] }
 0xe3f   :  { %v4378_v32 = vadd.f32 %v4376_v23, %v13137_v19  ;;  %v13143_v23 = vld [vmem:[#allocation59_spill] sm:$0xff] }
 0xe40   :  { %v13144_v19 = vld [vmem:[#allocation27_spill] sm:$0xff] }
 0xe41   :  { %9291 = vtanh.f32 %v4378_v32  ;;  %v13145_v32 = vld [vmem:[#allocation46_spill] sm:$0xff] }
 0xe48   :  { %v9286_v27 = vpop.eup %9285 }
 0xe49   :  { %v9288_v54 = vpop.eup %9287  ;;  %v4381_v20 = vsub.f32 %v11428_v18, %v9286_v27  ;;  %v13148_v18 = vld [vmem:[#allocation42_spill] sm:$0xff] }
 0xe4a   :  { %v9290_v30 = vpop.eup %9289 }
 0xe4b   :  { %v4368_v31 = vadd.f32 1.0, %v9290_v30  ;;  %v4383_v2 = vmul.f32 %v9288_v54, %v4381_v20  ;;  %v13147_v30 = vld [vmem:[#allocation66_spill] sm:$0xff] }
 0xe4d   :  { %9293 = vrcp.f32 %v4368_v31  ;;  %v11518_v9 = vadd.f32 %v9286_v27, %v4383_v2  ;;  %v13146_v27 = vld [vmem:[#allocation22_spill] sm:$0xff] }
 0xe4e   :  { %v9292_v62 = vpop.eup %9291 }
 0xe4f   :  { %v4382_v33 = vsub.f32 %v11431_v3, %v9292_v62 }
 0xe5a   :  { %v9294_v6 = vpop.eup %9293 }
 0xe5b   :  { %v4384_v16 = vmul.f32 %v9294_v6, %v4382_v33 }
 0xe5d   :  { %v11521_v1 = vadd.f32 %v9292_v62, %v4384_v16 }
 0xe5f   :  { %v4389_v35 = vpack.c.bf16 %v11521_v1, %v11518_v9 }
 0xe61   :  { %4423 = vmatmul.mubr.bf16.vlgmr.msra.gmra.mxu0 %v4389_v35  ;;  %4464 = vmatmul.mubr.bf16.vlgmr.msra.gmra.mxu1 %v4389_v35 }
 0xe62   :  { %4473 = vmatpush1.bf16.msra.mxu0 %v11295_v11  ;;  %4504 = vmatprep.mubr.bf16.mxu0 %v12902_v61 }
 0xe63   :  { %4474 = vmatprep.subr.bf16.mxu0 %v11299_v26  ;;  %4565 = vmatpush1.bf16.msra.mxu1 %v11302_v41 }
 0xe64   :  { %4566 = vmatprep.subr.bf16.mxu1 %v11305_v38  ;;  %4596 = vmatprep.mubr.bf16.mxu1 %v12902_v61 }
 0xe66   :  { %4475 = vmatpush1.bf16.msra.mxu0 %v11309_v39 }
 0xe67   :  { %4476 = vmatprep.subr.bf16.mxu0 %v11312_v0  ;;  %4567 = vmatpush1.bf16.msra.mxu1 %v11315_v57 }
 0xe68   :  { %4568 = vmatprep.subr.bf16.mxu1 %v11318_v51 }
 0xe6a   :  { %4477 = vmatpush1.bf16.msra.mxu0 %v11321_v58 }
 0xe6b   :  { %4478 = vmatprep.subr.bf16.mxu0 %v11446_v47  ;;  %4569 = vmatpush1.bf16.msra.mxu1 %v11325_v44 }
 0xe6c   :  { %4570 = vmatprep.subr.bf16.mxu1 %v11328_v49 }
 0xe6e   :  { %4479 = vmatpush1.bf16.msra.mxu0 %v11451_v50 }
 0xe6f   :  { %4480 = vmatprep.subr.bf16.mxu0 %v11454_v21  ;;  %4571 = vmatpush1.bf16.msra.mxu1 %v11333_v40 }
 0xe70   :  { %4572 = vmatprep.subr.bf16.mxu1 %v11336_v63 }
 0xe72   :  { %4481 = vmatpush1.bf16.msra.mxu0 %v11459_v15 }
 0xe73   :  { %4482 = vmatprep.subr.bf16.mxu0 %v11462_v60  ;;  %4573 = vmatpush1.bf16.msra.mxu1 %v11341_v22 }
 0xe74   :  { %4574 = vmatprep.subr.bf16.mxu1 %v11344_v46 }
 0xe76   :  { %4483 = vmatpush1.bf16.msra.mxu0 %v11467_v29 }
 0xe77   :  { %4484 = vmatprep.subr.bf16.mxu0 %v11470_v45  ;;  %4575 = vmatpush1.bf16.msra.mxu1 %v11349_v36 }
 0xe78   :  { %4576 = vmatprep.subr.bf16.mxu1 %v11352_v4 }
 0xe7a   :  { %4485 = vmatpush1.bf16.msra.mxu0 %v11475_v52 }
 0xe7b   :  { %4486 = vmatprep.subr.bf16.mxu0 %v11478_v5  ;;  %4577 = vmatpush1.bf16.msra.mxu1 %v11357_v48 }
 0xe7c   :  { %4578 = vmatprep.subr.bf16.mxu1 %v11360_v43 }
 0xe7e   :  { %4487 = vmatpush1.bf16.msra.mxu0 %v11483_v7 }
 0xe7f   :  { %4605 = vmatprep.subr.bf16.mxu0 %v11364_v25  ;;  %4579 = vmatpush1.bf16.msra.mxu1 %v11367_v12 }
 0xe80   :  { %4646 = vmatprep.subr.bf16.mxu1 %v11370_v34 }
 0xe81   :  { %4505 = vmatmul.mubr.bf16.vlgmr.msra.gmra.mxu0 %v4389_v35 }
 0xe82   :  { %4606 = vmatpush1.bf16.msra.mxu0 %v11373_v28  ;;  %4637 = vmatprep.mubr.bf16.mxu0 %v12902_v61 }
 0xe83   :  { %4607 = vmatprep.subr.bf16.mxu0 %v11377_v37 }
 0xe86   :  { %4608 = vmatpush1.bf16.msra.mxu0 %v11380_v10 }
 0xe87   :  { %4609 = vmatprep.subr.bf16.mxu0 %v11383_v8 }
 0xe8a   :  { %4610 = vmatpush1.bf16.msra.mxu0 %v11386_v56 }
 0xe8b   :  { %4611 = vmatprep.subr.bf16.mxu0 %v11389_v42 }
 0xe8e   :  { %4612 = vmatpush1.bf16.msra.mxu0 %v11392_v55 }
 0xe8f   :  { %4613 = vmatprep.subr.bf16.mxu0 %v13138_v24 }
 0xe92   :  { %4614 = vmatpush1.bf16.msra.mxu0 %v13139_v13 }
 0xe93   :  { %4615 = vmatprep.subr.bf16.mxu0 %v13140_v14 }
 0xe96   :  { %4616 = vmatpush1.bf16.msra.mxu0 %v13141_v53 }
 0xe97   :  { %4617 = vmatprep.subr.bf16.mxu0 %v13142_v59  ;;  %v13150_v59 = vld [vmem:[#allocation67_spill] sm:$0xff] }
 0xe9a   :  { %4618 = vmatpush1.bf16.msra.mxu0 %v13143_v23 }
 0xe9b   :  { %4619 = vmatprep.subr.bf16.mxu0 %v13144_v19  ;;  %v13149_v19 = vld [vmem:[#allocation53_spill] sm:$0xff] }
 0xe9e   :  { %4620 = vmatpush1.bf16.msra.mxu0 %v13145_v32  ;;  %v2678_v32 = vadd.f32 %v13150_v59, %v13149_v19 }
 0xe9f   :  { %4738 = vmatprep.subr.bf16.mxu0 %v13146_v27 }
 0xf21   :  { %v4424_v54 = vpop.f32.mrf.mxu0  ;;  %v4465_v20 = vpop.f32.mrf.mxu1 }
 0xf22   :  { %v4519_v31 = vadd.f32 %v4424_v54, %v13147_v30 }
 0xf23   :  { %v4426_v2 = vpop.f32.mrf.mxu0  ;;  %v4467_v62 = vpop.f32.mrf.mxu1 }
 0xf24   :  { %v8104_v33 = vmul.f32 -1.442695, %v4519_v31  ;;  %v4533_v27 = vadd.f32 %v4426_v2, %v2678_v32 }
 0xf25   :  { %v4428_v6 = vpop.f32.mrf.mxu0  ;;  %v4468_v16 = vpop.f32.mrf.mxu1 }
 0xf26   :  { %9295 = vpow2.f32 %v8104_v33  ;;  %v8106_v53 = vmul.f32 -1.442695, %v4533_v27 }
 0xf27   :  { %v4429_v35 = vpop.f32.mrf.mxu0  ;;  %v4469_v3 = vpop.f32.mrf.mxu1 }
 0xf28   :  { %v4520_v17 = vadd.f32 %v4469_v3, %v13148_v18  ;;  %v11583_v18 = vld [vmem:[%s12697_s5 + $0x2] ss:$0 sm:$0xff]  ;;  %v11591_v35 = vld [vmem:[%s12697_s5 + $0x3] ss:$0 sm:$0xff] }
 0xf2a   :  { %v8105_v23 = vmul.f32 -1.442695, %v4520_v17  ;;  %v4547_v17 = vadd.f32 %v11583_v18, %v4465_v20 }
 0xf2c   :  { %9297 = vpow2.f32 %v8105_v23 }
 0xf2d   :  { %9299 = vpow2.f32 %v8106_v53 }
 0xf33   :  { %v9296_v14 = vpop.eup %9295 }
 0xf34   :  { %v4527_v13 = vadd.f32 1.0, %v9296_v14  ;;  %v13151_v14 = vld [vmem:[#allocation68_spill] sm:$0xff] }
 0xf36   :  { %9301 = vrcp.f32 %v4527_v13  ;;  %v13152_v13 = vld [vmem:[#allocation23_spill] sm:$0xff] }
 0xf39   :  { %v9298_v54 = vpop.eup %9297 }
 0xf3a   :  { %v4528_v30 = vadd.f32 1.0, %v9298_v54  ;;  %v9300_v62 = vpop.eup %9299 }
 0xf3b   :  { %v4541_v32 = vadd.f32 1.0, %v9300_v62 }
 0xf3c   :  { %9303 = vrcp.f32 %v4528_v30  ;;  %v13153_v30 = vld [vmem:[#allocation19_spill] sm:$0xff] }
 0xf41   :  { %v4506_v31 = vpop.f32.mrf.mxu0 }
 0xf43   :  { %v9302_v3 = vpop.eup %9301  ;;  %v4507_v59 = vpop.f32.mrf.mxu0 }
 0xf44   :  { %v4549_v23 = vmul.f32 %v9302_v3, %v4547_v17 }
 0xf45   :  { %v4508_v2 = vpop.f32.mrf.mxu0 }
 0xf46   :  { %v4551_v53 = vadd.f32 %v4549_v23, %v13151_v14  ;;  %v4534_v33 = vadd.f32 %v4508_v2, %v13152_v13 }
 0xf47   :  { %v4510_v6 = vpop.f32.mrf.mxu0 }
 0xf48   :  { %9305 = vtanh.f32 %v4551_v53  ;;  %v8107_v16 = vmul.f32 -1.442695, %v4534_v33  ;;  %v4548_v27 = vadd.f32 %v11591_v35, %v4510_v6 }
 0xf49   :  { %v9304_v20 = vpop.eup %9303  ;;  %9307 = vrcp.f32 %v4541_v32 }
 0xf4a   :  { %9309 = vpow2.f32 %v8107_v16  ;;  %v4550_v54 = vmul.f32 %v9304_v20, %v4548_v27 }
 0xf4c   :  { %v4552_v31 = vadd.f32 %v4550_v54, %v13153_v30 }
 0xf4e   :  { %9311 = vtanh.f32 %v4552_v31 }
 0xf55   :  { %v9306_v62 = vpop.eup %9305 }
 0xf56   :  { %v9308_v17 = vpop.eup %9307  ;;  %v4555_v3 = vsub.f32 %v11518_v9, %v9306_v62 }
 0xf57   :  { %v9310_v59 = vpop.eup %9309 }
 0xf58   :  { %v4542_v23 = vadd.f32 1.0, %v9310_v59  ;;  %v4557_v2 = vmul.f32 %v9308_v17, %v4555_v3  ;;  %v13164_v59 = vld [vmem:[#allocation40_spill] sm:$0xff] }
 0xf5a   :  { %9313 = vrcp.f32 %v4542_v23  ;;  %v11596_v14 = vadd.f32 %v9306_v62, %v4557_v2  ;;  %v13165_v23 = vld [vmem:[#allocation52_spill] sm:$0xff] }
 0xf5b   :  { %v9312_v53 = vpop.eup %9311  ;;  %v3094_v2 = vadd.f32 %v13165_v23, %v13164_v59  ;;  %v8857_v59 = vld [vmem:[#allocation6 + $0x380] ss:$12 sps:$4 sm:$0xff]   ;;  %v8860_v23 = vld [vmem:[#allocation6 + $0x424] ss:$12 sps:$4 sm:$0xff]  }
 0xf5c   :  { %v4556_v13 = vsub.f32 %v11521_v1, %v9312_v53 }
 0xf67   :  { %v9314_v33 = vpop.eup %9313 }
 0xf68   :  { %v4558_v32 = vmul.f32 %v9314_v33, %v4556_v13 }
 0xf6a   :  { %v11599_v6 = vadd.f32 %v9312_v53, %v4558_v32  ;;  %v13166_v32 = vld [vmem:[#allocation71_spill] sm:$0xff] }
 0xf6c   :  { %v4563_v16 = vpack.c.bf16 %v11599_v6, %v11596_v14 }
 0xf6e   :  { %4597 = vmatmul.mubr.bf16.vlgmr.msra.gmra.mxu1 %v4563_v16  ;;  %4638 = vmatmul.mubr.bf16.vlgmr.msra.gmra.mxu0 %v4563_v16 }
 0xf6f   :  { %4647 = vmatpush1.bf16.msra.mxu1 %v11295_v11  ;;  %4678 = vmatprep.mubr.bf16.mxu1 %v12902_v61 }
 0xf70   :  { %4648 = vmatprep.subr.bf16.mxu1 %v11299_v26  ;;  %4739 = vmatpush1.bf16.msra.mxu0 %v11302_v41  ;;  %v13154_v41 = vld [vmem:[#allocation58_spill] sm:$0xff] }
 0xf71   :  { %4740 = vmatprep.subr.bf16.mxu0 %v11305_v38  ;;  %4770 = vmatprep.mubr.bf16.mxu0 %v12902_v61  ;;  %v13155_v38 = vld [vmem:[#allocation41_spill] sm:$0xff] }
 0xf73   :  { %4649 = vmatpush1.bf16.msra.mxu1 %v11309_v39 }
 0xf74   :  { %4650 = vmatprep.subr.bf16.mxu1 %v11312_v0  ;;  %4741 = vmatpush1.bf16.msra.mxu0 %v11315_v57  ;;  %v13156_v57 = vld [vmem:[#allocation73_spill] sm:$0xff] }
 0xf75   :  { %4742 = vmatprep.subr.bf16.mxu0 %v11318_v51  ;;  %v13157_v51 = vld [vmem:[#allocation30_spill] sm:$0xff] }
 0xf77   :  { %4651 = vmatpush1.bf16.msra.mxu1 %v11321_v58 }
 0xf78   :  { %4652 = vmatprep.subr.bf16.mxu1 %v11446_v47  ;;  %4743 = vmatpush1.bf16.msra.mxu0 %v11325_v44  ;;  %v13158_v44 = vld [vmem:[#allocation59_spill] sm:$0xff] }
 0xf79   :  { %4744 = vmatprep.subr.bf16.mxu0 %v11328_v49  ;;  %v13159_v49 = vld [vmem:[#allocation27_spill] sm:$0xff] }
 0xf7b   :  { %4653 = vmatpush1.bf16.msra.mxu1 %v11451_v50 }
 0xf7c   :  { %4654 = vmatprep.subr.bf16.mxu1 %v11454_v21  ;;  %4745 = vmatpush1.bf16.msra.mxu0 %v11333_v40  ;;  %v13160_v40 = vld [vmem:[#allocation46_spill] sm:$0xff] }
 0xf7d   :  { %4746 = vmatprep.subr.bf16.mxu0 %v11336_v63 }
 0xf7f   :  { %4655 = vmatpush1.bf16.msra.mxu1 %v11459_v15 }
 0xf80   :  { %4656 = vmatprep.subr.bf16.mxu1 %v11462_v60  ;;  %4747 = vmatpush1.bf16.msra.mxu0 %v11341_v22 }
 0xf81   :  { %4748 = vmatprep.subr.bf16.mxu0 %v11344_v46  ;;  %v13161_v46 = vld [vmem:[#allocation69_spill] sm:$0xff] }
 0xf83   :  { %4657 = vmatpush1.bf16.msra.mxu1 %v11467_v29 }
 0xf84   :  { %4658 = vmatprep.subr.bf16.mxu1 %v11470_v45  ;;  %4749 = vmatpush1.bf16.msra.mxu0 %v11349_v36 }
 0xf85   :  { %4750 = vmatprep.subr.bf16.mxu0 %v11352_v4 }
 0xf87   :  { %4659 = vmatpush1.bf16.msra.mxu1 %v11475_v52 }
 0xf88   :  { %4660 = vmatprep.subr.bf16.mxu1 %v11478_v5  ;;  %4751 = vmatpush1.bf16.msra.mxu0 %v11357_v48 }
 0xf89   :  { %4752 = vmatprep.subr.bf16.mxu0 %v11360_v43 }
 0xf8b   :  { %4661 = vmatpush1.bf16.msra.mxu1 %v11483_v7 }
 0xf8c   :  { %4779 = vmatprep.subr.bf16.mxu1 %v11364_v25  ;;  %4753 = vmatpush1.bf16.msra.mxu0 %v11367_v12 }
 0xf8d   :  { %4820 = vmatprep.subr.bf16.mxu0 %v11370_v34 }
 0xf8e   :  { %4679 = vmatmul.mubr.bf16.vlgmr.msra.gmra.mxu1 %v4563_v16 }
 0xf8f   :  { %4780 = vmatpush1.bf16.msra.mxu1 %v11373_v28  ;;  %4811 = vmatprep.mubr.bf16.mxu1 %v12902_v61 }
 0xf90   :  { %4781 = vmatprep.subr.bf16.mxu1 %v11377_v37  ;;  %v13162_v37 = vld [vmem:[#allocation48_spill] sm:$0xff] }
 0xf93   :  { %4782 = vmatpush1.bf16.msra.mxu1 %v11380_v10 }
 0xf94   :  { %4783 = vmatprep.subr.bf16.mxu1 %v11383_v8 }
 0xf97   :  { %4784 = vmatpush1.bf16.msra.mxu1 %v11386_v56  ;;  %v13163_v56 = vld [vmem:[#allocation70_spill] sm:$0xff] }
 0xf98   :  { %4785 = vmatprep.subr.bf16.mxu1 %v11389_v42 }
 0xf9b   :  { %4786 = vmatpush1.bf16.msra.mxu1 %v11392_v55 }
 0xf9c   :  { %4787 = vmatprep.subr.bf16.mxu1 %v13138_v24 }
 0xf9f   :  { %4788 = vmatpush1.bf16.msra.mxu1 %v13154_v41 }
 0xfa0   :  { %4789 = vmatprep.subr.bf16.mxu1 %v13155_v38 }
 0xfa3   :  { %4790 = vmatpush1.bf16.msra.mxu1 %v13156_v57 }
 0xfa4   :  { %4791 = vmatprep.subr.bf16.mxu1 %v13157_v51 }
 0xfa7   :  { %4792 = vmatpush1.bf16.msra.mxu1 %v13158_v44 }
 0xfa8   :  { %4793 = vmatprep.subr.bf16.mxu1 %v13159_v49 }
 0xfab   :  { %4794 = vmatpush1.bf16.msra.mxu1 %v13160_v40  ;;  %v13167_v40 = vld [vmem:[#allocation13_spill] sm:$0xff] }
0x102e   :  { %v4598_v63 = vpop.f32.mrf.mxu1  ;;  %v4639_v22 = vpop.f32.mrf.mxu0 }
0x102f   :  { %v4693_v36 = vadd.f32 %v4598_v63, %v13161_v46  ;;  %v4721_v62 = vadd.f32 %v11583_v18, %v4639_v22 }
0x1030   :  { %v4600_v4 = vpop.f32.mrf.mxu1  ;;  %v4641_v48 = vpop.f32.mrf.mxu0 }
0x1031   :  { %v8108_v43 = vmul.f32 -1.442695, %v4693_v36  ;;  %v4707_v42 = vadd.f32 %v4600_v4, %v13163_v56  ;;  %v8840_v56 = vld [vmem:[#allocation6 + $0x300] ss:$12 sps:$4 sm:$0xff]  }
0x1032   :  { %v4602_v25 = vpop.f32.mrf.mxu1  ;;  %v4642_v12 = vpop.f32.mrf.mxu0 }
0x1033   :  { %9315 = vpow2.f32 %v8108_v43  ;;  %v8110_v55 = vmul.f32 -1.442695, %v4707_v42  ;;  %v8845_v42 = vld [vmem:[#allocation6 + $0x46c] ss:$12 sps:$4 sm:$0xff]  }
0x1034   :  { %v4603_v34 = vpop.f32.mrf.mxu1  ;;  %v4643_v28 = vpop.f32.mrf.mxu0 }
0x1035   :  { %v4694_v10 = vadd.f32 %v4643_v28, %v13162_v37 }
0x1037   :  { %v8109_v8 = vmul.f32 -1.442695, %v4694_v10 }
0x1039   :  { %9317 = vpow2.f32 %v8109_v8 }
0x103a   :  { %9319 = vpow2.f32 %v8110_v55  ;;  %v8846_v55 = vld [vmem:[#allocation6 + $0x470] ss:$12 sps:$4 sm:$0xff]  }
0x1040   :  { %v9316_v24 = vpop.eup %9315 }
0x1041   :  { %v4701_v27 = vadd.f32 1.0, %v9316_v24  ;;  %v8843_v24 = vld [vmem:[#allocation6 + $0x468] ss:$12 sps:$4 sm:$0xff]  }
0x1043   :  { %9321 = vrcp.f32 %v4701_v27  ;;  %v8847_v27 = vld [vmem:[#allocation6 + $0x3b0] ss:$12 sps:$4 sm:$0xff]  }
0x1046   :  { %v9318_v20 = vpop.eup %9317 }
0x1047   :  { %v4702_v54 = vadd.f32 1.0, %v9318_v20  ;;  %v9320_v31 = vpop.eup %9319  ;;  %v8850_v20 = vld [vmem:[#allocation6 + $0x454] ss:$12 sps:$4 sm:$0xff]  }
0x1048   :  { %v4715_v13 = vadd.f32 1.0, %v9320_v31  ;;  %v8852_v31 = vld [vmem:[#allocation6 + $0x398] ss:$12 sps:$4 sm:$0xff]  }
0x1049   :  { %9323 = vrcp.f32 %v4702_v54  ;;  %v8851_v54 = vld [vmem:[#allocation6 + $0x458] ss:$12 sps:$4 sm:$0xff]  }
0x104e   :  { %v4680_v30 = vpop.f32.mrf.mxu1 }
0x104f   :  { %v8848_v30 = vld [vmem:[#allocation6 + $0x450] ss:$12 sps:$4 sm:$0xff]  }
0x1050   :  { %v9322_v17 = vpop.eup %9321  ;;  %v4681_v3 = vpop.f32.mrf.mxu1 }
0x1051   :  { %v4723_v53 = vmul.f32 %v9322_v17, %v4721_v62  ;;  %v8855_v62 = vld [vmem:[#allocation6 + $0x43c] ss:$12 sps:$4 sm:$0xff]   ;;  %v8856_v17 = vld [vmem:[#allocation6 + $0x440] ss:$12 sps:$4 sm:$0xff]   ;;  %v8853_v3 = vld [vmem:[#allocation6 + $0x438] ss:$12 sps:$4 sm:$0xff]  }
0x1052   :  { %v4682_v33 = vpop.f32.mrf.mxu1 }
0x1053   :  { %v4725_v16 = vadd.f32 %v4723_v53, %v13166_v32  ;;  %v4708_v41 = vadd.f32 %v4682_v33, %v3094_v2  ;;  %v8861_v2 = vld [vmem:[#allocation6 + $0x428] ss:$12 sps:$4 sm:$0xff]   ;;  %v8858_v53 = vld [vmem:[#allocation6 + $0x420] ss:$12 sps:$4 sm:$0xff]   ;;  %v8866_v32 = vld [vmem:[#allocation6 + $0x410] ss:$12 sps:$4 sm:$0xff]  }
0x1054   :  { %v4684_v38 = vpop.f32.mrf.mxu1  ;;  %v8865_v33 = vld [vmem:[#allocation6 + $0x40c] ss:$12 sps:$4 sm:$0xff]  }
0x1055   :  { %9325 = vtanh.f32 %v4725_v16  ;;  %v8111_v57 = vmul.f32 -1.442695, %v4708_v41  ;;  %v4722_v51 = vadd.f32 %v11591_v35, %v4684_v38  ;;  %v8863_v16 = vld [vmem:[#allocation6 + $0x408] ss:$12 sps:$4 sm:$0xff]   ;;  %v8867_v41 = vld [vmem:[#allocation6 + $0x350] ss:$12 sps:$4 sm:$0xff]  }
0x1056   :  { %v9324_v44 = vpop.eup %9323  ;;  %9327 = vrcp.f32 %v4715_v13  ;;  %v8862_v13 = vld [vmem:[#allocation6 + $0x368] ss:$12 sps:$4 sm:$0xff]  }
0x1057   :  { %9329 = vpow2.f32 %v8111_v57  ;;  %v4724_v49 = vmul.f32 %v9324_v44, %v4722_v51  ;;  %v8870_v38 = vld [vmem:[#allocation6 + $0x3f4] ss:$12 sps:$4 sm:$0xff]   ;;  %v8871_v57 = vld [vmem:[#allocation6 + $0x3f8] ss:$12 sps:$4 sm:$0xff]   ;;  %v8868_v51 = vld [vmem:[#allocation6 + $0x3f0] ss:$12 sps:$4 sm:$0xff]  }
0x1058   :  { %v8872_v44 = vld [vmem:[#allocation6 + $0x338] ss:$12 sps:$4 sm:$0xff]  }
0x1059   :  { %v4726_v63 = vadd.f32 %v4724_v49, %v13167_v40  ;;  %v8875_v49 = vld [vmem:[#allocation6 + $0x3dc] ss:$12 sps:$4 sm:$0xff]   ;;  %v8876_v40 = vld [vmem:[#allocation6 + $0x3e0] ss:$12 sps:$4 sm:$0xff]  }
0x105b   :  { %9331 = vtanh.f32 %v4726_v63  ;;  %v8873_v63 = vld [vmem:[#allocation6 + $0x3d8] ss:$12 sps:$4 sm:$0xff]  }
0x1062   :  { %v9326_v22 = vpop.eup %9325 }
0x1063   :  { %v9328_v46 = vpop.eup %9327  ;;  %v4729_v36 = vsub.f32 %v11596_v14, %v9326_v22 }
0x1064   :  { %v9330_v4 = vpop.eup %9329 }
0x1065   :  { %v4716_v48 = vadd.f32 1.0, %v9330_v4  ;;  %v4731_v43 = vmul.f32 %v9328_v46, %v4729_v36  ;;  %v8880_v46 = vld [vmem:[#allocation6 + $0x3c4] ss:$12 sps:$4 sm:$0xff]   ;;  %v8881_v36 = vld [vmem:[#allocation6 + $0x3c8] ss:$12 sps:$4 sm:$0xff]  }
0x1066   :  { %v8878_v4 = vld [vmem:[#allocation6 + $0x3c0] ss:$12 sps:$4 sm:$0xff]  }
0x1067   :  { %9333 = vrcp.f32 %v4716_v48  ;;  %v11663_v25 = vadd.f32 %v9326_v22, %v4731_v43  ;;  %v8877_v22 = vld [vmem:[#allocation6 + $0x320] ss:$12 sps:$4 sm:$0xff]   ;;  %v8882_v48 = vld [vmem:[#allocation6 + $0x308] ss:$12 sps:$4 sm:$0xff]  }
0x1068   :  { %v9332_v12 = vpop.eup %9331  ;;  %v8885_v43 = vld [vmem:[#allocation6 + $0x52c] ss:$12 sps:$4 sm:$0xff]  }
0x1069   :  { %v4730_v34 = vsub.f32 %v11599_v6, %v9332_v12 }
0x1074   :  { %v9334_v28 = vpop.eup %9333 }
0x1075   :  { %v4732_v37 = vmul.f32 %v9334_v28, %v4730_v34 }
0x1077   :  { %v11666_v10 = vadd.f32 %v9332_v12, %v4732_v37  ;;  %v8886_v12 = vld [vmem:[#allocation6 + $0x5f0] ss:$12 sps:$4 sm:$0xff]  }
0x1078   :  { %v13168_v37 = vld [vmem:[#allocation34_spill] sm:$0xff] }
0x1079   :  { %v4737_v8 = vpack.c.bf16 %v11666_v10, %v11663_v25 }
0x107b   :  { %4771 = vmatmul.mubr.bf16.vlgmr.msra.gmra.mxu0 %v4737_v8  ;;  %4812 = vmatmul.mubr.bf16.vlgmr.msra.gmra.mxu1 %v4737_v8 }
0x107c   :  { %4821 = vmatpush1.bf16.msra.mxu0 %v11295_v11  ;;  %4852 = vmatprep.mubr.bf16.mxu0 %v12902_v61  ;;  %v8821_v11 = vld [vmem:[#allocation6 + $0x3ac] ss:$12 sps:$4 sm:$0xff]  }
0x107d   :  { %4822 = vmatprep.subr.bf16.mxu0 %v11299_v26  ;;  %v8819_v26 = vld [vmem:[#allocation6 + $0x3a8] ss:$12 sps:$4 sm:$0xff]   ;;  %5339 = vmatprep.subr.bf16.mxu1 %v8821_v11 }
0x107e   :  { %5340 = vmatpush1.bf16.msra.mxu1 %v8819_v26 }
0x1080   :  { %4823 = vmatpush1.bf16.msra.mxu0 %v11309_v39  ;;  %v8824_v39 = vld [vmem:[#allocation6 + $0x394] ss:$12 sps:$4 sm:$0xff]  }
0x1081   :  { %4824 = vmatprep.subr.bf16.mxu0 %v11312_v0  ;;  %v8822_v0 = vld [vmem:[#allocation6 + $0x390] ss:$12 sps:$4 sm:$0xff]   ;;  %5341 = vmatprep.subr.bf16.mxu1 %v8824_v39 }
0x1082   :  { %5342 = vmatpush1.bf16.msra.mxu1 %v8822_v0 }
0x1084   :  { %4825 = vmatpush1.bf16.msra.mxu0 %v11321_v58  ;;  %v8827_v58 = vld [vmem:[#allocation6 + $0x37c] ss:$12 sps:$4 sm:$0xff]  }
0x1085   :  { %4826 = vmatprep.subr.bf16.mxu0 %v11446_v47  ;;  %v8825_v47 = vld [vmem:[#allocation6 + $0x378] ss:$12 sps:$4 sm:$0xff]   ;;  %5343 = vmatprep.subr.bf16.mxu1 %v8827_v58 }
0x1086   :  { %5344 = vmatpush1.bf16.msra.mxu1 %v8825_v47 }
0x1088   :  { %4827 = vmatpush1.bf16.msra.mxu0 %v11451_v50  ;;  %v8830_v50 = vld [vmem:[#allocation6 + $0x364] ss:$12 sps:$4 sm:$0xff]  }
0x1089   :  { %4828 = vmatprep.subr.bf16.mxu0 %v11454_v21  ;;  %v8828_v21 = vld [vmem:[#allocation6 + $0x360] ss:$12 sps:$4 sm:$0xff]   ;;  %5345 = vmatprep.subr.bf16.mxu1 %v8830_v50 }
0x108a   :  { %5346 = vmatpush1.bf16.msra.mxu1 %v8828_v21  ;;  %v13169_v21 = vld [vmem:[#allocation29_spill] sm:$0xff] }
0x108c   :  { %4829 = vmatpush1.bf16.msra.mxu0 %v11459_v15  ;;  %v8833_v15 = vld [vmem:[#allocation6 + $0x34c] ss:$12 sps:$4 sm:$0xff]  }
0x108d   :  { %4830 = vmatprep.subr.bf16.mxu0 %v11462_v60  ;;  %v8831_v60 = vld [vmem:[#allocation6 + $0x348] ss:$12 sps:$4 sm:$0xff]   ;;  %5347 = vmatprep.subr.bf16.mxu1 %v8833_v15 }
0x108e   :  { %5348 = vmatpush1.bf16.msra.mxu1 %v8831_v60 }
0x1090   :  { %4831 = vmatpush1.bf16.msra.mxu0 %v11467_v29  ;;  %v8836_v29 = vld [vmem:[#allocation6 + $0x334] ss:$12 sps:$4 sm:$0xff]  }
0x1091   :  { %4832 = vmatprep.subr.bf16.mxu0 %v11470_v45  ;;  %v8834_v45 = vld [vmem:[#allocation6 + $0x330] ss:$12 sps:$4 sm:$0xff]   ;;  %5349 = vmatprep.subr.bf16.mxu1 %v8836_v29 }
0x1092   :  { %5350 = vmatpush1.bf16.msra.mxu1 %v8834_v45  ;;  %v13170_v29 = vld [vmem:[#allocation31_spill] sm:$0xff] }
0x1093   :  { %v2688_v45 = vadd.f32 %v13170_v29, %v13149_v19  ;;  %v13171_v19 = vld [vmem:[#allocation21_spill] sm:$0xff]  ;;  %v13179_v29 = vld [vmem:[#allocation60_spill] sm:$0xff] }
0x1094   :  { %4833 = vmatpush1.bf16.msra.mxu0 %v11475_v52  ;;  %v8839_v52 = vld [vmem:[#allocation6 + $0x31c] ss:$12 sps:$4 sm:$0xff]  }
0x1095   :  { %4834 = vmatprep.subr.bf16.mxu0 %v11478_v5  ;;  %v8837_v5 = vld [vmem:[#allocation6 + $0x318] ss:$12 sps:$4 sm:$0xff]   ;;  %5351 = vmatprep.subr.bf16.mxu1 %v8839_v52 }
0x1096   :  { %5352 = vmatpush1.bf16.msra.mxu1 %v8837_v5 }
0x1098   :  { %4835 = vmatpush1.bf16.msra.mxu0 %v11483_v7  ;;  %v8842_v7 = vld [vmem:[#allocation6 + $0x304] ss:$12 sps:$4 sm:$0xff]  }
0x1099   :  { %5353 = vmatprep.subr.bf16.mxu1 %v8842_v7  ;;  %8405 = vmatprep.subr.bf16.mxu0 %v8846_v55 }
0x109a   :  { %5354 = vmatpush1.bf16.msra.mxu1 %v8840_v56 }
0x109b   :  { %4853 = vmatmul.mubr.bf16.vlgmr.msra.gmra.mxu0 %v4737_v8  ;;  %5355 = vmatprep.subr.bf16.mxu1 %v8845_v42 }
0x109c   :  { %8406 = vmatpush3.bf16.msra.mxu0 %v8847_v27 }
0x109d   :  { %8407 = vmatprep.subr.bf16.mxu0 %v8851_v54 }
0x109e   :  { %5356 = vmatpush2.bf16.msra.mxu1 %v8843_v24 }
0x109f   :  { %5357 = vmatprep.subr.bf16.mxu1 %v8850_v20 }
0x10a0   :  { %8408 = vmatpush3.bf16.msra.mxu0 %v8852_v31 }
0x10a1   :  { %8409 = vmatprep.subr.bf16.mxu0 %v8856_v17 }
0x10a2   :  { %5358 = vmatpush2.bf16.msra.mxu1 %v8848_v30 }
0x10a3   :  { %5359 = vmatprep.subr.bf16.mxu1 %v8855_v62 }
0x10a4   :  { %8410 = vmatpush3.bf16.msra.mxu0 %v8857_v59  ;;  %v13172_v59 = vld [vmem:[#allocation15_spill] sm:$0xff] }
0x10a5   :  { %8411 = vmatprep.subr.bf16.mxu0 %v8861_v2 }
0x10a6   :  { %5360 = vmatpush2.bf16.msra.mxu1 %v8853_v3 }
0x10a7   :  { %5361 = vmatprep.subr.bf16.mxu1 %v8860_v23 }
0x10a8   :  { %8412 = vmatpush3.bf16.msra.mxu0 %v8862_v13 }
0x10a9   :  { %8413 = vmatprep.subr.bf16.mxu0 %v8866_v32 }
0x10aa   :  { %5362 = vmatpush2.bf16.msra.mxu1 %v8858_v53 }
0x10ab   :  { %5363 = vmatprep.subr.bf16.mxu1 %v8865_v33 }
0x10ac   :  { %8414 = vmatpush3.bf16.msra.mxu0 %v8867_v41 }
0x10ad   :  { %8415 = vmatprep.subr.bf16.mxu0 %v8871_v57 }
0x10ae   :  { %5364 = vmatpush2.bf16.msra.mxu1 %v8863_v16  ;;  %v13173_v16 = vld [vmem:[#allocation36_spill] sm:$0xff] }
0x10af   :  { %5365 = vmatprep.subr.bf16.mxu1 %v8870_v38 }
0x10b0   :  { %8416 = vmatpush3.bf16.msra.mxu0 %v8872_v44 }
0x10b1   :  { %8417 = vmatprep.subr.bf16.mxu0 %v8876_v40 }
0x10b2   :  { %5366 = vmatpush2.bf16.msra.mxu1 %v8868_v51 }
0x10b3   :  { %5367 = vmatprep.subr.bf16.mxu1 %v8875_v49 }
0x10b4   :  { %8418 = vmatpush3.bf16.msra.mxu0 %v8877_v22 }
0x10b5   :  { %8419 = vmatprep.subr.bf16.mxu0 %v8881_v36 }
0x10b6   :  { %5368 = vmatpush2.bf16.msra.mxu1 %v8873_v63 }
0x10b7   :  { %5369 = vmatprep.subr.bf16.mxu1 %v8880_v46 }
0x10b8   :  { %8420 = vmatpush3.bf16.msra.mxu0 %v8882_v48  ;;  %v8883_v48 = vld [vmem:[#allocation6 + $0x528] ss:$12 sps:$4 sm:$0xff]  }
0x10b9   :  { %5775 = vmatprep.subr.bf16.mxu0 %v8885_v43  ;;  %v8887_v43 = vld [vmem:[#allocation6 + $0x530] ss:$12 sps:$4 sm:$0xff]  }
0x10ba   :  { %5370 = vmatpush2.bf16.msra.mxu1 %v8878_v4 }
0x10bb   :  { %8445 = vmatprep.subr.bf16.mxu1 %v8886_v12  ;;  %v13174_v12 = vld [vmem:[#allocation57_spill] sm:$0xff] }
0x113b   :  { %v4772_v34 = vpop.f32.mrf.mxu0  ;;  %v4813_v28 = vpop.f32.mrf.mxu1 }
0x113c   :  { %v4867_v8 = vadd.f32 %v4772_v34, %v13168_v37  ;;  %v4895_v20 = vadd.f32 %v11583_v18, %v4813_v28  ;;  %v13175_v34 = vld [vmem:[#allocation61_spill] sm:$0xff]  ;;  %v8890_v37 = vld [vmem:[#allocation6 + $0x514] ss:$12 sps:$4 sm:$0xff]  }
0x113d   :  { %v4774_v11 = vpop.f32.mrf.mxu0  ;;  %v4815_v26 = vpop.f32.mrf.mxu1  ;;  %v11704_v28 = vpack.c.bf16 %v13175_v34, %v13174_v12  ;;  %v8955_v12 = vld [vmem:[#allocation6 + $0x574] ss:$12 sps:$4 sm:$0xff]   ;;  %v11781_v34 = vld [vmem:[#allocation8 + $0x364] ss:$24 sps:$4 sm:$0xff]  }
0x113e   :  { %v8112_v39 = vmul.f32 -1.442695, %v4867_v8  ;;  %v4881_v52 = vadd.f32 %v4774_v11, %v2688_v45  ;;  %v8891_v8 = vld [vmem:[#allocation6 + $0x5d8] ss:$12 sps:$4 sm:$0xff]   ;;  %v8888_v11 = vld [vmem:[#allocation6 + $0x510] ss:$12 sps:$4 sm:$0xff]  }
0x113f   :  { %v4776_v0 = vpop.f32.mrf.mxu0  ;;  %v4816_v58 = vpop.f32.mrf.mxu1  ;;  %v8892_v26 = vld [vmem:[#allocation6 + $0x518] ss:$12 sps:$4 sm:$0xff]  }
0x1140   :  { %9335 = vpow2.f32 %v8112_v39  ;;  %v8114_v5 = vmul.f32 -1.442695, %v4881_v52  ;;  %v8895_v39 = vld [vmem:[#allocation6 + $0x4fc] ss:$12 sps:$4 sm:$0xff]   ;;  %v8896_v0 = vld [vmem:[#allocation6 + $0x5c0] ss:$12 sps:$4 sm:$0xff]  }
0x1141   :  { %v4777_v47 = vpop.f32.mrf.mxu0  ;;  %v4817_v50 = vpop.f32.mrf.mxu1  ;;  %v8893_v58 = vld [vmem:[#allocation6 + $0x4f8] ss:$12 sps:$4 sm:$0xff]   ;;  %v8898_v52 = vld [vmem:[#allocation6 + $0x4e0] ss:$12 sps:$4 sm:$0xff]  }
0x1142   :  { %v4868_v15 = vadd.f32 %v4817_v50, %v13169_v21  ;;  %v8897_v47 = vld [vmem:[#allocation6 + $0x500] ss:$12 sps:$4 sm:$0xff]   ;;  %v8900_v21 = vld [vmem:[#allocation6 + $0x4e4] ss:$12 sps:$4 sm:$0xff]  }
0x1144   :  { %v8113_v60 = vmul.f32 -1.442695, %v4868_v15  ;;  %v8901_v15 = vld [vmem:[#allocation6 + $0x5a8] ss:$12 sps:$4 sm:$0xff]  }
0x1146   :  { %9337 = vpow2.f32 %v8113_v60  ;;  %v13178_v60 = vld [vmem:[#allocation45_spill] sm:$0xff] }
0x1147   :  { %9339 = vpow2.f32 %v8114_v5  ;;  %v11724_v45 = vpack.c.bf16 %v13179_v29, %v13178_v60  ;;  %v8902_v5 = vld [vmem:[#allocation6 + $0x4e8] ss:$12 sps:$4 sm:$0xff]   ;;  %v11808_v60 = vld [vmem:[#allocation8 + $0x458] ss:$24 sps:$4 sm:$0xff]  }
0x1148   :  { %v11812_v29 = vld [vmem:[#allocation8 + $0x460] ss:$24 sps:$4 sm:$0xff]  }
0x114d   :  { %v9336_v7 = vpop.eup %9335 }
0x114e   :  { %v4875_v56 = vadd.f32 1.0, %v9336_v7  ;;  %v8905_v7 = vld [vmem:[#allocation6 + $0x4cc] ss:$12 sps:$4 sm:$0xff]  }
0x1150   :  { %9341 = vrcp.f32 %v4875_v56  ;;  %v8906_v56 = vld [vmem:[#allocation6 + $0x590] ss:$12 sps:$4 sm:$0xff]  }
0x1153   :  { %v9338_v42 = vpop.eup %9337 }
0x1154   :  { %v4876_v55 = vadd.f32 1.0, %v9338_v42  ;;  %v9340_v27 = vpop.eup %9339  ;;  %v8903_v42 = vld [vmem:[#allocation6 + $0x4c8] ss:$12 sps:$4 sm:$0xff]  }
0x1155   :  { %v4889_v62 = vadd.f32 1.0, %v9340_v27  ;;  %v8910_v27 = vld [vmem:[#allocation6 + $0x4b4] ss:$12 sps:$4 sm:$0xff]  }
0x1156   :  { %9343 = vrcp.f32 %v4876_v55  ;;  %v8907_v55 = vld [vmem:[#allocation6 + $0x4d0] ss:$12 sps:$4 sm:$0xff]  }
0x115b   :  { %v4854_v24 = vpop.f32.mrf.mxu0 }
0x115c   :  { %v11730_v24 = vpack.c.bf16 %v11596_v14, %v11518_v9  ;;  %v8915_v9 = vld [vmem:[#allocation6 + $0x49c] ss:$12 sps:$4 sm:$0xff]   ;;  %v8916_v14 = vld [vmem:[#allocation6 + $0x560] ss:$12 sps:$4 sm:$0xff]  }
0x115d   :  { %v9342_v54 = vpop.eup %9341  ;;  %v4855_v30 = vpop.f32.mrf.mxu0 }
0x115e   :  { %v4897_v31 = vmul.f32 %v9342_v54, %v4895_v20  ;;  %v8911_v20 = vld [vmem:[#allocation6 + $0x578] ss:$12 sps:$4 sm:$0xff]   ;;  %v13180_v54 = vld [vmem:[#allocation62_spill] sm:$0xff] }
0x115f   :  { %v4856_v17 = vpop.f32.mrf.mxu0  ;;  %v13181_v30 = vld [vmem:[#allocation74_spill] sm:$0xff] }
0x1160   :  { %v4899_v3 = vadd.f32 %v4897_v31, %v13171_v19  ;;  %v4882_v23 = vadd.f32 %v4856_v17, %v13172_v59  ;;  %v11736_v31 = vpack.c.bf16 %v13181_v30, %v13180_v54  ;;  %v8912_v17 = vld [vmem:[#allocation6 + $0x4b8] ss:$12 sps:$4 sm:$0xff]   ;;  %v11849_v54 = vld [vmem:[#allocation8 + $0x3c8] ss:$24 sps:$4 sm:$0xff]  }
0x1161   :  { %v4858_v2 = vpop.f32.mrf.mxu0  ;;  %v8913_v19 = vld [vmem:[#allocation6 + $0x498] ss:$12 sps:$4 sm:$0xff]   ;;  %13186 = vst [vmem:[#allocation55_spill] sm:$0xff] %v11849_v54  ;;  %v11853_v30 = vld [vmem:[#allocation8 + $0x3d0] ss:$24 sps:$4 sm:$0xff]  }
0x1162   :  { %9345 = vtanh.f32 %v4899_v3  ;;  %v8115_v53 = vmul.f32 -1.442695, %v4882_v23  ;;  %v4896_v13 = vadd.f32 %v11591_v35, %v4858_v2  ;;  %v8917_v3 = vld [vmem:[#allocation6 + $0x4a0] ss:$12 sps:$4 sm:$0xff]   ;;  %v8920_v23 = vld [vmem:[#allocation6 + $0x484] ss:$12 sps:$4 sm:$0xff]  }
0x1163   :  { %v9344_v33 = vpop.eup %9343  ;;  %9347 = vrcp.f32 %v4889_v62  ;;  %v8908_v62 = vld [vmem:[#allocation6 + $0x4b0] ss:$12 sps:$4 sm:$0xff]   ;;  %v8921_v2 = vld [vmem:[#allocation6 + $0x548] ss:$12 sps:$4 sm:$0xff]  }
0x1164   :  { %9349 = vpow2.f32 %v8115_v53  ;;  %v4898_v32 = vmul.f32 %v9344_v33, %v4896_v13  ;;  %v8918_v53 = vld [vmem:[#allocation6 + $0x480] ss:$12 sps:$4 sm:$0xff]   ;;  %v8922_v13 = vld [vmem:[#allocation6 + $0x488] ss:$12 sps:$4 sm:$0xff]  }
0x1165   :  { %v8925_v33 = vld [vmem:[#allocation6 + $0x5ec] ss:$12 sps:$4 sm:$0xff]  }
0x1166   :  { %v4900_v18 = vadd.f32 %v4898_v32, %v13173_v16  ;;  %v11748_v32 = vld [vmem:[#allocation8 + $0x454] ss:$24 sps:$4 sm:$0xff]   ;;  %v11750_v16 = vld [vmem:[#allocation8 + $0x450] ss:$24 sps:$4 sm:$0xff]  }
0x1167   :  { %13182 = vst [vmem:[#allocation54_spill] sm:$0xff] %v11748_v32 }
0x1168   :  { %9351 = vtanh.f32 %v4900_v18  ;;  %v8931_v18 = vld [vmem:[#allocation6 + $0x5d4] ss:$12 sps:$4 sm:$0xff]  }
0x116f   :  { %v9346_v41 = vpop.eup %9345 }
0x1170   :  { %v9348_v38 = vpop.eup %9347  ;;  %v4903_v57 = vsub.f32 %v11663_v25, %v9346_v41 }
0x1171   :  { %v9350_v51 = vpop.eup %9349 }
0x1172   :  { %v4890_v44 = vadd.f32 1.0, %v9350_v51  ;;  %v4905_v49 = vmul.f32 %v9348_v38, %v4903_v57  ;;  %v8929_v38 = vld [vmem:[#allocation6 + $0x5d0] ss:$12 sps:$4 sm:$0xff]   ;;  %v11757_v57 = vld [vmem:[#allocation8 + $0x420] ss:$24 sps:$4 sm:$0xff]  }
0x1173   :  { %v8937_v51 = vld [vmem:[#allocation6 + $0x5bc] ss:$12 sps:$4 sm:$0xff]  }
0x1174   :  { %9353 = vrcp.f32 %v4890_v44  ;;  %v11696_v40 = vadd.f32 %v9346_v41, %v4905_v49  ;;  %v11753_v41 = vld [vmem:[#allocation8 + $0x424] ss:$24 sps:$4 sm:$0xff]   ;;  %v11760_v44 = vld [vmem:[#allocation8 + $0x3f4] ss:$24 sps:$4 sm:$0xff]  }
0x1175   :  { %v9352_v63 = vpop.eup %9351  ;;  %v8935_v49 = vld [vmem:[#allocation6 + $0x5b8] ss:$12 sps:$4 sm:$0xff]  }
0x1176   :  { %v4904_v35 = vsub.f32 %v11666_v10, %v9352_v63  ;;  %v11742_v59 = vpack.c.bf16 %v11696_v40, %v11663_v25  ;;  %v8923_v25 = vld [vmem:[#allocation6 + $0x5e8] ss:$12 sps:$4 sm:$0xff]  }
0x1177   :  { %v11764_v40 = vld [vmem:[#allocation8 + $0x3f0] ss:$24 sps:$4 sm:$0xff]  }
0x1181   :  { %v9354_v22 = vpop.eup %9353 }
0x1182   :  { %v4906_v46 = vmul.f32 %v9354_v22, %v4904_v35  ;;  %v11767_v35 = vld [vmem:[#allocation8 + $0x3c4] ss:$24 sps:$4 sm:$0xff]   ;;  %v8941_v22 = vld [vmem:[#allocation6 + $0x5a0] ss:$12 sps:$4 sm:$0xff]  }
0x1184   :  { %v4908_v36 = vadd.f32 %v9352_v63, %v4906_v46  ;;  %v8943_v63 = vld [vmem:[#allocation6 + $0x5a4] ss:$12 sps:$4 sm:$0xff]   ;;  %v11771_v46 = vld [vmem:[#allocation8 + $0x3c0] ss:$24 sps:$4 sm:$0xff]  }
0x1186   :  { %v11700_v4 = vpack.c.bf16 %v11666_v10, %v4908_v36  ;;  %v11712_v10 = vpack.c.bf16 %v11521_v1, %v11599_v6  ;;  %v13176_v1 = vld [vmem:[#allocation43_spill] sm:$0xff]  ;;  %v13177_v6 = vld [vmem:[#allocation24_spill] sm:$0xff] }
0x1187   :  { %v11718_v50 = vpack.c.bf16 %v13177_v6, %v13176_v1  ;;  %v8949_v36 = vld [vmem:[#allocation6 + $0x58c] ss:$12 sps:$4 sm:$0xff]  }
0x1188   :  { %5371 = vmatprep.mubr.bf16.mxu1 %v11700_v4  ;;  %5444 = vmatprep.mubr.bf16.mxu0 %v11700_v4  ;;  %v8965_v1 = vld [vmem:[#allocation6 + $0x540] ss:$12 sps:$4 sm:$0xff]  }
0x1189   :  { %5372 = vmatmul.mubr.bf16.vlgmr.msra.gmra.mxu1 %v11704_v28  ;;  %5445 = vmatmul.mubr.bf16.vlgmr.msra.gmra.mxu0 %v11704_v28  ;;  %v11799_v6 = vld [vmem:[#allocation8 + $0x300] ss:$24 sps:$4 sm:$0xff]  }
0x118a   :  { %5776 = vmatpush1.bf16.msra.mxu0 %v8883_v48  ;;  %8446 = vmatpush3.bf16.msra.mxu1 %v8887_v43  ;;  %v8947_v48 = vld [vmem:[#allocation6 + $0x588] ss:$12 sps:$4 sm:$0xff]  }
0x118b   :  { %5381 = vmatprep.mubr.bf16.mxu1 %v11712_v10  ;;  %5452 = vmatprep.mubr.bf16.mxu0 %v11712_v10  ;;  %v11778_v43 = vld [vmem:[#allocation8 + $0x390] ss:$24 sps:$4 sm:$0xff]  }
0x118c   :  { %5777 = vmatprep.subr.bf16.mxu0 %v8890_v37  ;;  %8447 = vmatprep.subr.bf16.mxu1 %v8891_v8  ;;  %v8953_v37 = vld [vmem:[#allocation6 + $0x570] ss:$12 sps:$4 sm:$0xff]   ;;  %v11785_v8 = vld [vmem:[#allocation8 + $0x360] ss:$24 sps:$4 sm:$0xff]  }
0x118e   :  { %5778 = vmatpush1.bf16.msra.mxu0 %v8888_v11  ;;  %8448 = vmatpush3.bf16.msra.mxu1 %v8892_v26  ;;  %v8961_v11 = vld [vmem:[#allocation6 + $0x55c] ss:$12 sps:$4 sm:$0xff]   ;;  %v11788_v26 = vld [vmem:[#allocation8 + $0x334] ss:$24 sps:$4 sm:$0xff]  }
0x118f   :  { %5779 = vmatprep.subr.bf16.mxu0 %v8895_v39  ;;  %8449 = vmatprep.subr.bf16.mxu1 %v8896_v0  ;;  %v8959_v39 = vld [vmem:[#allocation6 + $0x558] ss:$12 sps:$4 sm:$0xff]   ;;  %v11792_v0 = vld [vmem:[#allocation8 + $0x330] ss:$24 sps:$4 sm:$0xff]  }
0x1191   :  { %5382 = vmatmul.mubr.bf16.gmra.mxu1 %v11718_v50  ;;  %5453 = vmatmul.mubr.bf16.gmra.mxu0 %v11718_v50 }
0x1192   :  { %5780 = vmatpush1.bf16.msra.mxu0 %v8893_v58  ;;  %8450 = vmatpush3.bf16.msra.mxu1 %v8897_v47  ;;  %v8967_v58 = vld [vmem:[#allocation6 + $0x544] ss:$12 sps:$4 sm:$0xff]  }
0x1193   :  { %5391 = vmatprep.mubr.bf16.mxu1 %v11724_v45  ;;  %5460 = vmatprep.mubr.bf16.mxu0 %v11724_v45  ;;  %v11795_v47 = vld [vmem:[#allocation8 + $0x304] ss:$24 sps:$4 sm:$0xff]  }
0x1194   :  { %5781 = vmatprep.subr.bf16.mxu0 %v8900_v21  ;;  %8451 = vmatprep.subr.bf16.mxu1 %v8901_v15  ;;  %v11802_v21 = vld [vmem:[#allocation8 + $0x45c] ss:$24 sps:$4 sm:$0xff]  }
0x1195   :  { %v11804_v15 = vld [vmem:[#allocation8 + $0x464] ss:$24 sps:$4 sm:$0xff]  }
0x1196   :  { %5782 = vmatpush1.bf16.msra.mxu0 %v8898_v52  ;;  %8452 = vmatpush3.bf16.msra.mxu1 %v8902_v5  ;;  %v11814_v52 = vld [vmem:[#allocation8 + $0x42c] ss:$24 sps:$4 sm:$0xff]  }
0x1197   :  { %5783 = vmatprep.subr.bf16.mxu0 %v8905_v7  ;;  %8453 = vmatprep.subr.bf16.mxu1 %v8906_v56  ;;  %v11816_v5 = vld [vmem:[#allocation8 + $0x434] ss:$24 sps:$4 sm:$0xff]   ;;  %v11822_v7 = vld [vmem:[#allocation8 + $0x428] ss:$24 sps:$4 sm:$0xff]  }
0x1198   :  { %v11826_v56 = vld [vmem:[#allocation8 + $0x430] ss:$24 sps:$4 sm:$0xff]  }
0x1199   :  { %5392 = vmatmul.mubr.bf16.gmra.mxu1 %v11730_v24  ;;  %5461 = vmatmul.mubr.bf16.gmra.mxu0 %v11730_v24 }
0x119a   :  { %5784 = vmatpush1.bf16.msra.mxu0 %v8903_v42  ;;  %8454 = vmatpush3.bf16.msra.mxu1 %v8907_v55  ;;  %v11828_v42 = vld [vmem:[#allocation8 + $0x3fc] ss:$24 sps:$4 sm:$0xff]  }
0x119b   :  { %5401 = vmatprep.mubr.bf16.mxu1 %v11736_v31  ;;  %5468 = vmatprep.mubr.bf16.mxu0 %v11736_v31  ;;  %13183 = vst [vmem:[#allocation26_spill] sm:$0xff] %v11828_v42  ;;  %v11831_v55 = vld [vmem:[#allocation8 + $0x404] ss:$24 sps:$4 sm:$0xff]  }
0x119c   :  { %5785 = vmatprep.subr.bf16.mxu0 %v8910_v27  ;;  %8455 = vmatprep.subr.bf16.mxu1 %v8911_v20  ;;  %v11841_v27 = vld [vmem:[#allocation8 + $0x3cc] ss:$24 sps:$4 sm:$0xff]  }
0x119d   :  { %13185 = vst [vmem:[#allocation28_spill] sm:$0xff] %v11841_v27  ;;  %v11844_v20 = vld [vmem:[#allocation8 + $0x3d4] ss:$24 sps:$4 sm:$0xff]  }
0x119e   :  { %5786 = vmatpush1.bf16.msra.mxu0 %v8908_v62  ;;  %8456 = vmatpush3.bf16.msra.mxu1 %v8912_v17  ;;  %v11855_v62 = vld [vmem:[#allocation8 + $0x39c] ss:$24 sps:$4 sm:$0xff]  }
0x119f   :  { %5787 = vmatprep.subr.bf16.mxu0 %v8915_v9  ;;  %8457 = vmatprep.subr.bf16.mxu1 %v8916_v14  ;;  %13187 = vst [vmem:[#allocation35_spill] sm:$0xff] %v11855_v62  ;;  %v11858_v17 = vld [vmem:[#allocation8 + $0x3a4] ss:$24 sps:$4 sm:$0xff]   ;;  %v11870_v14 = vld [vmem:[#allocation8 + $0x374] ss:$24 sps:$4 sm:$0xff]  }
0x11a0   :  { %v11867_v9 = vld [vmem:[#allocation8 + $0x36c] ss:$24 sps:$4 sm:$0xff]  }
0x11a1   :  { %5402 = vmatmul.mubr.bf16.gmra.mxu1 %v11742_v59  ;;  %5469 = vmatmul.mubr.bf16.gmra.mxu0 %v11742_v59  ;;  %13189 = vst [vmem:[#allocation32_spill] sm:$0xff] %v11867_v9 }
0x11a2   :  { %5788 = vmatpush1.bf16.msra.mxu0 %v8913_v19  ;;  %8458 = vmatpush3.bf16.msra.mxu1 %v8917_v3  ;;  %v11875_v19 = vld [vmem:[#allocation8 + $0x368] ss:$24 sps:$4 sm:$0xff]  }
0x11a3   :  { %5807 = vmatprep.mubr.bf16.mxu0 %v11700_v4  ;;  %5880 = vmatprep.mubr.bf16.mxu1 %v11700_v4  ;;  %v11774_v4 = vld [vmem:[#allocation8 + $0x394] ss:$24 sps:$4 sm:$0xff]   ;;  %13190 = vst [vmem:[#allocation72_spill] sm:$0xff] %v11875_v19  ;;  %v11879_v3 = vld [vmem:[#allocation8 + $0x370] ss:$24 sps:$4 sm:$0xff]  }
0x11a4   :  { %5789 = vmatprep.subr.bf16.mxu0 %v8920_v23  ;;  %8459 = vmatprep.subr.bf16.mxu1 %v8921_v2  ;;  %v11881_v23 = vld [vmem:[#allocation8 + $0x33c] ss:$24 sps:$4 sm:$0xff]  }
0x11a5   :  { %13191 = vst [vmem:[#allocation20_spill] sm:$0xff] %v11881_v23  ;;  %v11884_v2 = vld [vmem:[#allocation8 + $0x344] ss:$24 sps:$4 sm:$0xff]  }
0x11a6   :  { %5790 = vmatpush1.bf16.msra.mxu0 %v8918_v53  ;;  %8460 = vmatpush3.bf16.msra.mxu1 %v8922_v13  ;;  %v11893_v53 = vld [vmem:[#allocation8 + $0x30c] ss:$24 sps:$4 sm:$0xff]  }
0x11a7   :  { %5791 = vmatprep.subr.bf16.mxu0 %v8925_v33  ;;  %6242 = vmatprep.subr.bf16.mxu1 %v11748_v32  ;;  %13193 = vst [vmem:[#allocation37_spill] sm:$0xff] %v11893_v53  ;;  %v11896_v13 = vld [vmem:[#allocation8 + $0x314] ss:$24 sps:$4 sm:$0xff]   ;;  %v11900_v33 = vld [vmem:[#allocation8 + $0x308] ss:$24 sps:$4 sm:$0xff]  }
0x11a8   :  { %13194 = vst [vmem:[#allocation25_spill] sm:$0xff] %v11900_v33 }
0x11a9   :  { %5881 = vmatmul.mubr.bf16.vlgmr.msra.gmra.mxu1 %v11704_v28 }
0x11aa   :  { %5792 = vmatpush2.bf16.msra.mxu0 %v8923_v25  ;;  %6243 = vmatpush1.bf16.msra.mxu1 %v11750_v16  ;;  %v11905_v25 = vld [vmem:[#allocation8 + $0x310] ss:$24 sps:$4 sm:$0xff]  }
0x11ab   :  { %5888 = vmatprep.mubr.bf16.mxu1 %v11712_v10  ;;  %5793 = vmatprep.subr.bf16.mxu0 %v8931_v18 }
0x11ac   :  { %6244 = vmatprep.subr.bf16.mxu1 %v11753_v41 }
0x11ae   :  { %5794 = vmatpush2.bf16.msra.mxu0 %v8929_v38  ;;  %6245 = vmatpush1.bf16.msra.mxu1 %v11757_v57 }
0x11af   :  { %5795 = vmatprep.subr.bf16.mxu0 %v8937_v51  ;;  %6246 = vmatprep.subr.bf16.mxu1 %v11760_v44 }
0x11b1   :  { %5889 = vmatmul.mubr.bf16.gmra.mxu1 %v11718_v50 }
0x11b2   :  { %5796 = vmatpush2.bf16.msra.mxu0 %v8935_v49  ;;  %6247 = vmatpush1.bf16.msra.mxu1 %v11764_v40 }
0x11b3   :  { %5896 = vmatprep.mubr.bf16.mxu1 %v11724_v45  ;;  %5797 = vmatprep.subr.bf16.mxu0 %v8943_v63  ;;  %v13195_v63 = vld [vmem:[#allocation14_spill] sm:$0xff] }
0x11b4   :  { %6248 = vmatprep.subr.bf16.mxu1 %v11767_v35 }
0x11b6   :  { %5798 = vmatpush2.bf16.msra.mxu0 %v8941_v22  ;;  %6249 = vmatpush1.bf16.msra.mxu1 %v11771_v46 }
0x11b7   :  { %5799 = vmatprep.subr.bf16.mxu0 %v8949_v36  ;;  %6250 = vmatprep.subr.bf16.mxu1 %v11774_v4 }
0x11b9   :  { %5897 = vmatmul.mubr.bf16.gmra.mxu1 %v11730_v24 }
0x11ba   :  { %5800 = vmatpush2.bf16.msra.mxu0 %v8947_v48  ;;  %6251 = vmatpush1.bf16.msra.mxu1 %v11778_v43 }
0x11bb   :  { %5904 = vmatprep.mubr.bf16.mxu1 %v11736_v31  ;;  %5801 = vmatprep.subr.bf16.mxu0 %v8955_v12 }
0x11bc   :  { %6252 = vmatprep.subr.bf16.mxu1 %v11781_v34 }
0x11be   :  { %5802 = vmatpush2.bf16.msra.mxu0 %v8953_v37  ;;  %6253 = vmatpush1.bf16.msra.mxu1 %v11785_v8  ;;  %v13196_v37 = vld [vmem:[#allocation17_spill] sm:$0xff] }
0x11bf   :  { %5803 = vmatprep.subr.bf16.mxu0 %v8961_v11  ;;  %6254 = vmatprep.subr.bf16.mxu1 %v11788_v26 }
0x11c1   :  { %5905 = vmatmul.mubr.bf16.gmra.mxu1 %v11742_v59 }
0x11c2   :  { %5804 = vmatpush2.bf16.msra.mxu0 %v8959_v39  ;;  %6255 = vmatpush1.bf16.msra.mxu1 %v11792_v0 }
0x11c3   :  { %5805 = vmatprep.subr.bf16.mxu0 %v8967_v58  ;;  %6256 = vmatprep.subr.bf16.mxu1 %v11795_v47 }
0x11c4   :  { %6274 = vmatprep.mubr.bf16.mxu1 %v12902_v61 }
0x11c6   :  { %5806 = vmatpush2.bf16.msra.mxu0 %v8965_v1  ;;  %6257 = vmatpush1.bf16.msra.mxu1 %v11799_v6 }
0x11c7   :  { %6283 = vmatprep.subr.bf16.mxu0 %v11802_v21  ;;  %6324 = vmatprep.subr.bf16.mxu1 %v11804_v15 }
0x11c9   :  { %5808 = vmatmul.mubr.bf16.vlgmr.msra.gmra.mxu0 %v11704_v28  ;;  %6275 = vmatmul.mubr.bf16.vlgmr.msra.gmra.mxu1 %v12902_v61  ;;  %v11835_v28 = vld [vmem:[#allocation8 + $0x3f8] ss:$24 sps:$4 sm:$0xff]  }
0x11ca   :  { %5817 = vmatprep.mubr.bf16.mxu0 %v11712_v10  ;;  %6284 = vmatpush1.bf16.msra.mxu0 %v11808_v60  ;;  %13184 = vst [vmem:[#allocation39_spill] sm:$0xff] %v11835_v28  ;;  %v11839_v10 = vld [vmem:[#allocation8 + $0x400] ss:$24 sps:$4 sm:$0xff]  }
0x11cb   :  { %6325 = vmatpush1.bf16.msra.mxu1 %v11812_v29  ;;  %6285 = vmatprep.subr.bf16.mxu0 %v11814_v52 }
0x11cc   :  { %6326 = vmatprep.subr.bf16.mxu1 %v11816_v5  ;;  %6356 = vmatprep.mubr.bf16.mxu1 %v12902_v61 }
0x11ce   :  { %6286 = vmatpush1.bf16.msra.mxu0 %v11822_v7 }
0x11cf   :  { %6327 = vmatpush1.bf16.msra.mxu1 %v11826_v56  ;;  %6287 = vmatprep.subr.bf16.mxu0 %v11828_v42 }
0x11d0   :  { %6328 = vmatprep.subr.bf16.mxu1 %v11831_v55 }
0x11d1   :  { %5818 = vmatmul.mubr.bf16.gmra.mxu0 %v11718_v50  ;;  %v11861_v50 = vld [vmem:[#allocation8 + $0x398] ss:$24 sps:$4 sm:$0xff]  }
0x11d2   :  { %5827 = vmatprep.mubr.bf16.mxu0 %v11724_v45  ;;  %6288 = vmatpush1.bf16.msra.mxu0 %v11835_v28  ;;  %13188 = vst [vmem:[#allocation56_spill] sm:$0xff] %v11861_v50  ;;  %v11865_v45 = vld [vmem:[#allocation8 + $0x3a0] ss:$24 sps:$4 sm:$0xff]  }
0x11d3   :  { %6329 = vmatpush1.bf16.msra.mxu1 %v11839_v10  ;;  %6289 = vmatprep.subr.bf16.mxu0 %v11841_v27 }
0x11d4   :  { %6330 = vmatprep.subr.bf16.mxu1 %v11844_v20 }
0x11d6   :  { %6290 = vmatpush1.bf16.msra.mxu0 %v11849_v54 }
0x11d7   :  { %6331 = vmatpush1.bf16.msra.mxu1 %v11853_v30  ;;  %6291 = vmatprep.subr.bf16.mxu0 %v11855_v62 }
0x11d8   :  { %6332 = vmatprep.subr.bf16.mxu1 %v11858_v17 }
0x11d9   :  { %5828 = vmatmul.mubr.bf16.gmra.mxu0 %v11730_v24  ;;  %v11887_v24 = vld [vmem:[#allocation8 + $0x338] ss:$24 sps:$4 sm:$0xff]  }
0x11da   :  { %5837 = vmatprep.mubr.bf16.mxu0 %v11736_v31  ;;  %6292 = vmatpush1.bf16.msra.mxu0 %v11861_v50  ;;  %13192 = vst [vmem:[#allocation38_spill] sm:$0xff] %v11887_v24  ;;  %v11891_v31 = vld [vmem:[#allocation8 + $0x340] ss:$24 sps:$4 sm:$0xff]  }
0x11db   :  { %6333 = vmatpush1.bf16.msra.mxu1 %v11865_v45  ;;  %6293 = vmatprep.subr.bf16.mxu0 %v11867_v9 }
0x11dc   :  { %6334 = vmatprep.subr.bf16.mxu1 %v11870_v14 }
0x11de   :  { %6294 = vmatpush1.bf16.msra.mxu0 %v11875_v19 }
0x11df   :  { %6335 = vmatpush1.bf16.msra.mxu1 %v11879_v3  ;;  %6295 = vmatprep.subr.bf16.mxu0 %v11881_v23 }
0x11e0   :  { %6336 = vmatprep.subr.bf16.mxu1 %v11884_v2 }
0x11e1   :  { %5838 = vmatmul.mubr.bf16.gmra.mxu0 %v11742_v59  ;;  %v8116_v59 = vld [vmem:[%s12696_s4 + $0xc] sm:$0x7] }
0x11e2   :  { %6296 = vmatpush1.bf16.msra.mxu0 %v11887_v24  ;;  %6315 = vmatprep.mubr.bf16.mxu0 %v12902_v61  ;;  %v11956_v22 = vrot.slane %v8116_v59, %v13195_v63  ;;  %v11961_v11 = vrot.slane %v8116_v59, %v13196_v37 }
0x11e3   :  { %6337 = vmatpush1.bf16.msra.mxu1 %v11891_v31  ;;  %6297 = vmatprep.subr.bf16.mxu0 %v11893_v53 }
0x11e4   :  { %6338 = vmatprep.subr.bf16.mxu1 %v11896_v13 }
0x11e6   :  { %6298 = vmatpush1.bf16.msra.mxu0 %v11900_v33 }
0x11e7   :  { %6339 = vmatpush1.bf16.msra.mxu1 %v11905_v25  ;;  %6416 = vmatprep.subr.bf16.mxu0 %v11748_v32 }
0x11e8   :  { %6457 = vmatprep.subr.bf16.mxu1 %v11802_v21 }
0x11e9   :  { %6316 = vmatmul.mubr.bf16.vlgmr.msra.gmra.mxu0 %v12902_v61 }
0x11ea   :  { %6357 = vmatmul.mubr.bf16.vlgmr.msra.gmra.mxu1 %v12902_v61  ;;  %6417 = vmatpush1.bf16.msra.mxu0 %v11750_v16 }
0x11eb   :  { %6458 = vmatpush1.bf16.msra.mxu1 %v11808_v60  ;;  %6418 = vmatprep.subr.bf16.mxu0 %v11753_v41 }
0x11ec   :  { %6459 = vmatprep.subr.bf16.mxu1 %v11814_v52  ;;  %6448 = vmatprep.mubr.bf16.mxu0 %v12902_v61 }
0x11ed   :  { %6489 = vmatprep.mubr.bf16.mxu1 %v12902_v61 }
0x11ee   :  { %6419 = vmatpush1.bf16.msra.mxu0 %v11757_v57 }
0x11ef   :  { %6460 = vmatpush1.bf16.msra.mxu1 %v11822_v7  ;;  %6420 = vmatprep.subr.bf16.mxu0 %v11760_v44 }
0x11f0   :  { %6461 = vmatprep.subr.bf16.mxu1 %v11828_v42 }
0x11f2   :  { %6421 = vmatpush1.bf16.msra.mxu0 %v11764_v40 }
0x11f3   :  { %6462 = vmatpush1.bf16.msra.mxu1 %v11835_v28  ;;  %6422 = vmatprep.subr.bf16.mxu0 %v11767_v35 }
0x11f4   :  { %6463 = vmatprep.subr.bf16.mxu1 %v11841_v27 }
0x11f6   :  { %6423 = vmatpush1.bf16.msra.mxu0 %v11771_v46 }
0x11f7   :  { %6464 = vmatpush1.bf16.msra.mxu1 %v11849_v54  ;;  %6424 = vmatprep.subr.bf16.mxu0 %v11774_v4 }
0x11f8   :  { %6465 = vmatprep.subr.bf16.mxu1 %v11855_v62 }
0x11fa   :  { %6425 = vmatpush1.bf16.msra.mxu0 %v11778_v43 }
0x11fb   :  { %6466 = vmatpush1.bf16.msra.mxu1 %v11861_v50  ;;  %6426 = vmatprep.subr.bf16.mxu0 %v11781_v34 }
0x11fc   :  { %6467 = vmatprep.subr.bf16.mxu1 %v11867_v9 }
0x11fe   :  { %6427 = vmatpush1.bf16.msra.mxu0 %v11785_v8 }
0x11ff   :  { %6468 = vmatpush1.bf16.msra.mxu1 %v11875_v19  ;;  %6428 = vmatprep.subr.bf16.mxu0 %v11788_v26 }
0x1200   :  { %6469 = vmatprep.subr.bf16.mxu1 %v11881_v23 }
0x1202   :  { %6429 = vmatpush1.bf16.msra.mxu0 %v11792_v0 }
0x1203   :  { %6470 = vmatpush1.bf16.msra.mxu1 %v11887_v24  ;;  %6430 = vmatprep.subr.bf16.mxu0 %v11795_v47 }
0x1204   :  { %6471 = vmatprep.subr.bf16.mxu1 %v11893_v53 }
0x1206   :  { %6431 = vmatpush1.bf16.msra.mxu0 %v11799_v6 }
0x1207   :  { %6472 = vmatpush1.bf16.msra.mxu1 %v11900_v33  ;;  %6498 = vmatprep.subr.bf16.mxu0 %v11804_v15 }
0x1208   :  { %6590 = vmatprep.subr.bf16.mxu1 %v11748_v32  ;;  %v13198_v32 = vld [vmem:[#allocation12_spill] sm:$0xff] }
0x1209   :  { %v11967_v33 = vrot.slane %v8116_v59, %v13198_v32 }
0x1249   :  { %v11951_v18 = vpop.f32.mrf.mxu1  ;;  %v8421_v38 = vpop.f32.mrf.mxu0 }
0x124b   :  { %v11953_v51 = vpop.f32.mrf.mxu1  ;;  %v8422_v49 = vpop.f32.mrf.mxu0 }
0x124c   :  { %v11958_v36 = vadd.f32 %v8422_v49, %v8421_v38 }
0x124d   :  { %v5377_v48 = vpop.f32.mrf.mxu1  ;;  %v8424_v12 = vpop.f32.mrf.mxu0 }
0x124e   :  { %v11964_v39 = vadd.f32 %v5377_v48, %v11956_v22 }
0x124f   :  { %v5379_v58 = vpop.f32.mrf.mxu1  ;;  %v8425_v1 = vpop.f32.mrf.mxu0 }
0x1250   :  { %13197 = vst [vmem:[#allocation16_spill] sm:$0xff] %v11964_v39  ;;  %v11970_v53 = vadd.f32 %v5379_v58, %v11961_v11  ;;  %v8426_v24 = vadd.f32 %v8425_v1, %v8424_v12 }
0x1251   :  { %v5383_v23 = vpop.f32.mrf.mxu1  ;;  %v8427_v38 = vpop.f32.mrf.mxu0 }
0x1252   :  { %13199 = vst [vmem:[#allocation51_spill] sm:$0xff] %v11970_v53  ;;  %v11973_v49 = vadd.f32 %v8426_v24, %v11967_v33  ;;  %v11976_v19 = vadd.f32 %v5383_v23, %v11956_v22 }
0x1253   :  { %v5385_v9 = vpop.f32.mrf.mxu1  ;;  %v8428_v48 = vpop.f32.mrf.mxu0 }
0x1254   :  { %13200 = vst [vmem:[#allocation50_spill] sm:$0xff] %v11973_v49  ;;  %13201 = vst [vmem:[#allocation49_spill] sm:$0xff] %v11976_v19  ;;  %v11979_v39 = vadd.f32 %v5385_v9, %v11961_v11  ;;  %v8429_v50 = vadd.f32 %v8428_v48, %v8427_v38 }
0x1255   :  { %v5387_v59 = vpop.f32.mrf.mxu1  ;;  %v8430_v62 = vpop.f32.mrf.mxu0 }
0x1256   :  { %13202 = vst [vmem:[#allocation63_spill] sm:$0xff] %v11979_v39  ;;  %v11982_v58 = vadd.f32 %v8429_v50, %v11967_v33  ;;  %v11985_v12 = vadd.f32 %v5387_v59, %v11956_v22 }
0x1257   :  { %v5389_v1 = vpop.f32.mrf.mxu1  ;;  %v8431_v24 = vpop.f32.mrf.mxu0 }
0x1258   :  { %13203 = vst [vmem:[#allocation44_spill] sm:$0xff] %v11982_v58  ;;  %13204 = vst [vmem:[#allocation64_spill] sm:$0xff] %v11985_v12  ;;  %v11988_v49 = vadd.f32 %v5389_v1, %v11961_v11  ;;  %v8432_v23 = vadd.f32 %v8431_v24, %v8430_v62 }
0x1259   :  { %v5393_v19 = vpop.f32.mrf.mxu1  ;;  %v8433_v53 = vpop.f32.mrf.mxu0 }
0x125a   :  { %13205 = vst [vmem:[#allocation18_spill] sm:$0xff] %v11988_v49  ;;  %v11991_v9 = vadd.f32 %v8432_v23, %v11967_v33  ;;  %v11994_v38 = vadd.f32 %v5393_v19, %v11956_v22 }
0x125b   :  { %v5395_v48 = vpop.f32.mrf.mxu1  ;;  %v8434_v50 = vpop.f32.mrf.mxu0 }
0x125c   :  { %13206 = vst [vmem:[#allocation65_spill] sm:$0xff] %v11991_v9  ;;  %13207 = vst [vmem:[#allocation33_spill] sm:$0xff] %v11994_v38  ;;  %v11997_v58 = vadd.f32 %v5395_v48, %v11961_v11  ;;  %v8435_v59 = vadd.f32 %v8434_v50, %v8433_v53 }
0x125d   :  { %v5397_v12 = vpop.f32.mrf.mxu1  ;;  %v8436_v39 = vpop.f32.mrf.mxu0 }
0x125e   :  { %13208 = vst [vmem:[#allocation47_spill] sm:$0xff] %v11997_v58  ;;  %v12000_v1 = vadd.f32 %v8435_v59, %v11967_v33  ;;  %v12003_v62 = vadd.f32 %v5397_v12, %v11956_v22 }
0x125f   :  { %v5399_v24 = vpop.f32.mrf.mxu1  ;;  %v8437_v23 = vpop.f32.mrf.mxu0 }
0x1260   :  { %13209 = vst [vmem:[#allocation22_spill] sm:$0xff] %v12000_v1  ;;  %13210 = vst [vmem:[#allocation66_spill] sm:$0xff] %v12003_v62  ;;  %v12006_v9 = vadd.f32 %v5399_v24, %v11961_v11  ;;  %v8438_v19 = vadd.f32 %v8437_v23, %v8436_v39 }
0x1261   :  { %v5403_v38 = vpop.f32.mrf.mxu1  ;;  %v8439_v49 = vpop.f32.mrf.mxu0 }
0x1262   :  { %13211 = vst [vmem:[#allocation42_spill] sm:$0xff] %v12006_v9  ;;  %v12009_v48 = vadd.f32 %v8438_v19, %v11967_v33  ;;  %v12012_v53 = vadd.f32 %v5403_v38, %v11956_v22 }
0x1263   :  { %v5405_v50 = vpop.f32.mrf.mxu1  ;;  %v8440_v59 = vpop.f32.mrf.mxu0 }
0x1264   :  { %13212 = vst [vmem:[#allocation53_spill] sm:$0xff] %v12009_v48  ;;  %13213 = vst [vmem:[#allocation67_spill] sm:$0xff] %v12012_v53  ;;  %v12015_v1 = vadd.f32 %v5405_v50, %v11961_v11  ;;  %v8441_v12 = vadd.f32 %v8440_v59, %v8439_v49  ;;  %v8165_v49 = vld [vmem:[%s12696_s4 + $0xf] sm:$0x7] }
0x1265   :  { %v5407_v62 = vpop.f32.mrf.mxu1  ;;  %v8442_v58 = vpop.f32.mrf.mxu0 }
0x1266   :  { %13214 = vst [vmem:[#allocation68_spill] sm:$0xff] %v12015_v1  ;;  %v12018_v24 = vadd.f32 %v8441_v12, %v11967_v33  ;;  %v12021_v39 = vadd.f32 %v5407_v62, %v11956_v22  ;;  %v12033_v12 = vrot.slane %v8165_v49, %v13198_v32 }
0x1267   :  { %v5409_v23 = vpop.f32.mrf.mxu1  ;;  %v8443_v19 = vpop.f32.mrf.mxu0 }
0x1268   :  { %13215 = vst [vmem:[#allocation23_spill] sm:$0xff] %v12018_v24  ;;  %13216 = vst [vmem:[#allocation19_spill] sm:$0xff] %v12021_v39  ;;  %v12024_v48 = vadd.f32 %v5409_v23, %v11961_v11  ;;  %v8444_v38 = vadd.f32 %v8443_v19, %v8442_v58 }
0x1269   :  { %v8461_v53 = vpop.f32.mrf.mxu1 }
0x126a   :  { %13217 = vst [vmem:[#allocation58_spill] sm:$0xff] %v12024_v48  ;;  %v12027_v9 = vadd.f32 %v8444_v38, %v11967_v33 }
0x126b   :  { %v8462_v50 = vpop.f32.mrf.mxu1 }
0x126c   :  { %13218 = vst [vmem:[#allocation41_spill] sm:$0xff] %v12027_v9 }
0x126d   :  { %v8464_v59 = vpop.f32.mrf.mxu1 }
0x126f   :  { %v8465_v62 = vpop.f32.mrf.mxu1 }
0x1270   :  { %v8466_v39 = vadd.f32 %v8465_v62, %v8464_v59 }
0x1271   :  { %v8467_v24 = vpop.f32.mrf.mxu1 }
0x1272   :  { %v12036_v23 = vadd.f32 %v8466_v39, %v12033_v12 }
0x1273   :  { %v8468_v58 = vpop.f32.mrf.mxu1 }
0x1274   :  { %13219 = vst [vmem:[#allocation73_spill] sm:$0xff] %v12036_v23  ;;  %v8469_v53 = vadd.f32 %v8468_v58, %v8467_v24 }
0x1275   :  { %v8470_v19 = vpop.f32.mrf.mxu1 }
0x1276   :  { %v12039_v38 = vadd.f32 %v8469_v53, %v12033_v12 }
0x1277   :  { %v8471_v50 = vpop.f32.mrf.mxu1 }
0x1278   :  { %13220 = vst [vmem:[#allocation30_spill] sm:$0xff] %v12039_v38  ;;  %v8472_v9 = vadd.f32 %v8471_v50, %v8470_v19 }
0x1279   :  { %v8473_v48 = vpop.f32.mrf.mxu1 }
0x127a   :  { %v12042_v1 = vadd.f32 %v8472_v9, %v12033_v12 }
0x127b   :  { %v8474_v32 = vpop.f32.mrf.mxu1 }
0x127c   :  { %13221 = vst [vmem:[#allocation59_spill] sm:$0xff] %v12042_v1  ;;  %v8475_v54 = vadd.f32 %v8474_v32, %v8473_v48  ;;  %v5374_v48 = vadd.f32 %v11951_v18, %v11956_v22 }
0x127d   :  { %v8476_v27 = vpop.f32.mrf.mxu1 }
0x127e   :  { %v12045_v59 = vadd.f32 %v8475_v54, %v12033_v12 }
0x127f   :  { %v8477_v39 = vpop.f32.mrf.mxu1 }
0x1280   :  { %13222 = vst [vmem:[#allocation27_spill] sm:$0xff] %v12045_v59  ;;  %v8478_v62 = vadd.f32 %v8477_v39, %v8476_v27  ;;  %v5507_v27 = vrot.slane %v8165_v49, %v13195_v63  ;;  %v5376_v63 = vadd.f32 %v11953_v51, %v11961_v11 }
0x1281   :  { %v8479_v23 = vpop.f32.mrf.mxu1 }
0x1282   :  { %v12048_v24 = vadd.f32 %v8478_v62, %v12033_v12 }
0x1283   :  { %v8480_v58 = vpop.f32.mrf.mxu1 }
0x1284   :  { %13223 = vst [vmem:[#allocation46_spill] sm:$0xff] %v12048_v24  ;;  %v8481_v53 = vadd.f32 %v8480_v58, %v8479_v23  ;;  %v5511_v23 = vrot.slane %v8165_v49, %v13196_v37 }
0x1285   :  { %v8482_v38 = vpop.f32.mrf.mxu1 }
0x1286   :  { %v12051_v19 = vadd.f32 %v8481_v53, %v12033_v12 }
0x1287   :  { %v8483_v9 = vpop.f32.mrf.mxu1 }
0x1288   :  { %13224 = vst [vmem:[#allocation69_spill] sm:$0xff] %v12051_v19  ;;  %v12055_v50 = vadd.f32 %v8483_v9, %v8482_v38 }
0x1289   :  { %v5809_v54 = vpop.f32.mrf.mxu0  ;;  %v6276_v32 = vpop.f32.mrf.mxu1 }
0x128a   :  { %v6371_v1 = vadd.f32 %v6276_v32, %v5374_v48 }
0x128b   :  { %v5811_v39 = vpop.f32.mrf.mxu0  ;;  %v6278_v62 = vpop.f32.mrf.mxu1 }
0x128c   :  { %v8266_v59 = vmul.f32 -1.442695, %v6371_v1  ;;  %v6385_v1 = vadd.f32 %v6278_v62, %v5376_v63 }
0x128d   :  { %v5813_v58 = vpop.f32.mrf.mxu0  ;;  %v6280_v24 = vpop.f32.mrf.mxu1 }
0x128e   :  { %9355 = vpow2.f32 %v8266_v59  ;;  %v12059_v53 = vadd.f32 %v5813_v58, %v5507_v27  ;;  %v8268_v54 = vmul.f32 -1.442695, %v6385_v1 }
0x128f   :  { %v5815_v19 = vpop.f32.mrf.mxu0  ;;  %v6281_v28 = vpop.f32.mrf.mxu1 }
0x1290   :  { %13225 = vst [vmem:[#allocation48_spill] sm:$0xff] %v12059_v53  ;;  %v12061_v18 = vadd.f32 %v5815_v19, %v5511_v23  ;;  %9357 = vpow2.f32 %v8268_v54 }
0x1291   :  { %v5819_v22 = vpop.f32.mrf.mxu0 }
0x1292   :  { %13226 = vst [vmem:[#allocation70_spill] sm:$0xff] %v12061_v18  ;;  %v12063_v38 = vadd.f32 %v5819_v22, %v5507_v27 }
0x1293   :  { %v5821_v9 = vpop.f32.mrf.mxu0 }
0x1294   :  { %13227 = vst [vmem:[#allocation40_spill] sm:$0xff] %v12063_v38  ;;  %v12067_v48 = vadd.f32 %v5821_v9, %v5511_v23 }
0x1295   :  { %v5823_v37 = vpop.f32.mrf.mxu0 }
0x1296   :  { %13228 = vst [vmem:[#allocation52_spill] sm:$0xff] %v12067_v48  ;;  %v12069_v49 = vadd.f32 %v5823_v37, %v5507_v27 }
0x1297   :  { %v5825_v59 = vpop.f32.mrf.mxu0 }
0x1298   :  { %13229 = vst [vmem:[#allocation71_spill] sm:$0xff] %v12069_v49  ;;  %v12071_v24 = vadd.f32 %v5825_v59, %v5511_v23 }
0x1299   :  { %v5829_v28 = vpop.f32.mrf.mxu0 }
0x129a   :  { %13230 = vst [vmem:[#allocation13_spill] sm:$0xff] %v12071_v24  ;;  %v12073_v19 = vadd.f32 %v5829_v28, %v5507_v27 }
0x129b   :  { %v9356_v32 = vpop.eup %9355  ;;  %v5831_v39 = vpop.f32.mrf.mxu0 }
0x129c   :  { %13231 = vst [vmem:[#allocation34_spill] sm:$0xff] %v12073_v19  ;;  %v6379_v58 = vadd.f32 1.0, %v9356_v32  ;;  %v12075_v22 = vadd.f32 %v5831_v39, %v5511_v23  ;;  %v12088_v32 = vld [vmem:[%s12697_s5 + $0x4] ss:$0 sm:$0xff] }
0x129d   :  { %v5833_v51 = vpop.f32.mrf.mxu0  ;;  %13237 = vst [vmem:[#allocation57_spill] sm:$0xff] %v12088_v32  ;;  %v9358_v39 = vpop.eup %9357 }
0x129e   :  { %13232 = vst [vmem:[#allocation29_spill] sm:$0xff] %v12075_v22  ;;  %9359 = vrcp.f32 %v6379_v58  ;;  %v12077_v11 = vadd.f32 %v5833_v51, %v5507_v27  ;;  %v6393_v24 = vadd.f32 1.0, %v9358_v39  ;;  %v13241_v39 = vld [vmem:[#allocation28_spill] sm:$0xff] }
0x129f   :  { %v5835_v62 = vpop.f32.mrf.mxu0 }
0x12a0   :  { %13233 = vst [vmem:[#allocation31_spill] sm:$0xff] %v12077_v11  ;;  %v12079_v63 = vadd.f32 %v5835_v62, %v5511_v23 }
0x12a1   :  { %v5839_v9 = vpop.f32.mrf.mxu0 }
0x12a2   :  { %13234 = vst [vmem:[#allocation21_spill] sm:$0xff] %v12079_v63  ;;  %v12081_v37 = vadd.f32 %v5839_v9, %v5507_v27  ;;  %v5447_v9 = vadd.f32 %v11958_v36, %v11967_v33 }
0x12a3   :  { %v5841_v1 = vpop.f32.mrf.mxu0 }
0x12a4   :  { %13235 = vst [vmem:[#allocation15_spill] sm:$0xff] %v12081_v37  ;;  %v12083_v59 = vadd.f32 %v5841_v1, %v5511_v23 }
0x12a5   :  { %v5843_v28 = vpop.f32.mrf.mxu0 }
0x12a6   :  { %13236 = vst [vmem:[#allocation36_spill] sm:$0xff] %v12083_v59  ;;  %v5844_v49 = vadd.f32 %v5843_v28, %v5507_v27  ;;  %v12098_v27 = vld [vmem:[%s12697_s5 + $0x5] ss:$0 sm:$0xff] }
0x12a7   :  { %v5845_v18 = vpop.f32.mrf.mxu0 }
0x12a9   :  { %v6317_v54 = vpop.f32.mrf.mxu0 }
0x12aa   :  { %v6399_v58 = vadd.f32 %v12088_v32, %v6317_v54  ;;  %v6358_v51 = vpop.f32.mrf.mxu1  ;;  %v5846_v54 = vadd.f32 %v5845_v18, %v5511_v23 }
0x12ab   :  { %v9360_v62 = vpop.eup %9359  ;;  %v6319_v53 = vpop.f32.mrf.mxu0 }
0x12ac   :  { %v6401_v48 = vmul.f32 %v9360_v62, %v6399_v58  ;;  %v6359_v1 = vpop.f32.mrf.mxu1  ;;  %v13242_v62 = vld [vmem:[#allocation55_spill] sm:$0xff] }
0x12ad   :  { %v6320_v38 = vpop.f32.mrf.mxu0  ;;  %v13244_v1 = vld [vmem:[#allocation56_spill] sm:$0xff] }
0x12ae   :  { %v6403_v22 = vadd.f32 %v6401_v48, %v5447_v9  ;;  %v6360_v59 = vpop.f32.mrf.mxu1  ;;  %v13243_v9 = vld [vmem:[#allocation35_spill] sm:$0xff] }
0x12af   :  { %v6321_v19 = vpop.f32.mrf.mxu0  ;;  %v6386_v51 = vadd.f32 %v6360_v59, %v5846_v54  ;;  %v13245_v54 = vld [vmem:[#allocation32_spill] sm:$0xff] }
0x12b0   :  { %9361 = vtanh.f32 %v6403_v22  ;;  %v6372_v63 = vadd.f32 %v6321_v19, %v5844_v49  ;;  %v6362_v48 = vpop.f32.mrf.mxu1 }
0x12b1   :  { %9363 = vrcp.f32 %v6393_v24  ;;  %v8269_v42 = vmul.f32 -1.442695, %v6386_v51  ;;  %v6400_v23 = vadd.f32 %v12098_v27, %v6362_v48  ;;  %v5910_v24 = vadd.f32 %v12055_v50, %v12033_v12  ;;  %v13239_v12 = vld [vmem:[#allocation26_spill] sm:$0xff]  ;;  %v13240_v50 = vld [vmem:[#allocation39_spill] sm:$0xff]  ;;  %v13246_v51 = vld [vmem:[#allocation72_spill] sm:$0xff] }
0x12b2   :  { %v8267_v11 = vmul.f32 -1.442695, %v6372_v63  ;;  %v13251_v48 = vld [vmem:[#allocation54_spill] sm:$0xff] }
0x12b4   :  { %9365 = vpow2.f32 %v8267_v11 }
0x12b5   :  { %9367 = vpow2.f32 %v8269_v42 }
0x12bd   :  { %v9362_v32 = vpop.eup %9361 }
0x12be   :  { %v6407_v53 = vsub.f32 0.0, %v9362_v32  ;;  %v9364_v37 = vpop.eup %9363 }
0x12c0   :  { %v6409_v33 = vmul.f32 %v9364_v37, %v6407_v53  ;;  %v13247_v53 = vld [vmem:[#allocation20_spill] sm:$0xff] }
0x12c1   :  { %v9366_v36 = vpop.eup %9365 }
0x12c2   :  { %v6380_v58 = vadd.f32 1.0, %v9366_v36  ;;  %v12093_v38 = vadd.f32 %v9362_v32, %v6409_v33  ;;  %v9368_v49 = vpop.eup %9367  ;;  %v13248_v33 = vld [vmem:[#allocation38_spill] sm:$0xff]  ;;  %v13249_v36 = vld [vmem:[#allocation37_spill] sm:$0xff] }
0x12c3   :  { %v6394_v22 = vadd.f32 1.0, %v9368_v49 }
0x12c4   :  { %9369 = vrcp.f32 %v6380_v58  ;;  %v13250_v58 = vld [vmem:[#allocation25_spill] sm:$0xff] }
0x12d1   :  { %v9370_v18 = vpop.eup %9369 }
0x12d2   :  { %v6402_v19 = vmul.f32 %v9370_v18, %v6400_v23  ;;  %v13252_v18 = vld [vmem:[#allocation16_spill] sm:$0xff] }
0x12d4   :  { %v6404_v11 = vadd.f32 %v6402_v19, %v5910_v24 }
0x12d6   :  { %9371 = vtanh.f32 %v6404_v11 }
0x12d7   :  { %9373 = vrcp.f32 %v6394_v22 }
0x12e3   :  { %v9372_v42 = vpop.eup %9371 }
0x12e4   :  { %v6408_v63 = vsub.f32 0.0, %v9372_v42  ;;  %v9374_v37 = vpop.eup %9373 }
0x12e6   :  { %v6410_v59 = vmul.f32 %v9374_v37, %v6408_v63 }
0x12e8   :  { %v12103_v28 = vadd.f32 %v9372_v42, %v6410_v59 }
0x12ea   :  { %13238 = vst [vmem:[#allocation61_spill] sm:$0xff] %v12103_v28  ;;  %v6415_v32 = vpack.c.bf16 %v12103_v28, %v12093_v38 }
0x12ec   :  { %6449 = vmatmul.mubr.bf16.vlgmr.msra.gmra.mxu0 %v6415_v32  ;;  %6490 = vmatmul.mubr.bf16.vlgmr.msra.gmra.mxu1 %v6415_v32 }
0x12ed   :  { %6499 = vmatpush1.bf16.msra.mxu0 %v11812_v29  ;;  %6530 = vmatprep.mubr.bf16.mxu0 %v12902_v61 }
0x12ee   :  { %6500 = vmatprep.subr.bf16.mxu0 %v11816_v5  ;;  %6591 = vmatpush1.bf16.msra.mxu1 %v11750_v16 }
0x12ef   :  { %6592 = vmatprep.subr.bf16.mxu1 %v11753_v41  ;;  %6622 = vmatprep.mubr.bf16.mxu1 %v12902_v61 }
0x12f1   :  { %6501 = vmatpush1.bf16.msra.mxu0 %v11826_v56 }
0x12f2   :  { %6502 = vmatprep.subr.bf16.mxu0 %v11831_v55  ;;  %6593 = vmatpush1.bf16.msra.mxu1 %v11757_v57 }
0x12f3   :  { %6594 = vmatprep.subr.bf16.mxu1 %v11760_v44 }
0x12f5   :  { %6503 = vmatpush1.bf16.msra.mxu0 %v11839_v10 }
0x12f6   :  { %6504 = vmatprep.subr.bf16.mxu0 %v11844_v20  ;;  %6595 = vmatpush1.bf16.msra.mxu1 %v11764_v40 }
0x12f7   :  { %6596 = vmatprep.subr.bf16.mxu1 %v11767_v35 }
0x12f9   :  { %6505 = vmatpush1.bf16.msra.mxu0 %v11853_v30 }
0x12fa   :  { %6506 = vmatprep.subr.bf16.mxu0 %v11858_v17  ;;  %6597 = vmatpush1.bf16.msra.mxu1 %v11771_v46 }
0x12fb   :  { %6598 = vmatprep.subr.bf16.mxu1 %v11774_v4 }
0x12fd   :  { %6507 = vmatpush1.bf16.msra.mxu0 %v11865_v45 }
0x12fe   :  { %6508 = vmatprep.subr.bf16.mxu0 %v11870_v14  ;;  %6599 = vmatpush1.bf16.msra.mxu1 %v11778_v43 }
0x12ff   :  { %6600 = vmatprep.subr.bf16.mxu1 %v11781_v34 }
0x1301   :  { %6509 = vmatpush1.bf16.msra.mxu0 %v11879_v3 }
0x1302   :  { %6510 = vmatprep.subr.bf16.mxu0 %v11884_v2  ;;  %6601 = vmatpush1.bf16.msra.mxu1 %v11785_v8 }
0x1303   :  { %6602 = vmatprep.subr.bf16.mxu1 %v11788_v26 }
0x1305   :  { %6511 = vmatpush1.bf16.msra.mxu0 %v11891_v31 }
0x1306   :  { %6512 = vmatprep.subr.bf16.mxu0 %v11896_v13  ;;  %6603 = vmatpush1.bf16.msra.mxu1 %v11792_v0 }
0x1307   :  { %6604 = vmatprep.subr.bf16.mxu1 %v11795_v47 }
0x1309   :  { %6513 = vmatpush1.bf16.msra.mxu0 %v11905_v25 }
0x130a   :  { %6631 = vmatprep.subr.bf16.mxu0 %v11802_v21  ;;  %6605 = vmatpush1.bf16.msra.mxu1 %v11799_v6 }
0x130b   :  { %6672 = vmatprep.subr.bf16.mxu1 %v11804_v15 }
0x130c   :  { %6531 = vmatmul.mubr.bf16.vlgmr.msra.gmra.mxu0 %v6415_v32  ;;  %v13253_v32 = vld [vmem:[#allocation15_spill] sm:$0xff] }
0x130d   :  { %6632 = vmatpush1.bf16.msra.mxu0 %v11808_v60  ;;  %6663 = vmatprep.mubr.bf16.mxu0 %v12902_v61 }
0x130e   :  { %6633 = vmatprep.subr.bf16.mxu0 %v11814_v52 }
0x1311   :  { %6634 = vmatpush1.bf16.msra.mxu0 %v11822_v7 }
0x1312   :  { %6635 = vmatprep.subr.bf16.mxu0 %v13239_v12 }
0x1315   :  { %6636 = vmatpush1.bf16.msra.mxu0 %v13240_v50 }
0x1316   :  { %6637 = vmatprep.subr.bf16.mxu0 %v13241_v39 }
0x1319   :  { %6638 = vmatpush1.bf16.msra.mxu0 %v13242_v62 }
0x131a   :  { %6639 = vmatprep.subr.bf16.mxu0 %v13243_v9 }
0x131d   :  { %6640 = vmatpush1.bf16.msra.mxu0 %v13244_v1 }
0x131e   :  { %6641 = vmatprep.subr.bf16.mxu0 %v13245_v54 }
0x1321   :  { %6642 = vmatpush1.bf16.msra.mxu0 %v13246_v51 }
0x1322   :  { %6643 = vmatprep.subr.bf16.mxu0 %v13247_v53 }
0x1325   :  { %6644 = vmatpush1.bf16.msra.mxu0 %v13248_v33 }
0x1326   :  { %6645 = vmatprep.subr.bf16.mxu0 %v13249_v36  ;;  %v13254_v36 = vld [vmem:[#allocation51_spill] sm:$0xff] }
0x1329   :  { %6646 = vmatpush1.bf16.msra.mxu0 %v13250_v58 }
0x132a   :  { %6764 = vmatprep.subr.bf16.mxu0 %v13251_v48 }
0x13ac   :  { %v6450_v49 = vpop.f32.mrf.mxu0  ;;  %v6491_v23 = vpop.f32.mrf.mxu1 }
0x13ad   :  { %v6545_v24 = vadd.f32 %v6450_v49, %v13252_v18 }
0x13ae   :  { %v6452_v19 = vpop.f32.mrf.mxu0  ;;  %v6493_v22 = vpop.f32.mrf.mxu1 }
0x13af   :  { %v8270_v11 = vmul.f32 -1.442695, %v6545_v24  ;;  %v6559_v58 = vadd.f32 %v6452_v19, %v13254_v36  ;;  %v13257_v36 = vld [vmem:[#allocation36_spill] sm:$0xff] }
0x13b0   :  { %v6454_v42 = vpop.f32.mrf.mxu0  ;;  %v6494_v63 = vpop.f32.mrf.mxu1 }
0x13b1   :  { %9375 = vpow2.f32 %v8270_v11  ;;  %v8272_v51 = vmul.f32 -1.442695, %v6559_v58  ;;  %v13255_v42 = vld [vmem:[#allocation57_spill] sm:$0xff] }
0x13b2   :  { %v6455_v37 = vpop.f32.mrf.mxu0  ;;  %v6495_v59 = vpop.f32.mrf.mxu1  ;;  %v6573_v11 = vadd.f32 %v13255_v42, %v6491_v23 }
0x13b3   :  { %v6546_v33 = vadd.f32 %v6495_v59, %v13253_v32 }
0x13b5   :  { %v8271_v53 = vmul.f32 -1.442695, %v6546_v33 }
0x13b7   :  { %9377 = vpow2.f32 %v8271_v53  ;;  %v13256_v53 = vld [vmem:[#allocation50_spill] sm:$0xff] }
0x13b8   :  { %9379 = vpow2.f32 %v8272_v51 }
0x13be   :  { %v9376_v48 = vpop.eup %9375 }
0x13bf   :  { %v6553_v54 = vadd.f32 1.0, %v9376_v48 }
0x13c1   :  { %9381 = vrcp.f32 %v6553_v54 }
0x13c4   :  { %v9378_v49 = vpop.eup %9377 }
0x13c5   :  { %v6554_v18 = vadd.f32 1.0, %v9378_v49  ;;  %v9380_v22 = vpop.eup %9379 }
0x13c6   :  { %v6567_v59 = vadd.f32 1.0, %v9380_v22 }
0x13c7   :  { %9383 = vrcp.f32 %v6554_v18  ;;  %v13258_v18 = vld [vmem:[#allocation69_spill] sm:$0xff] }
0x13cc   :  { %v6532_v24 = vpop.f32.mrf.mxu0 }
0x13ce   :  { %v9382_v63 = vpop.eup %9381  ;;  %v6533_v37 = vpop.f32.mrf.mxu0 }
0x13cf   :  { %v6575_v1 = vmul.f32 %v9382_v63, %v6573_v11 }
0x13d0   :  { %v6534_v33 = vpop.f32.mrf.mxu0 }
0x13d1   :  { %v6577_v32 = vadd.f32 %v6575_v1, %v13256_v53  ;;  %v6560_v58 = vadd.f32 %v6534_v33, %v13257_v36 }
0x13d2   :  { %v6536_v19 = vpop.f32.mrf.mxu0 }
0x13d3   :  { %9385 = vtanh.f32 %v6577_v32  ;;  %v8273_v51 = vmul.f32 -1.442695, %v6560_v58  ;;  %v6574_v54 = vadd.f32 %v12098_v27, %v6536_v19 }
0x13d4   :  { %v9384_v48 = vpop.eup %9383  ;;  %9387 = vrcp.f32 %v6567_v59 }
0x13d5   :  { %9389 = vpow2.f32 %v8273_v51  ;;  %v6576_v49 = vmul.f32 %v9384_v48, %v6574_v54 }
0x13d7   :  { %v6578_v23 = vadd.f32 %v6576_v49, %v13258_v18 }
0x13d9   :  { %9391 = vtanh.f32 %v6578_v23 }
0x13e0   :  { %v9386_v24 = vpop.eup %9385 }
0x13e1   :  { %v9388_v37 = vpop.eup %9387  ;;  %v6581_v22 = vsub.f32 %v12093_v38, %v9386_v24 }
0x13e2   :  { %v9390_v11 = vpop.eup %9389 }
0x13e3   :  { %v6568_v1 = vadd.f32 1.0, %v9390_v11  ;;  %v6583_v63 = vmul.f32 %v9388_v37, %v6581_v22  ;;  %v13271_v22 = vld [vmem:[#allocation21_spill] sm:$0xff] }
0x13e5   :  { %9393 = vrcp.f32 %v6568_v1  ;;  %v12167_v33 = vadd.f32 %v9386_v24, %v6583_v63  ;;  %v13270_v24 = vld [vmem:[#allocation44_spill] sm:$0xff] }
0x13e6   :  { %v9392_v53 = vpop.eup %9391 }
0x13e7   :  { %v6582_v32 = vsub.f32 %v12103_v28, %v9392_v53 }
0x13f2   :  { %v9394_v36 = vpop.eup %9393 }
0x13f3   :  { %v6584_v59 = vmul.f32 %v9394_v36, %v6582_v32 }
0x13f5   :  { %v12170_v58 = vadd.f32 %v9392_v53, %v6584_v59  ;;  %v13272_v59 = vld [vmem:[#allocation46_spill] sm:$0xff] }
0x13f7   :  { %v6589_v19 = vpack.c.bf16 %v12170_v58, %v12167_v33 }
0x13f9   :  { %6623 = vmatmul.mubr.bf16.vlgmr.msra.gmra.mxu1 %v6589_v19  ;;  %6664 = vmatmul.mubr.bf16.vlgmr.msra.gmra.mxu0 %v6589_v19 }
0x13fa   :  { %6673 = vmatpush1.bf16.msra.mxu1 %v11812_v29  ;;  %6704 = vmatprep.mubr.bf16.mxu1 %v12902_v61 }
0x13fb   :  { %6674 = vmatprep.subr.bf16.mxu1 %v11816_v5  ;;  %6765 = vmatpush1.bf16.msra.mxu0 %v11750_v16  ;;  %v13259_v16 = vld [vmem:[#allocation56_spill] sm:$0xff] }
0x13fc   :  { %6766 = vmatprep.subr.bf16.mxu0 %v11753_v41  ;;  %6796 = vmatprep.mubr.bf16.mxu0 %v12902_v61  ;;  %v13260_v41 = vld [vmem:[#allocation32_spill] sm:$0xff] }
0x13fe   :  { %6675 = vmatpush1.bf16.msra.mxu1 %v11826_v56  ;;  %v13269_v56 = vld [vmem:[#allocation63_spill] sm:$0xff] }
0x13ff   :  { %6676 = vmatprep.subr.bf16.mxu1 %v11831_v55  ;;  %6767 = vmatpush1.bf16.msra.mxu0 %v11757_v57  ;;  %v13261_v57 = vld [vmem:[#allocation72_spill] sm:$0xff] }
0x1400   :  { %6768 = vmatprep.subr.bf16.mxu0 %v11760_v44  ;;  %v13262_v44 = vld [vmem:[#allocation20_spill] sm:$0xff] }
0x1402   :  { %6677 = vmatpush1.bf16.msra.mxu1 %v11839_v10 }
0x1403   :  { %6678 = vmatprep.subr.bf16.mxu1 %v11844_v20  ;;  %6769 = vmatpush1.bf16.msra.mxu0 %v11764_v40  ;;  %v13263_v40 = vld [vmem:[#allocation38_spill] sm:$0xff] }
0x1404   :  { %6770 = vmatprep.subr.bf16.mxu0 %v11767_v35  ;;  %v13264_v35 = vld [vmem:[#allocation37_spill] sm:$0xff] }
0x1406   :  { %6679 = vmatpush1.bf16.msra.mxu1 %v11853_v30 }
0x1407   :  { %6680 = vmatprep.subr.bf16.mxu1 %v11858_v17  ;;  %6771 = vmatpush1.bf16.msra.mxu0 %v11771_v46  ;;  %v13265_v46 = vld [vmem:[#allocation25_spill] sm:$0xff] }
0x1408   :  { %6772 = vmatprep.subr.bf16.mxu0 %v11774_v4  ;;  %v12224_v4 = vld [vmem:[#allocation8 + $0x454] ss:$24 sps:$4 sm:$0xff]  }
0x1409   :  { %13266 = vst [vmem:[#allocation43_spill] sm:$0xff] %v12224_v4 }
0x140a   :  { %6681 = vmatpush1.bf16.msra.mxu1 %v11865_v45 }
0x140b   :  { %6682 = vmatprep.subr.bf16.mxu1 %v11870_v14  ;;  %6773 = vmatpush1.bf16.msra.mxu0 %v11778_v43 }
0x140c   :  { %6774 = vmatprep.subr.bf16.mxu0 %v11781_v34 }
0x140e   :  { %6683 = vmatpush1.bf16.msra.mxu1 %v11879_v3 }
0x140f   :  { %6684 = vmatprep.subr.bf16.mxu1 %v11884_v2  ;;  %6775 = vmatpush1.bf16.msra.mxu0 %v11785_v8  ;;  %v13267_v8 = vld [vmem:[#allocation49_spill] sm:$0xff] }
0x1410   :  { %6776 = vmatprep.subr.bf16.mxu0 %v11788_v26 }
0x1412   :  { %6685 = vmatpush1.bf16.msra.mxu1 %v11891_v31 }
0x1413   :  { %6686 = vmatprep.subr.bf16.mxu1 %v11896_v13  ;;  %6777 = vmatpush1.bf16.msra.mxu0 %v11792_v0 }
0x1414   :  { %6778 = vmatprep.subr.bf16.mxu0 %v11795_v47 }
0x1416   :  { %6687 = vmatpush1.bf16.msra.mxu1 %v11905_v25 }
0x1417   :  { %6805 = vmatprep.subr.bf16.mxu1 %v11802_v21  ;;  %6779 = vmatpush1.bf16.msra.mxu0 %v11799_v6 }
0x1418   :  { %6846 = vmatprep.subr.bf16.mxu0 %v11804_v15 }
0x1419   :  { %6705 = vmatmul.mubr.bf16.vlgmr.msra.gmra.mxu1 %v6589_v19 }
0x141a   :  { %6806 = vmatpush1.bf16.msra.mxu1 %v11808_v60  ;;  %6837 = vmatprep.mubr.bf16.mxu1 %v12902_v61 }
0x141b   :  { %6807 = vmatprep.subr.bf16.mxu1 %v11814_v52  ;;  %v13268_v52 = vld [vmem:[#allocation31_spill] sm:$0xff] }
0x141e   :  { %6808 = vmatpush1.bf16.msra.mxu1 %v11822_v7 }
0x141f   :  { %6809 = vmatprep.subr.bf16.mxu1 %v13239_v12 }
0x1422   :  { %6810 = vmatpush1.bf16.msra.mxu1 %v13240_v50 }
0x1423   :  { %6811 = vmatprep.subr.bf16.mxu1 %v13241_v39 }
0x1426   :  { %6812 = vmatpush1.bf16.msra.mxu1 %v13242_v62 }
0x1427   :  { %6813 = vmatprep.subr.bf16.mxu1 %v13243_v9 }
0x142a   :  { %6814 = vmatpush1.bf16.msra.mxu1 %v13259_v16 }
0x142b   :  { %6815 = vmatprep.subr.bf16.mxu1 %v13260_v41 }
0x142e   :  { %6816 = vmatpush1.bf16.msra.mxu1 %v13261_v57 }
0x142f   :  { %6817 = vmatprep.subr.bf16.mxu1 %v13262_v44 }
0x1432   :  { %6818 = vmatpush1.bf16.msra.mxu1 %v13263_v40 }
0x1433   :  { %6819 = vmatprep.subr.bf16.mxu1 %v13264_v35 }
0x1436   :  { %6820 = vmatpush1.bf16.msra.mxu1 %v13265_v46 }
0x1437   :  { %6938 = vmatprep.subr.bf16.mxu1 %v12224_v4 }
0x14b9   :  { %v6624_v43 = vpop.f32.mrf.mxu1  ;;  %v6665_v34 = vpop.f32.mrf.mxu0 }
0x14ba   :  { %v6719_v26 = vadd.f32 %v6624_v43, %v13267_v8  ;;  %v6747_v51 = vadd.f32 %v13255_v42, %v6665_v34 }
0x14bb   :  { %v6626_v0 = vpop.f32.mrf.mxu1  ;;  %v6667_v47 = vpop.f32.mrf.mxu0 }
0x14bc   :  { %v8274_v6 = vmul.f32 -1.442695, %v6719_v26  ;;  %v6733_v55 = vadd.f32 %v6626_v0, %v13269_v56  ;;  %v12273_v56 = vld [vmem:[#allocation8 + $0x3f0] ss:$24 sps:$4 sm:$0xff]  }
0x14bd   :  { %v6628_v21 = vpop.f32.mrf.mxu1  ;;  %v6668_v15 = vpop.f32.mrf.mxu0 }
0x14be   :  { %9395 = vpow2.f32 %v8274_v6  ;;  %v8276_v10 = vmul.f32 -1.442695, %v6733_v55  ;;  %v12243_v21 = vld [vmem:[#allocation8 + $0x460] ss:$24 sps:$4 sm:$0xff]   ;;  %v12253_v15 = vld [vmem:[#allocation8 + $0x424] ss:$24 sps:$4 sm:$0xff]  }
0x14bf   :  { %v6629_v60 = vpop.f32.mrf.mxu1  ;;  %v6669_v29 = vpop.f32.mrf.mxu0  ;;  %v12276_v55 = vld [vmem:[#allocation8 + $0x3c4] ss:$24 sps:$4 sm:$0xff]  }
0x14c0   :  { %v6720_v5 = vadd.f32 %v6669_v29, %v13268_v52  ;;  %v12257_v60 = vld [vmem:[#allocation8 + $0x430] ss:$24 sps:$4 sm:$0xff]   ;;  %v12260_v29 = vld [vmem:[#allocation8 + $0x404] ss:$24 sps:$4 sm:$0xff]   ;;  %v12263_v52 = vld [vmem:[#allocation8 + $0x420] ss:$24 sps:$4 sm:$0xff]  }
0x14c2   :  { %v8275_v7 = vmul.f32 -1.442695, %v6720_v5  ;;  %v12266_v5 = vld [vmem:[#allocation8 + $0x3f4] ss:$24 sps:$4 sm:$0xff]  }
0x14c4   :  { %9397 = vpow2.f32 %v8275_v7  ;;  %v12269_v7 = vld [vmem:[#allocation8 + $0x400] ss:$24 sps:$4 sm:$0xff]  }
0x14c5   :  { %9399 = vpow2.f32 %v8276_v10  ;;  %v12281_v10 = vld [vmem:[#allocation8 + $0x3c0] ss:$24 sps:$4 sm:$0xff]  }
0x14cb   :  { %v9396_v38 = vpop.eup %9395 }
0x14cc   :  { %v6727_v12 = vadd.f32 1.0, %v9396_v38  ;;  %v12284_v38 = vld [vmem:[#allocation8 + $0x394] ss:$24 sps:$4 sm:$0xff]  }
0x14ce   :  { %9401 = vrcp.f32 %v6727_v12  ;;  %v12292_v12 = vld [vmem:[#allocation8 + $0x364] ss:$24 sps:$4 sm:$0xff]  }
0x14d1   :  { %v9398_v50 = vpop.eup %9397 }
0x14d2   :  { %v6728_v39 = vadd.f32 1.0, %v9398_v50  ;;  %v9400_v9 = vpop.eup %9399  ;;  %v12328_v50 = vld [vmem:[#allocation8 + $0x428] ss:$24 sps:$4 sm:$0xff]  }
0x14d3   :  { %v6741_v18 = vadd.f32 1.0, %v9400_v9  ;;  %v12337_v9 = vld [vmem:[#allocation8 + $0x3cc] ss:$24 sps:$4 sm:$0xff]  }
0x14d4   :  { %9403 = vrcp.f32 %v6728_v39  ;;  %v12331_v39 = vld [vmem:[#allocation8 + $0x3fc] ss:$24 sps:$4 sm:$0xff]  }
0x14d9   :  { %v6706_v62 = vpop.f32.mrf.mxu1 }
0x14da   :  { %v12334_v62 = vld [vmem:[#allocation8 + $0x3f8] ss:$24 sps:$4 sm:$0xff]  }
0x14db   :  { %v9402_v54 = vpop.eup %9401  ;;  %v6707_v48 = vpop.f32.mrf.mxu1 }
0x14dc   :  { %v6749_v49 = vmul.f32 %v9402_v54, %v6747_v51  ;;  %v12340_v51 = vld [vmem:[#allocation8 + $0x3c8] ss:$24 sps:$4 sm:$0xff]   ;;  %v12343_v54 = vld [vmem:[#allocation8 + $0x39c] ss:$24 sps:$4 sm:$0xff]   ;;  %v12346_v48 = vld [vmem:[#allocation8 + $0x398] ss:$24 sps:$4 sm:$0xff]  }
0x14dd   :  { %v6708_v23 = vpop.f32.mrf.mxu1  ;;  %13273 = vst [vmem:[#allocation24_spill] sm:$0xff] %v12346_v48 }
0x14de   :  { %v6751_v37 = vadd.f32 %v6749_v49, %v13270_v24  ;;  %v6734_v11 = vadd.f32 %v6708_v23, %v13271_v22  ;;  %v12349_v49 = vld [vmem:[#allocation8 + $0x36c] ss:$24 sps:$4 sm:$0xff]   ;;  %v12355_v23 = vld [vmem:[#allocation8 + $0x33c] ss:$24 sps:$4 sm:$0xff]   ;;  %v12358_v24 = vld [vmem:[#allocation8 + $0x338] ss:$24 sps:$4 sm:$0xff]  }
0x14df   :  { %v6710_v1 = vpop.f32.mrf.mxu1  ;;  %13274 = vst [vmem:[#allocation45_spill] sm:$0xff] %v12349_v49  ;;  %13276 = vst [vmem:[#allocation62_spill] sm:$0xff] %v12355_v23 }
0x14e0   :  { %9405 = vtanh.f32 %v6751_v37  ;;  %v8277_v63 = vmul.f32 -1.442695, %v6734_v11  ;;  %v6748_v53 = vadd.f32 %v12098_v27, %v6710_v1  ;;  %13277 = vst [vmem:[#allocation74_spill] sm:$0xff] %v12358_v24  ;;  %v12361_v37 = vld [vmem:[#allocation8 + $0x30c] ss:$24 sps:$4 sm:$0xff]  }
0x14e1   :  { %v9404_v32 = vpop.eup %9403  ;;  %9407 = vrcp.f32 %v6741_v18  ;;  %v12352_v18 = vld [vmem:[#allocation8 + $0x368] ss:$24 sps:$4 sm:$0xff]   ;;  %13278 = vst [vmem:[#allocation14_spill] sm:$0xff] %v12361_v37 }
0x14e2   :  { %9409 = vpow2.f32 %v8277_v63  ;;  %v6750_v36 = vmul.f32 %v9404_v32, %v6748_v53  ;;  %13275 = vst [vmem:[#allocation60_spill] sm:$0xff] %v12352_v18  ;;  %v13279_v1 = vld [vmem:[#allocation64_spill] sm:$0xff] }
0x14e4   :  { %v6752_v19 = vadd.f32 %v6750_v36, %v13272_v59 }
0x14e6   :  { %9411 = vtanh.f32 %v6752_v19 }
0x14ed   :  { %v9406_v16 = vpop.eup %9405 }
0x14ee   :  { %v9408_v41 = vpop.eup %9407  ;;  %v6755_v57 = vsub.f32 %v12167_v33, %v9406_v16  ;;  %v12247_v33 = vld [vmem:[#allocation8 + $0x434] ss:$24 sps:$4 sm:$0xff]  }
0x14ef   :  { %v9410_v44 = vpop.eup %9409 }
0x14f0   :  { %v6742_v40 = vadd.f32 1.0, %v9410_v44  ;;  %v6757_v35 = vmul.f32 %v9408_v41, %v6755_v57  ;;  %v13280_v57 = vld [vmem:[#allocation34_spill] sm:$0xff] }
0x14f2   :  { %9413 = vrcp.f32 %v6742_v40  ;;  %v12236_v43 = vadd.f32 %v9406_v16, %v6757_v35  ;;  %v13281_v35 = vld [vmem:[#allocation18_spill] sm:$0xff] }
0x14f3   :  { %v9412_v34 = vpop.eup %9411 }
0x14f4   :  { %v6756_v8 = vsub.f32 %v12170_v58, %v9412_v34  ;;  %v12250_v58 = vld [vmem:[#allocation8 + $0x450] ss:$24 sps:$4 sm:$0xff]  }
0x14ff   :  { %v9414_v26 = vpop.eup %9413 }
0x1500   :  { %v6758_v0 = vmul.f32 %v9414_v26, %v6756_v8 }
0x1502   :  { %v12239_v47 = vadd.f32 %v9412_v34, %v6758_v0 }
0x1504   :  { %v6763_v6 = vpack.c.bf16 %v12239_v47, %v12236_v43 }
0x1506   :  { %6797 = vmatmul.mubr.bf16.vlgmr.msra.gmra.mxu0 %v6763_v6  ;;  %6838 = vmatmul.mubr.bf16.vlgmr.msra.gmra.mxu1 %v6763_v6 }
0x1507   :  { %6847 = vmatpush1.bf16.msra.mxu0 %v12243_v21  ;;  %6878 = vmatprep.mubr.bf16.mxu0 %v12902_v61 }
0x1508   :  { %6848 = vmatprep.subr.bf16.mxu0 %v12247_v33  ;;  %6939 = vmatpush1.bf16.msra.mxu1 %v12250_v58 }
0x1509   :  { %6940 = vmatprep.subr.bf16.mxu1 %v12253_v15  ;;  %6970 = vmatprep.mubr.bf16.mxu1 %v12902_v61 }
0x150b   :  { %6849 = vmatpush1.bf16.msra.mxu0 %v12257_v60 }
0x150c   :  { %6850 = vmatprep.subr.bf16.mxu0 %v12260_v29  ;;  %6941 = vmatpush1.bf16.msra.mxu1 %v12263_v52 }
0x150d   :  { %6942 = vmatprep.subr.bf16.mxu1 %v12266_v5 }
0x150f   :  { %6851 = vmatpush1.bf16.msra.mxu0 %v12269_v7 }
0x1510   :  { %6852 = vmatprep.subr.bf16.mxu0 %v11844_v20  ;;  %6943 = vmatpush1.bf16.msra.mxu1 %v12273_v56  ;;  %v12289_v20 = vld [vmem:[#allocation8 + $0x390] ss:$24 sps:$4 sm:$0xff]  }
0x1511   :  { %6944 = vmatprep.subr.bf16.mxu1 %v12276_v55 }
0x1513   :  { %6853 = vmatpush1.bf16.msra.mxu0 %v11853_v30  ;;  %v12297_v30 = vld [vmem:[#allocation8 + $0x360] ss:$24 sps:$4 sm:$0xff]  }
0x1514   :  { %6854 = vmatprep.subr.bf16.mxu0 %v11858_v17  ;;  %6945 = vmatpush1.bf16.msra.mxu1 %v12281_v10  ;;  %v12300_v17 = vld [vmem:[#allocation8 + $0x334] ss:$24 sps:$4 sm:$0xff]  }
0x1515   :  { %6946 = vmatprep.subr.bf16.mxu1 %v12284_v38 }
0x1517   :  { %6855 = vmatpush1.bf16.msra.mxu0 %v11865_v45  ;;  %v12305_v45 = vld [vmem:[#allocation8 + $0x330] ss:$24 sps:$4 sm:$0xff]  }
0x1518   :  { %6856 = vmatprep.subr.bf16.mxu0 %v11870_v14  ;;  %6947 = vmatpush1.bf16.msra.mxu1 %v12289_v20  ;;  %v12308_v14 = vld [vmem:[#allocation8 + $0x304] ss:$24 sps:$4 sm:$0xff]  }
0x1519   :  { %6948 = vmatprep.subr.bf16.mxu1 %v12292_v12 }
0x151b   :  { %6857 = vmatpush1.bf16.msra.mxu0 %v11879_v3  ;;  %v12312_v3 = vld [vmem:[#allocation8 + $0x45c] ss:$24 sps:$4 sm:$0xff]  }
0x151c   :  { %6858 = vmatprep.subr.bf16.mxu0 %v11884_v2  ;;  %6949 = vmatpush1.bf16.msra.mxu1 %v12297_v30  ;;  %v12315_v2 = vld [vmem:[#allocation8 + $0x300] ss:$24 sps:$4 sm:$0xff]  }
0x151d   :  { %6950 = vmatprep.subr.bf16.mxu1 %v12300_v17 }
0x151f   :  { %6859 = vmatpush1.bf16.msra.mxu0 %v11891_v31  ;;  %v12318_v31 = vld [vmem:[#allocation8 + $0x464] ss:$24 sps:$4 sm:$0xff]  }
0x1520   :  { %6860 = vmatprep.subr.bf16.mxu0 %v11896_v13  ;;  %6951 = vmatpush1.bf16.msra.mxu1 %v12305_v45  ;;  %v12321_v13 = vld [vmem:[#allocation8 + $0x458] ss:$24 sps:$4 sm:$0xff]  }
0x1521   :  { %6952 = vmatprep.subr.bf16.mxu1 %v12308_v14 }
0x1523   :  { %6861 = vmatpush1.bf16.msra.mxu0 %v11905_v25  ;;  %v12325_v25 = vld [vmem:[#allocation8 + $0x42c] ss:$24 sps:$4 sm:$0xff]  }
0x1524   :  { %6979 = vmatprep.subr.bf16.mxu0 %v12312_v3  ;;  %6953 = vmatpush1.bf16.msra.mxu1 %v12315_v2 }
0x1525   :  { %7020 = vmatprep.subr.bf16.mxu1 %v12318_v31 }
0x1526   :  { %6879 = vmatmul.mubr.bf16.vlgmr.msra.gmra.mxu0 %v6763_v6 }
0x1527   :  { %6980 = vmatpush1.bf16.msra.mxu0 %v12321_v13  ;;  %7011 = vmatprep.mubr.bf16.mxu0 %v12902_v61 }
0x1528   :  { %6981 = vmatprep.subr.bf16.mxu0 %v12325_v25 }
0x152b   :  { %6982 = vmatpush1.bf16.msra.mxu0 %v12328_v50 }
0x152c   :  { %6983 = vmatprep.subr.bf16.mxu0 %v12331_v39 }
0x152f   :  { %6984 = vmatpush1.bf16.msra.mxu0 %v12334_v62 }
0x1530   :  { %6985 = vmatprep.subr.bf16.mxu0 %v12337_v9 }
0x1533   :  { %6986 = vmatpush1.bf16.msra.mxu0 %v12340_v51 }
0x1534   :  { %6987 = vmatprep.subr.bf16.mxu0 %v12343_v54 }
0x1537   :  { %6988 = vmatpush1.bf16.msra.mxu0 %v12346_v48 }
0x1538   :  { %6989 = vmatprep.subr.bf16.mxu0 %v12349_v49 }
0x153b   :  { %6990 = vmatpush1.bf16.msra.mxu0 %v12352_v18 }
0x153c   :  { %6991 = vmatprep.subr.bf16.mxu0 %v12355_v23 }
0x153f   :  { %6992 = vmatpush1.bf16.msra.mxu0 %v12358_v24 }
0x1540   :  { %6993 = vmatprep.subr.bf16.mxu0 %v12361_v37 }
0x1543   :  { %6994 = vmatpush1.bf16.msra.mxu0 %v13265_v46 }
0x1544   :  { %7112 = vmatprep.subr.bf16.mxu0 %v12224_v4 }
0x15c6   :  { %v6798_v22 = vpop.f32.mrf.mxu0  ;;  %v6839_v11 = vpop.f32.mrf.mxu1 }
0x15c7   :  { %v6893_v63 = vadd.f32 %v6798_v22, %v13279_v1 }
0x15c8   :  { %v6800_v53 = vpop.f32.mrf.mxu0  ;;  %v6841_v32 = vpop.f32.mrf.mxu1 }
0x15c9   :  { %v8278_v36 = vmul.f32 -1.442695, %v6893_v63  ;;  %v6907_v46 = vadd.f32 %v6800_v53, %v13281_v35  ;;  %v6921_v63 = vadd.f32 %v13255_v42, %v6839_v11  ;;  %v13283_v53 = vld [vmem:[#allocation29_spill] sm:$0xff] }
0x15ca   :  { %v6802_v59 = vpop.f32.mrf.mxu0  ;;  %v6842_v19 = vpop.f32.mrf.mxu1 }
0x15cb   :  { %9415 = vpow2.f32 %v8278_v36  ;;  %v8280_v34 = vmul.f32 -1.442695, %v6907_v46 }
0x15cc   :  { %v6803_v16 = vpop.f32.mrf.mxu0  ;;  %v6843_v41 = vpop.f32.mrf.mxu1 }
0x15cd   :  { %v6894_v44 = vadd.f32 %v6843_v41, %v13280_v57  ;;  %v13282_v41 = vld [vmem:[#allocation65_spill] sm:$0xff] }
0x15cf   :  { %v8279_v40 = vmul.f32 -1.442695, %v6894_v44 }
0x15d1   :  { %9417 = vpow2.f32 %v8279_v40 }
0x15d2   :  { %9419 = vpow2.f32 %v8280_v34 }
0x15d8   :  { %v9416_v8 = vpop.eup %9415 }
0x15d9   :  { %v6901_v26 = vadd.f32 1.0, %v9416_v8 }
0x15db   :  { %9421 = vrcp.f32 %v6901_v26  ;;  %v13284_v26 = vld [vmem:[#allocation27_spill] sm:$0xff] }
0x15de   :  { %v9418_v0 = vpop.eup %9417 }
0x15df   :  { %v6902_v6 = vadd.f32 1.0, %v9418_v0  ;;  %v9420_v1 = vpop.eup %9419 }
0x15e0   :  { %v6915_v19 = vadd.f32 1.0, %v9420_v1 }
0x15e1   :  { %9423 = vrcp.f32 %v6902_v6 }
0x15e6   :  { %v6880_v22 = vpop.f32.mrf.mxu0 }
0x15e8   :  { %v9422_v32 = vpop.eup %9421  ;;  %v6881_v36 = vpop.f32.mrf.mxu0 }
0x15e9   :  { %v6923_v59 = vmul.f32 %v9422_v32, %v6921_v63 }
0x15ea   :  { %v6882_v16 = vpop.f32.mrf.mxu0 }
0x15eb   :  { %v6925_v57 = vadd.f32 %v6923_v59, %v13282_v41  ;;  %v6908_v44 = vadd.f32 %v6882_v16, %v13283_v53 }
0x15ec   :  { %v6884_v40 = vpop.f32.mrf.mxu0 }
0x15ed   :  { %9425 = vtanh.f32 %v6925_v57  ;;  %v8281_v35 = vmul.f32 -1.442695, %v6908_v44  ;;  %v6922_v46 = vadd.f32 %v12098_v27, %v6884_v40  ;;  %v12401_v44 = vld [vmem:[#allocation8 + $0x3a4] ss:$24 sps:$4 sm:$0xff]   ;;  %v12406_v40 = vld [vmem:[#allocation8 + $0x3a0] ss:$24 sps:$4 sm:$0xff]  }
0x15ee   :  { %v9424_v34 = vpop.eup %9423  ;;  %9427 = vrcp.f32 %v6915_v19 }
0x15ef   :  { %9429 = vpow2.f32 %v8281_v35  ;;  %v6924_v8 = vmul.f32 %v9424_v34, %v6922_v46  ;;  %v12409_v35 = vld [vmem:[#allocation8 + $0x374] ss:$24 sps:$4 sm:$0xff]   ;;  %v12414_v46 = vld [vmem:[#allocation8 + $0x370] ss:$24 sps:$4 sm:$0xff]   ;;  %v12417_v34 = vld [vmem:[#allocation8 + $0x344] ss:$24 sps:$4 sm:$0xff]  }
0x15f1   :  { %v6926_v11 = vadd.f32 %v6924_v8, %v13284_v26  ;;  %v12422_v8 = vld [vmem:[#allocation8 + $0x340] ss:$24 sps:$4 sm:$0xff]   ;;  %v12425_v26 = vld [vmem:[#allocation8 + $0x314] ss:$24 sps:$4 sm:$0xff]  }
0x15f3   :  { %9431 = vtanh.f32 %v6926_v11  ;;  %v12430_v11 = vld [vmem:[#allocation8 + $0x310] ss:$24 sps:$4 sm:$0xff]  }
0x15fa   :  { %v9426_v0 = vpop.eup %9425 }
0x15fb   :  { %v9428_v6 = vpop.eup %9427  ;;  %v6929_v22 = vsub.f32 %v12236_v43, %v9426_v0  ;;  %v12393_v43 = vld [vmem:[#allocation8 + $0x3d4] ss:$24 sps:$4 sm:$0xff]  }
0x15fc   :  { %v9430_v1 = vpop.eup %9429 }
0x15fd   :  { %v6916_v63 = vadd.f32 1.0, %v9430_v1  ;;  %v6931_v32 = vmul.f32 %v9428_v6, %v6929_v22  ;;  %v13286_v1 = vld [vmem:[#allocation33_spill] sm:$0xff] }
0x15ff   :  { %9433 = vrcp.f32 %v6916_v63  ;;  %v12375_v36 = vadd.f32 %v9426_v0, %v6931_v32  ;;  %v12451_v0 = vld [vmem:[#allocation8 + $0x308] ss:$24 sps:$4 sm:$0xff]  }
0x1600   :  { %v9432_v59 = vpop.eup %9431  ;;  %13285 = vst [vmem:[#allocation17_spill] sm:$0xff] %v12451_v0 }
0x1601   :  { %v6930_v16 = vsub.f32 %v12239_v47, %v9432_v59  ;;  %v12398_v47 = vld [vmem:[#allocation8 + $0x3d0] ss:$24 sps:$4 sm:$0xff]  }
0x160c   :  { %v9434_v41 = vpop.eup %9433 }
0x160d   :  { %v6932_v19 = vmul.f32 %v9434_v41, %v6930_v16 }
0x160f   :  { %v12378_v57 = vadd.f32 %v9432_v59, %v6932_v19 }
0x1611   :  { %v6937_v53 = vpack.c.bf16 %v12378_v57, %v12375_v36 }
0x1613   :  { %6971 = vmatmul.mubr.bf16.vlgmr.msra.gmra.mxu1 %v6937_v53  ;;  %7012 = vmatmul.mubr.bf16.vlgmr.msra.gmra.mxu0 %v6937_v53 }
0x1614   :  { %7021 = vmatpush1.bf16.msra.mxu1 %v12243_v21  ;;  %7052 = vmatprep.mubr.bf16.mxu1 %v12902_v61 }
0x1615   :  { %7022 = vmatprep.subr.bf16.mxu1 %v12247_v33  ;;  %7113 = vmatpush1.bf16.msra.mxu0 %v12250_v58 }
0x1616   :  { %7114 = vmatprep.subr.bf16.mxu0 %v12253_v15  ;;  %7144 = vmatprep.mubr.bf16.mxu0 %v12902_v61 }
0x1618   :  { %7023 = vmatpush1.bf16.msra.mxu1 %v12257_v60 }
0x1619   :  { %7024 = vmatprep.subr.bf16.mxu1 %v12260_v29  ;;  %7115 = vmatpush1.bf16.msra.mxu0 %v12263_v52 }
0x161a   :  { %7116 = vmatprep.subr.bf16.mxu0 %v12266_v5 }
0x161c   :  { %7025 = vmatpush1.bf16.msra.mxu1 %v12269_v7 }
0x161d   :  { %7026 = vmatprep.subr.bf16.mxu1 %v12393_v43  ;;  %7117 = vmatpush1.bf16.msra.mxu0 %v12273_v56 }
0x161e   :  { %7118 = vmatprep.subr.bf16.mxu0 %v12276_v55 }
0x1620   :  { %7027 = vmatpush1.bf16.msra.mxu1 %v12398_v47 }
0x1621   :  { %7028 = vmatprep.subr.bf16.mxu1 %v12401_v44  ;;  %7119 = vmatpush1.bf16.msra.mxu0 %v12281_v10 }
0x1622   :  { %7120 = vmatprep.subr.bf16.mxu0 %v12284_v38 }
0x1624   :  { %7029 = vmatpush1.bf16.msra.mxu1 %v12406_v40 }
0x1625   :  { %7030 = vmatprep.subr.bf16.mxu1 %v12409_v35  ;;  %7121 = vmatpush1.bf16.msra.mxu0 %v12289_v20 }
0x1626   :  { %7122 = vmatprep.subr.bf16.mxu0 %v12292_v12 }
0x1628   :  { %7031 = vmatpush1.bf16.msra.mxu1 %v12414_v46 }
0x1629   :  { %7032 = vmatprep.subr.bf16.mxu1 %v12417_v34  ;;  %7123 = vmatpush1.bf16.msra.mxu0 %v12297_v30 }
0x162a   :  { %7124 = vmatprep.subr.bf16.mxu0 %v12300_v17 }
0x162c   :  { %7033 = vmatpush1.bf16.msra.mxu1 %v12422_v8 }
0x162d   :  { %7034 = vmatprep.subr.bf16.mxu1 %v12425_v26  ;;  %7125 = vmatpush1.bf16.msra.mxu0 %v12305_v45 }
0x162e   :  { %7126 = vmatprep.subr.bf16.mxu0 %v12308_v14 }
0x1630   :  { %7035 = vmatpush1.bf16.msra.mxu1 %v12430_v11 }
0x1631   :  { %7153 = vmatprep.subr.bf16.mxu1 %v12312_v3  ;;  %7127 = vmatpush1.bf16.msra.mxu0 %v12315_v2 }
0x1632   :  { %7194 = vmatprep.subr.bf16.mxu0 %v12318_v31 }
0x1633   :  { %7053 = vmatmul.mubr.bf16.vlgmr.msra.gmra.mxu1 %v6937_v53 }
0x1634   :  { %7154 = vmatpush1.bf16.msra.mxu1 %v12321_v13  ;;  %7185 = vmatprep.mubr.bf16.mxu1 %v12902_v61 }
0x1635   :  { %7155 = vmatprep.subr.bf16.mxu1 %v12325_v25 }
0x1638   :  { %7156 = vmatpush1.bf16.msra.mxu1 %v12328_v50 }
0x1639   :  { %7157 = vmatprep.subr.bf16.mxu1 %v12331_v39 }
0x163c   :  { %7158 = vmatpush1.bf16.msra.mxu1 %v12334_v62 }
0x163d   :  { %7159 = vmatprep.subr.bf16.mxu1 %v12337_v9 }
0x1640   :  { %7160 = vmatpush1.bf16.msra.mxu1 %v12340_v51 }
0x1641   :  { %7161 = vmatprep.subr.bf16.mxu1 %v12343_v54 }
0x1644   :  { %7162 = vmatpush1.bf16.msra.mxu1 %v12346_v48 }
0x1645   :  { %7163 = vmatprep.subr.bf16.mxu1 %v12349_v49 }
0x1648   :  { %7164 = vmatpush1.bf16.msra.mxu1 %v12352_v18  ;;  %v13288_v18 = vld [vmem:[#allocation47_spill] sm:$0xff] }
0x1649   :  { %7165 = vmatprep.subr.bf16.mxu1 %v12355_v23 }
0x164c   :  { %7166 = vmatpush1.bf16.msra.mxu1 %v12358_v24  ;;  %v13287_v24 = vld [vmem:[#allocation71_spill] sm:$0xff] }
0x164d   :  { %7167 = vmatprep.subr.bf16.mxu1 %v12361_v37 }
0x1650   :  { %7168 = vmatpush1.bf16.msra.mxu1 %v12451_v0 }
0x1651   :  { %7286 = vmatprep.subr.bf16.mxu1 %v12224_v4 }
0x16d3   :  { %v6972_v6 = vpop.f32.mrf.mxu1  ;;  %v7013_v22 = vpop.f32.mrf.mxu0 }
0x16d4   :  { %v7067_v63 = vadd.f32 %v6972_v6, %v13286_v1 }
0x16d5   :  { %v6974_v32 = vpop.f32.mrf.mxu1  ;;  %v7015_v59 = vpop.f32.mrf.mxu0 }
0x16d6   :  { %v8282_v16 = vmul.f32 -1.442695, %v7067_v63  ;;  %v7081_v0 = vadd.f32 %v6974_v32, %v13288_v18  ;;  %v13290_v18 = vld [vmem:[#allocation13_spill] sm:$0xff] }
0x16d7   :  { %v6976_v41 = vpop.f32.mrf.mxu1  ;;  %v7016_v19 = vpop.f32.mrf.mxu0 }
0x16d8   :  { %9435 = vpow2.f32 %v8282_v16  ;;  %v8284_v49 = vmul.f32 -1.442695, %v7081_v0  ;;  %v7095_v16 = vadd.f32 %v13255_v42, %v7013_v22 }
0x16d9   :  { %v6977_v53 = vpop.f32.mrf.mxu1  ;;  %v7017_v28 = vpop.f32.mrf.mxu0 }
0x16da   :  { %v7068_v37 = vadd.f32 %v7017_v28, %v13287_v24 }
0x16dc   :  { %v8283_v23 = vmul.f32 -1.442695, %v7068_v37 }
0x16de   :  { %9437 = vpow2.f32 %v8283_v23  ;;  %v13289_v23 = vld [vmem:[#allocation22_spill] sm:$0xff] }
0x16df   :  { %9439 = vpow2.f32 %v8284_v49 }
0x16e5   :  { %v9436_v4 = vpop.eup %9435 }
0x16e6   :  { %v7075_v48 = vadd.f32 1.0, %v9436_v4 }
0x16e8   :  { %9441 = vrcp.f32 %v7075_v48 }
0x16eb   :  { %v9438_v6 = vpop.eup %9437 }
0x16ec   :  { %v7076_v1 = vadd.f32 1.0, %v9438_v6  ;;  %v9440_v59 = vpop.eup %9439 }
0x16ed   :  { %v7089_v28 = vadd.f32 1.0, %v9440_v59 }
0x16ee   :  { %9443 = vrcp.f32 %v7076_v1  ;;  %v13291_v1 = vld [vmem:[#allocation59_spill] sm:$0xff] }
0x16f3   :  { %v7054_v63 = vpop.f32.mrf.mxu1 }
0x16f5   :  { %v9442_v41 = vpop.eup %9441  ;;  %v7055_v19 = vpop.f32.mrf.mxu1 }
0x16f6   :  { %v7097_v53 = vmul.f32 %v9442_v41, %v7095_v16 }
0x16f7   :  { %v7056_v24 = vpop.f32.mrf.mxu1 }
0x16f8   :  { %v7099_v37 = vadd.f32 %v7097_v53, %v13289_v23  ;;  %v7082_v0 = vadd.f32 %v7056_v24, %v13290_v18 }
0x16f9   :  { %v7058_v32 = vpop.f32.mrf.mxu1 }
0x16fa   :  { %9445 = vtanh.f32 %v7099_v37  ;;  %v8285_v4 = vmul.f32 -1.442695, %v7082_v0  ;;  %v7096_v48 = vadd.f32 %v12098_v27, %v7058_v32  ;;  %v13294_v0 = vld [vmem:[#allocation60_spill] sm:$0xff]  ;;  %v13295_v32 = vld [vmem:[#allocation62_spill] sm:$0xff] }
0x16fb   :  { %v9444_v49 = vpop.eup %9443  ;;  %9447 = vrcp.f32 %v7089_v28 }
0x16fc   :  { %9449 = vpow2.f32 %v8285_v4  ;;  %v7098_v6 = vmul.f32 %v9444_v49, %v7096_v48  ;;  %v13296_v4 = vld [vmem:[#allocation74_spill] sm:$0xff]  ;;  %v13298_v49 = vld [vmem:[#allocation17_spill] sm:$0xff] }
0x16fd   :  { %v13297_v48 = vld [vmem:[#allocation14_spill] sm:$0xff] }
0x16fe   :  { %v7100_v42 = vadd.f32 %v7098_v6, %v13291_v1  ;;  %v13299_v6 = vld [vmem:[#allocation43_spill] sm:$0xff] }
0x1700   :  { %9451 = vtanh.f32 %v7100_v42 }
0x1707   :  { %v9446_v22 = vpop.eup %9445 }
0x1708   :  { %v9448_v63 = vpop.eup %9447  ;;  %v7103_v59 = vsub.f32 %v12375_v36, %v9446_v22  ;;  %v13292_v36 = vld [vmem:[#allocation24_spill] sm:$0xff] }
0x1709   :  { %v9450_v16 = vpop.eup %9449 }
0x170a   :  { %v7090_v41 = vadd.f32 1.0, %v9450_v16  ;;  %v7105_v19 = vmul.f32 %v9448_v63, %v7103_v59 }
0x170c   :  { %9453 = vrcp.f32 %v7090_v41  ;;  %v12464_v53 = vadd.f32 %v9446_v22, %v7105_v19  ;;  %v13300_v22 = vld [vmem:[#allocation66_spill] sm:$0xff] }
0x170d   :  { %v9452_v24 = vpop.eup %9451 }
0x170e   :  { %v7104_v27 = vsub.f32 %v12378_v57, %v9452_v24  ;;  %v13293_v57 = vld [vmem:[#allocation45_spill] sm:$0xff] }
0x1719   :  { %v9454_v23 = vpop.eup %9453 }
0x171a   :  { %v7106_v28 = vmul.f32 %v9454_v23, %v7104_v27 }
0x171c   :  { %v12467_v37 = vadd.f32 %v9452_v24, %v7106_v28  ;;  %v13301_v28 = vld [vmem:[#allocation40_spill] sm:$0xff] }
0x171e   :  { %v7111_v18 = vpack.c.bf16 %v12467_v37, %v12464_v53 }
0x1720   :  { %7145 = vmatmul.mubr.bf16.vlgmr.msra.gmra.mxu0 %v7111_v18  ;;  %7186 = vmatmul.mubr.bf16.vlgmr.msra.gmra.mxu1 %v7111_v18 }
0x1721   :  { %7195 = vmatpush1.bf16.msra.mxu0 %v12243_v21  ;;  %7226 = vmatprep.mubr.bf16.mxu0 %v12902_v61 }
0x1722   :  { %7196 = vmatprep.subr.bf16.mxu0 %v12247_v33  ;;  %7287 = vmatpush1.bf16.msra.mxu1 %v12250_v58 }
0x1723   :  { %7288 = vmatprep.subr.bf16.mxu1 %v12253_v15  ;;  %7318 = vmatprep.mubr.bf16.mxu1 %v12902_v61 }
0x1725   :  { %7197 = vmatpush1.bf16.msra.mxu0 %v12257_v60 }
0x1726   :  { %7198 = vmatprep.subr.bf16.mxu0 %v12260_v29  ;;  %7289 = vmatpush1.bf16.msra.mxu1 %v12263_v52 }
0x1727   :  { %7290 = vmatprep.subr.bf16.mxu1 %v12266_v5 }
0x1729   :  { %7199 = vmatpush1.bf16.msra.mxu0 %v12269_v7 }
0x172a   :  { %7200 = vmatprep.subr.bf16.mxu0 %v12393_v43  ;;  %7291 = vmatpush1.bf16.msra.mxu1 %v12273_v56 }
0x172b   :  { %7292 = vmatprep.subr.bf16.mxu1 %v12276_v55 }
0x172d   :  { %7201 = vmatpush1.bf16.msra.mxu0 %v12398_v47 }
0x172e   :  { %7202 = vmatprep.subr.bf16.mxu0 %v12401_v44  ;;  %7293 = vmatpush1.bf16.msra.mxu1 %v12281_v10 }
0x172f   :  { %7294 = vmatprep.subr.bf16.mxu1 %v12284_v38 }
0x1731   :  { %7203 = vmatpush1.bf16.msra.mxu0 %v12406_v40 }
0x1732   :  { %7204 = vmatprep.subr.bf16.mxu0 %v12409_v35  ;;  %7295 = vmatpush1.bf16.msra.mxu1 %v12289_v20 }
0x1733   :  { %7296 = vmatprep.subr.bf16.mxu1 %v12292_v12 }
0x1735   :  { %7205 = vmatpush1.bf16.msra.mxu0 %v12414_v46 }
0x1736   :  { %7206 = vmatprep.subr.bf16.mxu0 %v12417_v34  ;;  %7297 = vmatpush1.bf16.msra.mxu1 %v12297_v30 }
0x1737   :  { %7298 = vmatprep.subr.bf16.mxu1 %v12300_v17 }
0x1739   :  { %7207 = vmatpush1.bf16.msra.mxu0 %v12422_v8 }
0x173a   :  { %7208 = vmatprep.subr.bf16.mxu0 %v12425_v26  ;;  %7299 = vmatpush1.bf16.msra.mxu1 %v12305_v45 }
0x173b   :  { %7300 = vmatprep.subr.bf16.mxu1 %v12308_v14 }
0x173d   :  { %7209 = vmatpush1.bf16.msra.mxu0 %v12430_v11 }
0x173e   :  { %7327 = vmatprep.subr.bf16.mxu0 %v12312_v3  ;;  %7301 = vmatpush1.bf16.msra.mxu1 %v12315_v2 }
0x173f   :  { %7368 = vmatprep.subr.bf16.mxu1 %v12318_v31 }
0x1740   :  { %7227 = vmatmul.mubr.bf16.vlgmr.msra.gmra.mxu0 %v7111_v18 }
0x1741   :  { %7328 = vmatpush1.bf16.msra.mxu0 %v12321_v13  ;;  %7359 = vmatprep.mubr.bf16.mxu0 %v12902_v61 }
0x1742   :  { %7329 = vmatprep.subr.bf16.mxu0 %v12325_v25 }
0x1745   :  { %7330 = vmatpush1.bf16.msra.mxu0 %v12328_v50 }
0x1746   :  { %7331 = vmatprep.subr.bf16.mxu0 %v12331_v39 }
0x1749   :  { %7332 = vmatpush1.bf16.msra.mxu0 %v12334_v62 }
0x174a   :  { %7333 = vmatprep.subr.bf16.mxu0 %v12337_v9 }
0x174d   :  { %7334 = vmatpush1.bf16.msra.mxu0 %v12340_v51 }
0x174e   :  { %7335 = vmatprep.subr.bf16.mxu0 %v12343_v54 }
0x1751   :  { %7336 = vmatpush1.bf16.msra.mxu0 %v13292_v36 }
0x1752   :  { %7337 = vmatprep.subr.bf16.mxu0 %v13293_v57 }
0x1755   :  { %7338 = vmatpush1.bf16.msra.mxu0 %v13294_v0 }
0x1756   :  { %7339 = vmatprep.subr.bf16.mxu0 %v13295_v32 }
0x1759   :  { %7340 = vmatpush1.bf16.msra.mxu0 %v13296_v4 }
0x175a   :  { %7341 = vmatprep.subr.bf16.mxu0 %v13297_v48  ;;  %v13302_v48 = vld [vmem:[#allocation42_spill] sm:$0xff] }
0x175d   :  { %7342 = vmatpush1.bf16.msra.mxu0 %v13298_v49 }
0x175e   :  { %7460 = vmatprep.subr.bf16.mxu0 %v13299_v6 }
0x17e0   :  { %v7146_v1 = vpop.f32.mrf.mxu0  ;;  %v7187_v42 = vpop.f32.mrf.mxu1 }
0x17e1   :  { %v7241_v63 = vadd.f32 %v7146_v1, %v13300_v22 }
0x17e2   :  { %v7148_v59 = vpop.f32.mrf.mxu0  ;;  %v7189_v16 = vpop.f32.mrf.mxu1 }
0x17e3   :  { %v8286_v41 = vmul.f32 -1.442695, %v7241_v63  ;;  %v7255_v49 = vadd.f32 %v7148_v59, %v13302_v48 }
0x17e4   :  { %v7150_v19 = vpop.f32.mrf.mxu0  ;;  %v7190_v24 = vpop.f32.mrf.mxu1 }
0x17e5   :  { %9455 = vpow2.f32 %v8286_v41  ;;  %v8288_v32 = vmul.f32 -1.442695, %v7255_v49  ;;  %v12528_v41 = vld [vmem:[%s12697_s5 + $0x4] ss:$0 sm:$0xff] }
0x17e6   :  { %v7151_v27 = vpop.f32.mrf.mxu0  ;;  %v7191_v23 = vpop.f32.mrf.mxu1  ;;  %v7269_v19 = vadd.f32 %v12528_v41, %v7187_v42 }
0x17e7   :  { %v7242_v18 = vadd.f32 %v7191_v23, %v13301_v28  ;;  %v13303_v27 = vld [vmem:[#allocation53_spill] sm:$0xff] }
0x17e9   :  { %v8287_v4 = vmul.f32 -1.442695, %v7242_v18 }
0x17eb   :  { %9457 = vpow2.f32 %v8287_v4 }
0x17ec   :  { %9459 = vpow2.f32 %v8288_v32 }
0x17f2   :  { %v9456_v6 = vpop.eup %9455 }
0x17f3   :  { %v7249_v0 = vadd.f32 1.0, %v9456_v6  ;;  %v12536_v6 = vld [vmem:[%s12697_s5 + $0x5] ss:$0 sm:$0xff] }
0x17f5   :  { %9461 = vrcp.f32 %v7249_v0  ;;  %v13304_v0 = vld [vmem:[#allocation52_spill] sm:$0xff] }
0x17f8   :  { %v9458_v1 = vpop.eup %9457 }
0x17f9   :  { %v7250_v22 = vadd.f32 1.0, %v9458_v1  ;;  %v9460_v16 = vpop.eup %9459 }
0x17fa   :  { %v7263_v49 = vadd.f32 1.0, %v9460_v16 }
0x17fb   :  { %9463 = vrcp.f32 %v7250_v22 }
0x1800   :  { %v7228_v63 = vpop.f32.mrf.mxu0 }
0x1801   :  { %v13305_v63 = vld [vmem:[#allocation30_spill] sm:$0xff] }
0x1802   :  { %v9462_v4 = vpop.eup %9461  ;;  %v7229_v24 = vpop.f32.mrf.mxu0 }
0x1803   :  { %v7271_v48 = vmul.f32 %v9462_v4, %v7269_v19 }
0x1804   :  { %v7230_v59 = vpop.f32.mrf.mxu0 }
0x1805   :  { %v7273_v32 = vadd.f32 %v7271_v48, %v13303_v27  ;;  %v7256_v23 = vadd.f32 %v7230_v59, %v13304_v0 }
0x1806   :  { %v7232_v28 = vpop.f32.mrf.mxu0 }
0x1807   :  { %9465 = vtanh.f32 %v7273_v32  ;;  %v8289_v18 = vmul.f32 -1.442695, %v7256_v23  ;;  %v7270_v1 = vadd.f32 %v12536_v6, %v7232_v28 }
0x1808   :  { %v9464_v42 = vpop.eup %9463  ;;  %9467 = vrcp.f32 %v7263_v49 }
0x1809   :  { %9469 = vpow2.f32 %v8289_v18  ;;  %v7272_v22 = vmul.f32 %v9464_v42, %v7270_v1 }
0x180b   :  { %v7274_v16 = vadd.f32 %v7272_v22, %v13305_v63 }
0x180d   :  { %9471 = vtanh.f32 %v7274_v16 }
0x1814   :  { %v9466_v19 = vpop.eup %9465 }
0x1815   :  { %v9468_v4 = vpop.eup %9467  ;;  %v7277_v24 = vsub.f32 %v12464_v53, %v9466_v19 }
0x1816   :  { %v9470_v48 = vpop.eup %9469 }
0x1817   :  { %v7264_v59 = vadd.f32 1.0, %v9470_v48  ;;  %v7279_v27 = vmul.f32 %v9468_v4, %v7277_v24  ;;  %v13314_v4 = vld [vmem:[#allocation23_spill] sm:$0xff]  ;;  %v13315_v48 = vld [vmem:[#allocation70_spill] sm:$0xff] }
0x1819   :  { %9473 = vrcp.f32 %v7264_v59  ;;  %v12541_v32 = vadd.f32 %v9466_v19, %v7279_v27 }
0x181a   :  { %v9472_v0 = vpop.eup %9471 }
0x181b   :  { %v7278_v23 = vsub.f32 %v12467_v37, %v9472_v0 }
0x1826   :  { %v9474_v28 = vpop.eup %9473 }
0x1827   :  { %v7280_v49 = vmul.f32 %v9474_v28, %v7278_v23 }
0x1829   :  { %v12544_v18 = vadd.f32 %v9472_v0, %v7280_v49 }
0x182b   :  { %v7285_v1 = vpack.c.bf16 %v12544_v18, %v12541_v32 }
0x182d   :  { %7319 = vmatmul.mubr.bf16.vlgmr.msra.gmra.mxu1 %v7285_v1  ;;  %7360 = vmatmul.mubr.bf16.vlgmr.msra.gmra.mxu0 %v7285_v1 }
0x182e   :  { %7369 = vmatpush1.bf16.msra.mxu1 %v12243_v21  ;;  %7400 = vmatprep.mubr.bf16.mxu1 %v12902_v61 }
0x182f   :  { %7370 = vmatprep.subr.bf16.mxu1 %v12247_v33  ;;  %7461 = vmatpush1.bf16.msra.mxu0 %v12250_v58  ;;  %v13306_v58 = vld [vmem:[#allocation60_spill] sm:$0xff] }
0x1830   :  { %7462 = vmatprep.subr.bf16.mxu0 %v12253_v15  ;;  %7492 = vmatprep.mubr.bf16.mxu0 %v12902_v61  ;;  %v13307_v15 = vld [vmem:[#allocation62_spill] sm:$0xff] }
0x1832   :  { %7371 = vmatpush1.bf16.msra.mxu1 %v12257_v60 }
0x1833   :  { %7372 = vmatprep.subr.bf16.mxu1 %v12260_v29  ;;  %7463 = vmatpush1.bf16.msra.mxu0 %v12263_v52  ;;  %v13308_v52 = vld [vmem:[#allocation74_spill] sm:$0xff] }
0x1834   :  { %7464 = vmatprep.subr.bf16.mxu0 %v12266_v5  ;;  %v13309_v5 = vld [vmem:[#allocation14_spill] sm:$0xff] }
0x1836   :  { %7373 = vmatpush1.bf16.msra.mxu1 %v12269_v7 }
0x1837   :  { %7374 = vmatprep.subr.bf16.mxu1 %v12393_v43  ;;  %7465 = vmatpush1.bf16.msra.mxu0 %v12273_v56  ;;  %v13310_v56 = vld [vmem:[#allocation17_spill] sm:$0xff] }
0x1838   :  { %7466 = vmatprep.subr.bf16.mxu0 %v12276_v55 }
0x183a   :  { %7375 = vmatpush1.bf16.msra.mxu1 %v12398_v47 }
0x183b   :  { %7376 = vmatprep.subr.bf16.mxu1 %v12401_v44  ;;  %7467 = vmatpush1.bf16.msra.mxu0 %v12281_v10 }
0x183c   :  { %7468 = vmatprep.subr.bf16.mxu0 %v12284_v38  ;;  %v13311_v38 = vld [vmem:[#allocation67_spill] sm:$0xff] }
0x183e   :  { %7377 = vmatpush1.bf16.msra.mxu1 %v12406_v40 }
0x183f   :  { %7378 = vmatprep.subr.bf16.mxu1 %v12409_v35  ;;  %7469 = vmatpush1.bf16.msra.mxu0 %v12289_v20 }
0x1840   :  { %7470 = vmatprep.subr.bf16.mxu0 %v12292_v12 }
0x1842   :  { %7379 = vmatpush1.bf16.msra.mxu1 %v12414_v46 }
0x1843   :  { %7380 = vmatprep.subr.bf16.mxu1 %v12417_v34  ;;  %7471 = vmatpush1.bf16.msra.mxu0 %v12297_v30 }
0x1844   :  { %7472 = vmatprep.subr.bf16.mxu0 %v12300_v17 }
0x1846   :  { %7381 = vmatpush1.bf16.msra.mxu1 %v12422_v8 }
0x1847   :  { %7382 = vmatprep.subr.bf16.mxu1 %v12425_v26  ;;  %7473 = vmatpush1.bf16.msra.mxu0 %v12305_v45 }
0x1848   :  { %7474 = vmatprep.subr.bf16.mxu0 %v12308_v14 }
0x184a   :  { %7383 = vmatpush1.bf16.msra.mxu1 %v12430_v11 }
0x184b   :  { %7501 = vmatprep.subr.bf16.mxu1 %v12312_v3  ;;  %7475 = vmatpush1.bf16.msra.mxu0 %v12315_v2 }
0x184c   :  { %7542 = vmatprep.subr.bf16.mxu0 %v12318_v31  ;;  %v13312_v31 = vld [vmem:[#allocation48_spill] sm:$0xff] }
0x184d   :  { %7401 = vmatmul.mubr.bf16.vlgmr.msra.gmra.mxu1 %v7285_v1  ;;  %v13316_v1 = vld [vmem:[#allocation73_spill] sm:$0xff] }
0x184e   :  { %7502 = vmatpush1.bf16.msra.mxu1 %v12321_v13  ;;  %7533 = vmatprep.mubr.bf16.mxu1 %v12902_v61 }
0x184f   :  { %7503 = vmatprep.subr.bf16.mxu1 %v12325_v25 }
0x1852   :  { %7504 = vmatpush1.bf16.msra.mxu1 %v12328_v50  ;;  %v13313_v50 = vld [vmem:[#allocation68_spill] sm:$0xff] }
0x1853   :  { %7505 = vmatprep.subr.bf16.mxu1 %v12331_v39 }
0x1856   :  { %7506 = vmatpush1.bf16.msra.mxu1 %v12334_v62 }
0x1857   :  { %7507 = vmatprep.subr.bf16.mxu1 %v12337_v9 }
0x185a   :  { %7508 = vmatpush1.bf16.msra.mxu1 %v12340_v51 }
0x185b   :  { %7509 = vmatprep.subr.bf16.mxu1 %v12343_v54 }
0x185e   :  { %7510 = vmatpush1.bf16.msra.mxu1 %v13292_v36 }
0x185f   :  { %7511 = vmatprep.subr.bf16.mxu1 %v13293_v57 }
0x1862   :  { %7512 = vmatpush1.bf16.msra.mxu1 %v13306_v58 }
0x1863   :  { %7513 = vmatprep.subr.bf16.mxu1 %v13307_v15 }
0x1866   :  { %7514 = vmatpush1.bf16.msra.mxu1 %v13308_v52 }
0x1867   :  { %7515 = vmatprep.subr.bf16.mxu1 %v13309_v5 }
0x186a   :  { %7516 = vmatpush1.bf16.msra.mxu1 %v13310_v56 }
0x18ed   :  { %v7320_v55 = vpop.f32.mrf.mxu1  ;;  %v7361_v10 = vpop.f32.mrf.mxu0 }
0x18ee   :  { %v7415_v20 = vadd.f32 %v7320_v55, %v13311_v38  ;;  %v7443_v57 = vadd.f32 %v12528_v41, %v7361_v10 }
0x18ef   :  { %v7322_v12 = vpop.f32.mrf.mxu1  ;;  %v7363_v30 = vpop.f32.mrf.mxu0 }
0x18f0   :  { %v8290_v17 = vmul.f32 -1.442695, %v7415_v20  ;;  %v7429_v39 = vadd.f32 %v7322_v12, %v13313_v50 }
0x18f1   :  { %v7324_v45 = vpop.f32.mrf.mxu1  ;;  %v7364_v14 = vpop.f32.mrf.mxu0 }
0x18f2   :  { %9475 = vpow2.f32 %v8290_v17  ;;  %v8292_v62 = vmul.f32 -1.442695, %v7429_v39  ;;  %v13317_v14 = vld [vmem:[#allocation61_spill] sm:$0xff] }
0x18f3   :  { %v7325_v3 = vpop.f32.mrf.mxu1  ;;  %v7365_v2 = vpop.f32.mrf.mxu0 }
0x18f4   :  { %v7416_v13 = vadd.f32 %v7365_v2, %v13312_v31  ;;  %v7637_v3 = vpack.c.bf16 %v13317_v14, %v13317_v14  ;;  %v13318_v2 = vld [vmem:[#allocation19_spill] sm:$0xff] }
0x18f6   :  { %v8291_v25 = vmul.f32 -1.442695, %v7416_v13 }
0x18f8   :  { %9477 = vpow2.f32 %v8291_v25 }
0x18f9   :  { %9479 = vpow2.f32 %v8292_v62 }
0x18ff   :  { %v9476_v9 = vpop.eup %9475 }
0x1900   :  { %v7423_v51 = vadd.f32 1.0, %v9476_v9 }
0x1902   :  { %9481 = vrcp.f32 %v7423_v51 }
0x1905   :  { %v9478_v54 = vpop.eup %9477 }
0x1906   :  { %v7424_v53 = vadd.f32 1.0, %v9478_v54  ;;  %v9480_v36 = vpop.eup %9479  ;;  %v13319_v54 = vld [vmem:[#allocation58_spill] sm:$0xff] }
0x1907   :  { %v7437_v16 = vadd.f32 1.0, %v9480_v36 }
0x1908   :  { %9483 = vrcp.f32 %v7424_v53 }
0x190d   :  { %v7402_v37 = vpop.f32.mrf.mxu1 }
0x190f   :  { %v9482_v42 = vpop.eup %9481  ;;  %v7403_v22 = vpop.f32.mrf.mxu1 }
0x1910   :  { %v7445_v63 = vmul.f32 %v9482_v42, %v7443_v57 }
0x1911   :  { %v7404_v19 = vpop.f32.mrf.mxu1 }
0x1912   :  { %v7447_v24 = vadd.f32 %v7445_v63, %v13314_v4  ;;  %v7430_v59 = vadd.f32 %v7404_v19, %v13315_v48  ;;  %v13320_v48 = vld [vmem:[#allocation41_spill] sm:$0xff] }
0x1913   :  { %v7406_v27 = vpop.f32.mrf.mxu1 }
0x1914   :  { %9485 = vtanh.f32 %v7447_v24  ;;  %v8293_v0 = vmul.f32 -1.442695, %v7430_v59  ;;  %v7444_v23 = vadd.f32 %v12536_v6, %v7406_v27 }
0x1915   :  { %v9484_v28 = vpop.eup %9483  ;;  %9487 = vrcp.f32 %v7437_v16 }
0x1916   :  { %9489 = vpow2.f32 %v8293_v0  ;;  %v7446_v49 = vmul.f32 %v9484_v28, %v7444_v23 }
0x1918   :  { %v7448_v58 = vadd.f32 %v7446_v49, %v13316_v1 }
0x191a   :  { %9491 = vtanh.f32 %v7448_v58 }
0x1921   :  { %v9486_v15 = vpop.eup %9485 }
0x1922   :  { %v9488_v52 = vpop.eup %9487  ;;  %v7451_v5 = vsub.f32 %v12541_v32, %v9486_v15 }
0x1923   :  { %v9490_v56 = vpop.eup %9489 }
0x1924   :  { %v7438_v55 = vadd.f32 1.0, %v9490_v56  ;;  %v7453_v10 = vmul.f32 %v9488_v52, %v7451_v5 }
0x1926   :  { %9493 = vrcp.f32 %v7438_v55  ;;  %v12607_v38 = vadd.f32 %v9486_v15, %v7453_v10  ;;  %v8314_v55 = vld [vmem:[%s12699_s7] ss:$0 sm:$0xff] }
0x1927   :  { %v9492_v20 = vpop.eup %9491 }
0x1928   :  { %v7452_v6 = vsub.f32 %v12544_v18, %v9492_v20 }
0x1933   :  { %v9494_v12 = vpop.eup %9493 }
0x1934   :  { %v7454_v30 = vmul.f32 %v9494_v12, %v7452_v6 }
0x1936   :  { %v7456_v17 = vadd.f32 %v9492_v20, %v7454_v30 }
0x1938   :  { %v7459_v45 = vpack.c.bf16 %v7456_v17, %v12607_v38 }
0x193a   :  { %7493 = vmatmul.mubr.bf16.vlgmr.msra.gmra.mxu0 %v7459_v45  ;;  %7534 = vmatmul.mubr.bf16.vlgmr.msra.gmra.mxu1 %v7459_v45 }
0x193b   :  { %7543 = vmatpush1.bf16.msra.mxu0 %v12243_v21  ;;  %7798 = vmatprep.mubr.bf16.mxu1 %v7637_v3  ;;  %v9020_v21 = vld [vmem:[%s12698_s6 + $0x38] sm:$0xff]  }
0x193c   :  { %7544 = vmatprep.subr.bf16.mxu0 %v12247_v33  ;;  %7574 = vmatprep.mubr.bf16.mxu0 %v12902_v61  ;;  %v9019_v61 = vld [vmem:[%s12698_s6 + $0x78] sm:$0xff]   ;;  %v9021_v33 = vld [vmem:[%s12698_s6 + $0x70] sm:$0xff]  }
0x193d   :  { %8485 = vmatprep.subr.bf16.mxu1 %v9019_v61 }
0x193e   :  { %8486 = vmatpush3.bf16.msra.mxu1 %v9020_v21 }
0x193f   :  { %7545 = vmatpush1.bf16.msra.mxu0 %v12257_v60  ;;  %v9022_v60 = vld [vmem:[%s12698_s6 + $0x30] sm:$0xff]   ;;  %8487 = vmatprep.subr.bf16.mxu1 %v9021_v33 }
0x1940   :  { %7546 = vmatprep.subr.bf16.mxu0 %v12260_v29  ;;  %v9023_v29 = vld [vmem:[%s12698_s6 + $0x68] sm:$0xff]  }
0x1942   :  { %8488 = vmatpush3.bf16.msra.mxu1 %v9022_v60 }
0x1943   :  { %7547 = vmatpush1.bf16.msra.mxu0 %v12269_v7  ;;  %v9024_v7 = vld [vmem:[%s12698_s6 + $0x28] sm:$0xff]   ;;  %8489 = vmatprep.subr.bf16.mxu1 %v9023_v29 }
0x1944   :  { %7548 = vmatprep.subr.bf16.mxu0 %v12393_v43  ;;  %v9025_v43 = vld [vmem:[%s12698_s6 + $0x60] sm:$0xff]  }
0x1946   :  { %8490 = vmatpush3.bf16.msra.mxu1 %v9024_v7 }
0x1947   :  { %7549 = vmatpush1.bf16.msra.mxu0 %v12398_v47  ;;  %v9026_v47 = vld [vmem:[%s12698_s6 + $0x20] sm:$0xff]   ;;  %8491 = vmatprep.subr.bf16.mxu1 %v9025_v43 }
0x1948   :  { %7550 = vmatprep.subr.bf16.mxu0 %v12401_v44  ;;  %v9027_v44 = vld [vmem:[%s12698_s6 + $0x58] sm:$0xff]  }
0x194a   :  { %8492 = vmatpush3.bf16.msra.mxu1 %v9026_v47 }
0x194b   :  { %7551 = vmatpush1.bf16.msra.mxu0 %v12406_v40  ;;  %v9028_v40 = vld [vmem:[%s12698_s6 + $0x18] sm:$0xff]   ;;  %8493 = vmatprep.subr.bf16.mxu1 %v9027_v44 }
0x194c   :  { %7552 = vmatprep.subr.bf16.mxu0 %v12409_v35  ;;  %v9029_v35 = vld [vmem:[%s12698_s6 + $0x50] sm:$0xff]  }
0x194e   :  { %8494 = vmatpush3.bf16.msra.mxu1 %v9028_v40 }
0x194f   :  { %7553 = vmatpush1.bf16.msra.mxu0 %v12414_v46  ;;  %v9030_v46 = vld [vmem:[%s12698_s6 + $0x10] sm:$0xff]   ;;  %8495 = vmatprep.subr.bf16.mxu1 %v9029_v35 }
0x1950   :  { %7554 = vmatprep.subr.bf16.mxu0 %v12417_v34  ;;  %v9031_v34 = vld [vmem:[%s12698_s6 + $0x48] sm:$0xff]  }
0x1952   :  { %8496 = vmatpush3.bf16.msra.mxu1 %v9030_v46 }
0x1953   :  { %7555 = vmatpush1.bf16.msra.mxu0 %v12422_v8  ;;  %v9032_v8 = vld [vmem:[%s12698_s6 + $0x8] sm:$0xff]   ;;  %8497 = vmatprep.subr.bf16.mxu1 %v9031_v34 }
0x1954   :  { %7556 = vmatprep.subr.bf16.mxu0 %v12425_v26  ;;  %v9033_v26 = vld [vmem:[%s12698_s6 + $0x40] sm:$0xff]  }
0x1956   :  { %8498 = vmatpush3.bf16.msra.mxu1 %v9032_v8 }
0x1957   :  { %7557 = vmatpush1.bf16.msra.mxu0 %v12430_v11  ;;  %v9034_v11 = vld [vmem:[%s12698_s6] sm:$0xff]   ;;  %8499 = vmatprep.subr.bf16.mxu1 %v9033_v26 }
0x195a   :  { %7575 = vmatmul.mubr.bf16.vlgmr.msra.gmra.mxu0 %v7459_v45  ;;  %8500 = vmatpush3.bf16.msra.mxu1 %v9034_v11 }
0x19fa   :  { %v7494_v32 = vpop.f32.mrf.mxu0  ;;  %v7535_v18 = vpop.f32.mrf.mxu1 }
0x19fb   :  { %v7589_v31 = vadd.f32 %v7494_v32, %v13318_v2  ;;  %v7617_v63 = vadd.f32 %v12528_v41, %v7535_v18  ;;  %v7635_v41 = vld [vmem:[%s12692_s0] sm:$0xff] }
0x19fc   :  { %v7496_v13 = vpop.f32.mrf.mxu0  ;;  %v7537_v25 = vpop.f32.mrf.mxu1 }
0x19fd   :  { %v8294_v50 = vmul.f32 -1.442695, %v7589_v31  ;;  %v7603_v53 = vadd.f32 %v7496_v13, %v13319_v54 }
0x19fe   :  { %v7498_v39 = vpop.f32.mrf.mxu0  ;;  %v7538_v62 = vpop.f32.mrf.mxu1 }
0x19ff   :  { %9495 = vpow2.f32 %v8294_v50  ;;  %v8296_v37 = vmul.f32 -1.442695, %v7603_v53 }
0x1a00   :  { %v7499_v9 = vpop.f32.mrf.mxu0  ;;  %v7539_v51 = vpop.f32.mrf.mxu1 }
0x1a01   :  { %9497 = vpow2.f32 %v8296_v37 }
0x1a0c   :  { %v9496_v36 = vpop.eup %9495 }
0x1a0d   :  { %v7597_v57 = vadd.f32 1.0, %v9496_v36 }
0x1a0e   :  { %v9498_v22 = vpop.eup %9497 }
0x1a0f   :  { %9499 = vrcp.f32 %v7597_v57  ;;  %v7611_v27 = vadd.f32 1.0, %v9498_v22 }
0x1a1a   :  { %v7576_v42 = vpop.f32.mrf.mxu0 }
0x1a1c   :  { %v9500_v16 = vpop.eup %9499  ;;  %v7577_v19 = vpop.f32.mrf.mxu0 }
0x1a1d   :  { %v7619_v4 = vmul.f32 %v9500_v16, %v7617_v63 }
0x1a1e   :  { %v7578_v24 = vpop.f32.mrf.mxu0 }
0x1a1f   :  { %v7621_v59 = vadd.f32 %v7619_v4, %v13320_v48 }
0x1a20   :  { %v7580_v0 = vpop.f32.mrf.mxu0 }
0x1a21   :  { %9501 = vtanh.f32 %v7621_v59 }
0x1a22   :  { %9503 = vrcp.f32 %v7611_v27 }
0x1a2e   :  { %v9502_v23 = vpop.eup %9501 }
0x1a2f   :  { %v7625_v28 = vsub.f32 %v12607_v38, %v9502_v23  ;;  %v9504_v49 = vpop.eup %9503 }
0x1a31   :  { %v7627_v1 = vmul.f32 %v9504_v49, %v7625_v28 }
0x1a33   :  { %v7629_v58 = vadd.f32 %v9502_v23, %v7627_v1 }
0x1a35   :  { %v7636_v15 = vpack.c.bf16 %v7629_v58, %v7629_v58 }
0x1a37   :  { %7799 = vmatmul.mubr.bf16.vlgmr.msra.gmra.mxu1 %v7636_v15 }
0x1af7   :  { %v8501_v52 = vpop.f32.mrf.mxu1 }
0x1af9   :  { %v8502_v5 = vpop.f32.mrf.mxu1 }
0x1afa   :  { %v8503_v56 = vadd.f32 %v8502_v5, %v8501_v52 }
0x1afb   :  { %v8504_v10 = vpop.f32.mrf.mxu1 }
0x1afc   :  { %v7806_v20 = vadd.f32 %v8503_v56, %v7635_v41 }
0x1afd   :  { %v8505_v6 = vpop.f32.mrf.mxu1 }
0x1afe   :  { %v7814_v38 = vadd.f32 %v8314_v55, %v7806_v20 }
0x1b00   :  { %7815 = vst.msk [vmem:[%s12700_s8] sm:$0xff] %vm109_vm1, %v7814_v38 }
0x1b01   :  { %7820 = vsyncpa [#allocation7], 1 }
0x1b02   :  { %7821 = vsyncpa [#allocation9], 1 }

</bundles_post_ra>
